<compile_context>
chip_gen: v6e
topology: v6e:2x2x1
jax: 0.10.0
libtpu: 0.0.40
codegen_flags: <defaults>
</compile_context>

<pallas_src>
import numpy as np
import jax
import jax.numpy as jnp
from jax.experimental import pallas as pl
from jax.experimental.pallas import tpu as pltpu

N_LAYERS = 2
C1 = N_LAYERS                      # conv1 out channels (2)
C2 = N_LAYERS ** 2                 # conv2 out channels (4)
N_LINEAR = 300
LATENT = 5
IMG = 14                           # spatial size
POOLED = IMG // 2                  # 7
FLAT = C2 * POOLED * POOLED        # 196 (also fc5 output width)
FLAT_PAD = 256                     # lane-padded feature width (fc1 input / fc5 output)
MV_PAD = 256                       # merged fc21/fc22 output width
LOGVAR_OFF = 128                   # logvar columns start at a vreg boundary
VMAX = 2 * POOLED - 1              # 13 (pairwise-max tile size)


# ----------------------------- fused Pallas kernel --------------------------

def _vae_fused_kernel(x_ref, c1w_ref, c1b_ref, c2w_ref, c2b_ref,
                      spread_ref, mask_ref, agg_ref,
                      w1_ref, b1_ref, wmv_ref, bmv_ref,
                      w3_ref, b3_ref, w4_ref, b4_ref, w5_ref, b5_ref,
                      eps_ref,
                      xrec_ref, mv_ref):
    f32 = jnp.float32
    TB = x_ref.shape[0]            # batch tile

    # Constant border mask (hoisted out of every loop): 1 on the 14x14 interior
    # of a 16x16 frame, 0 on the 1-pixel border.
    ri = jax.lax.broadcasted_iota(jnp.int32, (IMG + 2, IMG + 2), 0)
    ci = jax.lax.broadcasted_iota(jnp.int32, (IMG + 2, IMG + 2), 1)
    interior = ((ri >= 1) & (ri <= IMG) & (ci >= 1) & (ci <= IMG)).astype(f32)

    # Read every conv weight/bias SMEM scalar exactly once.
    c1w = [[[c1w_ref[(oc * 3 + kh) * 3 + kw] for kw in range(3)]
            for kh in range(3)] for oc in range(C1)]
    c1b = [c1b_ref[oc] for oc in range(C1)]
    c2w = [[[[c2w_ref[((oc * C1 + ic) * 3 + kh) * 3 + kw] for kw in range(3)]
             for kh in range(3)] for ic in range(C1)] for oc in range(C2)]
    c2b = [c2b_ref[oc] for oc in range(C2)]

    # ---- conv1 -> relu -> conv2 -> relu -> 2x2 pairwise maxes ---------------
    # TODO(synk): the per-(b, oc) 14x14 VPU MACs could be further packed
    # across batch x channel on the sublane axis; at these toy sizes the
    # unrolled form keeps the code simple and is not the saturating slot.
    v_rows = []
    for b in range(TB):
        xp = x_ref[b]                                            # (18,18), 2-padded
        xwin = [[xp[kh:kh + IMG + 2, kw:kw + IMG + 2]            # 9 windows, hoisted
                 for kw in range(3)] for kh in range(3)]
        # conv1 (1->2) on the full 16x16 frame; zeroing the border afterwards
        # yields exactly the zero-padded input conv2 needs (no halo stores).
        a1p = []
        for oc in range(C1):
            acc = None
            for kh in range(3):
                for kw in range(3):
                    t = c1w[oc][kh][kw] * xwin[kh][kw]
                    acc = t if acc is None else acc + t
            a1p.append(jnp.maximum(acc + c1b[oc], 0.0) * interior)   # (16,16)

        # conv2 (2->4): 9 shifted windows per input channel, hoisted over oc.
        a1win = [[[a1p[ic][kh:kh + IMG, kw:kw + IMG] for kw in range(3)]
                  for kh in range(3)] for ic in range(C1)]
        vtiles = []
        for oc in range(C2):
            acc = None
            for ic in range(C1):
                for kh in range(3):
                    for kw in range(3):
                        t = c2w[oc][ic][kh][kw] * a1win[ic][kh][kw]
                        acc = t if acc is None else acc + t
            acc = jnp.maximum(acc + c2b[oc], 0.0)                     # (14,14)
            # 2x2 max pool = adjacent pairwise maxes; the even-row/col picks
            # are folded into the spread/mask matmuls below.
            hmax = jnp.maximum(acc[:, 0:VMAX], acc[:, 1:VMAX + 1])    # (14,13)
            vmax = jnp.maximum(hmax[0:VMAX, :], hmax[1:VMAX + 1, :])  # (13,13)
            vtiles.append(vmax)
        v_rows.append(jnp.concatenate(vtiles, axis=1))                # (13,52)
    v_all = v_rows[0] if TB == 1 else jnp.concatenate(v_rows, axis=0)  # (13*TB,52)

    # ---- pool-select + flatten + batch gather as lane-dense matmuls ---------
    # y_all[b*13+r, oc*49+h*7+w] = vmax[b,oc][r, 2w]; mask keeps r == 2h rows;
    # agg sums each batch's 13 rows -> flat[b, oc*49+h*7+w] = pooled[b,oc,h,w].
    y_all = jnp.dot(v_all, spread_ref[...], preferred_element_type=f32)  # (13TB,256)
    flat = jnp.dot(agg_ref[...], y_all * mask_ref[...],
                   preferred_element_type=f32)                           # (TB,256)
    # relu(maxpool(relu(x))) == maxpool(relu(x)) -> no extra relu needed.

    # ---- dense encoder ------------------------------------------------------
    h1 = jnp.maximum(
        jnp.dot(flat, w1_ref[...], preferred_element_type=f32) + b1_ref[...], 0.0)
    mv = jnp.dot(h1, wmv_ref[...], preferred_element_type=f32) + bmv_ref[...]
    mv_ref[...] = mv                                   # lane-dense (TB,256) store

    mu = mv[:, 0:LATENT]
    logvar = mv[:, LOGVAR_OFF:LOGVAR_OFF + LATENT]

    # ---- reparameterization (eps supplied explicitly, torch.randn_like) -----
    z = mu + eps_ref[...] * jnp.exp(0.5 * logvar)                       # (TB,5)

    # ---- decoder ------------------------------------------------------------
    h3 = jnp.maximum(
        jnp.dot(z, w3_ref[...], preferred_element_type=f32) + b3_ref[...], 0.0)
    h4 = jnp.maximum(
        jnp.dot(h3, w4_ref[...], preferred_element_type=f32) + b4_ref[...], 0.0)
    y5 = jnp.dot(h4, w5_ref[...], preferred_element_type=f32) + b5_ref[...]
    xrec_ref[...] = 1.0 / (1.0 + jnp.exp(-y5))         # exact f32 sigmoid, (TB,256)


# ------------------------------- wrapper -------------------------------------

def _selection_constants(tb):
    """Exact 0/1 matrices folding pool-selection + flatten + batch gather."""
    spread = np.zeros((C2 * VMAX, FLAT_PAD), np.float32)
    mask = np.zeros((VMAX * tb, FLAT_PAD), np.float32)
    agg = np.zeros((tb, VMAX * tb), np.float32)
    for k in range(FLAT):
        oc, rem = divmod(k, POOLED * POOLED)
        hh, ww = divmod(rem, POOLED)
        spread[oc * VMAX + 2 * ww, k] = 1.0      # even-column pick + channel concat
        for t in range(tb):
            mask[t * VMAX + 2 * hh, k] = 1.0     # even-row pick
    for b in range(tb):
        agg[b, b * VMAX:(b + 1) * VMAX] = 1.0    # per-batch row reduction
    return jnp.asarray(spread), jnp.asarray(mask), jnp.asarray(agg)


def vae_forward(kp, x, eps):
    """Fused VAE forward. x: (B, 1, 14, 14) f32 NCHW; eps: (B, 5) f32."""
    B = x.shape[0]
    TB = B if B <= 8 else 8                       # batch tile (bounds unroll size)
    assert B % TB == 0, "batch must be a multiple of the batch tile"
    n_blocks = B // TB

    # Zero-pad by 2 in the wrapper (fused XLA pad) -> no in-kernel halo writes.
    xpad = jnp.pad(x[:, 0, :, :], ((0, 0), (2, 2), (2, 2)))     # (B, 18, 18)
    spread, mask, agg = _selection_constants(TB)

    vmem = pl.BlockSpec(memory_space=pltpu.MemorySpace.VMEM)
    smem = pl.BlockSpec(memory_space=pltpu.MemorySpace.SMEM)

    in_specs = [
        pl.BlockSpec((TB, IMG + 4, IMG + 4), lambda i: (i, 0, 0)),   # xpad (blocked)
        smem, smem, smem, smem,                                      # conv w/b scalars
        vmem, vmem, vmem,                                            # spread/mask/agg
        vmem, vmem, vmem, vmem,                                      # w1,b1,wmv,bmv
        vmem, vmem, vmem, vmem, vmem, vmem,                          # w3,b3,w4,b4,w5,b5
        pl.BlockSpec((TB, LATENT), lambda i: (i, 0)),                # eps (blocked)
    ]
    out_specs = (pl.BlockSpec((TB, FLAT_PAD), lambda i: (i, 0)),
                 pl.BlockSpec((TB, MV_PAD), lambda i: (i, 0)))
    out_shape = (jax.ShapeDtypeStruct((B, FLAT_PAD), jnp.float32),
                 jax.ShapeDtypeStruct((B, MV_PAD), jnp.float32))

    xrec_pad, mv = pl.pallas_call(
        _vae_fused_kernel,
        out_shape=out_shape,
        grid=(n_blocks,),
        in_specs=in_specs,
        out_specs=out_specs,
        compiler_params=pltpu.CompilerParams(
            dimension_semantics=("parallel",)),       # megacore/v7x batch split
    )(xpad, kp["c1w"], kp["c1b"], kp["c2w"], kp["c2b"],
      spread, mask, agg,
      kp["w1"], kp["b1"], kp["wmv"], kp["bmv"],
      kp["w3"], kp["b3"], kp["w4"], kp["b4"], kp["w5"], kp["b5"], eps)

    x_rec = xrec_pad[:, :FLAT]                      # XLA fuses these slices
    mu = mv[:, :LATENT]
    logvar = mv[:, LOGVAR_OFF:LOGVAR_OFF + LATENT]
    return x_rec, mu, logvar


# --------------------------- parameters --------------------------------------

def init_params(key):
    """PyTorch-default init U(-1/sqrt(fan_in), 1/sqrt(fan_in)).
    conv weights: (O, I, 3, 3); linear weights stored as (in, out)."""
    def uniform(k, shape, fan_in):
        bound = float(fan_in) ** -0.5
        return jax.random.uniform(k, shape, jnp.float32, -bound, bound)

    keys = jax.random.split(key, 16)
    p = {}
    p["conv1_w"] = uniform(keys[0], (C1, 1, 3, 3), 1 * 9)
    p["conv1_b"] = uniform(keys[1], (C1,), 1 * 9)
    p["conv2_w"] = uniform(keys[2], (C2, C1, 3, 3), C1 * 9)
    p["conv2_b"] = uniform(keys[3], (C2,), C1 * 9)

    def lin(kw, kb, fin, fout):
        return uniform(kw, (fin, fout), fin), uniform(kb, (fout,), fin)

    p["fc1_w"], p["fc1_b"] = lin(keys[4], keys[5], FLAT, N_LINEAR)
    p["fc21_w"], p["fc21_b"] = lin(keys[6], keys[7], N_LINEAR, LATENT)
    p["fc22_w"], p["fc22_b"] = lin(keys[8], keys[9], N_LINEAR, LATENT)
    p["fc3_w"], p["fc3_b"] = lin(keys[10], keys[11], LATENT, N_LINEAR)
    p["fc4_w"], p["fc4_b"] = lin(keys[12], keys[13], N_LINEAR, N_LINEAR * 2)
    p["fc5_w"], p["fc5_b"] = lin(keys[14], keys[15], N_LINEAR * 2, FLAT)
    return p


def pack_params(p):
    """One-time host-side repack into the fused kernel's VMEM/SMEM layouts."""
    kp = {}
    kp["c1w"] = p["conv1_w"].reshape(-1)            # (18,) SMEM scalars
    kp["c1b"] = p["conv1_b"]                        # (2,)
    kp["c2w"] = p["conv2_w"].reshape(-1)            # (72,)
    kp["c2b"] = p["conv2_b"]                        # (4,)
    # fc1: zero-pad the 196 input rows up to the lane-dense 256-wide flatten.
    kp["w1"] = jnp.zeros((FLAT_PAD, N_LINEAR), jnp.float32).at[:FLAT, :].set(p["fc1_w"])
    kp["b1"] = p["fc1_b"].reshape(1, N_LINEAR)
    # fc21 / fc22 merged: mu at cols [0:5], logvar at cols [128:133].
    wmv = jnp.zeros((N_LINEAR, MV_PAD), jnp.float32)
    wmv = wmv.at[:, 0:LATENT].set(p["fc21_w"])
    wmv = wmv.at[:, LOGVAR_OFF:LOGVAR_OFF + LATENT].set(p["fc22_w"])
    bmv = jnp.zeros((1, MV_PAD), jnp.float32)
    bmv = bmv.at[0, 0:LATENT].set(p["fc21_b"])
    bmv = bmv.at[0, LOGVAR_OFF:LOGVAR_OFF + LATENT].set(p["fc22_b"])
    kp["wmv"], kp["bmv"] = wmv, bmv
    kp["w3"], kp["b3"] = p["fc3_w"], p["fc3_b"].reshape(1, -1)
    kp["w4"], kp["b4"] = p["fc4_w"], p["fc4_b"].reshape(1, -1)
    # fc5: lane-pad the 196-wide output to 256 so x_rec is an unmasked store.
    kp["w5"] = jnp.zeros((N_LINEAR * 2, FLAT_PAD), jnp.float32).at[:, :FLAT].set(p["fc5_w"])
    kp["b5"] = jnp.zeros((1, FLAT_PAD), jnp.float32).at[0, :FLAT].set(p["fc5_b"])
    return kp


# --------------------------- pure-JAX reference -------------------------------

def vae_reference(p, x, eps):
    hp = jax.lax.Precision.HIGHEST
    B = x.shape[0]
    h = jax.lax.conv_general_dilated(x, p["conv1_w"], (1, 1), ((1, 1), (1, 1)),
                                     dimension_numbers=("NCHW", "OIHW", "NCHW"),
                                     precision=hp)
    h = jax.nn.relu(h + p["conv1_b"].reshape(1, -1, 1, 1))
    h = jax.lax.conv_general_dilated(h, p["conv2_w"], (1, 1), ((1, 1), (1, 1)),
                                     dimension_numbers=("NCHW", "OIHW", "NCHW"),
                                     precision=hp)
    h = jax.nn.relu(h + p["conv2_b"].reshape(1, -1, 1, 1))
    h = h.reshape(B, C2, POOLED, 2, POOLED, 2).max(axis=(3, 5))
    h = jax.nn.relu(h).reshape(B, FLAT)
    h = jax.nn.relu(jnp.dot(h, p["fc1_w"], precision=hp) + p["fc1_b"])
    mu = jnp.dot(h, p["fc21_w"], precision=hp) + p["fc21_b"]
    logvar = jnp.dot(h, p["fc22_w"], precision=hp) + p["fc22_b"]
    z = mu + eps * jnp.exp(0.5 * logvar)
    d = jax.nn.relu(jnp.dot(z, p["fc3_w"], precision=hp) + p["fc3_b"])
    d = jax.nn.relu(jnp.dot(d, p["fc4_w"], precision=hp) + p["fc4_b"])
    x_rec = jax.nn.sigmoid(jnp.dot(d, p["fc5_w"], precision=hp) + p["fc5_b"])
    return x_rec, mu, logvar


if __name__ == "__main__":
    key = jax.random.PRNGKey(0)
    k_param, k_x, k_eps = jax.random.split(key, 3)

    B = 2
    params = init_params(k_param)
    kparams = pack_params(params)
    x = jax.random.uniform(k_x, (B, 1, IMG, IMG), jnp.float32)   # NCHW 14x14
    eps = jax.random.normal(k_eps, (B, LATENT), jnp.float32)     # reparam noise

    x_rec, mu, logvar = vae_forward(kparams, x, eps)
    jax.block_until_ready((x_rec, mu, logvar))

    assert x_rec.shape == (B, FLAT)
    assert mu.shape == (B, LATENT) and logvar.shape == (B, LATENT)
    assert bool(jnp.all(jnp.isfinite(x_rec)))
    assert bool(jnp.all((x_rec >= 0.0) & (x_rec <= 1.0)))

    # Structural check vs. pure-JAX reference (loose tol absorbs MXU f32-pass /
    # accumulation-order differences; real indexing bugs give O(0.1+) errors).
    r_rec, r_mu, r_logvar = vae_reference(params, x, eps)
    np.testing.assert_allclose(np.asarray(x_rec), np.asarray(r_rec), rtol=5e-2, atol=5e-2)
    np.testing.assert_allclose(np.asarray(mu), np.asarray(r_mu), rtol=5e-2, atol=5e-2)
    np.testing.assert_allclose(np.asarray(logvar), np.asarray(r_logvar), rtol=5e-2, atol=5e-2)

    print("KERNEL_OK")
</pallas_src>

<mosaic_0001>
module attributes {stable_mosaic.version = 11 : i64} {
  func.func @_vae_fused_kernel(%arg0: i32, %arg1: memref<2x18x18xf32, #tpu.memory_space<vmem>>, %arg2: memref<18xf32, #tpu.memory_space<smem>>, %arg3: memref<2xf32, #tpu.memory_space<smem>>, %arg4: memref<72xf32, #tpu.memory_space<smem>>, %arg5: memref<4xf32, #tpu.memory_space<smem>>, %arg6: memref<52x256xf32, #tpu.memory_space<vmem>>, %arg7: memref<26x256xf32, #tpu.memory_space<vmem>>, %arg8: memref<2x26xf32, #tpu.memory_space<vmem>>, %arg9: memref<256x300xf32, #tpu.memory_space<vmem>>, %arg10: memref<1x300xf32, #tpu.memory_space<vmem>>, %arg11: memref<300x256xf32, #tpu.memory_space<vmem>>, %arg12: memref<1x256xf32, #tpu.memory_space<vmem>>, %arg13: memref<5x300xf32, #tpu.memory_space<vmem>>, %arg14: memref<1x300xf32, #tpu.memory_space<vmem>>, %arg15: memref<300x600xf32, #tpu.memory_space<vmem>>, %arg16: memref<1x600xf32, #tpu.memory_space<vmem>>, %arg17: memref<600x256xf32, #tpu.memory_space<vmem>>, %arg18: memref<1x256xf32, #tpu.memory_space<vmem>>, %arg19: memref<2x5xf32, #tpu.memory_space<vmem>>, %arg20: memref<2x256xf32, #tpu.memory_space<vmem>>, %arg21: memref<2x256xf32, #tpu.memory_space<vmem>>) attributes {dimension_semantics = [#tpu.dimension_semantics<parallel>], iteration_bounds = array<i64: 1>, scalar_prefetch = 0 : i64, scratch_operands = 0 : i64, tpu.core_type = #tpu.core_type<tc>, window_params = [{transform_indices = @transform_0, window_bounds = array<i64: 2, 18, 18>}, {transform_indices = @transform_1, window_bounds = array<i64: 18>}, {transform_indices = @transform_2, window_bounds = array<i64: 2>}, {transform_indices = @transform_3, window_bounds = array<i64: 72>}, {transform_indices = @transform_4, window_bounds = array<i64: 4>}, {pipeline_mode = #tpu.pipeline_mode<synchronous>, transform_indices = @transform_5, window_bounds = array<i64: 52, 256>}, {pipeline_mode = #tpu.pipeline_mode<synchronous>, transform_indices = @transform_6, window_bounds = array<i64: 26, 256>}, {pipeline_mode = #tpu.pipeline_mode<synchronous>, transform_indices = @transform_7, window_bounds = array<i64: 2, 26>}, {pipeline_mode = #tpu.pipeline_mode<synchronous>, transform_indices = @transform_8, window_bounds = array<i64: 256, 300>}, {pipeline_mode = #tpu.pipeline_mode<synchronous>, transform_indices = @transform_9, window_bounds = array<i64: 1, 300>}, {pipeline_mode = #tpu.pipeline_mode<synchronous>, transform_indices = @transform_10, window_bounds = array<i64: 300, 256>}, {pipeline_mode = #tpu.pipeline_mode<synchronous>, transform_indices = @transform_11, window_bounds = array<i64: 1, 256>}, {pipeline_mode = #tpu.pipeline_mode<synchronous>, transform_indices = @transform_12, window_bounds = array<i64: 5, 300>}, {pipeline_mode = #tpu.pipeline_mode<synchronous>, transform_indices = @transform_13, window_bounds = array<i64: 1, 300>}, {pipeline_mode = #tpu.pipeline_mode<synchronous>, transform_indices = @transform_14, window_bounds = array<i64: 300, 600>}, {pipeline_mode = #tpu.pipeline_mode<synchronous>, transform_indices = @transform_15, window_bounds = array<i64: 1, 600>}, {pipeline_mode = #tpu.pipeline_mode<synchronous>, transform_indices = @transform_16, window_bounds = array<i64: 600, 256>}, {pipeline_mode = #tpu.pipeline_mode<synchronous>, transform_indices = @transform_17, window_bounds = array<i64: 1, 256>}, {transform_indices = @transform_18, window_bounds = array<i64: 2, 5>}, {transform_indices = @transform_19, window_bounds = array<i64: 2, 256>}, {transform_indices = @transform_20, window_bounds = array<i64: 2, 256>}]} {
    %0 = tpu.iota {dimensions = array<i32: 0>} : vector<16x16xi32>
    %1 = tpu.iota {dimensions = array<i32: 1>} : vector<16x16xi32>
    %c1_i32 = arith.constant 1 : i32
    %2 = vector.broadcast %c1_i32 : i32 to vector<16x16xi32>
    %3 = arith.cmpi sge, %0, %2 : vector<16x16xi32>
    %c14_i32 = arith.constant 14 : i32
    %4 = vector.broadcast %c14_i32 : i32 to vector<16x16xi32>
    %5 = arith.cmpi sle, %0, %4 : vector<16x16xi32>
    %6 = arith.andi %3, %5 : vector<16x16xi1>
    %c1_i32_0 = arith.constant 1 : i32
    %7 = vector.broadcast %c1_i32_0 : i32 to vector<16x16xi32>
    %8 = arith.cmpi sge, %1, %7 : vector<16x16xi32>
    %9 = arith.andi %6, %8 : vector<16x16xi1>
    %c14_i32_1 = arith.constant 14 : i32
    %10 = vector.broadcast %c14_i32_1 : i32 to vector<16x16xi32>
    %11 = arith.cmpi sle, %1, %10 : vector<16x16xi32>
    %12 = arith.andi %9, %11 : vector<16x16xi1>
    %13 = arith.extui %12 : vector<16x16xi1> to vector<16x16xi32>
    %14 = arith.sitofp %13 : vector<16x16xi32> to vector<16x16xf32>
    %c0 = arith.constant 0 : index
    %15 = memref.load %arg2[%c0] : memref<18xf32, #tpu.memory_space<smem>>
    %c1 = arith.constant 1 : index
    %16 = memref.load %arg2[%c1] : memref<18xf32, #tpu.memory_space<smem>>
    %c2 = arith.constant 2 : index
    %17 = memref.load %arg2[%c2] : memref<18xf32, #tpu.memory_space<smem>>
    %c3 = arith.constant 3 : index
    %18 = memref.load %arg2[%c3] : memref<18xf32, #tpu.memory_space<smem>>
    %c4 = arith.constant 4 : index
    %19 = memref.load %arg2[%c4] : memref<18xf32, #tpu.memory_space<smem>>
    %c5 = arith.constant 5 : index
    %20 = memref.load %arg2[%c5] : memref<18xf32, #tpu.memory_space<smem>>
    %c6 = arith.constant 6 : index
    %21 = memref.load %arg2[%c6] : memref<18xf32, #tpu.memory_space<smem>>
    %c7 = arith.constant 7 : index
    %22 = memref.load %arg2[%c7] : memref<18xf32, #tpu.memory_space<smem>>
    %c8 = arith.constant 8 : index
    %23 = memref.load %arg2[%c8] : memref<18xf32, #tpu.memory_space<smem>>
    %c9 = arith.constant 9 : index
    %24 = memref.load %arg2[%c9] : memref<18xf32, #tpu.memory_space<smem>>
    %c10 = arith.constant 10 : index
    %25 = memref.load %arg2[%c10] : memref<18xf32, #tpu.memory_space<smem>>
    %c11 = arith.constant 11 : index
    %26 = memref.load %arg2[%c11] : memref<18xf32, #tpu.memory_space<smem>>
    %c12 = arith.constant 12 : index
    %27 = memref.load %arg2[%c12] : memref<18xf32, #tpu.memory_space<smem>>
    %c13 = arith.constant 13 : index
    %28 = memref.load %arg2[%c13] : memref<18xf32, #tpu.memory_space<smem>>
    %c14 = arith.constant 14 : index
    %29 = memref.load %arg2[%c14] : memref<18xf32, #tpu.memory_space<smem>>
    %c15 = arith.constant 15 : index
    %30 = memref.load %arg2[%c15] : memref<18xf32, #tpu.memory_space<smem>>
    %c16 = arith.constant 16 : index
    %31 = memref.load %arg2[%c16] : memref<18xf32, #tpu.memory_space<smem>>
    %c17 = arith.constant 17 : index
    %32 = memref.load %arg2[%c17] : memref<18xf32, #tpu.memory_space<smem>>
    %c0_2 = arith.constant 0 : index
    %33 = memref.load %arg3[%c0_2] : memref<2xf32, #tpu.memory_space<smem>>
    %c1_3 = arith.constant 1 : index
    %34 = memref.load %arg3[%c1_3] : memref<2xf32, #tpu.memory_space<smem>>
    %c0_4 = arith.constant 0 : index
    %35 = memref.load %arg4[%c0_4] : memref<72xf32, #tpu.memory_space<smem>>
    %c1_5 = arith.constant 1 : index
    %36 = memref.load %arg4[%c1_5] : memref<72xf32, #tpu.memory_space<smem>>
    %c2_6 = arith.constant 2 : index
    %37 = memref.load %arg4[%c2_6] : memref<72xf32, #tpu.memory_space<smem>>
    %c3_7 = arith.constant 3 : index
    %38 = memref.load %arg4[%c3_7] : memref<72xf32, #tpu.memory_space<smem>>
    %c4_8 = arith.constant 4 : index
    %39 = memref.load %arg4[%c4_8] : memref<72xf32, #tpu.memory_space<smem>>
    %c5_9 = arith.constant 5 : index
    %40 = memref.load %arg4[%c5_9] : memref<72xf32, #tpu.memory_space<smem>>
    %c6_10 = arith.constant 6 : index
    %41 = memref.load %arg4[%c6_10] : memref<72xf32, #tpu.memory_space<smem>>
    %c7_11 = arith.constant 7 : index
    %42 = memref.load %arg4[%c7_11] : memref<72xf32, #tpu.memory_space<smem>>
    %c8_12 = arith.constant 8 : index
    %43 = memref.load %arg4[%c8_12] : memref<72xf32, #tpu.memory_space<smem>>
    %c9_13 = arith.constant 9 : index
    %44 = memref.load %arg4[%c9_13] : memref<72xf32, #tpu.memory_space<smem>>
    %c10_14 = arith.constant 10 : index
    %45 = memref.load %arg4[%c10_14] : memref<72xf32, #tpu.memory_space<smem>>
    %c11_15 = arith.constant 11 : index
    %46 = memref.load %arg4[%c11_15] : memref<72xf32, #tpu.memory_space<smem>>
    %c12_16 = arith.constant 12 : index
    %47 = memref.load %arg4[%c12_16] : memref<72xf32, #tpu.memory_space<smem>>
    %c13_17 = arith.constant 13 : index
    %48 = memref.load %arg4[%c13_17] : memref<72xf32, #tpu.memory_space<smem>>
    %c14_18 = arith.constant 14 : index
    %49 = memref.load %arg4[%c14_18] : memref<72xf32, #tpu.memory_space<smem>>
    %c15_19 = arith.constant 15 : index
    %50 = memref.load %arg4[%c15_19] : memref<72xf32, #tpu.memory_space<smem>>
    %c16_20 = arith.constant 16 : index
    %51 = memref.load %arg4[%c16_20] : memref<72xf32, #tpu.memory_space<smem>>
    %c17_21 = arith.constant 17 : index
    %52 = memref.load %arg4[%c17_21] : memref<72xf32, #tpu.memory_space<smem>>
    %c18 = arith.constant 18 : index
    %53 = memref.load %arg4[%c18] : memref<72xf32, #tpu.memory_space<smem>>
    %c19 = arith.constant 19 : index
    %54 = memref.load %arg4[%c19] : memref<72xf32, #tpu.memory_space<smem>>
    %c20 = arith.constant 20 : index
    %55 = memref.load %arg4[%c20] : memref<72xf32, #tpu.memory_space<smem>>
    %c21 = arith.constant 21 : index
    %56 = memref.load %arg4[%c21] : memref<72xf32, #tpu.memory_space<smem>>
    %c22 = arith.constant 22 : index
    %57 = memref.load %arg4[%c22] : memref<72xf32, #tpu.memory_space<smem>>
    %c23 = arith.constant 23 : index
    %58 = memref.load %arg4[%c23] : memref<72xf32, #tpu.memory_space<smem>>
    %c24 = arith.constant 24 : index
    %59 = memref.load %arg4[%c24] : memref<72xf32, #tpu.memory_space<smem>>
    %c25 = arith.constant 25 : index
    %60 = memref.load %arg4[%c25] : memref<72xf32, #tpu.memory_space<smem>>
    %c26 = arith.constant 26 : index
    %61 = memref.load %arg4[%c26] : memref<72xf32, #tpu.memory_space<smem>>
    %c27 = arith.constant 27 : index
    %62 = memref.load %arg4[%c27] : memref<72xf32, #tpu.memory_space<smem>>
    %c28 = arith.constant 28 : index
    %63 = memref.load %arg4[%c28] : memref<72xf32, #tpu.memory_space<smem>>
    %c29 = arith.constant 29 : index
    %64 = memref.load %arg4[%c29] : memref<72xf32, #tpu.memory_space<smem>>
    %c30 = arith.constant 30 : index
    %65 = memref.load %arg4[%c30] : memref<72xf32, #tpu.memory_space<smem>>
    %c31 = arith.constant 31 : index
    %66 = memref.load %arg4[%c31] : memref<72xf32, #tpu.memory_space<smem>>
    %c32 = arith.constant 32 : index
    %67 = memref.load %arg4[%c32] : memref<72xf32, #tpu.memory_space<smem>>
    %c33 = arith.constant 33 : index
    %68 = memref.load %arg4[%c33] : memref<72xf32, #tpu.memory_space<smem>>
    %c34 = arith.constant 34 : index
    %69 = memref.load %arg4[%c34] : memref<72xf32, #tpu.memory_space<smem>>
    %c35 = arith.constant 35 : index
    %70 = memref.load %arg4[%c35] : memref<72xf32, #tpu.memory_space<smem>>
    %c36 = arith.constant 36 : index
    %71 = memref.load %arg4[%c36] : memref<72xf32, #tpu.memory_space<smem>>
    %c37 = arith.constant 37 : index
    %72 = memref.load %arg4[%c37] : memref<72xf32, #tpu.memory_space<smem>>
    %c38 = arith.constant 38 : index
    %73 = memref.load %arg4[%c38] : memref<72xf32, #tpu.memory_space<smem>>
    %c39 = arith.constant 39 : index
    %74 = memref.load %arg4[%c39] : memref<72xf32, #tpu.memory_space<smem>>
    %c40 = arith.constant 40 : index
    %75 = memref.load %arg4[%c40] : memref<72xf32, #tpu.memory_space<smem>>
    %c41 = arith.constant 41 : index
    %76 = memref.load %arg4[%c41] : memref<72xf32, #tpu.memory_space<smem>>
    %c42 = arith.constant 42 : index
    %77 = memref.load %arg4[%c42] : memref<72xf32, #tpu.memory_space<smem>>
    %c43 = arith.constant 43 : index
    %78 = memref.load %arg4[%c43] : memref<72xf32, #tpu.memory_space<smem>>
    %c44 = arith.constant 44 : index
    %79 = memref.load %arg4[%c44] : memref<72xf32, #tpu.memory_space<smem>>
    %c45 = arith.constant 45 : index
    %80 = memref.load %arg4[%c45] : memref<72xf32, #tpu.memory_space<smem>>
    %c46 = arith.constant 46 : index
    %81 = memref.load %arg4[%c46] : memref<72xf32, #tpu.memory_space<smem>>
    %c47 = arith.constant 47 : index
    %82 = memref.load %arg4[%c47] : memref<72xf32, #tpu.memory_space<smem>>
    %c48 = arith.constant 48 : index
    %83 = memref.load %arg4[%c48] : memref<72xf32, #tpu.memory_space<smem>>
    %c49 = arith.constant 49 : index
    %84 = memref.load %arg4[%c49] : memref<72xf32, #tpu.memory_space<smem>>
    %c50 = arith.constant 50 : index
    %85 = memref.load %arg4[%c50] : memref<72xf32, #tpu.memory_space<smem>>
    %c51 = arith.constant 51 : index
    %86 = memref.load %arg4[%c51] : memref<72xf32, #tpu.memory_space<smem>>
    %c52 = arith.constant 52 : index
    %87 = memref.load %arg4[%c52] : memref<72xf32, #tpu.memory_space<smem>>
    %c53 = arith.constant 53 : index
    %88 = memref.load %arg4[%c53] : memref<72xf32, #tpu.memory_space<smem>>
    %c54 = arith.constant 54 : index
    %89 = memref.load %arg4[%c54] : memref<72xf32, #tpu.memory_space<smem>>
    %c55 = arith.constant 55 : index
    %90 = memref.load %arg4[%c55] : memref<72xf32, #tpu.memory_space<smem>>
    %c56 = arith.constant 56 : index
    %91 = memref.load %arg4[%c56] : memref<72xf32, #tpu.memory_space<smem>>
    %c57 = arith.constant 57 : index
    %92 = memref.load %arg4[%c57] : memref<72xf32, #tpu.memory_space<smem>>
    %c58 = arith.constant 58 : index
    %93 = memref.load %arg4[%c58] : memref<72xf32, #tpu.memory_space<smem>>
    %c59 = arith.constant 59 : index
    %94 = memref.load %arg4[%c59] : memref<72xf32, #tpu.memory_space<smem>>
    %c60 = arith.constant 60 : index
    %95 = memref.load %arg4[%c60] : memref<72xf32, #tpu.memory_space<smem>>
    %c61 = arith.constant 61 : index
    %96 = memref.load %arg4[%c61] : memref<72xf32, #tpu.memory_space<smem>>
    %c62 = arith.constant 62 : index
    %97 = memref.load %arg4[%c62] : memref<72xf32, #tpu.memory_space<smem>>
    %c63 = arith.constant 63 : index
    %98 = memref.load %arg4[%c63] : memref<72xf32, #tpu.memory_space<smem>>
    %c64 = arith.constant 64 : index
    %99 = memref.load %arg4[%c64] : memref<72xf32, #tpu.memory_space<smem>>
    %c65 = arith.constant 65 : index
    %100 = memref.load %arg4[%c65] : memref<72xf32, #tpu.memory_space<smem>>
    %c66 = arith.constant 66 : index
    %101 = memref.load %arg4[%c66] : memref<72xf32, #tpu.memory_space<smem>>
    %c67 = arith.constant 67 : index
    %102 = memref.load %arg4[%c67] : memref<72xf32, #tpu.memory_space<smem>>
    %c68 = arith.constant 68 : index
    %103 = memref.load %arg4[%c68] : memref<72xf32, #tpu.memory_space<smem>>
    %c69 = arith.constant 69 : index
    %104 = memref.load %arg4[%c69] : memref<72xf32, #tpu.memory_space<smem>>
    %c70 = arith.constant 70 : index
    %105 = memref.load %arg4[%c70] : memref<72xf32, #tpu.memory_space<smem>>
    %c71 = arith.constant 71 : index
    %106 = memref.load %arg4[%c71] : memref<72xf32, #tpu.memory_space<smem>>
    %c0_22 = arith.constant 0 : index
    %107 = memref.load %arg5[%c0_22] : memref<4xf32, #tpu.memory_space<smem>>
    %c1_23 = arith.constant 1 : index
    %108 = memref.load %arg5[%c1_23] : memref<4xf32, #tpu.memory_space<smem>>
    %c2_24 = arith.constant 2 : index
    %109 = memref.load %arg5[%c2_24] : memref<4xf32, #tpu.memory_space<smem>>
    %c3_25 = arith.constant 3 : index
    %110 = memref.load %arg5[%c3_25] : memref<4xf32, #tpu.memory_space<smem>>
    %c0_26 = arith.constant 0 : index
    %c0_27 = arith.constant 0 : index
    %c0_28 = arith.constant 0 : index
    %111 = vector.load %arg1[%c0_26, %c0_27, %c0_28] : memref<2x18x18xf32, #tpu.memory_space<vmem>>, vector<1x18x18xf32>
    %112 = vector.shape_cast %111 : vector<1x18x18xf32> to vector<18x18xf32>
    %113 = vector.extract_strided_slice %112 {offsets = [0, 0], sizes = [16, 16], strides = [1, 1]} : vector<18x18xf32> to vector<16x16xf32>
    %114 = vector.extract_strided_slice %112 {offsets = [0, 1], sizes = [16, 16], strides = [1, 1]} : vector<18x18xf32> to vector<16x16xf32>
    %115 = vector.extract_strided_slice %112 {offsets = [0, 2], sizes = [16, 16], strides = [1, 1]} : vector<18x18xf32> to vector<16x16xf32>
    %116 = vector.extract_strided_slice %112 {offsets = [1, 0], sizes = [16, 16], strides = [1, 1]} : vector<18x18xf32> to vector<16x16xf32>
    %117 = vector.extract_strided_slice %112 {offsets = [1, 1], sizes = [16, 16], strides = [1, 1]} : vector<18x18xf32> to vector<16x16xf32>
    %118 = vector.extract_strided_slice %112 {offsets = [1, 2], sizes = [16, 16], strides = [1, 1]} : vector<18x18xf32> to vector<16x16xf32>
    %119 = vector.extract_strided_slice %112 {offsets = [2, 0], sizes = [16, 16], strides = [1, 1]} : vector<18x18xf32> to vector<16x16xf32>
    %120 = vector.extract_strided_slice %112 {offsets = [2, 1], sizes = [16, 16], strides = [1, 1]} : vector<18x18xf32> to vector<16x16xf32>
    %121 = vector.extract_strided_slice %112 {offsets = [2, 2], sizes = [16, 16], strides = [1, 1]} : vector<18x18xf32> to vector<16x16xf32>
    %122 = vector.broadcast %15 : f32 to vector<16x16xf32>
    %123 = arith.mulf %122, %113 : vector<16x16xf32>
    %124 = vector.broadcast %16 : f32 to vector<16x16xf32>
    %125 = arith.mulf %124, %114 : vector<16x16xf32>
    %126 = arith.addf %123, %125 : vector<16x16xf32>
    %127 = vector.broadcast %17 : f32 to vector<16x16xf32>
    %128 = arith.mulf %127, %115 : vector<16x16xf32>
    %129 = arith.addf %126, %128 : vector<16x16xf32>
    %130 = vector.broadcast %18 : f32 to vector<16x16xf32>
    %131 = arith.mulf %130, %116 : vector<16x16xf32>
    %132 = arith.addf %129, %131 : vector<16x16xf32>
    %133 = vector.broadcast %19 : f32 to vector<16x16xf32>
    %134 = arith.mulf %133, %117 : vector<16x16xf32>
    %135 = arith.addf %132, %134 : vector<16x16xf32>
    %136 = vector.broadcast %20 : f32 to vector<16x16xf32>
    %137 = arith.mulf %136, %118 : vector<16x16xf32>
    %138 = arith.addf %135, %137 : vector<16x16xf32>
    %139 = vector.broadcast %21 : f32 to vector<16x16xf32>
    %140 = arith.mulf %139, %119 : vector<16x16xf32>
    %141 = arith.addf %138, %140 : vector<16x16xf32>
    %142 = vector.broadcast %22 : f32 to vector<16x16xf32>
    %143 = arith.mulf %142, %120 : vector<16x16xf32>
    %144 = arith.addf %141, %143 : vector<16x16xf32>
    %145 = vector.broadcast %23 : f32 to vector<16x16xf32>
    %146 = arith.mulf %145, %121 : vector<16x16xf32>
    %147 = arith.addf %144, %146 : vector<16x16xf32>
    %148 = vector.broadcast %33 : f32 to vector<16x16xf32>
    %149 = arith.addf %147, %148 : vector<16x16xf32>
    %cst = arith.constant 0.000000e+00 : f32
    %150 = vector.broadcast %cst : f32 to vector<16x16xf32>
    %151 = arith.maximumf %149, %150 : vector<16x16xf32>
    %152 = arith.mulf %151, %14 : vector<16x16xf32>
    %153 = vector.broadcast %24 : f32 to vector<16x16xf32>
    %154 = arith.mulf %153, %113 : vector<16x16xf32>
    %155 = vector.broadcast %25 : f32 to vector<16x16xf32>
    %156 = arith.mulf %155, %114 : vector<16x16xf32>
    %157 = arith.addf %154, %156 : vector<16x16xf32>
    %158 = vector.broadcast %26 : f32 to vector<16x16xf32>
    %159 = arith.mulf %158, %115 : vector<16x16xf32>
    %160 = arith.addf %157, %159 : vector<16x16xf32>
    %161 = vector.broadcast %27 : f32 to vector<16x16xf32>
    %162 = arith.mulf %161, %116 : vector<16x16xf32>
    %163 = arith.addf %160, %162 : vector<16x16xf32>
    %164 = vector.broadcast %28 : f32 to vector<16x16xf32>
    %165 = arith.mulf %164, %117 : vector<16x16xf32>
    %166 = arith.addf %163, %165 : vector<16x16xf32>
    %167 = vector.broadcast %29 : f32 to vector<16x16xf32>
    %168 = arith.mulf %167, %118 : vector<16x16xf32>
    %169 = arith.addf %166, %168 : vector<16x16xf32>
    %170 = vector.broadcast %30 : f32 to vector<16x16xf32>
    %171 = arith.mulf %170, %119 : vector<16x16xf32>
    %172 = arith.addf %169, %171 : vector<16x16xf32>
    %173 = vector.broadcast %31 : f32 to vector<16x16xf32>
    %174 = arith.mulf %173, %120 : vector<16x16xf32>
    %175 = arith.addf %172, %174 : vector<16x16xf32>
    %176 = vector.broadcast %32 : f32 to vector<16x16xf32>
    %177 = arith.mulf %176, %121 : vector<16x16xf32>
    %178 = arith.addf %175, %177 : vector<16x16xf32>
    %179 = vector.broadcast %34 : f32 to vector<16x16xf32>
    %180 = arith.addf %178, %179 : vector<16x16xf32>
    %cst_29 = arith.constant 0.000000e+00 : f32
    %181 = vector.broadcast %cst_29 : f32 to vector<16x16xf32>
    %182 = arith.maximumf %180, %181 : vector<16x16xf32>
    %183 = arith.mulf %182, %14 : vector<16x16xf32>
    %184 = vector.extract_strided_slice %152 {offsets = [0, 0], sizes = [14, 14], strides = [1, 1]} : vector<16x16xf32> to vector<14x14xf32>
    %185 = vector.extract_strided_slice %152 {offsets = [0, 1], sizes = [14, 14], strides = [1, 1]} : vector<16x16xf32> to vector<14x14xf32>
    %186 = vector.extract_strided_slice %152 {offsets = [0, 2], sizes = [14, 14], strides = [1, 1]} : vector<16x16xf32> to vector<14x14xf32>
    %187 = vector.extract_strided_slice %152 {offsets = [1, 0], sizes = [14, 14], strides = [1, 1]} : vector<16x16xf32> to vector<14x14xf32>
    %188 = vector.extract_strided_slice %152 {offsets = [1, 1], sizes = [14, 14], strides = [1, 1]} : vector<16x16xf32> to vector<14x14xf32>
    %189 = vector.extract_strided_slice %152 {offsets = [1, 2], sizes = [14, 14], strides = [1, 1]} : vector<16x16xf32> to vector<14x14xf32>
    %190 = vector.extract_strided_slice %152 {offsets = [2, 0], sizes = [14, 14], strides = [1, 1]} : vector<16x16xf32> to vector<14x14xf32>
    %191 = vector.extract_strided_slice %152 {offsets = [2, 1], sizes = [14, 14], strides = [1, 1]} : vector<16x16xf32> to vector<14x14xf32>
    %192 = vector.extract_strided_slice %152 {offsets = [2, 2], sizes = [14, 14], strides = [1, 1]} : vector<16x16xf32> to vector<14x14xf32>
    %193 = vector.extract_strided_slice %183 {offsets = [0, 0], sizes = [14, 14], strides = [1, 1]} : vector<16x16xf32> to vector<14x14xf32>
    %194 = vector.extract_strided_slice %183 {offsets = [0, 1], sizes = [14, 14], strides = [1, 1]} : vector<16x16xf32> to vector<14x14xf32>
    %195 = vector.extract_strided_slice %183 {offsets = [0, 2], sizes = [14, 14], strides = [1, 1]} : vector<16x16xf32> to vector<14x14xf32>
    %196 = vector.extract_strided_slice %183 {offsets = [1, 0], sizes = [14, 14], strides = [1, 1]} : vector<16x16xf32> to vector<14x14xf32>
    %197 = vector.extract_strided_slice %183 {offsets = [1, 1], sizes = [14, 14], strides = [1, 1]} : vector<16x16xf32> to vector<14x14xf32>
    %198 = vector.extract_strided_slice %183 {offsets = [1, 2], sizes = [14, 14], strides = [1, 1]} : vector<16x16xf32> to vector<14x14xf32>
    %199 = vector.extract_strided_slice %183 {offsets = [2, 0], sizes = [14, 14], strides = [1, 1]} : vector<16x16xf32> to vector<14x14xf32>
    %200 = vector.extract_strided_slice %183 {offsets = [2, 1], sizes = [14, 14], strides = [1, 1]} : vector<16x16xf32> to vector<14x14xf32>
    %201 = vector.extract_strided_slice %183 {offsets = [2, 2], sizes = [14, 14], strides = [1, 1]} : vector<16x16xf32> to vector<14x14xf32>
    %202 = vector.broadcast %35 : f32 to vector<14x14xf32>
    %203 = arith.mulf %202, %184 : vector<14x14xf32>
    %204 = vector.broadcast %36 : f32 to vector<14x14xf32>
    %205 = arith.mulf %204, %185 : vector<14x14xf32>
    %206 = arith.addf %203, %205 : vector<14x14xf32>
    %207 = vector.broadcast %37 : f32 to vector<14x14xf32>
    %208 = arith.mulf %207, %186 : vector<14x14xf32>
    %209 = arith.addf %206, %208 : vector<14x14xf32>
    %210 = vector.broadcast %38 : f32 to vector<14x14xf32>
    %211 = arith.mulf %210, %187 : vector<14x14xf32>
    %212 = arith.addf %209, %211 : vector<14x14xf32>
    %213 = vector.broadcast %39 : f32 to vector<14x14xf32>
    %214 = arith.mulf %213, %188 : vector<14x14xf32>
    %215 = arith.addf %212, %214 : vector<14x14xf32>
    %216 = vector.broadcast %40 : f32 to vector<14x14xf32>
    %217 = arith.mulf %216, %189 : vector<14x14xf32>
    %218 = arith.addf %215, %217 : vector<14x14xf32>
    %219 = vector.broadcast %41 : f32 to vector<14x14xf32>
    %220 = arith.mulf %219, %190 : vector<14x14xf32>
    %221 = arith.addf %218, %220 : vector<14x14xf32>
    %222 = vector.broadcast %42 : f32 to vector<14x14xf32>
    %223 = arith.mulf %222, %191 : vector<14x14xf32>
    %224 = arith.addf %221, %223 : vector<14x14xf32>
    %225 = vector.broadcast %43 : f32 to vector<14x14xf32>
    %226 = arith.mulf %225, %192 : vector<14x14xf32>
    %227 = arith.addf %224, %226 : vector<14x14xf32>
    %228 = vector.broadcast %44 : f32 to vector<14x14xf32>
    %229 = arith.mulf %228, %193 : vector<14x14xf32>
    %230 = arith.addf %227, %229 : vector<14x14xf32>
    %231 = vector.broadcast %45 : f32 to vector<14x14xf32>
    %232 = arith.mulf %231, %194 : vector<14x14xf32>
    %233 = arith.addf %230, %232 : vector<14x14xf32>
    %234 = vector.broadcast %46 : f32 to vector<14x14xf32>
    %235 = arith.mulf %234, %195 : vector<14x14xf32>
    %236 = arith.addf %233, %235 : vector<14x14xf32>
    %237 = vector.broadcast %47 : f32 to vector<14x14xf32>
    %238 = arith.mulf %237, %196 : vector<14x14xf32>
    %239 = arith.addf %236, %238 : vector<14x14xf32>
    %240 = vector.broadcast %48 : f32 to vector<14x14xf32>
    %241 = arith.mulf %240, %197 : vector<14x14xf32>
    %242 = arith.addf %239, %241 : vector<14x14xf32>
    %243 = vector.broadcast %49 : f32 to vector<14x14xf32>
    %244 = arith.mulf %243, %198 : vector<14x14xf32>
    %245 = arith.addf %242, %244 : vector<14x14xf32>
    %246 = vector.broadcast %50 : f32 to vector<14x14xf32>
    %247 = arith.mulf %246, %199 : vector<14x14xf32>
    %248 = arith.addf %245, %247 : vector<14x14xf32>
    %249 = vector.broadcast %51 : f32 to vector<14x14xf32>
    %250 = arith.mulf %249, %200 : vector<14x14xf32>
    %251 = arith.addf %248, %250 : vector<14x14xf32>
    %252 = vector.broadcast %52 : f32 to vector<14x14xf32>
    %253 = arith.mulf %252, %201 : vector<14x14xf32>
    %254 = arith.addf %251, %253 : vector<14x14xf32>
    %255 = vector.broadcast %107 : f32 to vector<14x14xf32>
    %256 = arith.addf %254, %255 : vector<14x14xf32>
    %cst_30 = arith.constant 0.000000e+00 : f32
    %257 = vector.broadcast %cst_30 : f32 to vector<14x14xf32>
    %258 = arith.maximumf %256, %257 : vector<14x14xf32>
    %259 = vector.extract_strided_slice %258 {offsets = [0, 0], sizes = [14, 13], strides = [1, 1]} : vector<14x14xf32> to vector<14x13xf32>
    %260 = vector.extract_strided_slice %258 {offsets = [0, 1], sizes = [14, 13], strides = [1, 1]} : vector<14x14xf32> to vector<14x13xf32>
    %261 = arith.maximumf %259, %260 : vector<14x13xf32>
    %262 = vector.extract_strided_slice %261 {offsets = [0, 0], sizes = [13, 13], strides = [1, 1]} : vector<14x13xf32> to vector<13x13xf32>
    %263 = vector.extract_strided_slice %261 {offsets = [1, 0], sizes = [13, 13], strides = [1, 1]} : vector<14x13xf32> to vector<13x13xf32>
    %264 = arith.maximumf %262, %263 : vector<13x13xf32>
    %265 = vector.broadcast %53 : f32 to vector<14x14xf32>
    %266 = arith.mulf %265, %184 : vector<14x14xf32>
    %267 = vector.broadcast %54 : f32 to vector<14x14xf32>
    %268 = arith.mulf %267, %185 : vector<14x14xf32>
    %269 = arith.addf %266, %268 : vector<14x14xf32>
    %270 = vector.broadcast %55 : f32 to vector<14x14xf32>
    %271 = arith.mulf %270, %186 : vector<14x14xf32>
    %272 = arith.addf %269, %271 : vector<14x14xf32>
    %273 = vector.broadcast %56 : f32 to vector<14x14xf32>
    %274 = arith.mulf %273, %187 : vector<14x14xf32>
    %275 = arith.addf %272, %274 : vector<14x14xf32>
    %276 = vector.broadcast %57 : f32 to vector<14x14xf32>
    %277 = arith.mulf %276, %188 : vector<14x14xf32>
    %278 = arith.addf %275, %277 : vector<14x14xf32>
    %279 = vector.broadcast %58 : f32 to vector<14x14xf32>
    %280 = arith.mulf %279, %189 : vector<14x14xf32>
    %281 = arith.addf %278, %280 : vector<14x14xf32>
    %282 = vector.broadcast %59 : f32 to vector<14x14xf32>
    %283 = arith.mulf %282, %190 : vector<14x14xf32>
    %284 = arith.addf %281, %283 : vector<14x14xf32>
    %285 = vector.broadcast %60 : f32 to vector<14x14xf32>
    %286 = arith.mulf %285, %191 : vector<14x14xf32>
    %287 = arith.addf %284, %286 : vector<14x14xf32>
    %288 = vector.broadcast %61 : f32 to vector<14x14xf32>
    %289 = arith.mulf %288, %192 : vector<14x14xf32>
    %290 = arith.addf %287, %289 : vector<14x14xf32>
    %291 = vector.broadcast %62 : f32 to vector<14x14xf32>
    %292 = arith.mulf %291, %193 : vector<14x14xf32>
    %293 = arith.addf %290, %292 : vector<14x14xf32>
    %294 = vector.broadcast %63 : f32 to vector<14x14xf32>
    %295 = arith.mulf %294, %194 : vector<14x14xf32>
    %296 = arith.addf %293, %295 : vector<14x14xf32>
    %297 = vector.broadcast %64 : f32 to vector<14x14xf32>
    %298 = arith.mulf %297, %195 : vector<14x14xf32>
    %299 = arith.addf %296, %298 : vector<14x14xf32>
    %300 = vector.broadcast %65 : f32 to vector<14x14xf32>
    %301 = arith.mulf %300, %196 : vector<14x14xf32>
    %302 = arith.addf %299, %301 : vector<14x14xf32>
    %303 = vector.broadcast %66 : f32 to vector<14x14xf32>
    %304 = arith.mulf %303, %197 : vector<14x14xf32>
    %305 = arith.addf %302, %304 : vector<14x14xf32>
    %306 = vector.broadcast %67 : f32 to vector<14x14xf32>
    %307 = arith.mulf %306, %198 : vector<14x14xf32>
    %308 = arith.addf %305, %307 : vector<14x14xf32>
    %309 = vector.broadcast %68 : f32 to vector<14x14xf32>
    %310 = arith.mulf %309, %199 : vector<14x14xf32>
    %311 = arith.addf %308, %310 : vector<14x14xf32>
    %312 = vector.broadcast %69 : f32 to vector<14x14xf32>
    %313 = arith.mulf %312, %200 : vector<14x14xf32>
    %314 = arith.addf %311, %313 : vector<14x14xf32>
    %315 = vector.broadcast %70 : f32 to vector<14x14xf32>
    %316 = arith.mulf %315, %201 : vector<14x14xf32>
    %317 = arith.addf %314, %316 : vector<14x14xf32>
    %318 = vector.broadcast %108 : f32 to vector<14x14xf32>
    %319 = arith.addf %317, %318 : vector<14x14xf32>
    %cst_31 = arith.constant 0.000000e+00 : f32
    %320 = vector.broadcast %cst_31 : f32 to vector<14x14xf32>
    %321 = arith.maximumf %319, %320 : vector<14x14xf32>
    %322 = vector.extract_strided_slice %321 {offsets = [0, 0], sizes = [14, 13], strides = [1, 1]} : vector<14x14xf32> to vector<14x13xf32>
    %323 = vector.extract_strided_slice %321 {offsets = [0, 1], sizes = [14, 13], strides = [1, 1]} : vector<14x14xf32> to vector<14x13xf32>
    %324 = arith.maximumf %322, %323 : vector<14x13xf32>
    %325 = vector.extract_strided_slice %324 {offsets = [0, 0], sizes = [13, 13], strides = [1, 1]} : vector<14x13xf32> to vector<13x13xf32>
    %326 = vector.extract_strided_slice %324 {offsets = [1, 0], sizes = [13, 13], strides = [1, 1]} : vector<14x13xf32> to vector<13x13xf32>
    %327 = arith.maximumf %325, %326 : vector<13x13xf32>
    %328 = vector.broadcast %71 : f32 to vector<14x14xf32>
    %329 = arith.mulf %328, %184 : vector<14x14xf32>
    %330 = vector.broadcast %72 : f32 to vector<14x14xf32>
    %331 = arith.mulf %330, %185 : vector<14x14xf32>
    %332 = arith.addf %329, %331 : vector<14x14xf32>
    %333 = vector.broadcast %73 : f32 to vector<14x14xf32>
    %334 = arith.mulf %333, %186 : vector<14x14xf32>
    %335 = arith.addf %332, %334 : vector<14x14xf32>
    %336 = vector.broadcast %74 : f32 to vector<14x14xf32>
    %337 = arith.mulf %336, %187 : vector<14x14xf32>
    %338 = arith.addf %335, %337 : vector<14x14xf32>
    %339 = vector.broadcast %75 : f32 to vector<14x14xf32>
    %340 = arith.mulf %339, %188 : vector<14x14xf32>
    %341 = arith.addf %338, %340 : vector<14x14xf32>
    %342 = vector.broadcast %76 : f32 to vector<14x14xf32>
    %343 = arith.mulf %342, %189 : vector<14x14xf32>
    %344 = arith.addf %341, %343 : vector<14x14xf32>
    %345 = vector.broadcast %77 : f32 to vector<14x14xf32>
    %346 = arith.mulf %345, %190 : vector<14x14xf32>
    %347 = arith.addf %344, %346 : vector<14x14xf32>
    %348 = vector.broadcast %78 : f32 to vector<14x14xf32>
    %349 = arith.mulf %348, %191 : vector<14x14xf32>
    %350 = arith.addf %347, %349 : vector<14x14xf32>
    %351 = vector.broadcast %79 : f32 to vector<14x14xf32>
    %352 = arith.mulf %351, %192 : vector<14x14xf32>
    %353 = arith.addf %350, %352 : vector<14x14xf32>
    %354 = vector.broadcast %80 : f32 to vector<14x14xf32>
    %355 = arith.mulf %354, %193 : vector<14x14xf32>
    %356 = arith.addf %353, %355 : vector<14x14xf32>
    %357 = vector.broadcast %81 : f32 to vector<14x14xf32>
    %358 = arith.mulf %357, %194 : vector<14x14xf32>
    %359 = arith.addf %356, %358 : vector<14x14xf32>
    %360 = vector.broadcast %82 : f32 to vector<14x14xf32>
    %361 = arith.mulf %360, %195 : vector<14x14xf32>
    %362 = arith.addf %359, %361 : vector<14x14xf32>
    %363 = vector.broadcast %83 : f32 to vector<14x14xf32>
    %364 = arith.mulf %363, %196 : vector<14x14xf32>
    %365 = arith.addf %362, %364 : vector<14x14xf32>
    %366 = vector.broadcast %84 : f32 to vector<14x14xf32>
    %367 = arith.mulf %366, %197 : vector<14x14xf32>
    %368 = arith.addf %365, %367 : vector<14x14xf32>
    %369 = vector.broadcast %85 : f32 to vector<14x14xf32>
    %370 = arith.mulf %369, %198 : vector<14x14xf32>
    %371 = arith.addf %368, %370 : vector<14x14xf32>
    %372 = vector.broadcast %86 : f32 to vector<14x14xf32>
    %373 = arith.mulf %372, %199 : vector<14x14xf32>
    %374 = arith.addf %371, %373 : vector<14x14xf32>
    %375 = vector.broadcast %87 : f32 to vector<14x14xf32>
    %376 = arith.mulf %375, %200 : vector<14x14xf32>
    %377 = arith.addf %374, %376 : vector<14x14xf32>
    %378 = vector.broadcast %88 : f32 to vector<14x14xf32>
    %379 = arith.mulf %378, %201 : vector<14x14xf32>
    %380 = arith.addf %377, %379 : vector<14x14xf32>
    %381 = vector.broadcast %109 : f32 to vector<14x14xf32>
    %382 = arith.addf %380, %381 : vector<14x14xf32>
    %cst_32 = arith.constant 0.000000e+00 : f32
    %383 = vector.broadcast %cst_32 : f32 to vector<14x14xf32>
    %384 = arith.maximumf %382, %383 : vector<14x14xf32>
    %385 = vector.extract_strided_slice %384 {offsets = [0, 0], sizes = [14, 13], strides = [1, 1]} : vector<14x14xf32> to vector<14x13xf32>
    %386 = vector.extract_strided_slice %384 {offsets = [0, 1], sizes = [14, 13], strides = [1, 1]} : vector<14x14xf32> to vector<14x13xf32>
    %387 = arith.maximumf %385, %386 : vector<14x13xf32>
    %388 = vector.extract_strided_slice %387 {offsets = [0, 0], sizes = [13, 13], strides = [1, 1]} : vector<14x13xf32> to vector<13x13xf32>
    %389 = vector.extract_strided_slice %387 {offsets = [1, 0], sizes = [13, 13], strides = [1, 1]} : vector<14x13xf32> to vector<13x13xf32>
    %390 = arith.maximumf %388, %389 : vector<13x13xf32>
    %391 = vector.broadcast %89 : f32 to vector<14x14xf32>
    %392 = arith.mulf %391, %184 : vector<14x14xf32>
    %393 = vector.broadcast %90 : f32 to vector<14x14xf32>
    %394 = arith.mulf %393, %185 : vector<14x14xf32>
    %395 = arith.addf %392, %394 : vector<14x14xf32>
    %396 = vector.broadcast %91 : f32 to vector<14x14xf32>
    %397 = arith.mulf %396, %186 : vector<14x14xf32>
    %398 = arith.addf %395, %397 : vector<14x14xf32>
    %399 = vector.broadcast %92 : f32 to vector<14x14xf32>
    %400 = arith.mulf %399, %187 : vector<14x14xf32>
    %401 = arith.addf %398, %400 : vector<14x14xf32>
    %402 = vector.broadcast %93 : f32 to vector<14x14xf32>
    %403 = arith.mulf %402, %188 : vector<14x14xf32>
    %404 = arith.addf %401, %403 : vector<14x14xf32>
    %405 = vector.broadcast %94 : f32 to vector<14x14xf32>
    %406 = arith.mulf %405, %189 : vector<14x14xf32>
    %407 = arith.addf %404, %406 : vector<14x14xf32>
    %408 = vector.broadcast %95 : f32 to vector<14x14xf32>
    %409 = arith.mulf %408, %190 : vector<14x14xf32>
    %410 = arith.addf %407, %409 : vector<14x14xf32>
    %411 = vector.broadcast %96 : f32 to vector<14x14xf32>
    %412 = arith.mulf %411, %191 : vector<14x14xf32>
    %413 = arith.addf %410, %412 : vector<14x14xf32>
    %414 = vector.broadcast %97 : f32 to vector<14x14xf32>
    %415 = arith.mulf %414, %192 : vector<14x14xf32>
    %416 = arith.addf %413, %415 : vector<14x14xf32>
    %417 = vector.broadcast %98 : f32 to vector<14x14xf32>
    %418 = arith.mulf %417, %193 : vector<14x14xf32>
    %419 = arith.addf %416, %418 : vector<14x14xf32>
    %420 = vector.broadcast %99 : f32 to vector<14x14xf32>
    %421 = arith.mulf %420, %194 : vector<14x14xf32>
    %422 = arith.addf %419, %421 : vector<14x14xf32>
    %423 = vector.broadcast %100 : f32 to vector<14x14xf32>
    %424 = arith.mulf %423, %195 : vector<14x14xf32>
    %425 = arith.addf %422, %424 : vector<14x14xf32>
    %426 = vector.broadcast %101 : f32 to vector<14x14xf32>
    %427 = arith.mulf %426, %196 : vector<14x14xf32>
    %428 = arith.addf %425, %427 : vector<14x14xf32>
    %429 = vector.broadcast %102 : f32 to vector<14x14xf32>
    %430 = arith.mulf %429, %197 : vector<14x14xf32>
    %431 = arith.addf %428, %430 : vector<14x14xf32>
    %432 = vector.broadcast %103 : f32 to vector<14x14xf32>
    %433 = arith.mulf %432, %198 : vector<14x14xf32>
    %434 = arith.addf %431, %433 : vector<14x14xf32>
    %435 = vector.broadcast %104 : f32 to vector<14x14xf32>
    %436 = arith.mulf %435, %199 : vector<14x14xf32>
    %437 = arith.addf %434, %436 : vector<14x14xf32>
    %438 = vector.broadcast %105 : f32 to vector<14x14xf32>
    %439 = arith.mulf %438, %200 : vector<14x14xf32>
    %440 = arith.addf %437, %439 : vector<14x14xf32>
    %441 = vector.broadcast %106 : f32 to vector<14x14xf32>
    %442 = arith.mulf %441, %201 : vector<14x14xf32>
    %443 = arith.addf %440, %442 : vector<14x14xf32>
    %444 = vector.broadcast %110 : f32 to vector<14x14xf32>
    %445 = arith.addf %443, %444 : vector<14x14xf32>
    %cst_33 = arith.constant 0.000000e+00 : f32
    %446 = vector.broadcast %cst_33 : f32 to vector<14x14xf32>
    %447 = arith.maximumf %445, %446 : vector<14x14xf32>
    %448 = vector.extract_strided_slice %447 {offsets = [0, 0], sizes = [14, 13], strides = [1, 1]} : vector<14x14xf32> to vector<14x13xf32>
    %449 = vector.extract_strided_slice %447 {offsets = [0, 1], sizes = [14, 13], strides = [1, 1]} : vector<14x14xf32> to vector<14x13xf32>
    %450 = arith.maximumf %448, %449 : vector<14x13xf32>
    %451 = vector.extract_strided_slice %450 {offsets = [0, 0], sizes = [13, 13], strides = [1, 1]} : vector<14x13xf32> to vector<13x13xf32>
    %452 = vector.extract_strided_slice %450 {offsets = [1, 0], sizes = [13, 13], strides = [1, 1]} : vector<14x13xf32> to vector<13x13xf32>
    %453 = arith.maximumf %451, %452 : vector<13x13xf32>
    %454 = tpu.concatenate %264, %327, %390, %453 in 1 : vector<13x13xf32>, vector<13x13xf32>, vector<13x13xf32>, vector<13x13xf32> -> vector<13x52xf32>
    %c1_34 = arith.constant 1 : index
    %c0_35 = arith.constant 0 : index
    %c0_36 = arith.constant 0 : index
    %455 = vector.load %arg1[%c1_34, %c0_35, %c0_36] : memref<2x18x18xf32, #tpu.memory_space<vmem>>, vector<1x18x18xf32>
    %456 = vector.shape_cast %455 : vector<1x18x18xf32> to vector<18x18xf32>
    %457 = vector.extract_strided_slice %456 {offsets = [0, 0], sizes = [16, 16], strides = [1, 1]} : vector<18x18xf32> to vector<16x16xf32>
    %458 = vector.extract_strided_slice %456 {offsets = [0, 1], sizes = [16, 16], strides = [1, 1]} : vector<18x18xf32> to vector<16x16xf32>
    %459 = vector.extract_strided_slice %456 {offsets = [0, 2], sizes = [16, 16], strides = [1, 1]} : vector<18x18xf32> to vector<16x16xf32>
    %460 = vector.extract_strided_slice %456 {offsets = [1, 0], sizes = [16, 16], strides = [1, 1]} : vector<18x18xf32> to vector<16x16xf32>
    %461 = vector.extract_strided_slice %456 {offsets = [1, 1], sizes = [16, 16], strides = [1, 1]} : vector<18x18xf32> to vector<16x16xf32>
    %462 = vector.extract_strided_slice %456 {offsets = [1, 2], sizes = [16, 16], strides = [1, 1]} : vector<18x18xf32> to vector<16x16xf32>
    %463 = vector.extract_strided_slice %456 {offsets = [2, 0], sizes = [16, 16], strides = [1, 1]} : vector<18x18xf32> to vector<16x16xf32>
    %464 = vector.extract_strided_slice %456 {offsets = [2, 1], sizes = [16, 16], strides = [1, 1]} : vector<18x18xf32> to vector<16x16xf32>
    %465 = vector.extract_strided_slice %456 {offsets = [2, 2], sizes = [16, 16], strides = [1, 1]} : vector<18x18xf32> to vector<16x16xf32>
    %466 = vector.broadcast %15 : f32 to vector<16x16xf32>
    %467 = arith.mulf %466, %457 : vector<16x16xf32>
    %468 = vector.broadcast %16 : f32 to vector<16x16xf32>
    %469 = arith.mulf %468, %458 : vector<16x16xf32>
    %470 = arith.addf %467, %469 : vector<16x16xf32>
    %471 = vector.broadcast %17 : f32 to vector<16x16xf32>
    %472 = arith.mulf %471, %459 : vector<16x16xf32>
    %473 = arith.addf %470, %472 : vector<16x16xf32>
    %474 = vector.broadcast %18 : f32 to vector<16x16xf32>
    %475 = arith.mulf %474, %460 : vector<16x16xf32>
    %476 = arith.addf %473, %475 : vector<16x16xf32>
    %477 = vector.broadcast %19 : f32 to vector<16x16xf32>
    %478 = arith.mulf %477, %461 : vector<16x16xf32>
    %479 = arith.addf %476, %478 : vector<16x16xf32>
    %480 = vector.broadcast %20 : f32 to vector<16x16xf32>
    %481 = arith.mulf %480, %462 : vector<16x16xf32>
    %482 = arith.addf %479, %481 : vector<16x16xf32>
    %483 = vector.broadcast %21 : f32 to vector<16x16xf32>
    %484 = arith.mulf %483, %463 : vector<16x16xf32>
    %485 = arith.addf %482, %484 : vector<16x16xf32>
    %486 = vector.broadcast %22 : f32 to vector<16x16xf32>
    %487 = arith.mulf %486, %464 : vector<16x16xf32>
    %488 = arith.addf %485, %487 : vector<16x16xf32>
    %489 = vector.broadcast %23 : f32 to vector<16x16xf32>
    %490 = arith.mulf %489, %465 : vector<16x16xf32>
    %491 = arith.addf %488, %490 : vector<16x16xf32>
    %492 = vector.broadcast %33 : f32 to vector<16x16xf32>
    %493 = arith.addf %491, %492 : vector<16x16xf32>
    %cst_37 = arith.constant 0.000000e+00 : f32
    %494 = vector.broadcast %cst_37 : f32 to vector<16x16xf32>
    %495 = arith.maximumf %493, %494 : vector<16x16xf32>
    %496 = arith.mulf %495, %14 : vector<16x16xf32>
    %497 = vector.broadcast %24 : f32 to vector<16x16xf32>
    %498 = arith.mulf %497, %457 : vector<16x16xf32>
    %499 = vector.broadcast %25 : f32 to vector<16x16xf32>
    %500 = arith.mulf %499, %458 : vector<16x16xf32>
    %501 = arith.addf %498, %500 : vector<16x16xf32>
    %502 = vector.broadcast %26 : f32 to vector<16x16xf32>
    %503 = arith.mulf %502, %459 : vector<16x16xf32>
    %504 = arith.addf %501, %503 : vector<16x16xf32>
    %505 = vector.broadcast %27 : f32 to vector<16x16xf32>
    %506 = arith.mulf %505, %460 : vector<16x16xf32>
    %507 = arith.addf %504, %506 : vector<16x16xf32>
    %508 = vector.broadcast %28 : f32 to vector<16x16xf32>
    %509 = arith.mulf %508, %461 : vector<16x16xf32>
    %510 = arith.addf %507, %509 : vector<16x16xf32>
    %511 = vector.broadcast %29 : f32 to vector<16x16xf32>
    %512 = arith.mulf %511, %462 : vector<16x16xf32>
    %513 = arith.addf %510, %512 : vector<16x16xf32>
    %514 = vector.broadcast %30 : f32 to vector<16x16xf32>
    %515 = arith.mulf %514, %463 : vector<16x16xf32>
    %516 = arith.addf %513, %515 : vector<16x16xf32>
    %517 = vector.broadcast %31 : f32 to vector<16x16xf32>
    %518 = arith.mulf %517, %464 : vector<16x16xf32>
    %519 = arith.addf %516, %518 : vector<16x16xf32>
    %520 = vector.broadcast %32 : f32 to vector<16x16xf32>
    %521 = arith.mulf %520, %465 : vector<16x16xf32>
    %522 = arith.addf %519, %521 : vector<16x16xf32>
    %523 = vector.broadcast %34 : f32 to vector<16x16xf32>
    %524 = arith.addf %522, %523 : vector<16x16xf32>
    %cst_38 = arith.constant 0.000000e+00 : f32
    %525 = vector.broadcast %cst_38 : f32 to vector<16x16xf32>
    %526 = arith.maximumf %524, %525 : vector<16x16xf32>
    %527 = arith.mulf %526, %14 : vector<16x16xf32>
    %528 = vector.extract_strided_slice %496 {offsets = [0, 0], sizes = [14, 14], strides = [1, 1]} : vector<16x16xf32> to vector<14x14xf32>
    %529 = vector.extract_strided_slice %496 {offsets = [0, 1], sizes = [14, 14], strides = [1, 1]} : vector<16x16xf32> to vector<14x14xf32>
    %530 = vector.extract_strided_slice %496 {offsets = [0, 2], sizes = [14, 14], strides = [1, 1]} : vector<16x16xf32> to vector<14x14xf32>
    %531 = vector.extract_strided_slice %496 {offsets = [1, 0], sizes = [14, 14], strides = [1, 1]} : vector<16x16xf32> to vector<14x14xf32>
    %532 = vector.extract_strided_slice %496 {offsets = [1, 1], sizes = [14, 14], strides = [1, 1]} : vector<16x16xf32> to vector<14x14xf32>
    %533 = vector.extract_strided_slice %496 {offsets = [1, 2], sizes = [14, 14], strides = [1, 1]} : vector<16x16xf32> to vector<14x14xf32>
    %534 = vector.extract_strided_slice %496 {offsets = [2, 0], sizes = [14, 14], strides = [1, 1]} : vector<16x16xf32> to vector<14x14xf32>
    %535 = vector.extract_strided_slice %496 {offsets = [2, 1], sizes = [14, 14], strides = [1, 1]} : vector<16x16xf32> to vector<14x14xf32>
    %536 = vector.extract_strided_slice %496 {offsets = [2, 2], sizes = [14, 14], strides = [1, 1]} : vector<16x16xf32> to vector<14x14xf32>
    %537 = vector.extract_strided_slice %527 {offsets = [0, 0], sizes = [14, 14], strides = [1, 1]} : vector<16x16xf32> to vector<14x14xf32>
    %538 = vector.extract_strided_slice %527 {offsets = [0, 1], sizes = [14, 14], strides = [1, 1]} : vector<16x16xf32> to vector<14x14xf32>
    %539 = vector.extract_strided_slice %527 {offsets = [0, 2], sizes = [14, 14], strides = [1, 1]} : vector<16x16xf32> to vector<14x14xf32>
    %540 = vector.extract_strided_slice %527 {offsets = [1, 0], sizes = [14, 14], strides = [1, 1]} : vector<16x16xf32> to vector<14x14xf32>
    %541 = vector.extract_strided_slice %527 {offsets = [1, 1], sizes = [14, 14], strides = [1, 1]} : vector<16x16xf32> to vector<14x14xf32>
    %542 = vector.extract_strided_slice %527 {offsets = [1, 2], sizes = [14, 14], strides = [1, 1]} : vector<16x16xf32> to vector<14x14xf32>
    %543 = vector.extract_strided_slice %527 {offsets = [2, 0], sizes = [14, 14], strides = [1, 1]} : vector<16x16xf32> to vector<14x14xf32>
    %544 = vector.extract_strided_slice %527 {offsets = [2, 1], sizes = [14, 14], strides = [1, 1]} : vector<16x16xf32> to vector<14x14xf32>
    %545 = vector.extract_strided_slice %527 {offsets = [2, 2], sizes = [14, 14], strides = [1, 1]} : vector<16x16xf32> to vector<14x14xf32>
    %546 = vector.broadcast %35 : f32 to vector<14x14xf32>
    %547 = arith.mulf %546, %528 : vector<14x14xf32>
    %548 = vector.broadcast %36 : f32 to vector<14x14xf32>
    %549 = arith.mulf %548, %529 : vector<14x14xf32>
    %550 = arith.addf %547, %549 : vector<14x14xf32>
    %551 = vector.broadcast %37 : f32 to vector<14x14xf32>
    %552 = arith.mulf %551, %530 : vector<14x14xf32>
    %553 = arith.addf %550, %552 : vector<14x14xf32>
    %554 = vector.broadcast %38 : f32 to vector<14x14xf32>
    %555 = arith.mulf %554, %531 : vector<14x14xf32>
    %556 = arith.addf %553, %555 : vector<14x14xf32>
    %557 = vector.broadcast %39 : f32 to vector<14x14xf32>
    %558 = arith.mulf %557, %532 : vector<14x14xf32>
    %559 = arith.addf %556, %558 : vector<14x14xf32>
    %560 = vector.broadcast %40 : f32 to vector<14x14xf32>
    %561 = arith.mulf %560, %533 : vector<14x14xf32>
    %562 = arith.addf %559, %561 : vector<14x14xf32>
    %563 = vector.broadcast %41 : f32 to vector<14x14xf32>
    %564 = arith.mulf %563, %534 : vector<14x14xf32>
    %565 = arith.addf %562, %564 : vector<14x14xf32>
    %566 = vector.broadcast %42 : f32 to vector<14x14xf32>
    %567 = arith.mulf %566, %535 : vector<14x14xf32>
    %568 = arith.addf %565, %567 : vector<14x14xf32>
    %569 = vector.broadcast %43 : f32 to vector<14x14xf32>
    %570 = arith.mulf %569, %536 : vector<14x14xf32>
    %571 = arith.addf %568, %570 : vector<14x14xf32>
    %572 = vector.broadcast %44 : f32 to vector<14x14xf32>
    %573 = arith.mulf %572, %537 : vector<14x14xf32>
    %574 = arith.addf %571, %573 : vector<14x14xf32>
    %575 = vector.broadcast %45 : f32 to vector<14x14xf32>
    %576 = arith.mulf %575, %538 : vector<14x14xf32>
    %577 = arith.addf %574, %576 : vector<14x14xf32>
    %578 = vector.broadcast %46 : f32 to vector<14x14xf32>
    %579 = arith.mulf %578, %539 : vector<14x14xf32>
    %580 = arith.addf %577, %579 : vector<14x14xf32>
    %581 = vector.broadcast %47 : f32 to vector<14x14xf32>
    %582 = arith.mulf %581, %540 : vector<14x14xf32>
    %583 = arith.addf %580, %582 : vector<14x14xf32>
    %584 = vector.broadcast %48 : f32 to vector<14x14xf32>
    %585 = arith.mulf %584, %541 : vector<14x14xf32>
    %586 = arith.addf %583, %585 : vector<14x14xf32>
    %587 = vector.broadcast %49 : f32 to vector<14x14xf32>
    %588 = arith.mulf %587, %542 : vector<14x14xf32>
    %589 = arith.addf %586, %588 : vector<14x14xf32>
    %590 = vector.broadcast %50 : f32 to vector<14x14xf32>
    %591 = arith.mulf %590, %543 : vector<14x14xf32>
    %592 = arith.addf %589, %591 : vector<14x14xf32>
    %593 = vector.broadcast %51 : f32 to vector<14x14xf32>
    %594 = arith.mulf %593, %544 : vector<14x14xf32>
    %595 = arith.addf %592, %594 : vector<14x14xf32>
    %596 = vector.broadcast %52 : f32 to vector<14x14xf32>
    %597 = arith.mulf %596, %545 : vector<14x14xf32>
    %598 = arith.addf %595, %597 : vector<14x14xf32>
    %599 = vector.broadcast %107 : f32 to vector<14x14xf32>
    %600 = arith.addf %598, %599 : vector<14x14xf32>
    %cst_39 = arith.constant 0.000000e+00 : f32
    %601 = vector.broadcast %cst_39 : f32 to vector<14x14xf32>
    %602 = arith.maximumf %600, %601 : vector<14x14xf32>
    %603 = vector.extract_strided_slice %602 {offsets = [0, 0], sizes = [14, 13], strides = [1, 1]} : vector<14x14xf32> to vector<14x13xf32>
    %604 = vector.extract_strided_slice %602 {offsets = [0, 1], sizes = [14, 13], strides = [1, 1]} : vector<14x14xf32> to vector<14x13xf32>
    %605 = arith.maximumf %603, %604 : vector<14x13xf32>
    %606 = vector.extract_strided_slice %605 {offsets = [0, 0], sizes = [13, 13], strides = [1, 1]} : vector<14x13xf32> to vector<13x13xf32>
    %607 = vector.extract_strided_slice %605 {offsets = [1, 0], sizes = [13, 13], strides = [1, 1]} : vector<14x13xf32> to vector<13x13xf32>
    %608 = arith.maximumf %606, %607 : vector<13x13xf32>
    %609 = vector.broadcast %53 : f32 to vector<14x14xf32>
    %610 = arith.mulf %609, %528 : vector<14x14xf32>
    %611 = vector.broadcast %54 : f32 to vector<14x14xf32>
    %612 = arith.mulf %611, %529 : vector<14x14xf32>
    %613 = arith.addf %610, %612 : vector<14x14xf32>
    %614 = vector.broadcast %55 : f32 to vector<14x14xf32>
    %615 = arith.mulf %614, %530 : vector<14x14xf32>
    %616 = arith.addf %613, %615 : vector<14x14xf32>
    %617 = vector.broadcast %56 : f32 to vector<14x14xf32>
    %618 = arith.mulf %617, %531 : vector<14x14xf32>
    %619 = arith.addf %616, %618 : vector<14x14xf32>
    %620 = vector.broadcast %57 : f32 to vector<14x14xf32>
    %621 = arith.mulf %620, %532 : vector<14x14xf32>
    %622 = arith.addf %619, %621 : vector<14x14xf32>
    %623 = vector.broadcast %58 : f32 to vector<14x14xf32>
    %624 = arith.mulf %623, %533 : vector<14x14xf32>
    %625 = arith.addf %622, %624 : vector<14x14xf32>
    %626 = vector.broadcast %59 : f32 to vector<14x14xf32>
    %627 = arith.mulf %626, %534 : vector<14x14xf32>
    %628 = arith.addf %625, %627 : vector<14x14xf32>
    %629 = vector.broadcast %60 : f32 to vector<14x14xf32>
    %630 = arith.mulf %629, %535 : vector<14x14xf32>
    %631 = arith.addf %628, %630 : vector<14x14xf32>
    %632 = vector.broadcast %61 : f32 to vector<14x14xf32>
    %633 = arith.mulf %632, %536 : vector<14x14xf32>
    %634 = arith.addf %631, %633 : vector<14x14xf32>
    %635 = vector.broadcast %62 : f32 to vector<14x14xf32>
    %636 = arith.mulf %635, %537 : vector<14x14xf32>
    %637 = arith.addf %634, %636 : vector<14x14xf32>
    %638 = vector.broadcast %63 : f32 to vector<14x14xf32>
    %639 = arith.mulf %638, %538 : vector<14x14xf32>
    %640 = arith.addf %637, %639 : vector<14x14xf32>
    %641 = vector.broadcast %64 : f32 to vector<14x14xf32>
    %642 = arith.mulf %641, %539 : vector<14x14xf32>
    %643 = arith.addf %640, %642 : vector<14x14xf32>
    %644 = vector.broadcast %65 : f32 to vector<14x14xf32>
    %645 = arith.mulf %644, %540 : vector<14x14xf32>
    %646 = arith.addf %643, %645 : vector<14x14xf32>
    %647 = vector.broadcast %66 : f32 to vector<14x14xf32>
    %648 = arith.mulf %647, %541 : vector<14x14xf32>
    %649 = arith.addf %646, %648 : vector<14x14xf32>
    %650 = vector.broadcast %67 : f32 to vector<14x14xf32>
    %651 = arith.mulf %650, %542 : vector<14x14xf32>
    %652 = arith.addf %649, %651 : vector<14x14xf32>
    %653 = vector.broadcast %68 : f32 to vector<14x14xf32>
    %654 = arith.mulf %653, %543 : vector<14x14xf32>
    %655 = arith.addf %652, %654 : vector<14x14xf32>
    %656 = vector.broadcast %69 : f32 to vector<14x14xf32>
    %657 = arith.mulf %656, %544 : vector<14x14xf32>
    %658 = arith.addf %655, %657 : vector<14x14xf32>
    %659 = vector.broadcast %70 : f32 to vector<14x14xf32>
    %660 = arith.mulf %659, %545 : vector<14x14xf32>
    %661 = arith.addf %658, %660 : vector<14x14xf32>
    %662 = vector.broadcast %108 : f32 to vector<14x14xf32>
    %663 = arith.addf %661, %662 : vector<14x14xf32>
    %cst_40 = arith.constant 0.000000e+00 : f32
    %664 = vector.broadcast %cst_40 : f32 to vector<14x14xf32>
    %665 = arith.maximumf %663, %664 : vector<14x14xf32>
    %666 = vector.extract_strided_slice %665 {offsets = [0, 0], sizes = [14, 13], strides = [1, 1]} : vector<14x14xf32> to vector<14x13xf32>
    %667 = vector.extract_strided_slice %665 {offsets = [0, 1], sizes = [14, 13], strides = [1, 1]} : vector<14x14xf32> to vector<14x13xf32>
    %668 = arith.maximumf %666, %667 : vector<14x13xf32>
    %669 = vector.extract_strided_slice %668 {offsets = [0, 0], sizes = [13, 13], strides = [1, 1]} : vector<14x13xf32> to vector<13x13xf32>
    %670 = vector.extract_strided_slice %668 {offsets = [1, 0], sizes = [13, 13], strides = [1, 1]} : vector<14x13xf32> to vector<13x13xf32>
    %671 = arith.maximumf %669, %670 : vector<13x13xf32>
    %672 = vector.broadcast %71 : f32 to vector<14x14xf32>
    %673 = arith.mulf %672, %528 : vector<14x14xf32>
    %674 = vector.broadcast %72 : f32 to vector<14x14xf32>
    %675 = arith.mulf %674, %529 : vector<14x14xf32>
    %676 = arith.addf %673, %675 : vector<14x14xf32>
    %677 = vector.broadcast %73 : f32 to vector<14x14xf32>
    %678 = arith.mulf %677, %530 : vector<14x14xf32>
    %679 = arith.addf %676, %678 : vector<14x14xf32>
    %680 = vector.broadcast %74 : f32 to vector<14x14xf32>
    %681 = arith.mulf %680, %531 : vector<14x14xf32>
    %682 = arith.addf %679, %681 : vector<14x14xf32>
    %683 = vector.broadcast %75 : f32 to vector<14x14xf32>
    %684 = arith.mulf %683, %532 : vector<14x14xf32>
    %685 = arith.addf %682, %684 : vector<14x14xf32>
    %686 = vector.broadcast %76 : f32 to vector<14x14xf32>
    %687 = arith.mulf %686, %533 : vector<14x14xf32>
    %688 = arith.addf %685, %687 : vector<14x14xf32>
    %689 = vector.broadcast %77 : f32 to vector<14x14xf32>
    %690 = arith.mulf %689, %534 : vector<14x14xf32>
    %691 = arith.addf %688, %690 : vector<14x14xf32>
    %692 = vector.broadcast %78 : f32 to vector<14x14xf32>
    %693 = arith.mulf %692, %535 : vector<14x14xf32>
    %694 = arith.addf %691, %693 : vector<14x14xf32>
    %695 = vector.broadcast %79 : f32 to vector<14x14xf32>
    %696 = arith.mulf %695, %536 : vector<14x14xf32>
    %697 = arith.addf %694, %696 : vector<14x14xf32>
    %698 = vector.broadcast %80 : f32 to vector<14x14xf32>
    %699 = arith.mulf %698, %537 : vector<14x14xf32>
    %700 = arith.addf %697, %699 : vector<14x14xf32>
    %701 = vector.broadcast %81 : f32 to vector<14x14xf32>
    %702 = arith.mulf %701, %538 : vector<14x14xf32>
    %703 = arith.addf %700, %702 : vector<14x14xf32>
    %704 = vector.broadcast %82 : f32 to vector<14x14xf32>
    %705 = arith.mulf %704, %539 : vector<14x14xf32>
    %706 = arith.addf %703, %705 : vector<14x14xf32>
    %707 = vector.broadcast %83 : f32 to vector<14x14xf32>
    %708 = arith.mulf %707, %540 : vector<14x14xf32>
    %709 = arith.addf %706, %708 : vector<14x14xf32>
    %710 = vector.broadcast %84 : f32 to vector<14x14xf32>
    %711 = arith.mulf %710, %541 : vector<14x14xf32>
    %712 = arith.addf %709, %711 : vector<14x14xf32>
    %713 = vector.broadcast %85 : f32 to vector<14x14xf32>
    %714 = arith.mulf %713, %542 : vector<14x14xf32>
    %715 = arith.addf %712, %714 : vector<14x14xf32>
    %716 = vector.broadcast %86 : f32 to vector<14x14xf32>
    %717 = arith.mulf %716, %543 : vector<14x14xf32>
    %718 = arith.addf %715, %717 : vector<14x14xf32>
    %719 = vector.broadcast %87 : f32 to vector<14x14xf32>
    %720 = arith.mulf %719, %544 : vector<14x14xf32>
    %721 = arith.addf %718, %720 : vector<14x14xf32>
    %722 = vector.broadcast %88 : f32 to vector<14x14xf32>
    %723 = arith.mulf %722, %545 : vector<14x14xf32>
    %724 = arith.addf %721, %723 : vector<14x14xf32>
    %725 = vector.broadcast %109 : f32 to vector<14x14xf32>
    %726 = arith.addf %724, %725 : vector<14x14xf32>
    %cst_41 = arith.constant 0.000000e+00 : f32
    %727 = vector.broadcast %cst_41 : f32 to vector<14x14xf32>
    %728 = arith.maximumf %726, %727 : vector<14x14xf32>
    %729 = vector.extract_strided_slice %728 {offsets = [0, 0], sizes = [14, 13], strides = [1, 1]} : vector<14x14xf32> to vector<14x13xf32>
    %730 = vector.extract_strided_slice %728 {offsets = [0, 1], sizes = [14, 13], strides = [1, 1]} : vector<14x14xf32> to vector<14x13xf32>
    %731 = arith.maximumf %729, %730 : vector<14x13xf32>
    %732 = vector.extract_strided_slice %731 {offsets = [0, 0], sizes = [13, 13], strides = [1, 1]} : vector<14x13xf32> to vector<13x13xf32>
    %733 = vector.extract_strided_slice %731 {offsets = [1, 0], sizes = [13, 13], strides = [1, 1]} : vector<14x13xf32> to vector<13x13xf32>
    %734 = arith.maximumf %732, %733 : vector<13x13xf32>
    %735 = vector.broadcast %89 : f32 to vector<14x14xf32>
    %736 = arith.mulf %735, %528 : vector<14x14xf32>
    %737 = vector.broadcast %90 : f32 to vector<14x14xf32>
    %738 = arith.mulf %737, %529 : vector<14x14xf32>
    %739 = arith.addf %736, %738 : vector<14x14xf32>
    %740 = vector.broadcast %91 : f32 to vector<14x14xf32>
    %741 = arith.mulf %740, %530 : vector<14x14xf32>
    %742 = arith.addf %739, %741 : vector<14x14xf32>
    %743 = vector.broadcast %92 : f32 to vector<14x14xf32>
    %744 = arith.mulf %743, %531 : vector<14x14xf32>
    %745 = arith.addf %742, %744 : vector<14x14xf32>
    %746 = vector.broadcast %93 : f32 to vector<14x14xf32>
    %747 = arith.mulf %746, %532 : vector<14x14xf32>
    %748 = arith.addf %745, %747 : vector<14x14xf32>
    %749 = vector.broadcast %94 : f32 to vector<14x14xf32>
    %750 = arith.mulf %749, %533 : vector<14x14xf32>
    %751 = arith.addf %748, %750 : vector<14x14xf32>
    %752 = vector.broadcast %95 : f32 to vector<14x14xf32>
    %753 = arith.mulf %752, %534 : vector<14x14xf32>
    %754 = arith.addf %751, %753 : vector<14x14xf32>
    %755 = vector.broadcast %96 : f32 to vector<14x14xf32>
    %756 = arith.mulf %755, %535 : vector<14x14xf32>
    %757 = arith.addf %754, %756 : vector<14x14xf32>
    %758 = vector.broadcast %97 : f32 to vector<14x14xf32>
    %759 = arith.mulf %758, %536 : vector<14x14xf32>
    %760 = arith.addf %757, %759 : vector<14x14xf32>
    %761 = vector.broadcast %98 : f32 to vector<14x14xf32>
    %762 = arith.mulf %761, %537 : vector<14x14xf32>
    %763 = arith.addf %760, %762 : vector<14x14xf32>
    %764 = vector.broadcast %99 : f32 to vector<14x14xf32>
    %765 = arith.mulf %764, %538 : vector<14x14xf32>
    %766 = arith.addf %763, %765 : vector<14x14xf32>
    %767 = vector.broadcast %100 : f32 to vector<14x14xf32>
    %768 = arith.mulf %767, %539 : vector<14x14xf32>
    %769 = arith.addf %766, %768 : vector<14x14xf32>
    %770 = vector.broadcast %101 : f32 to vector<14x14xf32>
    %771 = arith.mulf %770, %540 : vector<14x14xf32>
    %772 = arith.addf %769, %771 : vector<14x14xf32>
    %773 = vector.broadcast %102 : f32 to vector<14x14xf32>
    %774 = arith.mulf %773, %541 : vector<14x14xf32>
    %775 = arith.addf %772, %774 : vector<14x14xf32>
    %776 = vector.broadcast %103 : f32 to vector<14x14xf32>
    %777 = arith.mulf %776, %542 : vector<14x14xf32>
    %778 = arith.addf %775, %777 : vector<14x14xf32>
    %779 = vector.broadcast %104 : f32 to vector<14x14xf32>
    %780 = arith.mulf %779, %543 : vector<14x14xf32>
    %781 = arith.addf %778, %780 : vector<14x14xf32>
    %782 = vector.broadcast %105 : f32 to vector<14x14xf32>
    %783 = arith.mulf %782, %544 : vector<14x14xf32>
    %784 = arith.addf %781, %783 : vector<14x14xf32>
    %785 = vector.broadcast %106 : f32 to vector<14x14xf32>
    %786 = arith.mulf %785, %545 : vector<14x14xf32>
    %787 = arith.addf %784, %786 : vector<14x14xf32>
    %788 = vector.broadcast %110 : f32 to vector<14x14xf32>
    %789 = arith.addf %787, %788 : vector<14x14xf32>
    %cst_42 = arith.constant 0.000000e+00 : f32
    %790 = vector.broadcast %cst_42 : f32 to vector<14x14xf32>
    %791 = arith.maximumf %789, %790 : vector<14x14xf32>
    %792 = vector.extract_strided_slice %791 {offsets = [0, 0], sizes = [14, 13], strides = [1, 1]} : vector<14x14xf32> to vector<14x13xf32>
    %793 = vector.extract_strided_slice %791 {offsets = [0, 1], sizes = [14, 13], strides = [1, 1]} : vector<14x14xf32> to vector<14x13xf32>
    %794 = arith.maximumf %792, %793 : vector<14x13xf32>
    %795 = vector.extract_strided_slice %794 {offsets = [0, 0], sizes = [13, 13], strides = [1, 1]} : vector<14x13xf32> to vector<13x13xf32>
    %796 = vector.extract_strided_slice %794 {offsets = [1, 0], sizes = [13, 13], strides = [1, 1]} : vector<14x13xf32> to vector<13x13xf32>
    %797 = arith.maximumf %795, %796 : vector<13x13xf32>
    %798 = tpu.concatenate %608, %671, %734, %797 in 1 : vector<13x13xf32>, vector<13x13xf32>, vector<13x13xf32>, vector<13x13xf32> -> vector<13x52xf32>
    %799 = tpu.concatenate %454, %798 in 0 : vector<13x52xf32>, vector<13x52xf32> -> vector<26x52xf32>
    %c0_43 = arith.constant 0 : index
    %c0_44 = arith.constant 0 : index
    %800 = vector.load %arg6[%c0_43, %c0_44] : memref<52x256xf32, #tpu.memory_space<vmem>>, vector<52x256xf32>
    %cst_45 = arith.constant dense<0.000000e+00> : vector<26x256xf32>
    %801 = tpu.matmul %799, %800, %cst_45 {dimension_numbers = #tpu.dot_dimension_numbers<[1], [0], [0], [1], [0, 0, 1, 1], [], []>} : vector<26x52xf32>, vector<52x256xf32>, vector<26x256xf32> -> vector<26x256xf32>
    %c0_46 = arith.constant 0 : index
    %c0_47 = arith.constant 0 : index
    %802 = vector.load %arg8[%c0_46, %c0_47] : memref<2x26xf32, #tpu.memory_space<vmem>>, vector<2x26xf32>
    %c0_48 = arith.constant 0 : index
    %c0_49 = arith.constant 0 : index
    %803 = vector.load %arg7[%c0_48, %c0_49] : memref<26x256xf32, #tpu.memory_space<vmem>>, vector<26x256xf32>
    %804 = arith.mulf %801, %803 : vector<26x256xf32>
    %cst_50 = arith.constant dense<0.000000e+00> : vector<2x256xf32>
    %805 = tpu.matmul %802, %804, %cst_50 {dimension_numbers = #tpu.dot_dimension_numbers<[1], [0], [0], [1], [0, 0, 1, 1], [], []>} : vector<2x26xf32>, vector<26x256xf32>, vector<2x256xf32> -> vector<2x256xf32>
    %c0_51 = arith.constant 0 : index
    %c0_52 = arith.constant 0 : index
    %806 = vector.load %arg9[%c0_51, %c0_52] : memref<256x300xf32, #tpu.memory_space<vmem>>, vector<256x300xf32>
    %cst_53 = arith.constant dense<0.000000e+00> : vector<2x300xf32>
    %807 = tpu.matmul %805, %806, %cst_53 {dimension_numbers = #tpu.dot_dimension_numbers<[1], [0], [0], [1], [0, 0, 1, 1], [], []>} : vector<2x256xf32>, vector<256x300xf32>, vector<2x300xf32> -> vector<2x300xf32>
    %c0_54 = arith.constant 0 : index
    %c0_55 = arith.constant 0 : index
    %808 = vector.load %arg10[%c0_54, %c0_55] : memref<1x300xf32, #tpu.memory_space<vmem>>, vector<1x300xf32>
    %809 = vector.broadcast %808 : vector<1x300xf32> to vector<2x300xf32>
    %810 = arith.addf %807, %809 : vector<2x300xf32>
    %cst_56 = arith.constant 0.000000e+00 : f32
    %811 = vector.broadcast %cst_56 : f32 to vector<2x300xf32>
    %812 = arith.maximumf %810, %811 : vector<2x300xf32>
    %c0_57 = arith.constant 0 : index
    %c0_58 = arith.constant 0 : index
    %813 = vector.load %arg11[%c0_57, %c0_58] : memref<300x256xf32, #tpu.memory_space<vmem>>, vector<300x256xf32>
    %cst_59 = arith.constant dense<0.000000e+00> : vector<2x256xf32>
    %814 = tpu.matmul %812, %813, %cst_59 {dimension_numbers = #tpu.dot_dimension_numbers<[1], [0], [0], [1], [0, 0, 1, 1], [], []>} : vector<2x300xf32>, vector<300x256xf32>, vector<2x256xf32> -> vector<2x256xf32>
    %c0_60 = arith.constant 0 : index
    %c0_61 = arith.constant 0 : index
    %815 = vector.load %arg12[%c0_60, %c0_61] : memref<1x256xf32, #tpu.memory_space<vmem>>, vector<1x256xf32>
    %816 = vector.broadcast %815 : vector<1x256xf32> to vector<2x256xf32>
    %817 = arith.addf %814, %816 : vector<2x256xf32>
    %c0_62 = arith.constant 0 : index
    %c0_63 = arith.constant 0 : index
    %818 = vector.load %arg21[%c0_62, %c0_63] : memref<2x256xf32, #tpu.memory_space<vmem>>, vector<2x256xf32>
    tpu.vector_store %arg21[%c0_62, %c0_63], %817 {strides = array<i32>} : memref<2x256xf32, #tpu.memory_space<vmem>>, vector<2x256xf32>,
    %819 = vector.extract_strided_slice %817 {offsets = [0, 0], sizes = [2, 5], strides = [1, 1]} : vector<2x256xf32> to vector<2x5xf32>
    %820 = vector.extract_strided_slice %817 {offsets = [0, 128], sizes = [2, 5], strides = [1, 1]} : vector<2x256xf32> to vector<2x5xf32>
    %c0_64 = arith.constant 0 : index
    %c0_65 = arith.constant 0 : index
    %821 = vector.load %arg19[%c0_64, %c0_65] : memref<2x5xf32, #tpu.memory_space<vmem>>, vector<2x5xf32>
    %cst_66 = arith.constant 5.000000e-01 : f32
    %822 = vector.broadcast %cst_66 : f32 to vector<2x5xf32>
    %823 = arith.mulf %822, %820 : vector<2x5xf32>
    %824 = math.exp %823 : vector<2x5xf32>
    %825 = arith.mulf %821, %824 : vector<2x5xf32>
    %826 = arith.addf %819, %825 : vector<2x5xf32>
    %c0_67 = arith.constant 0 : index
    %c0_68 = arith.constant 0 : index
    %827 = vector.load %arg13[%c0_67, %c0_68] : memref<5x300xf32, #tpu.memory_space<vmem>>, vector<5x300xf32>
    %cst_69 = arith.constant dense<0.000000e+00> : vector<2x300xf32>
    %828 = tpu.matmul %826, %827, %cst_69 {dimension_numbers = #tpu.dot_dimension_numbers<[1], [0], [0], [1], [0, 0, 1, 1], [], []>} : vector<2x5xf32>, vector<5x300xf32>, vector<2x300xf32> -> vector<2x300xf32>
    %c0_70 = arith.constant 0 : index
    %c0_71 = arith.constant 0 : index
    %829 = vector.load %arg14[%c0_70, %c0_71] : memref<1x300xf32, #tpu.memory_space<vmem>>, vector<1x300xf32>
    %830 = vector.broadcast %829 : vector<1x300xf32> to vector<2x300xf32>
    %831 = arith.addf %828, %830 : vector<2x300xf32>
    %cst_72 = arith.constant 0.000000e+00 : f32
    %832 = vector.broadcast %cst_72 : f32 to vector<2x300xf32>
    %833 = arith.maximumf %831, %832 : vector<2x300xf32>
    %c0_73 = arith.constant 0 : index
    %c0_74 = arith.constant 0 : index
    %834 = vector.load %arg15[%c0_73, %c0_74] : memref<300x600xf32, #tpu.memory_space<vmem>>, vector<300x600xf32>
    %cst_75 = arith.constant dense<0.000000e+00> : vector<2x600xf32>
    %835 = tpu.matmul %833, %834, %cst_75 {dimension_numbers = #tpu.dot_dimension_numbers<[1], [0], [0], [1], [0, 0, 1, 1], [], []>} : vector<2x300xf32>, vector<300x600xf32>, vector<2x600xf32> -> vector<2x600xf32>
    %c0_76 = arith.constant 0 : index
    %c0_77 = arith.constant 0 : index
    %836 = vector.load %arg16[%c0_76, %c0_77] : memref<1x600xf32, #tpu.memory_space<vmem>>, vector<1x600xf32>
    %837 = vector.broadcast %836 : vector<1x600xf32> to vector<2x600xf32>
    %838 = arith.addf %835, %837 : vector<2x600xf32>
    %cst_78 = arith.constant 0.000000e+00 : f32
    %839 = vector.broadcast %cst_78 : f32 to vector<2x600xf32>
    %840 = arith.maximumf %838, %839 : vector<2x600xf32>
    %c0_79 = arith.constant 0 : index
    %c0_80 = arith.constant 0 : index
    %841 = vector.load %arg17[%c0_79, %c0_80] : memref<600x256xf32, #tpu.memory_space<vmem>>, vector<600x256xf32>
    %cst_81 = arith.constant dense<0.000000e+00> : vector<2x256xf32>
    %842 = tpu.matmul %840, %841, %cst_81 {dimension_numbers = #tpu.dot_dimension_numbers<[1], [0], [0], [1], [0, 0, 1, 1], [], []>} : vector<2x600xf32>, vector<600x256xf32>, vector<2x256xf32> -> vector<2x256xf32>
    %c0_82 = arith.constant 0 : index
    %c0_83 = arith.constant 0 : index
    %843 = vector.load %arg18[%c0_82, %c0_83] : memref<1x256xf32, #tpu.memory_space<vmem>>, vector<1x256xf32>
    %844 = vector.broadcast %843 : vector<1x256xf32> to vector<2x256xf32>
    %845 = arith.addf %842, %844 : vector<2x256xf32>
    %cst_84 = arith.constant 0.000000e+00 : f32
    %846 = vector.broadcast %cst_84 : f32 to vector<2x256xf32>
    %847 = arith.subf %846, %845 : vector<2x256xf32>
    %848 = math.exp %847 : vector<2x256xf32>
    %cst_85 = arith.constant 1.000000e+00 : f32
    %849 = vector.broadcast %cst_85 : f32 to vector<2x256xf32>
    %850 = arith.addf %849, %848 : vector<2x256xf32>
    %cst_86 = arith.constant 1.000000e+00 : f32
    %851 = vector.broadcast %cst_86 : f32 to vector<2x256xf32>
    %852 = arith.divf %851, %850 : vector<2x256xf32>
    %c0_87 = arith.constant 0 : index
    %c0_88 = arith.constant 0 : index
    %853 = vector.load %arg20[%c0_87, %c0_88] : memref<2x256xf32, #tpu.memory_space<vmem>>, vector<2x256xf32>
    tpu.vector_store %arg20[%c0_87, %c0_88], %852 {strides = array<i32>} : memref<2x256xf32, #tpu.memory_space<vmem>>, vector<2x256xf32>,
    return
  }
  func.func @transform_0(%arg0: i32) -> (i32, i32, i32) {
    %c0_i32 = arith.constant 0 : i32
    %c0_i32_0 = arith.constant 0 : i32
    %c0_i32_1 = arith.constant 0 : i32
    return %arg0, %c0_i32, %c0_i32_0 : i32, i32, i32
  }
  func.func @transform_1(%arg0: i32) -> i32 {
    %c0_i32 = arith.constant 0 : i32
    %c0_i32_0 = arith.constant 0 : i32
    return %c0_i32 : i32
  }
  func.func @transform_2(%arg0: i32) -> i32 {
    %c0_i32 = arith.constant 0 : i32
    %c0_i32_0 = arith.constant 0 : i32
    return %c0_i32 : i32
  }
  func.func @transform_3(%arg0: i32) -> i32 {
    %c0_i32 = arith.constant 0 : i32
    %c0_i32_0 = arith.constant 0 : i32
    return %c0_i32 : i32
  }
  func.func @transform_4(%arg0: i32) -> i32 {
    %c0_i32 = arith.constant 0 : i32
    %c0_i32_0 = arith.constant 0 : i32
    return %c0_i32 : i32
  }
  func.func @transform_5(%arg0: i32) -> (i32, i32) {
    %c0_i32 = arith.constant 0 : i32
    %c0_i32_0 = arith.constant 0 : i32
    %c0_i32_1 = arith.constant 0 : i32
    return %c0_i32, %c0_i32_0 : i32, i32
  }
  func.func @transform_6(%arg0: i32) -> (i32, i32) {
    %c0_i32 = arith.constant 0 : i32
    %c0_i32_0 = arith.constant 0 : i32
    %c0_i32_1 = arith.constant 0 : i32
    return %c0_i32, %c0_i32_0 : i32, i32
  }
  func.func @transform_7(%arg0: i32) -> (i32, i32) {
    %c0_i32 = arith.constant 0 : i32
    %c0_i32_0 = arith.constant 0 : i32
    %c0_i32_1 = arith.constant 0 : i32
    return %c0_i32, %c0_i32_0 : i32, i32
  }
  func.func @transform_8(%arg0: i32) -> (i32, i32) {
    %c0_i32 = arith.constant 0 : i32
    %c0_i32_0 = arith.constant 0 : i32
    %c0_i32_1 = arith.constant 0 : i32
    return %c0_i32, %c0_i32_0 : i32, i32
  }
  func.func @transform_9(%arg0: i32) -> (i32, i32) {
    %c0_i32 = arith.constant 0 : i32
    %c0_i32_0 = arith.constant 0 : i32
    %c0_i32_1 = arith.constant 0 : i32
    return %c0_i32, %c0_i32_0 : i32, i32
  }
  func.func @transform_10(%arg0: i32) -> (i32, i32) {
    %c0_i32 = arith.constant 0 : i32
    %c0_i32_0 = arith.constant 0 : i32
    %c0_i32_1 = arith.constant 0 : i32
    return %c0_i32, %c0_i32_0 : i32, i32
  }
  func.func @transform_11(%arg0: i32) -> (i32, i32) {
    %c0_i32 = arith.constant 0 : i32
    %c0_i32_0 = arith.constant 0 : i32
    %c0_i32_1 = arith.constant 0 : i32
    return %c0_i32, %c0_i32_0 : i32, i32
  }
  func.func @transform_12(%arg0: i32) -> (i32, i32) {
    %c0_i32 = arith.constant 0 : i32
    %c0_i32_0 = arith.constant 0 : i32
    %c0_i32_1 = arith.constant 0 : i32
    return %c0_i32, %c0_i32_0 : i32, i32
  }
  func.func @transform_13(%arg0: i32) -> (i32, i32) {
    %c0_i32 = arith.constant 0 : i32
    %c0_i32_0 = arith.constant 0 : i32
    %c0_i32_1 = arith.constant 0 : i32
    return %c0_i32, %c0_i32_0 : i32, i32
  }
  func.func @transform_14(%arg0: i32) -> (i32, i32) {
    %c0_i32 = arith.constant 0 : i32
    %c0_i32_0 = arith.constant 0 : i32
    %c0_i32_1 = arith.constant 0 : i32
    return %c0_i32, %c0_i32_0 : i32, i32
  }
  func.func @transform_15(%arg0: i32) -> (i32, i32) {
    %c0_i32 = arith.constant 0 : i32
    %c0_i32_0 = arith.constant 0 : i32
    %c0_i32_1 = arith.constant 0 : i32
    return %c0_i32, %c0_i32_0 : i32, i32
  }
  func.func @transform_16(%arg0: i32) -> (i32, i32) {
    %c0_i32 = arith.constant 0 : i32
    %c0_i32_0 = arith.constant 0 : i32
    %c0_i32_1 = arith.constant 0 : i32
    return %c0_i32, %c0_i32_0 : i32, i32
  }
  func.func @transform_17(%arg0: i32) -> (i32, i32) {
    %c0_i32 = arith.constant 0 : i32
    %c0_i32_0 = arith.constant 0 : i32
    %c0_i32_1 = arith.constant 0 : i32
    return %c0_i32, %c0_i32_0 : i32, i32
  }
  func.func @transform_18(%arg0: i32) -> (i32, i32) {
    %c0_i32 = arith.constant 0 : i32
    %c0_i32_0 = arith.constant 0 : i32
    return %arg0, %c0_i32 : i32, i32
  }
  func.func @transform_19(%arg0: i32) -> (i32, i32) {
    %c0_i32 = arith.constant 0 : i32
    %c0_i32_0 = arith.constant 0 : i32
    return %arg0, %c0_i32 : i32, i32
  }
  func.func @transform_20(%arg0: i32) -> (i32, i32) {
    %c0_i32 = arith.constant 0 : i32
    %c0_i32_0 = arith.constant 0 : i32
    return %arg0, %c0_i32 : i32, i32
  }
}

</mosaic_0001>

<bundles_post_ra>
// kernel: tpu_custom_call.1
= control target key start
LH: loop header
LB: loop body
LE: loop exit
PB: predicated region body
PF: predicated region fallthrough
CT: control target
= control target key end

     0   :  { %s8601_s0 = inlined_call_operand.vmem [shape: f32[2,18,18], index: 0, kind: input, shape index: {}]   ;;  %s8602_s1 = inlined_call_operand.vmem [shape: f32[18], index: 1, kind: input, shape index: {}]   ;;  %s8603_s2 = inlined_call_operand.vmem [shape: f32[2], index: 2, kind: input, shape index: {}]   ;;  %s8604_s3 = inlined_call_operand.vmem [shape: f32[72], index: 3, kind: input, shape index: {}]   ;;  %s8605_s4 = inlined_call_operand.vmem [shape: f32[4], index: 4, kind: input, shape index: {}]   ;;  %s8606_s5 = inlined_call_operand.vmem [shape: f32[52,256], index: 5, kind: input, shape index: {}]   ;;  %s8607_s6 = inlined_call_operand.vmem [shape: f32[26,256], index: 6, kind: input, shape index: {}]   ;;  %s8608_s7 = inlined_call_operand.vmem [shape: f32[2,26], index: 7, kind: input, shape index: {}]   ;;  %s8609_s8 = inlined_call_operand.vmem [shape: f32[256,300], index: 8, kind: input, shape index: {}]   ;;  %s8610_s9 = inlined_call_operand.vmem [shape: f32[1,300], index: 9, kind: input, shape index: {}]   ;;  %s8611_s10 = inlined_call_operand.hbm [shape: f32[300,256], index: 10, kind: input, shape index: {}]   ;;  %s8612_s11 = inlined_call_operand.vmem [shape: f32[1,256], index: 11, kind: input, shape index: {}]   ;;  %s8613_s12 = inlined_call_operand.vmem [shape: f32[5,300], index: 12, kind: input, shape index: {}]   ;;  %s8614_s13 = inlined_call_operand.vmem [shape: f32[1,300], index: 13, kind: input, shape index: {}]   ;;  %s8615_s14 = inlined_call_operand.hbm [shape: f32[300,600], index: 14, kind: input, shape index: {}]   ;;  %s8616_s15 = inlined_call_operand.vmem [shape: f32[1,600], index: 15, kind: input, shape index: {}]   ;;  %s8617_s16 = inlined_call_operand.vmem [shape: f32[600,256], index: 16, kind: input, shape index: {}]   ;;  %s8618_s17 = inlined_call_operand.vmem [shape: f32[1,256], index: 17, kind: input, shape index: {}]   ;;  %s8619_s18 = inlined_call_operand.vmem [shape: f32[2,5], index: 18, kind: input, shape index: {}]   ;;  %s8620_s19 = inlined_call_operand.hbm [shape: f32[2,256], index: 19, kind: output, shape index: {0}]   ;;  %s8621_s20 = inlined_call_operand.hbm [shape: f32[2,256], index: 20, kind: output, shape index: {1}]  }
   0x1   :  { %8673 = sst [smem:[#allocation167_spill]] %s8601_s0 }
   0x2   :  { %8674 = sst [smem:[#allocation168_spill]] %s8602_s1 }
   0x3   :  { %8675 = sst [smem:[#allocation169_spill]] %s8603_s2 }
   0x4   :  { %8676 = sst [smem:[#allocation170_spill]] %s8604_s3 }
   0x5   :  { %8677 = sst [smem:[#allocation171_spill]] %s8605_s4 }
   0x6   :  { %26 = vsyncpa [#allocation5], 0 }
   0x7   :  { %27 = vsyncpa [#allocation7], 0 }
   0x8   :  { %28 = vsyncpa [#allocation10], 0 }
   0x9   :  { %29 = vsyncpa [#allocation3], 0 }
   0xa   :  { %30 = vsyncpa [#allocation13], 0 }
   0xb   :  { %31 = vsyncpa [#allocation4], 0  ;;  %s8678_s23 = sld [smem:[#allocation169_spill]] }
  0x11   :  { %s51_s24 = sshll.u32 %s8678_s23, 4  ;;  %s52_s24 = int_to_ptr.vmem [resolvable:$true] %s51_s24 }
  0x12   :  { %32 = vsyncpa [#allocation16], 0  ;;  %s8679_s3 = sld [smem:[#allocation168_spill]]  ;;  %s5185_s27 = scalar_lea.vmem %s52_s24, 16 }
  0x13   :  { %p5186_p0 = scmp.ne.s32.totalorder %s52_s24, %s5185_s27  ;;  %p5190_p1 = scmp.lt.s32.totalorder %s52_s24, %s52_s24 }
  0x14   :  { %p5191_p2 = scmp.lt.s32.totalorder %s5185_s27, %s5185_s27 }
  0x16   :  { %p5192_p3 = por %p5191_p2, %p5190_p1 }
  0x18   :  { %s41_s26 = sshll.u32 %s8679_s3, 4  ;;  %p5193_p4 = pnand %p5192_p3, %p5186_p0  ;;  %s42_s26 = int_to_ptr.vmem [resolvable:$true] %s41_s26 }
  0x1a   :  { %5196 = shalt.err (!%p5193_p4)
}
  0x1b   :  { %s5327_s28 = smov [#allocation6]   ;;  %s5197_s4 = scalar_lea.vmem %s42_s26, 16 }
  0x1c   :  { %54 = dma.vmem_to_smem %s52_s24, 16, %s5327_s28, [#allocation7]  }
  0x1d   :  { %p5198_p5 = scmp.ne.s32.totalorder %s42_s26, %s5197_s4  ;;  %p5202_p6 = scmp.lt.s32.totalorder %s42_s26, %s42_s26 }
  0x1e   :  { %p5203_p7 = scmp.lt.s32.totalorder %s5197_s4, %s5197_s4 }
  0x20   :  { %p5204_p8 = por %p5203_p7, %p5202_p6 }
  0x22   :  { %p5205_p9 = pnand %p5204_p8, %p5198_p5 }
  0x24   :  { %5208 = shalt.err (!%p5205_p9)
}
  0x25   :  { %s5328_s29 = smov [#allocation2]   ;;  %s8680_s21 = sld [smem:[#allocation170_spill]] }
  0x26   :  { %44 = dma.vmem_to_smem %s42_s26, 16, %s5328_s29, [#allocation5]  }
  0x27   :  { %s8681_s2 = sld [smem:[#allocation171_spill]] }
  0x2b   :  { %s61_s1 = sshll.u32 %s8680_s21, 4  ;;  %s62_s1 = int_to_ptr.vmem [resolvable:$true] %s61_s1 }
  0x2c   :  { %s5209_s24 = scalar_lea.vmem %s62_s1, 16  ;;  %p5214_p11 = scmp.lt.s32.totalorder %s62_s1, %s62_s1 }
  0x2d   :  { %s71_s25 = sshll.u32 %s8681_s2, 4  ;;  %p5210_p10 = scmp.ne.s32.totalorder %s62_s1, %s5209_s24  ;;  %s72_s25 = int_to_ptr.vmem [resolvable:$true] %s71_s25 }
  0x2e   :  { %p5215_p12 = scmp.lt.s32.totalorder %s5209_s24, %s5209_s24 }
  0x30   :  { %p5216_p13 = por %p5215_p12, %p5214_p11 }
  0x32   :  { %p5217_p0 = pnand %p5216_p13, %p5210_p10 }
  0x34   :  { %5220 = shalt.err (!%p5217_p0)
}
  0x35   :  { %s5329_s3 = smov [#allocation8]   ;;  %s5221_s26 = scalar_lea.vmem %s72_s25, 16 }
  0x36   :  { %64 = dma.vmem_to_smem %s62_s1, 16, %s5329_s3, [#allocation7]  }
  0x37   :  { %p5222_p1 = scmp.ne.s32.totalorder %s72_s25, %s5221_s26  ;;  %p5226_p2 = scmp.lt.s32.totalorder %s72_s25, %s72_s25 }
  0x38   :  { %p5227_p3 = scmp.lt.s32.totalorder %s5221_s26, %s5221_s26 }
  0x3a   :  { %p5228_p4 = por %p5227_p3, %p5226_p2 }
  0x3c   :  { %p5229_p5 = pnand %p5228_p4, %p5222_p1 }
  0x3e   :  { %5232 = shalt.err (!%p5229_p5)
}
  0x3f   :  { %s5330_s27 = smov [#allocation9]   ;;  %s5331_s28 = smov [#allocation11]  }
  0x40   :  { %74 = dma.vmem_to_smem %s72_s25, 16, %s5330_s27, [#allocation10]  }
  0x41   :  { %s90_s4 = sshll.u32 %s5331_s28, 4  ;;  %s91_s4 = int_to_ptr.vmem [resolvable:$true] %s90_s4 }
  0x42   :  { %s5241_s29 = scalar_lea.vmem %s91_s4, 9728  ;;  %p5246_p7 = scmp.lt.s32.totalorder %s91_s4, %s91_s4 }
  0x43   :  { %p5242_p6 = scmp.ne.s32.totalorder %s91_s4, %s5241_s29  ;;  %p5247_p8 = scmp.lt.s32.totalorder %s5241_s29, %s5241_s29 }
  0x45   :  { %p5248_p9 = por %p5247_p8, %p5246_p7 }
  0x47   :  { %p5249_p10 = pnand %p5248_p9, %p5242_p6 }
  0x49   :  { %5252 = shalt.err (!%p5249_p10)
}
  0x4a   :  { %s5332_s30 = smov 256   ;;  %s5333_s0 = smov 16  }
  0x4b   :  { %96 = dma.hbm_to_vmem [thread:$0]  %s8611_s10, 9728, %s91_s4, [#allocation3], %s5332_s30, %s5332_s30, %s5333_s0  }
  0x4c   :  { %s5334_s22 = smov [#allocation12]  }
  0x4d   :  { %s108_s23 = sshll.u32 %s5334_s22, 4  ;;  %s109_s23 = int_to_ptr.vmem [resolvable:$true] %s108_s23 }
  0x4e   :  { %s5261_s2 = scalar_lea.vmem %s109_s23, 24320  ;;  %p5266_p12 = scmp.lt.s32.totalorder %s109_s23, %s109_s23 }
  0x4f   :  { %p5262_p11 = scmp.ne.s32.totalorder %s109_s23, %s5261_s2  ;;  %p5267_p13 = scmp.lt.s32.totalorder %s5261_s2, %s5261_s2 }
  0x51   :  { %p5268_p0 = por %p5267_p13, %p5266_p12 }
  0x53   :  { %p5269_p1 = pnand %p5268_p0, %p5262_p11 }
  0x55   :  { %5272 = shalt.err (!%p5269_p1)
}
  0x56   :  { %s5335_s25 = smov 640   ;;  %s5336_s24 = smov 40  }
  0x57   :  { %114 = dma.hbm_to_vmem [thread:$0]  %s8615_s14, 24320, %s109_s23, [#allocation13], %s5335_s25, %s5335_s25, %s5336_s24  }
  0x58   :  { %5313 = dma.done.wait [#allocation5], 16  }
  0x59   :  { %5314 = vsyncadd [#allocation5], 4294967280 }
  0x5a   :  { %5315 = dma.done.wait [#allocation7], 32  }
  0x5b   :  { %5316 = vsyncadd [#allocation7], 4294967264 }
  0x5c   :  { %5317 = dma.done.wait [#allocation10], 16  }
  0x5d   :  { %5318 = vsyncadd [#allocation10], 4294967280 }
  0x5e   :  { %5319 = dma.done.wait [#allocation3], 9728  }
  0x5f   :  { %5320 = vsyncadd [#allocation3], 4294957568 }
  0x60   :  { %5321 = dma.done.wait [#allocation13], 24320  }
  0x61   :  { %5322 = vsyncadd [#allocation13], 4294942976 }
  0x62   :  { %141 = sfence }
  0x63   :  { %s4928_s10 = sld [smem:[#allocation2 + $0x1]]  ;;  %s5337_s2 = smov 127   ;;  %vm298_vm0 = vcmask 1046528   ;;  %vm355_vm1 = vcmask 1045504   ;;  %vm2940_vm10 = vcmask 1043456   ;;  %vm1624_vm11 = vcmask 105472  }
  0x64   :  { %s4929_s27 = sld [smem:[#allocation2 + $0x2]]  ;;  %vm1627_vm12 = vcmask 211968   ;;  %vm1630_vm13 = vcmask 318464   ;;  %vm2929_vm14 = vcmask 424960   ;;  %vm2909_vm15 = vcmask 1044480  }
  0x65   :  { %s4931_s28 = sld [smem:[#allocation2 + $0x4]] }
  0x66   :  { %s8682_s30 = sld [smem:[#allocation167_spill]] }
  0x67   :  { %s4932_s25 = sld [smem:[#allocation2 + $0x5]] }
  0x68   :  { %s4935_s4 = sld [smem:[#allocation2 + $0x8]] }
  0x69   :  { %v265_v2 = vstv %s4928_s10  ;;  %s4937_s29 = sld [smem:[#allocation2 + $0xa]] }
  0x6a   :  { %v278_v9 = vstv %s4929_s27  ;;  %s5338_s27 = smov 126   ;;  %s4938_s14 = sld [smem:[#allocation2 + $0xb]] }
  0x6b   :  { %v308_v11 = vstv %s4931_s28  ;;  %s4934_s28 = sld [smem:[#allocation2 + $0x7]] }
  0x6c   :  { %v5472_v0 = vld [vmem:[%s8682_s30 + $0x18] sm:$0xff]  ;;  %v5477_v1 = vld [vmem:[%s8682_s30] sm:$0xff]  ;;  %v5487_v4 = vld [vmem:[%s8682_s30 + $0x8] sm:$0xff]  ;;  %s4940_s0 = sld [smem:[#allocation2 + $0xd]] }
  0x6d   :  { %v5482_v3 = vld [vmem:[%s8682_s30 + $0x20] sm:$0xff]  ;;  %v1639_v5 = vmul.f32 %v5472_v0, %v265_v2  ;;  %v266_v6 = vmul.f32 %v265_v2, %v5477_v1  ;;  %v267_v8 = vmul.f32 %v265_v2, %v5487_v4  ;;  %v5498_v10 = vld [vmem:[%s8682_s30 + $0x10] sm:$0x3]  ;;  %v280_v12 = vmul.f32 %v278_v9, %v5487_v4  ;;  %v5510_v17 = vld [vmem:[%s8682_s30 + $0x28] sm:$0x3]  ;;  %s4941_s21 = sld [smem:[#allocation2 + $0xe]] }
  0x6e   :  { %v1640_v7 = vmul.f32 %v5482_v3, %v265_v2  ;;  %v279_v13 = vmul.f32 %v278_v9, %v5477_v1  ;;  %v310_v14 = vmul.f32 %v308_v11, %v5487_v4  ;;  %v311_v15 = vmul.f32 %v308_v11, %v5498_v10  ;;  %s4943_s1 = sld [smem:[#allocation2 + $0x10]] }
  0x6f   :  { %1643 = vrot.lane.b32.xlu1 %v1639_v5, %s5337_s2  ;;  %270 = vrot.lane.b32.xlu0 %v266_v6, %s5337_s2  ;;  %v309_v16 = vmul.f32 %v308_v11, %v5477_v1  ;;  %v1652_v18 = vmul.f32 %v5482_v3, %v278_v9  ;;  %v1651_v19 = vmul.f32 %v5472_v0, %v278_v9  ;;  %v328_v23 = vstv %s4932_s25  ;;  %s4944_s22 = sld [smem:[#allocation2 + $0x11]] }
  0x70   :  { %v1679_v20 = vmul.f32 %v5482_v3, %v308_v11  ;;  %v1680_v21 = vmul.f32 %v5510_v17, %v308_v11  ;;  %v1678_v22 = vmul.f32 %v5472_v0, %v308_v11  ;;  %v316_v24 = vrot.slane %v310_v14, 1  ;;  %s4930_s23 = sld [smem:[#allocation2 + $0x3]] }
  0x71   :  { %v318_v25 = vrot.slane %v311_v15, 1  ;;  %v315_v26 = vrot.slane %v309_v16, 1  ;;  %v330_v27 = vmul.f32 %v328_v23, %v5487_v4  ;;  %v331_v31 = vmul.f32 %v328_v23, %v5498_v10  ;;  %s163_s25 = sld [smem:[#allocation2]] }
  0x72   :  { %v1685_v28 = vrot.slane %v1679_v20, 1  ;;  %v1687_v29 = vrot.slane %v1680_v21, 1  ;;  %v1684_v30 = vrot.slane %v1678_v22, 1  ;;  %v329_v34 = vmul.f32 %v328_v23, %v5477_v1  ;;  %s4933_s24 = sld [smem:[#allocation2 + $0x6]] }
  0x73   :  { %1645 = vrot.lane.b32.xlu1 %v1640_v7, %s5337_s2  ;;  %272 = vrot.lane.b32.xlu0 %v267_v8, %s5337_s2  ;;  %v319_v32 = vsel %vm298_vm0, %v316_v24, %v318_v25  ;;  %v317_v33 = vsel %vm298_vm0, %v315_v26, %v316_v24  ;;  %v336_v35 = vrot.slane %v330_v27, 1  ;;  %v338_v38 = vrot.slane %v331_v31, 1  ;;  %s181_s3 = sld [smem:[#allocation6]] }
  0x74   :  { %v1688_v36 = vsel %vm298_vm0, %v1685_v28, %v1687_v29  ;;  %v1686_v37 = vsel %vm298_vm0, %v1684_v30, %v1685_v28  ;;  %v1698_v39 = vmul.f32 %v5482_v3, %v328_v23  ;;  %v335_v40 = vrot.slane %v329_v34, 1  ;;  %s4964_s26 = sld [smem:[#allocation8 + $0x13]] }
  0x75   :  { %v1699_v41 = vmul.f32 %v5510_v17, %v328_v23  ;;  %v1697_v42 = vmul.f32 %v5472_v0, %v328_v23  ;;  %v365_v43 = vstv %s4934_s28  ;;  %v339_v44 = vsel %vm298_vm0, %v336_v35, %v338_v38  ;;  %s4982_s10 = sld [smem:[#allocation8 + $0x25]] }
  0x76   :  { %v1704_v45 = vrot.slane %v1698_v39, 1  ;;  %v367_v46 = vmul.f32 %v365_v43, %v5487_v4  ;;  %v368_v47 = vmul.f32 %v365_v43, %v5498_v10  ;;  %v337_v48 = vsel %vm298_vm0, %v335_v40, %v336_v35  ;;  %s4965_s28 = sld [smem:[#allocation8 + $0x14]] }
  0x77   :  { %285 = vrot.lane.b32.xlu1 %v280_v12, %s5338_s27  ;;  %283 = vrot.lane.b32.xlu0 %v279_v13, %s5338_s27  ;;  %v1706_v49 = vrot.slane %v1699_v41, 1  ;;  %v1703_v50 = vrot.slane %v1697_v42, 1  ;;  %v366_v51 = vmul.f32 %v365_v43, %v5477_v1  ;;  %v1732_v52 = vmul.f32 %v5482_v3, %v365_v43 }
  0x78   :  { %v1733_v53 = vmul.f32 %v5510_v17, %v365_v43  ;;  %v373_v54 = vrot.slane %v367_v46, 2  ;;  %v375_v55 = vrot.slane %v368_v47, 2  ;;  %v1731_v56 = vmul.f32 %v5472_v0, %v365_v43 }
  0x79   :  { %v1707_v57 = vsel %vm298_vm0, %v1704_v45, %v1706_v49  ;;  %v1705_v58 = vsel %vm298_vm0, %v1703_v50, %v1704_v45  ;;  %v372_v59 = vrot.slane %v366_v51, 2  ;;  %v385_v60 = vstv %s4935_s4  ;;  %s5000_s4 = sld [smem:[#allocation8 + $0x37]] }
  0x7a   :  { %v1738_v61 = vrot.slane %v1732_v52, 2  ;;  %v1740_v62 = vrot.slane %v1733_v53, 2  ;;  %v376_v63 = vsel %vm355_vm1, %v373_v54, %v375_v55  ;;  %v1737_v2 = vrot.slane %v1731_v56, 2 }
  0x7b   :  { %1657 = vrot.lane.b32.xlu1 %v1652_v18, %s5338_s27  ;;  %1655 = vrot.lane.b32.xlu0 %v1651_v19, %s5338_s27  ;;  %v374_v5 = vsel %vm355_vm1, %v372_v59, %v373_v54  ;;  %v387_v6 = vmul.f32 %v385_v60, %v5487_v4  ;;  %v388_v7 = vmul.f32 %v385_v60, %v5498_v10  ;;  %v415_v26 = vstv %s4937_s29  ;;  %s4983_s29 = sld [smem:[#allocation8 + $0x26]] }
  0x7c   :  { %v386_v8 = vmul.f32 %v385_v60, %v5477_v1  ;;  %v1741_v9 = vsel %vm355_vm1, %v1738_v61, %v1740_v62  ;;  %v1739_v11 = vsel %vm355_vm1, %v1737_v2, %v1738_v61  ;;  %v1751_v12 = vmul.f32 %v5482_v3, %v385_v60 }
  0x7d   :  { %v1752_v13 = vmul.f32 %v5510_v17, %v385_v60  ;;  %v393_v14 = vrot.slane %v387_v6, 2  ;;  %v395_v15 = vrot.slane %v388_v7, 2  ;;  %v1750_v18 = vmul.f32 %v5472_v0, %v385_v60 }
  0x7e   :  { %v392_v16 = vrot.slane %v386_v8, 2  ;;  %v1757_v19 = vrot.slane %v1751_v12, 2  ;;  %v417_v27 = vmul.f32 %v415_v26, %v5487_v4  ;;  %v416_v28 = vmul.f32 %v415_v26, %v5477_v1 }
  0x7f   :  { %322 = vrot.lane.b32.xlu1 %v319_v32, %s5337_s2  ;;  %320 = vrot.lane.b32.xlu0 %v317_v33, %s5337_s2  ;;  %v396_v20 = vsel %vm355_vm1, %v393_v14, %v395_v15  ;;  %v1759_v22 = vrot.slane %v1752_v13, 2  ;;  %v1756_v23 = vrot.slane %v1750_v18, 2  ;;  %v8623_v29 = vmov 0.0  }
  0x80   :  { %v394_v21 = vsel %vm355_vm1, %v392_v16, %v393_v14  ;;  %3011 = vmatprep.mubr.f32.mxu0 %v8623_v29  ;;  %3127 = vmatprep.mubr.f32.mxu1 %v8623_v29  ;;  %v1778_v30 = vmul.f32 %v5482_v3, %v415_v26  ;;  %v1777_v31 = vmul.f32 %v5472_v0, %v415_v26  ;;  %v428_v32 = vstv %s4938_s14  ;;  %s5001_s14 = sld [smem:[#allocation8 + $0x38]] }
  0x81   :  { %v1760_v24 = vsel %vm355_vm1, %v1757_v19, %v1759_v22  ;;  %v1758_v25 = vsel %vm355_vm1, %v1756_v23, %v1757_v19  ;;  %v457_v33 = vstv %s4940_s0  ;;  %v430_v34 = vmul.f32 %v428_v32, %v5487_v4  ;;  %s4967_s0 = sld [smem:[#allocation8 + $0x16]] }
  0x82   :  { %v429_v35 = vmul.f32 %v428_v32, %v5477_v1  ;;  %v458_v38 = vmul.f32 %v457_v33, %v5477_v1  ;;  %v1817_v39 = vmul.f32 %v5482_v3, %v457_v33  ;;  %v1818_v40 = vmul.f32 %v5510_v17, %v457_v33 }
  0x83   :  { %1691 = vrot.lane.b32.xlu1 %v1688_v36, %s5337_s2  ;;  %1689 = vrot.lane.b32.xlu0 %v1686_v37, %s5337_s2  ;;  %v459_v36 = vmul.f32 %v457_v33, %v5487_v4  ;;  %v460_v37 = vmul.f32 %v457_v33, %v5498_v10  ;;  %v1790_v41 = vmul.f32 %v5482_v3, %v428_v32  ;;  %v477_v47 = vstv %s4941_s21  ;;  %s4985_s21 = sld [smem:[#allocation8 + $0x28]] }
  0x84   :  { %v1789_v42 = vmul.f32 %v5472_v0, %v428_v32  ;;  %v1816_v43 = vmul.f32 %v5472_v0, %v457_v33  ;;  %v464_v46 = vrot.slane %v458_v38, 1  ;;  %v1825_v49 = vrot.slane %v1818_v40, 1 }
  0x85   :  { %v467_v45 = vrot.slane %v460_v37, 1  ;;  %v479_v50 = vmul.f32 %v477_v47, %v5487_v4  ;;  %v480_v51 = vmul.f32 %v477_v47, %v5498_v10  ;;  %v478_v55 = vmul.f32 %v477_v47, %v5477_v1 }
  0x86   :  { %v1822_v54 = vrot.slane %v1816_v43, 1  ;;  %v1836_v59 = vmul.f32 %v5482_v3, %v477_v47  ;;  %v1837_v60 = vmul.f32 %v5510_v17, %v477_v47  ;;  %v513_v2 = vstv %s4943_s1  ;;  %s4968_s1 = sld [smem:[#allocation8 + $0x17]] }
  0x87   :  { %342 = vrot.lane.b32.xlu1 %v339_v44, %s5338_s27  ;;  %340 = vrot.lane.b32.xlu0 %v337_v48, %s5338_s27  ;;  %v465_v44 = vrot.slane %v459_v36, 1  ;;  %v1823_v48 = vrot.slane %v1817_v39, 1  ;;  %v484_v62 = vrot.slane %v478_v55, 1  ;;  %v515_v8 = vmul.f32 %v513_v2, %v5487_v4 }
  0x88   :  { %v1842_v6 = vrot.slane %v1836_v59, 1  ;;  %v1844_v7 = vrot.slane %v1837_v60, 1  ;;  %v516_v12 = vmul.f32 %v513_v2, %v5498_v10  ;;  %v514_v13 = vmul.f32 %v513_v2, %v5477_v1 }
  0x89   :  { %v468_v52 = vsel %vm298_vm0, %v465_v44, %v467_v45  ;;  %v466_v53 = vsel %vm298_vm0, %v464_v46, %v465_v44  ;;  %v1826_v56 = vsel %vm298_vm0, %v1823_v48, %v1825_v49  ;;  %v1824_v61 = vsel %vm298_vm0, %v1822_v54, %v1823_v48 }
  0x8a   :  { %v1870_v14 = vmul.f32 %v5482_v3, %v513_v2  ;;  %v1845_v15 = vsel %vm298_vm0, %v1842_v6, %v1844_v7  ;;  %v521_v16 = vrot.slane %v515_v8, 2  ;;  %v1871_v18 = vmul.f32 %v5510_v17, %v513_v2 }
  0x8b   :  { %1710 = vrot.lane.b32.xlu1 %v1707_v57, %s5338_s27  ;;  %1708 = vrot.lane.b32.xlu0 %v1705_v58, %s5338_s27  ;;  %v485_v57 = vrot.slane %v479_v50, 1  ;;  %v487_v58 = vrot.slane %v480_v51, 1  ;;  %v1869_v19 = vmul.f32 %v5472_v0, %v513_v2  ;;  %v520_v22 = vrot.slane %v514_v13, 2 }
  0x8c   :  { %v533_v23 = vstv %s4944_s22  ;;  %s5003_s22 = sld [smem:[#allocation8 + $0x3a]] }
  0x8d   :  { %v1875_v26 = vrot.slane %v1869_v19, 2  ;;  %v534_v32 = vmul.f32 %v533_v23, %v5477_v1  ;;  %v1889_v38 = vmul.f32 %v5482_v3, %v533_v23  ;;  %v1890_v39 = vmul.f32 %v5510_v17, %v533_v23 }
  0x8e   :  { %v1888_v40 = vmul.f32 %v5472_v0, %v533_v23 }
  0x8f   :  { %379 = vrot.lane.b32.xlu1 %v376_v63, %s5337_s2  ;;  %377 = vrot.lane.b32.xlu0 %v374_v5, %s5337_s2  ;;  %v1835_v63 = vmul.f32 %v5472_v0, %v477_v47  ;;  %v488_v5 = vsel %vm298_vm0, %v485_v57, %v487_v58  ;;  %v540_v37 = vrot.slane %v534_v32, 2  ;;  %v1895_v43 = vrot.slane %v1889_v38, 2 }
  0x90   :  { %v1897_v44 = vrot.slane %v1890_v39, 2  ;;  %v1894_v45 = vrot.slane %v1888_v40, 2 }
  0x92   :  { %v1898_v46 = vsel %vm355_vm1, %v1895_v43, %v1897_v44  ;;  %v1896_v47 = vsel %vm355_vm1, %v1894_v45, %v1895_v43 }
  0x93   :  { %1744 = vrot.lane.b32.xlu1 %v1741_v9, %s5337_s2  ;;  %1742 = vrot.lane.b32.xlu0 %v1739_v11, %s5337_s2  ;;  %v486_v9 = vsel %vm298_vm0, %v484_v62, %v485_v57  ;;  %v1841_v11 = vrot.slane %v1835_v63, 1  ;;  %v262_v57 = vstv %s163_s25  ;;  %s5004_s25 = sld [smem:[#allocation8 + $0x3b]] }
  0x97   :  { %399 = vrot.lane.b32.xlu1 %v396_v20, %s5338_s27  ;;  %397 = vrot.lane.b32.xlu0 %v394_v21, %s5338_s27  ;;  %v1843_v20 = vsel %vm298_vm0, %v1841_v11, %v1842_v6  ;;  %v523_v21 = vrot.slane %v516_v12, 2  ;;  %v264_v6 = vmul.f32 %v262_v57, %v5487_v4  ;;  %v1637_v11 = vmul.f32 %v5472_v0, %v262_v57 }
  0x9b   :  { %1763 = vrot.lane.b32.xlu1 %v1760_v24, %s5338_s27  ;;  %1761 = vrot.lane.b32.xlu0 %v1758_v25, %s5338_s27  ;;  %v1876_v24 = vrot.slane %v1870_v14, 2  ;;  %v1878_v25 = vrot.slane %v1871_v18, 2  ;;  %v1638_v14 = vmul.f32 %v5482_v3, %v262_v57 }
  0x9d   :  { %v1879_v33 = vsel %vm355_vm1, %v1876_v24, %v1878_v25 }
  0x9f   :  { %422 = vrot.lane.b32.xlu1 %v417_v27, %s5337_s2  ;;  %420 = vrot.lane.b32.xlu0 %v416_v28, %s5337_s2  ;;  %v535_v27 = vmul.f32 %v533_v23, %v5487_v4  ;;  %v536_v28 = vmul.f32 %v533_v23, %v5498_v10 }
  0xa1   :  { %v543_v36 = vrot.slane %v536_v28, 2 }
  0xa3   :  { %1783 = vrot.lane.b32.xlu1 %v1778_v30, %s5337_s2  ;;  %1781 = vrot.lane.b32.xlu0 %v1777_v31, %s5337_s2  ;;  %v524_v30 = vsel %vm355_vm1, %v521_v16, %v523_v21  ;;  %v522_v31 = vsel %vm355_vm1, %v520_v22, %v521_v16  ;;  %v348_v21 = vstv %s4933_s24  ;;  %v142_v22 = vlaneseq  ;;  %s4970_s24 = sld [smem:[#allocation8 + $0x19]] }
  0xa4   :  { %v351_v32 = vmul.f32 %v348_v21, %v5498_v10 }
  0xa7   :  { %435 = vrot.lane.b32.xlu1 %v430_v34, %s5338_s27  ;;  %433 = vrot.lane.b32.xlu0 %v429_v35, %s5338_s27  ;;  %v1877_v34 = vsel %vm355_vm1, %v1875_v26, %v1876_v24  ;;  %v541_v35 = vrot.slane %v535_v27, 2 }
  0xab   :  { %1795 = vrot.lane.b32.xlu1 %v1790_v41, %s5338_s27  ;;  %1793 = vrot.lane.b32.xlu0 %v1789_v42, %s5338_s27  ;;  %v544_v41 = vsel %vm355_vm1, %v541_v35, %v543_v36  ;;  %v542_v42 = vsel %vm355_vm1, %v540_v37, %v541_v35  ;;  %v5661_v37 = vshrl.u32 %v142_v22, 7 }
  0xad   :  { %8683 = vst [vmem:[#allocation24_spill] sm:$0xff] %v5661_v37  ;;  %vm147_vm3 = vcmp.ge.s32.totalorder %v5661_v37, 1 }
  0xaf   :  { %471 = vrot.lane.b32.xlu1 %v468_v52, %s5337_s2  ;;  %469 = vrot.lane.b32.xlu0 %v466_v53, %s5337_s2 }
  0xb3   :  { %1829 = vrot.lane.b32.xlu1 %v1826_v56, %s5337_s2  ;;  %1827 = vrot.lane.b32.xlu0 %v1824_v61, %s5337_s2  ;;  %v291_v56 = vstv %s4930_s23  ;;  %s4986_s23 = sld [smem:[#allocation8 + $0x29]] }
  0xb4   :  { %v293_v60 = vmul.f32 %v291_v56, %v5487_v4  ;;  %v294_v61 = vmul.f32 %v291_v56, %v5498_v10  ;;  %v292_v62 = vmul.f32 %v291_v56, %v5477_v1  ;;  %v1664_v63 = vmul.f32 %v5482_v3, %v291_v56 }
  0xb5   :  { %v1665_v2 = vmul.f32 %v5510_v17, %v291_v56  ;;  %v1663_v8 = vmul.f32 %v5472_v0, %v291_v56 }
  0xb6   :  { %v300_v12 = vrot.slane %v293_v60, 1  ;;  %v302_v13 = vrot.slane %v294_v61, 1  ;;  %v1670_v16 = vrot.slane %v1664_v63, 1 }
  0xb7   :  { %491 = vrot.lane.b32.xlu1 %v488_v5, %s5338_s27  ;;  %489 = vrot.lane.b32.xlu0 %v486_v9, %s5338_s27  ;;  %v263_v5 = vmul.f32 %v262_v57, %v5477_v1  ;;  %v1672_v18 = vrot.slane %v1665_v2, 1  ;;  %v1669_v23 = vrot.slane %v1663_v8, 1 }
  0xb8   :  { %v303_v28 = vsel %vm298_vm0, %v300_v12, %v302_v13 }
  0xb9   :  { %v1673_v36 = vsel %vm298_vm0, %v1670_v16, %v1672_v18  ;;  %v1671_v38 = vsel %vm298_vm0, %v1669_v23, %v1670_v16 }
  0xbb   :  { %1848 = vrot.lane.b32.xlu1 %v1845_v15, %s5338_s27  ;;  %1846 = vrot.lane.b32.xlu0 %v1843_v20, %s5338_s27  ;;  %v299_v15 = vrot.slane %v292_v62, 1 }
  0xbf   :  { %527 = vrot.lane.b32.xlu1 %v524_v30, %s5337_s2  ;;  %525 = vrot.lane.b32.xlu0 %v522_v31, %s5337_s2  ;;  %v301_v30 = vsel %vm298_vm0, %v299_v15, %v300_v12  ;;  %v350_v31 = vmul.f32 %v348_v21, %v5487_v4  ;;  %v1716_v4 = vmul.f32 %v5472_v0, %v348_v21 }
  0xc1   :  { %v357_v45 = vrot.slane %v350_v31, 2  ;;  %v1722_v57 = vrot.slane %v1716_v4, 2 }
  0xc3   :  { %1882 = vrot.lane.b32.xlu1 %v1879_v33, %s5337_s2  ;;  %1880 = vrot.lane.b32.xlu0 %v1877_v34, %s5337_s2  ;;  %v349_v33 = vmul.f32 %v348_v21, %v5477_v1 }
  0xc7   :  { %547 = vrot.lane.b32.xlu1 %v544_v41, %s5338_s27  ;;  %545 = vrot.lane.b32.xlu0 %v542_v42, %s5338_s27  ;;  %v1717_v41 = vmul.f32 %v5482_v3, %v348_v21  ;;  %v1718_v42 = vmul.f32 %v5510_v17, %v348_v21 }
  0xc9   :  { %v1723_v56 = vrot.slane %v1717_v41, 2  ;;  %v1725_v3 = vrot.slane %v1718_v42, 2 }
  0xcb   :  { %1901 = vrot.lane.b32.xlu1 %v1898_v46, %s5338_s27  ;;  %1899 = vrot.lane.b32.xlu0 %v1896_v47, %s5338_s27  ;;  %v359_v46 = vrot.slane %v351_v32, 2  ;;  %v356_v47 = vrot.slane %v349_v33, 2  ;;  %v1724_v12 = vsel %vm355_vm1, %v1722_v57, %v1723_v56  ;;  %v1096_v57 = vstv %s4983_s29  ;;  %s4945_s29 = sld [smem:[#allocation6 + $0x1]] }
  0xcd   :  { %v360_v60 = vsel %vm355_vm1, %v357_v45, %v359_v46  ;;  %v358_v61 = vsel %vm355_vm1, %v356_v47, %v357_v45 }
  0xe1   :  { %v1644_v48 = vpop.permute.xlu1 %1643  ;;  %v271_v49 = vpop.permute.xlu0 %270 }
  0xe2   :  { %v276_v19 = vadd.f32 %v271_v49, %v263_v5  ;;  %v1649_v34 = vadd.f32 %v1644_v48, %v1637_v11  ;;  %v146_v48 = vand.u32 127, %v142_v22  ;;  %v1726_v11 = vsel %vm355_vm1, %v1723_v56, %v1725_v3 }
  0xe4   :  { %vm153_vm2 = vcmp.ge.s32.totalorder %v146_v48, 1  ;;  %vm156_vm5 = vcmp.le.s32.totalorder %v146_v48, 14  ;;  %v836_v48 = vstv %s4965_s28  ;;  %s4971_s28 = sld [smem:[#allocation8 + $0x1a]] }
  0xe5   :  { %v1646_v50 = vpop.permute.xlu1 %1645  ;;  %v273_v51 = vpop.permute.xlu0 %272  ;;  %vm154_vm6 = vmand %vm147_vm3, %vm153_vm2  ;;  %vm5343_vm3 = vmmov 0  }
  0xe6   :  { %v277_v20 = vadd.f32 %v273_v51, %v264_v6  ;;  %v1650_v35 = vadd.f32 %v1646_v50, %v1638_v14  ;;  %v144_v51 = vadd.s32 8, %v5661_v37  ;;  %vm157_vm8 = vmand %vm154_vm6, %vm156_vm5 }
  0xe8   :  { %vm150_vm4 = vcmp.le.s32.totalorder %v144_v51, 14  ;;  %v1343_v51 = vstv %s5000_s4  ;;  %s5838_s4 = sld [smem:[#allocation8 + $0x3d]] }
  0xe9   :  { %v286_v52 = vpop.permute.xlu1 %285  ;;  %v284_v53 = vpop.permute.xlu0 %283  ;;  %vm155_vm7 = vmand %vm150_vm4, %vm153_vm2  ;;  %vm3669_vm2 = vcmask 39936   ;;  %vm4652_vm4 = vcmask 719872  }
  0xea   :  { %v290_v26 = vadd.f32 %v286_v52, %v277_v20  ;;  %v289_v27 = vadd.f32 %v284_v53, %v276_v19  ;;  %vm158_vm9 = vmand %vm155_vm7, %vm156_vm5 }
  0xec   :  { %v307_v44 = vadd.f32 %v303_v28, %v290_v26  ;;  %v306_v1 = vadd.f32 %v301_v30, %v289_v27  ;;  %v5681_v26 = vsel %vm157_vm8, 1.0, %v8623_v29 }
  0xed   :  { %v1658_v54 = vpop.permute.xlu1 %1657  ;;  %v1656_v55 = vpop.permute.xlu0 %1655 }
  0xee   :  { %v1662_v43 = vadd.f32 %v1658_v54, %v1650_v35  ;;  %v1661_v10 = vadd.f32 %v1656_v55, %v1649_v34  ;;  %v823_v34 = vstv %s4964_s26  ;;  %s4936_s26 = sld [smem:[#allocation2 + $0x9]] }
  0xf0   :  { %v1677_v17 = vadd.f32 %v1673_v36, %v1662_v43  ;;  %v1676_v0 = vadd.f32 %v1671_v38, %v1661_v10  ;;  %v1083_v43 = vstv %s4982_s10  ;;  %s4939_s10 = sld [smem:[#allocation2 + $0xc]] }
  0xf1   :  { %v323_v58 = vpop.permute.xlu1 %322  ;;  %v321_v59 = vpop.permute.xlu0 %320 }
  0xf2   :  { %v327_v49 = vadd.f32 %v323_v58, %v307_v44  ;;  %v326_v50 = vadd.f32 %v321_v59, %v306_v1 }
  0xf5   :  { %v1692_v7 = vpop.permute.xlu1 %1691  ;;  %v1690_v9 = vpop.permute.xlu0 %1689 }
  0xf6   :  { %v1696_v58 = vadd.f32 %v1692_v7, %v1677_v17  ;;  %v1695_v59 = vadd.f32 %v1690_v9, %v1676_v0  ;;  %v405_v9 = vstv %s181_s3  ;;  %s4988_s3 = sld [smem:[#allocation8 + $0x2b]] }
  0xf9   :  { %v343_v24 = vpop.permute.xlu1 %342  ;;  %v341_v25 = vpop.permute.xlu0 %340 }
  0xfa   :  { %v347_v54 = vadd.f32 %v343_v24, %v327_v49  ;;  %v346_v55 = vadd.f32 %v341_v25, %v326_v50  ;;  %v5678_v25 = vsel %vm158_vm9, 1.0, %v8623_v29 }
  0xfc   :  { %v364_v6 = vadd.f32 %v360_v60, %v347_v54  ;;  %v363_v8 = vadd.f32 %v358_v61, %v346_v55 }
  0xfd   :  { %v1711_v39 = vpop.permute.xlu1 %1710  ;;  %v1709_v40 = vpop.permute.xlu0 %1708 }
  0xfe   :  { %v1715_v2 = vadd.f32 %v1711_v39, %v1696_v58  ;;  %v1714_v5 = vadd.f32 %v1709_v40, %v1695_v59  ;;  %v1356_v58 = vstv %s5001_s14  ;;  %s4973_s14 = sld [smem:[#allocation8 + $0x1c]] }
 0x100   :  { %v1730_v16 = vadd.f32 %v1726_v11, %v1715_v2  ;;  %v1729_v18 = vadd.f32 %v1724_v12, %v1714_v5  ;;  %v1121_v11 = vstv %s4985_s21  ;;  %s4974_s21 = sld [smem:[#allocation8 + $0x1d]] }
 0x101   :  { %v380_v52 = vpop.permute.xlu1 %379  ;;  %v378_v53 = vpop.permute.xlu0 %377 }
 0x102   :  { %v384_v13 = vadd.f32 %v380_v52, %v364_v6  ;;  %v383_v7 = vadd.f32 %v378_v53, %v363_v8 }
 0x105   :  { %v1745_v62 = vpop.permute.xlu1 %1744  ;;  %v1743_v63 = vpop.permute.xlu0 %1742 }
 0x106   :  { %v1749_v21 = vadd.f32 %v1745_v62, %v1730_v16  ;;  %v1748_v22 = vadd.f32 %v1743_v63, %v1729_v18  ;;  %v861_v63 = vstv %s4967_s0  ;;  %s4991_s0 = sld [smem:[#allocation8 + $0x2e]] }
 0x109   :  { %v400_v14 = vpop.permute.xlu1 %399  ;;  %v398_v15 = vpop.permute.xlu0 %397 }
 0x10a   :  { %v404_v19 = vadd.f32 %v400_v14, %v384_v13  ;;  %v403_v20 = vadd.f32 %v398_v15, %v383_v7 }
 0x10c   :  { %v407_v23 = vadd.f32 %v405_v9, %v404_v19  ;;  %v406_v24 = vadd.f32 %v405_v9, %v403_v20 }
 0x10d   :  { %v1764_v27 = vpop.permute.xlu1 %1763  ;;  %v1762_v28 = vpop.permute.xlu0 %1761 }
 0x10e   :  { %v409_v30 = vmax.f32 %v407_v23, 0.0  ;;  %v408_v31 = vmax.f32 %v406_v24, 0.0  ;;  %v1768_v32 = vadd.f32 %v1764_v27, %v1749_v21  ;;  %v1767_v33 = vadd.f32 %v1762_v28, %v1748_v22 }
 0x10f   :  { %v877_v24 = vstv %s4968_s1  ;;  %s5009_s1 = sld [smem:[#allocation8 + $0x40]] }
 0x110   :  { %v5684_v35 = vmul.f32 %v5678_v25, %v409_v30  ;;  %v5687_v36 = vmul.f32 %v5681_v26, %v408_v31  ;;  %v1770_v38 = vadd.f32 %v1768_v32, %v405_v9  ;;  %v1769_v39 = vadd.f32 %v1767_v33, %v405_v9 }
 0x111   :  { %v5745_v16 = vpop.permute.xlu1 %422  ;;  %v5747_v18 = vpop.permute.xlu0 %420  ;;  %v1381_v31 = vstv %s5003_s22  ;;  %s4992_s22 = sld [smem:[#allocation8 + $0x2f]] }
 0x112   :  { %8684 = vst [vmem:[#allocation25_spill] sm:$0xff] %v5684_v35  ;;  %8685 = vst [vmem:[#allocation26_spill] sm:$0xff] %v5687_v36  ;;  %v1772_v40 = vmax.f32 %v1770_v38, 0.0  ;;  %v1771_v41 = vmax.f32 %v1769_v39, 0.0  ;;  %v824_v42 = vmul.f32 %v823_v34, %v5687_v36  ;;  %v825_v4 = vmul.f32 %v823_v34, %v5684_v35 }
 0x113   :  { %v1084_v1 = vmul.f32 %v1083_v43, %v5687_v36  ;;  %v1085_v45 = vmul.f32 %v1083_v43, %v5684_v35  ;;  %v837_v49 = vmul.f32 %v836_v48, %v5687_v36  ;;  %v838_v50 = vmul.f32 %v836_v48, %v5684_v35 }
 0x114   :  { %828 = vrot.lane.b32.xlu0 %v824_v42, %s5337_s2  ;;  %830 = vrot.lane.b32.xlu1 %v825_v4, %s5337_s2  ;;  %v5694_v10 = vmul.f32 %v5678_v25, %v1772_v40  ;;  %v5697_v44 = vmul.f32 %v5681_v26, %v1771_v41  ;;  %v1344_v52 = vmul.f32 %v1343_v51, %v5687_v36 }
 0x115   :  { %v1345_v53 = vmul.f32 %v1343_v51, %v5684_v35  ;;  %v1097_v17 = vmul.f32 %v1096_v57, %v5687_v36  ;;  %v1098_v0 = vmul.f32 %v1096_v57, %v5684_v35  ;;  %v1357_v59 = vmul.f32 %v1356_v58, %v5687_v36  ;;  %v5756_v27 = vpop.permute.xlu1 %1783  ;;  %v5758_v28 = vpop.permute.xlu0 %1781 }
 0x116   :  { %8686 = vst [vmem:[#allocation27_spill] sm:$0xff] %v5694_v10  ;;  %8687 = vst [vmem:[#allocation28_spill] sm:$0xff] %v5697_v44  ;;  %v2156_v46 = vmul.f32 %v5697_v44, %v823_v34  ;;  %v2157_v47 = vmul.f32 %v5694_v10, %v823_v34  ;;  %v2397_v56 = vmul.f32 %v5697_v44, %v1083_v43 }
 0x117   :  { %v2398_v3 = vmul.f32 %v5694_v10, %v1083_v43  ;;  %v2168_v54 = vmul.f32 %v5697_v44, %v836_v48  ;;  %v2169_v55 = vmul.f32 %v5694_v10, %v836_v48  ;;  %v2638_v60 = vmul.f32 %v5697_v44, %v1343_v51 }
 0x118   :  { %1088 = vrot.lane.b32.xlu0 %v1084_v1, %s5337_s2  ;;  %1090 = vrot.lane.b32.xlu1 %v1085_v45, %s5337_s2  ;;  %v2639_v61 = vmul.f32 %v5694_v10, %v1343_v51  ;;  %v1358_v62 = vmul.f32 %v1356_v58, %v5684_v35  ;;  %v2409_v2 = vmul.f32 %v5697_v44, %v1096_v57 }
 0x119   :  { %v2410_v5 = vmul.f32 %v5694_v10, %v1096_v57  ;;  %v862_v6 = vmul.f32 %v861_v63, %v5687_v36  ;;  %v863_v8 = vmul.f32 %v861_v63, %v5684_v35  ;;  %v2650_v12 = vmul.f32 %v5697_v44, %v1356_v58  ;;  %v5768_v43 = vpop.permute.xlu1 %435  ;;  %v5770_v1 = vpop.permute.xlu0 %433 }
 0x11a   :  { %v2651_v13 = vmul.f32 %v5694_v10, %v1356_v58  ;;  %v1122_v14 = vmul.f32 %v1121_v11, %v5687_v36  ;;  %v1123_v15 = vmul.f32 %v1121_v11, %v5684_v35  ;;  %v2191_v19 = vmul.f32 %v5697_v44, %v861_v63 }
 0x11b   :  { %v866_v7 = vrot.slane %v862_v6, 1  ;;  %v867_v9 = vrot.slane %v863_v8, 1  ;;  %v2192_v23 = vmul.f32 %v5694_v10, %v861_v63  ;;  %v878_v34 = vmul.f32 %v877_v24, %v5687_v36 }
 0x11c   :  { %2160 = vrot.lane.b32.xlu0 %v2156_v46, %s5337_s2  ;;  %2162 = vrot.lane.b32.xlu1 %v2157_v47, %s5337_s2  ;;  %v1126_v21 = vrot.slane %v1122_v14, 1  ;;  %v1127_v22 = vrot.slane %v1123_v15, 1  ;;  %v2195_v30 = vrot.slane %v2191_v19, 1  ;;  %v879_v38 = vmul.f32 %v877_v24, %v5684_v35 }
 0x11d   :  { %v868_v20 = vsel %vm298_vm0, %v866_v7, %v867_v9  ;;  %v2196_v33 = vrot.slane %v2192_v23, 1  ;;  %v1382_v39 = vmul.f32 %v1381_v31, %v5687_v36  ;;  %v882_v41 = vrot.slane %v878_v34, 1  ;;  %v5779_v51 = vpop.permute.xlu1 %1795 }
 0x11e   :  { %v1128_v32 = vsel %vm298_vm0, %v1126_v21, %v1127_v22  ;;  %v883_v42 = vrot.slane %v879_v38, 1  ;;  %v1383_v4 = vmul.f32 %v1381_v31, %v5684_v35  ;;  %v2432_v45 = vmul.f32 %v5697_v44, %v1121_v11 }
 0x11f   :  { %v2197_v40 = vsel %vm298_vm0, %v2195_v30, %v2196_v33  ;;  %v1386_v47 = vrot.slane %v1382_v39, 1  ;;  %v2674_v6 = vmul.f32 %v5694_v10, %v1381_v31  ;;  %v1397_v8 = vstv %s5004_s25  ;;  %s4976_s25 = sld [smem:[#allocation8 + $0x1f]] }
 0x120   :  { %841 = vrot.lane.b32.xlu0 %v837_v49, %s5338_s27  ;;  %843 = vrot.lane.b32.xlu1 %v838_v50, %s5338_s27  ;;  %v884_v46 = vsel %vm298_vm0, %v882_v41, %v883_v42  ;;  %v1387_v48 = vrot.slane %v1383_v4, 1  ;;  %v2433_v49 = vmul.f32 %v5694_v10, %v1121_v11  ;;  %v1137_v50 = vstv %s4986_s23  ;;  %s5858_s23 = sld [smem:[#allocation2 + $0xf]] }
 0x121   :  { %v1138_v57 = vmul.f32 %v1137_v50, %v5687_v36  ;;  %v5791_v58 = vpop.permute.xlu1 %471  ;;  %v1398_v14 = vmul.f32 %v1397_v8, %v5687_v36  ;;  %v1399_v15 = vmul.f32 %v1397_v8, %v5684_v35  ;;  %v2447_v19 = vmul.f32 %v5697_v44, %v1137_v50 }
 0x122   :  { %v2688_v34 = vmul.f32 %v5697_v44, %v1397_v8  ;;  %v2689_v38 = vmul.f32 %v5694_v10, %v1397_v8  ;;  %v905_v39 = vstv %s4970_s24  ;;  %v5830_v4 = vstv %s4988_s3  ;;  %s4994_s24 = sld [smem:[#allocation8 + $0x31]] }
 0x123   :  { %v1403_v23 = vrot.slane %v1399_v15, 1  ;;  %v2232_v8 = vmul.f32 %v5697_v44, %v905_v39  ;;  %v5865_v15 = vstv %s4971_s28  ;;  %s4977_s3 = sld [smem:[#allocation8 + $0x20]] }
 0x124   :  { %1348 = vrot.lane.b32.xlu0 %v1344_v52, %s5337_s2  ;;  %1350 = vrot.lane.b32.xlu1 %v1345_v53, %s5337_s2  ;;  %v5781_v52 = vpop.permute.xlu0 %1793  ;;  %v2436_v53 = vrot.slane %v2432_v45, 1  ;;  %v2692_v45 = vrot.slane %v2688_v34, 1  ;;  %v5874_v34 = vstv %s5838_s4  ;;  %s5895_s4 = sld [smem:[#allocation8 + $0x2c]] }
 0x125   :  { %v5802_v11 = vpop.permute.xlu1 %1829  ;;  %s5013_s28 = sld [smem:[#allocation8 + $0x44]] }
 0x128   :  { %2401 = vrot.lane.b32.xlu0 %v2397_v56, %s5337_s2  ;;  %2403 = vrot.lane.b32.xlu1 %v2398_v3, %s5337_s2  ;;  %v1388_v56 = vsel %vm298_vm0, %v1386_v47, %v1387_v48  ;;  %v2437_v3 = vrot.slane %v2433_v49, 1  ;;  %v906_v47 = vmul.f32 %v905_v39, %v5687_v36  ;;  %v412_v49 = vstv %s4936_s26  ;;  %s5012_s26 = sld [smem:[#allocation8 + $0x43]] }
 0x12c   :  { %1101 = vrot.lane.b32.xlu0 %v1097_v17, %s5338_s27  ;;  %1103 = vrot.lane.b32.xlu1 %v1098_v0, %s5338_s27  ;;  %v1139_v17 = vmul.f32 %v1137_v50, %v5684_v35  ;;  %v2206_v0 = vmul.f32 %v5697_v44, %v877_v24 }
 0x12e   :  { %v1500_v37 = vstv %s5012_s26  ;;  %s6311_s26 = sld [smem:[#allocation8 + $0x18]] }
 0x130   :  { %2172 = vrot.lane.b32.xlu0 %v2168_v54, %s5338_s27  ;;  %2174 = vrot.lane.b32.xlu1 %v2169_v55, %s5338_s27  ;;  %v2438_v54 = vsel %vm298_vm0, %v2436_v53, %v2437_v3  ;;  %v1142_v55 = vrot.slane %v1138_v57, 1  ;;  %v1166_v53 = vmul.f32 %v5830_v4, %v5687_v36 }
 0x134   :  { %2642 = vrot.lane.b32.xlu0 %v2638_v60, %s5337_s2  ;;  %2644 = vrot.lane.b32.xlu1 %v2639_v61, %s5337_s2  ;;  %v1143_v60 = vrot.slane %v1139_v17, 1  ;;  %v2207_v61 = vmul.f32 %v5694_v10, %v877_v24  ;;  %v5814_v24 = vpop.permute.xlu1 %491  ;;  %v1167_v17 = vmul.f32 %v5830_v4, %v5684_v35 }
 0x136   :  { %v1144_v63 = vsel %vm298_vm0, %v1142_v55, %v1143_v60  ;;  %v5179_v55 = vld [vmem:[%s8682_s30 + $0x8] sm:$0xff] }
 0x138   :  { %1361 = vrot.lane.b32.xlu0 %v1357_v59, %s5338_s27  ;;  %1363 = vrot.lane.b32.xlu1 %v1358_v62, %s5338_s27  ;;  %v5793_v59 = vpop.permute.xlu0 %469  ;;  %v2673_v62 = vmul.f32 %v5697_v44, %v1381_v31  ;;  %v2451_v31 = vrot.slane %v2447_v19, 1 }
 0x13c   :  { %2413 = vrot.lane.b32.xlu0 %v2409_v2, %s5338_s27  ;;  %2415 = vrot.lane.b32.xlu1 %v2410_v5, %s5338_s27  ;;  %v2210_v2 = vrot.slane %v2206_v0, 1  ;;  %v2211_v5 = vrot.slane %v2207_v61, 1  ;;  %v5180_v61 = vld [vmem:[%s8682_s30 + $0x10] sm:$0x3] }
 0x13e   :  { %v2212_v7 = vsel %vm298_vm0, %v2210_v2, %v2211_v5 }
 0x140   :  { %2654 = vrot.lane.b32.xlu0 %v2650_v12, %s5338_s27  ;;  %2656 = vrot.lane.b32.xlu1 %v2651_v13, %s5338_s27  ;;  %v5804_v12 = vpop.permute.xlu0 %1827  ;;  %v2677_v13 = vrot.slane %v2673_v62, 1 }
 0x144   :  { %869 = vrot.lane.b32.xlu0 %v868_v20, %s5337_s2  ;;  %871 = vrot.lane.b32.xlu1 %v867_v9, %s5337_s2  ;;  %v2678_v9 = vrot.slane %v2674_v6, 1  ;;  %v2448_v20 = vmul.f32 %v5694_v10, %v1137_v50  ;;  %v5816_v30 = vpop.permute.xlu0 %489  ;;  %v441_v50 = vstv %s4939_s10  ;;  %s4995_s10 = sld [smem:[#allocation8 + $0x32]] }
 0x145   :  { %v444_v62 = vmul.f32 %v5180_v61, %v441_v50 }
 0x146   :  { %v2679_v21 = vsel %vm298_vm0, %v2677_v13, %v2678_v9 }
 0x148   :  { %1129 = vrot.lane.b32.xlu0 %v1128_v32, %s5337_s2  ;;  %1131 = vrot.lane.b32.xlu1 %v1127_v22, %s5337_s2  ;;  %v1402_v22 = vrot.slane %v1398_v14, 1  ;;  %v2452_v32 = vrot.slane %v2448_v20, 1  ;;  %v5827_v41 = vpop.permute.xlu0 %1846  ;;  %v2233_v14 = vmul.f32 %v5694_v10, %v905_v39  ;;  %v451_v20 = vrot.slane %v444_v62, 1 }
 0x14c   :  { %2198 = vrot.lane.b32.xlu0 %v2197_v40, %s5337_s2  ;;  %2200 = vrot.lane.b32.xlu1 %v2196_v33, %s5337_s2  ;;  %v1404_v33 = vsel %vm298_vm0, %v1402_v22, %v1403_v23  ;;  %v5825_v40 = vpop.permute.xlu1 %1848 }
 0x150   :  { %885 = vrot.lane.b32.xlu0 %v884_v46, %s5338_s27  ;;  %887 = vrot.lane.b32.xlu1 %v883_v42, %s5338_s27  ;;  %v2453_v42 = vsel %vm298_vm0, %v2451_v31, %v2452_v32  ;;  %v2693_v46 = vrot.slane %v2689_v38, 1  ;;  %v5843_v0 = vpop.permute.xlu1 %527 }
 0x154   :  { %1389 = vrot.lane.b32.xlu0 %v1388_v56, %s5337_s2  ;;  %1391 = vrot.lane.b32.xlu1 %v1387_v48, %s5337_s2  ;;  %v907_v48 = vmul.f32 %v905_v39, %v5684_v35  ;;  %v2694_v56 = vsel %vm298_vm0, %v2692_v45, %v2693_v46  ;;  %v5869_v31 = vpop.permute.xlu1 %1882  ;;  %v2237_v39 = vrot.slane %v2233_v14, 2  ;;  %v923_v45 = vmul.f32 %v5865_v15, %v5684_v35 }
 0x156   :  { %v911_v57 = vrot.slane %v907_v48, 2  ;;  %v5890_v48 = vld [vmem:[%s8682_s30 + $0x18] sm:$0xff] }
 0x158   :  { %2439 = vrot.lane.b32.xlu0 %v2438_v54, %s5337_s2  ;;  %2441 = vrot.lane.b32.xlu1 %v2437_v3, %s5337_s2  ;;  %v910_v3 = vrot.slane %v906_v47, 2  ;;  %v5845_v54 = vpop.permute.xlu0 %525  ;;  %v5908_v14 = vpop.permute.xlu1 %547 }
 0x15a   :  { %v912_v13 = vsel %vm355_vm1, %v910_v3, %v911_v57  ;;  %v1775_v3 = vmul.f32 %v5890_v48, %v412_v49 }
 0x15c   :  { %1145 = vrot.lane.b32.xlu0 %v1144_v63, %s5338_s27  ;;  %1147 = vrot.lane.b32.xlu1 %v1143_v60, %s5338_s27  ;;  %v443_v60 = vmul.f32 %v5179_v55, %v441_v50  ;;  %v5181_v63 = vld [vmem:[%s8682_s30] sm:$0xff] }
 0x15d   :  { %v442_v2 = vmul.f32 %v5181_v63, %v441_v50  ;;  %v413_v6 = vmul.f32 %v5181_v63, %v412_v49 }
 0x15e   :  { %v449_v19 = vrot.slane %v443_v60, 1 }
 0x160   :  { %2213 = vrot.lane.b32.xlu0 %v2212_v7, %s5338_s27  ;;  %2215 = vrot.lane.b32.xlu1 %v2211_v5, %s5338_s27  ;;  %v414_v5 = vmul.f32 %v5179_v55, %v412_v49  ;;  %v1170_v7 = vrot.slane %v1166_v53, 2  ;;  %v1801_v53 = vmul.f32 %v5890_v48, %v441_v50 }
 0x162   :  { %v427_v22 = vadd.f32 %v5745_v16, %v414_v5  ;;  %v5182_v16 = vld [vmem:[%s8682_s30 + $0x20] sm:$0xff] }
 0x164   :  { %2680 = vrot.lane.b32.xlu0 %v2679_v21, %s5337_s2  ;;  %2682 = vrot.lane.b32.xlu1 %v2678_v9, %s5337_s2  ;;  %v1171_v9 = vrot.slane %v1167_v17, 2  ;;  %v448_v21 = vrot.slane %v442_v2, 1  ;;  %v440_v60 = vadd.f32 %v5768_v43, %v427_v22  ;;  %v497_v2 = vstv %s5858_s23  ;;  %s5010_s23 = sld [smem:[#allocation8 + $0x41]] }
 0x166   :  { %v1172_v38 = vsel %vm355_vm1, %v1170_v7, %v1171_v9  ;;  %v450_v17 = vsel %vm298_vm0, %v448_v21, %v449_v19  ;;  %v500_v21 = vmul.f32 %v5180_v61, %v497_v2 }
 0x168   :  { %1405 = vrot.lane.b32.xlu0 %v1404_v33, %s5338_s27  ;;  %1407 = vrot.lane.b32.xlu1 %v1403_v23, %s5338_s27  ;;  %v426_v23 = vadd.f32 %v5747_v18, %v413_v6  ;;  %v2236_v33 = vrot.slane %v2232_v8, 2  ;;  %v1802_v18 = vmul.f32 %v5182_v16, %v441_v50  ;;  %v927_v8 = vrot.slane %v923_v45, 2 }
 0x16a   :  { %v439_v62 = vadd.f32 %v5770_v1, %v426_v23  ;;  %v2238_v5 = vsel %vm355_vm1, %v2236_v33, %v2237_v39  ;;  %v1787_v1 = vadd.f32 %v5758_v28, %v1775_v3  ;;  %v498_v33 = vmul.f32 %v5181_v63, %v497_v2 }
 0x16b   :  { %v5926_v28 = vstv %s5895_s4  ;;  %s4979_s4 = sld [smem:[#allocation8 + $0x22]] }
 0x16c   :  { %2454 = vrot.lane.b32.xlu0 %v2453_v42, %s5338_s27  ;;  %2456 = vrot.lane.b32.xlu1 %v2452_v32, %s5338_s27  ;;  %v5871_v32 = vpop.permute.xlu0 %1880  ;;  %v922_v42 = vmul.f32 %v5865_v15, %v5687_v36  ;;  %v455_v23 = vadd.f32 %v450_v17, %v439_v62  ;;  %v1799_v61 = vadd.f32 %v5781_v52, %v1787_v1  ;;  %v504_v3 = vrot.slane %v498_v33, 2 }
 0x16d   :  { %v1183_v52 = vmul.f32 %v5926_v28, %v5684_v35 }
 0x16e   :  { %v926_v6 = vrot.slane %v922_v42, 2 }
 0x170   :  { %2695 = vrot.lane.b32.xlu0 %v2694_v56, %s5338_s27  ;;  %2697 = vrot.lane.b32.xlu1 %v2693_v46, %s5338_s27  ;;  %v5183_v46 = vld [vmem:[%s8682_s30 + $0x28] sm:$0x3]  ;;  %v1776_v56 = vmul.f32 %v5182_v16, %v412_v49  ;;  %v1808_v49 = vrot.slane %v1802_v18, 1  ;;  %v928_v42 = vsel %vm355_vm1, %v926_v6, %v927_v8  ;;  %s5936_s30 = sld [smem:[#allocation8 + $0x3e]] }
 0x171   :  { %v1803_v47 = vmul.f32 %v5183_v46, %v441_v50  ;;  %v1426_v50 = vmul.f32 %v5874_v34, %v5687_v36 }
 0x172   :  { %v1788_v43 = vadd.f32 %v5756_v27, %v1776_v56 }
 0x173   :  { %v1810_v7 = vrot.slane %v1803_v47, 1  ;;  %v1430_v45 = vrot.slane %v1426_v50, 2 }
 0x174   :  { %913 = vrot.lane.b32.xlu0 %v912_v13, %s5337_s2  ;;  %915 = vrot.lane.b32.xlu1 %v911_v57, %s5337_s2  ;;  %v452_v57 = vsel %vm298_vm0, %v449_v19, %v451_v20  ;;  %v1427_v13 = vmul.f32 %v5874_v34, %v5684_v35  ;;  %v5910_v19 = vpop.permute.xlu0 %545  ;;  %v499_v20 = vmul.f32 %v5179_v55, %v497_v2 }
 0x175   :  { %v456_v22 = vadd.f32 %v452_v57, %v440_v60  ;;  %v1811_v27 = vsel %vm298_vm0, %v1808_v49, %v1810_v7  ;;  %v1800_v55 = vadd.f32 %v5779_v51, %v1788_v43  ;;  %v5932_v57 = vpop.permute.xlu1 %1901  ;;  %v1182_v51 = vmul.f32 %v5926_v28, %v5687_v36 }
 0x176   :  { %v1431_v18 = vrot.slane %v1427_v13, 2  ;;  %v505_v63 = vrot.slane %v499_v20, 2  ;;  %v1854_v13 = vmul.f32 %v5890_v48, %v497_v2  ;;  %v2248_v48 = vmul.f32 %v5694_v10, %v5865_v15 }
 0x177   :  { %v476_v56 = vadd.f32 %v5791_v58, %v456_v22  ;;  %v1855_v58 = vmul.f32 %v5182_v16, %v497_v2  ;;  %v1186_v20 = vrot.slane %v1182_v51, 2 }
 0x178   :  { %1173 = vrot.lane.b32.xlu0 %v1172_v38, %s5337_s2  ;;  %1175 = vrot.lane.b32.xlu1 %v1171_v9, %s5337_s2  ;;  %v1807_v9 = vrot.slane %v1801_v53, 1  ;;  %v2473_v38 = vmul.f32 %v5697_v44, %v5830_v4  ;;  %v507_v53 = vrot.slane %v500_v21, 2  ;;  %v5934_v17 = vpop.permute.xlu0 %1899  ;;  %v1432_v62 = vsel %vm355_vm1, %v1430_v45, %v1431_v18 }
 0x179   :  { %v1187_v21 = vrot.slane %v1183_v52, 2 }
 0x17a   :  { %v1809_v47 = vsel %vm298_vm0, %v1807_v9, %v1808_v49  ;;  %v2477_v60 = vrot.slane %v2473_v38, 2  ;;  %v496_v49 = vadd.f32 %v5814_v24, %v476_v56  ;;  %v506_v9 = vsel %vm355_vm1, %v504_v3, %v505_v63 }
 0x17b   :  { %v1814_v6 = vadd.f32 %v1809_v47, %v1799_v61  ;;  %v1861_v24 = vrot.slane %v1855_v58, 2  ;;  %v2714_v47 = vmul.f32 %v5697_v44, %v5874_v34 }
 0x17c   :  { %2239 = vrot.lane.b32.xlu0 %v2238_v5, %s5337_s2  ;;  %2241 = vrot.lane.b32.xlu1 %v2237_v39, %s5337_s2  ;;  %v2474_v39 = vmul.f32 %v5694_v10, %v5830_v4  ;;  %v475_v4 = vadd.f32 %v5793_v59, %v455_v23  ;;  %v1856_v5 = vmul.f32 %v5183_v46, %v497_v2  ;;  %v1860_v23 = vrot.slane %v1854_v13, 2 }
 0x17d   :  { %v1815_v59 = vadd.f32 %v1811_v27, %v1800_v55  ;;  %v2247_v46 = vmul.f32 %v5697_v44, %v5865_v15  ;;  %v1833_v2 = vadd.f32 %v5804_v12, %v1814_v6  ;;  %v1188_v15 = vsel %vm355_vm1, %v1186_v20, %v1187_v21 }
 0x17e   :  { %v2478_v50 = vrot.slane %v2474_v39, 2  ;;  %v495_v7 = vadd.f32 %v5816_v30, %v475_v4  ;;  %v1863_v22 = vrot.slane %v1856_v5, 2  ;;  %v1441_v39 = vstv %s5936_s30  ;;  %s4997_s30 = sld [smem:[#allocation8 + $0x34]] }
 0x17f   :  { %v1834_v30 = vadd.f32 %v5802_v11, %v1815_v59  ;;  %v2252_v27 = vrot.slane %v2248_v48, 2  ;;  %v2715_v11 = vmul.f32 %v5694_v10, %v5874_v34  ;;  %v1852_v55 = vadd.f32 %v5827_v41, %v1833_v2 }
 0x180   :  { %929 = vrot.lane.b32.xlu0 %v928_v42, %s5338_s27  ;;  %931 = vrot.lane.b32.xlu1 %v927_v8, %s5338_s27  ;;  %v508_v8 = vsel %vm355_vm1, %v505_v63, %v507_v53  ;;  %v2479_v1 = vsel %vm355_vm1, %v2477_v60, %v2478_v50  ;;  %v511_v38 = vadd.f32 %v506_v9, %v495_v7  ;;  %v553_v6 = vstv %s4945_s29  ;;  %s4980_s29 = sld [smem:[#allocation8 + $0x23]] }
 0x181   :  { %v512_v33 = vadd.f32 %v508_v8, %v496_v49  ;;  %v1853_v12 = vadd.f32 %v5825_v40, %v1834_v30  ;;  %v1864_v61 = vsel %vm355_vm1, %v1861_v24, %v1863_v22  ;;  %v1862_v63 = vsel %vm355_vm1, %v1860_v23, %v1861_v24 }
 0x182   :  { %v531_v56 = vadd.f32 %v5845_v54, %v511_v38  ;;  %v1442_v34 = vmul.f32 %v1441_v39, %v5687_v36  ;;  %v1443_v60 = vmul.f32 %v1441_v39, %v5684_v35  ;;  %v2719_v41 = vrot.slane %v2715_v11, 2 }
 0x183   :  { %v532_v53 = vadd.f32 %v5843_v0, %v512_v33  ;;  %v1867_v0 = vadd.f32 %v1862_v63, %v1852_v55  ;;  %v2488_v13 = vmul.f32 %v5697_v44, %v5926_v28  ;;  %v2489_v49 = vmul.f32 %v5694_v10, %v5926_v28 }
 0x184   :  { %1433 = vrot.lane.b32.xlu0 %v1432_v62, %s5337_s2  ;;  %1435 = vrot.lane.b32.xlu1 %v1431_v18, %s5337_s2  ;;  %v2251_v18 = vrot.slane %v2247_v46, 2  ;;  %v2718_v62 = vrot.slane %v2714_v47, 2  ;;  %v551_v51 = vadd.f32 %v5910_v19, %v531_v56  ;;  %v1446_v5 = vrot.slane %v1442_v34, 2 }
 0x185   :  { %v552_v54 = vadd.f32 %v5908_v14, %v532_v53  ;;  %v1447_v59 = vrot.slane %v1443_v60, 2  ;;  %v1886_v19 = vadd.f32 %v5871_v32, %v1867_v0  ;;  %v2493_v48 = vrot.slane %v2489_v49, 2 }
 0x186   :  { %v5950_v43 = vpop.permute.xlu0 %828  ;;  %v5952_v16 = vpop.permute.xlu1 %830  ;;  %v2253_v40 = vsel %vm355_vm1, %v2251_v18, %v2252_v27  ;;  %v2720_v8 = vsel %vm355_vm1, %v2718_v62, %v2719_v41  ;;  %v554_v9 = vadd.f32 %v553_v6, %v551_v51  ;;  %v2729_v28 = vmul.f32 %v5697_v44, %v1441_v39 }
 0x187   :  { %v555_v7 = vadd.f32 %v553_v6, %v552_v54  ;;  %v1448_v20 = vsel %vm355_vm1, %v1446_v5, %v1447_v59  ;;  %v2730_v24 = vmul.f32 %v5694_v10, %v1441_v39  ;;  %v1905_v2 = vadd.f32 %v5934_v17, %v1886_v19 }
 0x188   :  { %2480 = vrot.lane.b32.xlu0 %v2479_v1, %s5337_s2  ;;  %2482 = vrot.lane.b32.xlu1 %v2478_v50, %s5337_s2  ;;  %v1868_v50 = vadd.f32 %v1864_v61, %v1853_v12  ;;  %v556_v32 = vmax.f32 %v554_v9, 0.0  ;;  %v2733_v38 = vrot.slane %v2729_v28, 2  ;;  %v942_v12 = vstv %s4973_s14  ;;  %s5015_s14 = sld [smem:[#allocation8 + $0x46]] }
 0x189   :  { %v2734_v18 = vrot.slane %v2730_v24, 2  ;;  %v1202_v60 = vstv %s4991_s0  ;;  %s4998_s0 = sld [smem:[#allocation8 + $0x35]] }
 0x18a   :  { %v5963_v42 = vpop.permute.xlu0 %1088  ;;  %v5965_v45 = vpop.permute.xlu1 %1090  ;;  %v1887_v14 = vadd.f32 %v5869_v31, %v1868_v50  ;;  %v557_v31 = vmax.f32 %v555_v7, 0.0 }
 0x18b   :  { %v2735_v11 = vsel %vm355_vm1, %v2733_v38, %v2734_v18 }
 0x18c   :  { %1189 = vrot.lane.b32.xlu0 %v1188_v15, %s5338_s27  ;;  %1191 = vrot.lane.b32.xlu1 %v1187_v21, %s5338_s27  ;;  %v2492_v21 = vrot.slane %v2488_v13, 2  ;;  %v1906_v30 = vadd.f32 %v5932_v57, %v1887_v14  ;;  %v6024_v39 = vmul.f32 %v5678_v25, %v557_v31  ;;  %v6027_v57 = vmul.f32 %v5681_v26, %v556_v32 }
 0x18d   :  { %v1907_v15 = vadd.f32 %v1905_v2, %v553_v6  ;;  %v1462_v14 = vstv %s5009_s1  ;;  %v1215_v31 = vstv %s4992_s22  ;;  %s6286_s1 = sld [smem:[#allocation8 + $0x24]] }
 0x18e   :  { %v5981_v4 = vpop.permute.xlu0 %2160  ;;  %v5983_v3 = vpop.permute.xlu1 %2162  ;;  %v2494_v33 = vsel %vm355_vm1, %v2492_v21, %v2493_v48  ;;  %8690 = vst [vmem:[#allocation31_spill] sm:$0xff] %v6024_v39  ;;  %8691 = vst [vmem:[#allocation32_spill] sm:$0xff] %v6027_v57  ;;  %v1908_v17 = vadd.f32 %v1906_v30, %v553_v6  ;;  %v943_v56 = vmul.f32 %v942_v12, %v6027_v57  ;;  %s6292_s22 = sld [smem:[#allocation8 + $0x36]] }
 0x18f   :  { %v1909_v61 = vmax.f32 %v1907_v15, 0.0  ;;  %v944_v34 = vmul.f32 %v942_v12, %v6024_v39  ;;  %v1203_v0 = vmul.f32 %v1202_v60, %v6027_v57  ;;  %v1204_v54 = vmul.f32 %v1202_v60, %v6024_v39 }
 0x190   :  { %2254 = vrot.lane.b32.xlu0 %v2253_v40, %s5338_s27  ;;  %2256 = vrot.lane.b32.xlu1 %v2252_v27, %s5338_s27  ;;  %v1910_v55 = vmax.f32 %v1908_v17, 0.0  ;;  %v1463_v9 = vmul.f32 %v1462_v14, %v6027_v57  ;;  %v1216_v2 = vmul.f32 %v1215_v31, %v6027_v57 }
 0x191   :  { %v6048_v62 = vmul.f32 %v5681_v26, %v1909_v61 }
 0x192   :  { %v5992_v52 = vpop.permute.xlu0 %841  ;;  %v5994_v58 = vpop.permute.xlu1 %843  ;;  %v6045_v40 = vmul.f32 %v5678_v25, %v1910_v55 }
 0x193   :  { %v2266_v26 = vmul.f32 %v6048_v62, %v942_v12  ;;  %v2507_v28 = vmul.f32 %v6048_v62, %v1202_v60  ;;  %v2748_v55 = vmul.f32 %v6048_v62, %v1462_v14 }
 0x194   :  { %2721 = vrot.lane.b32.xlu0 %v2720_v8, %s5337_s2  ;;  %2723 = vrot.lane.b32.xlu1 %v2719_v41, %s5337_s2  ;;  %v2267_v5 = vmul.f32 %v6045_v40, %v942_v12  ;;  %v2508_v24 = vmul.f32 %v6045_v40, %v1202_v60  ;;  %v2749_v61 = vmul.f32 %v6045_v40, %v1462_v14 }
 0x196   :  { %v6005_v46 = vpop.permute.xlu0 %1348  ;;  %v6007_v1 = vpop.permute.xlu1 %1350 }
 0x198   :  { %1449 = vrot.lane.b32.xlu0 %v1448_v20, %s5338_s27  ;;  %1451 = vrot.lane.b32.xlu1 %v1447_v59, %s5338_s27  ;;  %v955_v59 = vstv %s4974_s21  ;;  %v1464_v20 = vmul.f32 %v1462_v14, %v6024_v39  ;;  %s6281_s21 = sld [smem:[#allocation8 + $0x12]] }
 0x199   :  { %v956_v13 = vmul.f32 %v955_v59, %v6027_v57  ;;  %v957_v49 = vmul.f32 %v955_v59, %v6024_v39  ;;  %v2278_v17 = vmul.f32 %v6048_v62, %v955_v59  ;;  %v2279_v15 = vmul.f32 %v6045_v40, %v955_v59 }
 0x19a   :  { %v6016_v22 = vpop.permute.xlu0 %2401  ;;  %v6018_v23 = vpop.permute.xlu1 %2403 }
 0x19b   :  { %8688 = vst [vmem:[#allocation29_spill] sm:$0xff] %v6016_v22  ;;  %8689 = vst [vmem:[#allocation30_spill] sm:$0xff] %v6018_v23 }
 0x19c   :  { %2495 = vrot.lane.b32.xlu0 %v2494_v33, %s5338_s27  ;;  %2497 = vrot.lane.b32.xlu1 %v2493_v48, %s5338_s27  ;;  %v1217_v33 = vmul.f32 %v1215_v31, %v6024_v39 }
 0x19e   :  { %v6029_v27 = vpop.permute.xlu0 %1101  ;;  %v6031_v47 = vpop.permute.xlu1 %1103 }
 0x19f   :  { %8692 = vst [vmem:[#allocation33_spill] sm:$0xff] %v6029_v27  ;;  %8693 = vst [vmem:[#allocation34_spill] sm:$0xff] %v6031_v47 }
 0x1a0   :  { %2736 = vrot.lane.b32.xlu0 %v2735_v11, %s5338_s27  ;;  %2738 = vrot.lane.b32.xlu1 %v2734_v18, %s5338_s27 }
 0x1a2   :  { %v6036_v63 = vpop.permute.xlu0 %2172  ;;  %v6038_v53 = vpop.permute.xlu1 %2174 }
 0x1a3   :  { %8694 = vst [vmem:[#allocation35_spill] sm:$0xff] %v6036_v63  ;;  %8695 = vst [vmem:[#allocation36_spill] sm:$0xff] %v6038_v53 }
 0x1a4   :  { %947 = vrot.lane.b32.xlu0 %v943_v56, %s5337_s2  ;;  %949 = vrot.lane.b32.xlu1 %v944_v34, %s5337_s2  ;;  %v1475_v56 = vstv %s5010_s23  ;;  %s6294_s23 = sld [smem:[#allocation8 + $0x15]] }
 0x1a6   :  { %v6050_v41 = vpop.permute.xlu0 %2642  ;;  %v6052_v50 = vpop.permute.xlu1 %2644 }
 0x1a7   :  { %8696 = vst [vmem:[#allocation37_spill] sm:$0xff] %v6050_v41  ;;  %8697 = vst [vmem:[#allocation38_spill] sm:$0xff] %v6052_v50 }
 0x1a8   :  { %1207 = vrot.lane.b32.xlu0 %v1203_v0, %s5337_s2  ;;  %1209 = vrot.lane.b32.xlu1 %v1204_v54, %s5337_s2  ;;  %v1476_v0 = vmul.f32 %v1475_v56, %v6027_v57  ;;  %v1477_v54 = vmul.f32 %v1475_v56, %v6024_v39 }
 0x1aa   :  { %v6058_v51 = vpop.permute.xlu0 %1361  ;;  %v6060_v25 = vpop.permute.xlu1 %1363 }
 0x1ab   :  { %8698 = vst [vmem:[#allocation39_spill] sm:$0xff] %v6058_v51  ;;  %8699 = vst [vmem:[#allocation40_spill] sm:$0xff] %v6060_v25 }
 0x1ac   :  { %2270 = vrot.lane.b32.xlu0 %v2266_v26, %s5337_s2  ;;  %2272 = vrot.lane.b32.xlu1 %v2267_v5, %s5337_s2  ;;  %v980_v26 = vstv %s4976_s25  ;;  %s6301_s25 = sld [smem:[#allocation8 + $0x27]] }
 0x1ad   :  { %v981_v14 = vmul.f32 %v980_v26, %v6027_v57 }
 0x1ae   :  { %v6066_v6 = vpop.permute.xlu0 %2413  ;;  %v6068_v8 = vpop.permute.xlu1 %2415 }
 0x1af   :  { %8700 = vst [vmem:[#allocation41_spill] sm:$0xff] %v6066_v6  ;;  %8701 = vst [vmem:[#allocation42_spill] sm:$0xff] %v6068_v8 }
 0x1b0   :  { %960 = vrot.lane.b32.xlu0 %v956_v13, %s5338_s27  ;;  %962 = vrot.lane.b32.xlu1 %v957_v49, %s5338_s27  ;;  %v2519_v13 = vmul.f32 %v6048_v62, %v1215_v31  ;;  %v2520_v49 = vmul.f32 %v6045_v40, %v1215_v31  ;;  %v985_v31 = vrot.slane %v981_v14, 1  ;;  %v2302_v14 = vmul.f32 %v6045_v40, %v980_v26 }
 0x1b2   :  { %v6074_v19 = vpop.permute.xlu0 %2654  ;;  %v6076_v7 = vpop.permute.xlu1 %2656 }
 0x1b3   :  { %8702 = vst [vmem:[#allocation43_spill] sm:$0xff] %v6074_v19  ;;  %8703 = vst [vmem:[#allocation44_spill] sm:$0xff] %v6076_v7 }
 0x1b4   :  { %1467 = vrot.lane.b32.xlu0 %v1463_v9, %s5337_s2  ;;  %1469 = vrot.lane.b32.xlu1 %v1464_v20, %s5337_s2  ;;  %v982_v9 = vmul.f32 %v980_v26, %v6024_v39  ;;  %v1240_v20 = vstv %s4994_s24  ;;  %s5016_s24 = sld [smem:[#allocation8 + $0x47]] }
 0x1b6   :  { %v6082_v21 = vpop.permute.xlu0 %869  ;;  %v6084_v48 = vpop.permute.xlu1 %871 }
 0x1b7   :  { %8704 = vst [vmem:[#allocation45_spill] sm:$0xff] %v6082_v21  ;;  %8705 = vst [vmem:[#allocation46_spill] sm:$0xff] %v6084_v48 }
 0x1b8   :  { %2511 = vrot.lane.b32.xlu0 %v2507_v28, %s5337_s2  ;;  %2513 = vrot.lane.b32.xlu1 %v2508_v24, %s5337_s2 }
 0x1ba   :  { %v6090_v32 = vpop.permute.xlu0 %1129  ;;  %v6092_v30 = vpop.permute.xlu1 %1131 }
 0x1bb   :  { %8706 = vst [vmem:[#allocation47_spill] sm:$0xff] %v6090_v32  ;;  %8707 = vst [vmem:[#allocation48_spill] sm:$0xff] %v6092_v30 }
 0x1bc   :  { %1220 = vrot.lane.b32.xlu0 %v1216_v2, %s5338_s27  ;;  %1222 = vrot.lane.b32.xlu1 %v1217_v33, %s5338_s27  ;;  %v2760_v2 = vmul.f32 %v6048_v62, %v1475_v56  ;;  %v2761_v33 = vmul.f32 %v6045_v40, %v1475_v56 }
 0x1be   :  { %v6098_v38 = vpop.permute.xlu0 %2198  ;;  %v6100_v18 = vpop.permute.xlu1 %2200 }
 0x1bf   :  { %8708 = vst [vmem:[#allocation49_spill] sm:$0xff] %v6098_v38  ;;  %8709 = vst [vmem:[#allocation50_spill] sm:$0xff] %v6100_v18 }
 0x1c0   :  { %2282 = vrot.lane.b32.xlu0 %v2278_v17, %s5338_s27  ;;  %2284 = vrot.lane.b32.xlu1 %v2279_v15, %s5338_s27  ;;  %v986_v17 = vrot.slane %v982_v9, 1  ;;  %v1241_v15 = vmul.f32 %v1240_v20, %v6027_v57  ;;  %v996_v9 = vstv %s4977_s3  ;;  %s6309_s3 = sld [smem:[#allocation8 + $0x39]] }
 0x1c2   :  { %v6106_v11 = vpop.permute.xlu0 %885  ;;  %v6108_v12 = vpop.permute.xlu1 %887  ;;  %v1245_v56 = vrot.slane %v1241_v15, 1  ;;  %v998_v15 = vmul.f32 %v996_v9, %v6024_v39 }
 0x1c3   :  { %8710 = vst [vmem:[#allocation51_spill] sm:$0xff] %v6106_v11  ;;  %8711 = vst [vmem:[#allocation52_spill] sm:$0xff] %v6108_v12 }
 0x1c4   :  { %2752 = vrot.lane.b32.xlu0 %v2748_v55, %s5337_s2  ;;  %2754 = vrot.lane.b32.xlu1 %v2749_v61, %s5337_s2  ;;  %v1242_v55 = vmul.f32 %v1240_v20, %v6024_v39 }
 0x1c6   :  { %v6114_v34 = vpop.permute.xlu0 %1389  ;;  %v6116_v60 = vpop.permute.xlu1 %1391 }
 0x1c7   :  { %8712 = vst [vmem:[#allocation53_spill] sm:$0xff] %v6114_v34  ;;  %8713 = vst [vmem:[#allocation54_spill] sm:$0xff] %v6116_v60  ;;  %v2543_v60 = vmul.f32 %v6045_v40, %v1240_v20 }
 0x1c8   :  { %1480 = vrot.lane.b32.xlu0 %v1476_v0, %s5338_s27  ;;  %1482 = vrot.lane.b32.xlu1 %v1477_v54, %s5338_s27  ;;  %v2301_v54 = vmul.f32 %v6048_v62, %v980_v26 }
 0x1ca   :  { %v6122_v5 = vpop.permute.xlu0 %2439  ;;  %v6124_v59 = vpop.permute.xlu1 %2441  ;;  %v2305_v29 = vrot.slane %v2301_v54, 1  ;;  %v1502_v54 = vmul.f32 %v1500_v37, %v6024_v39 }
 0x1cb   :  { %8714 = vst [vmem:[#allocation55_spill] sm:$0xff] %v6122_v5  ;;  %8715 = vst [vmem:[#allocation56_spill] sm:$0xff] %v6124_v59  ;;  %v2306_v5 = vrot.slane %v2302_v14, 1  ;;  %v1002_v14 = vrot.slane %v998_v15, 1 }
 0x1cc   :  { %2523 = vrot.lane.b32.xlu0 %v2519_v13, %s5338_s27  ;;  %2525 = vrot.lane.b32.xlu1 %v2520_v49, %s5338_s27  ;;  %v987_v13 = vsel %vm298_vm0, %v985_v31, %v986_v17  ;;  %v1246_v49 = vrot.slane %v1242_v55, 1  ;;  %v997_v31 = vmul.f32 %v996_v9, %v6027_v57  ;;  %v1501_v55 = vmul.f32 %v1500_v37, %v6027_v57 }
 0x1ce   :  { %v6132_v28 = vpop.permute.xlu0 %1145  ;;  %v6134_v24 = vpop.permute.xlu1 %1147  ;;  %v1247_v59 = vsel %vm298_vm0, %v1245_v56, %v1246_v49  ;;  %v1001_v56 = vrot.slane %v997_v31, 1 }
 0x1cf   :  { %8716 = vst [vmem:[#allocation57_spill] sm:$0xff] %v6132_v28  ;;  %8717 = vst [vmem:[#allocation58_spill] sm:$0xff] %v6134_v24 }
 0x1d0   :  { %2764 = vrot.lane.b32.xlu0 %v2760_v2, %s5338_s27  ;;  %2766 = vrot.lane.b32.xlu1 %v2761_v33, %s5338_s27 }
 0x1d2   :  { %v6142_v61 = vpop.permute.xlu0 %2213  ;;  %v6144_v0 = vpop.permute.xlu1 %2215 }
 0x1d3   :  { %8718 = vst [vmem:[#allocation59_spill] sm:$0xff] %v6142_v61  ;;  %8719 = vst [vmem:[#allocation60_spill] sm:$0xff] %v6144_v0 }
 0x1d4   :  { %988 = vrot.lane.b32.xlu0 %v987_v13, %s5337_s2  ;;  %990 = vrot.lane.b32.xlu1 %v986_v17, %s5337_s2  ;;  %v2307_v13 = vsel %vm298_vm0, %v2305_v29, %v2306_v5  ;;  %v1256_v29 = vstv %s4995_s10  ;;  %s6318_s10 = sld [smem:[#allocation8 + $0x2a]] }
 0x1d6   :  { %v6151_v2 = vpop.permute.xlu0 %2680  ;;  %v6153_v33 = vpop.permute.xlu1 %2682 }
 0x1d7   :  { %8720 = vst [vmem:[#allocation61_spill] sm:$0xff] %v6151_v2  ;;  %8721 = vst [vmem:[#allocation62_spill] sm:$0xff] %v6153_v33  ;;  %v1505_v33 = vrot.slane %v1501_v55, 1  ;;  %v2542_v2 = vmul.f32 %v6048_v62, %v1240_v20 }
 0x1d8   :  { %1248 = vrot.lane.b32.xlu0 %v1247_v59, %s5337_s2  ;;  %1250 = vrot.lane.b32.xlu1 %v1246_v49, %s5337_s2 }
 0x1d9   :  { %v2546_v55 = vrot.slane %v2542_v2, 1 }
 0x1da   :  { %v6160_v26 = vpop.permute.xlu0 %1405  ;;  %v6162_v17 = vpop.permute.xlu1 %1407 }
 0x1db   :  { %8722 = vst [vmem:[#allocation63_spill] sm:$0xff] %v6160_v26  ;;  %8723 = vst [vmem:[#allocation64_spill] sm:$0xff] %v6162_v17  ;;  %v1506_v26 = vrot.slane %v1502_v54, 1  ;;  %v1003_v17 = vsel %vm298_vm0, %v1001_v56, %v1002_v14  ;;  %v2547_v54 = vrot.slane %v2543_v60, 1  ;;  %v1258_v56 = vmul.f32 %v1256_v29, %v6024_v39 }
 0x1dc   :  { %2308 = vrot.lane.b32.xlu0 %v2307_v13, %s5337_s2  ;;  %2310 = vrot.lane.b32.xlu1 %v2306_v5, %s5337_s2  ;;  %v1257_v13 = vmul.f32 %v1256_v29, %v6027_v57  ;;  %v2317_v60 = vmul.f32 %v6045_v40, %v996_v9 }
 0x1dd   :  { %v1507_v15 = vsel %vm298_vm0, %v1505_v33, %v1506_v26 }
 0x1de   :  { %v6169_v59 = vpop.permute.xlu0 %2454  ;;  %v6171_v49 = vpop.permute.xlu1 %2456  ;;  %v1261_v33 = vrot.slane %v1257_v13, 1  ;;  %v2321_v34 = vrot.slane %v2317_v60, 1 }
 0x1df   :  { %8724 = vst [vmem:[#allocation65_spill] sm:$0xff] %v6169_v59  ;;  %8725 = vst [vmem:[#allocation66_spill] sm:$0xff] %v6171_v49  ;;  %v1516_v49 = vstv %s5013_s28  ;;  %s6322_s28 = sld [smem:[#allocation8 + $0x3c]] }
 0x1e0   :  { %1004 = vrot.lane.b32.xlu0 %v1003_v17, %s5338_s27  ;;  %1006 = vrot.lane.b32.xlu1 %v1002_v14, %s5338_s27  ;;  %v2316_v14 = vmul.f32 %v6048_v62, %v996_v9  ;;  %v1518_v13 = vmul.f32 %v1516_v49, %v6024_v39 }
 0x1e2   :  { %v6178_v31 = vpop.permute.xlu0 %2695  ;;  %v6180_v5 = vpop.permute.xlu1 %2697  ;;  %v1522_v60 = vrot.slane %v1518_v13, 1 }
 0x1e3   :  { %8726 = vst [vmem:[#allocation67_spill] sm:$0xff] %v6178_v31  ;;  %8727 = vst [vmem:[#allocation68_spill] sm:$0xff] %v6180_v5  ;;  %v2548_v5 = vsel %vm298_vm0, %v2546_v55, %v2547_v54  ;;  %v1262_v31 = vrot.slane %v1258_v56, 1  ;;  %v2784_v55 = vmul.f32 %v6045_v40, %v1500_v37 }
 0x1e4   :  { %1508 = vrot.lane.b32.xlu0 %v1507_v15, %s5337_s2  ;;  %1510 = vrot.lane.b32.xlu1 %v1506_v26, %s5337_s2  ;;  %v2320_v26 = vrot.slane %v2316_v14, 1 }
 0x1e5   :  { %v1263_v59 = vsel %vm298_vm0, %v1261_v33, %v1262_v31  ;;  %v2788_v33 = vrot.slane %v2784_v55, 1  ;;  %v2798_v55 = vmul.f32 %v6048_v62, %v1516_v49 }
 0x1e6   :  { %v6187_v20 = vpop.permute.xlu0 %913  ;;  %v6189_v17 = vpop.permute.xlu1 %915  ;;  %v2322_v56 = vsel %vm298_vm0, %v2320_v26, %v2321_v34 }
 0x1e7   :  { %8728 = vst [vmem:[#allocation69_spill] sm:$0xff] %v6187_v20  ;;  %8729 = vst [vmem:[#allocation70_spill] sm:$0xff] %v6189_v17  ;;  %v2783_v17 = vmul.f32 %v6048_v62, %v1500_v37 }
 0x1e8   :  { %2549 = vrot.lane.b32.xlu0 %v2548_v5, %s5337_s2  ;;  %2551 = vrot.lane.b32.xlu1 %v2547_v54, %s5337_s2  ;;  %v1517_v54 = vmul.f32 %v1516_v49, %v6027_v57 }
 0x1e9   :  { %v2787_v14 = vrot.slane %v2783_v17, 1 }
 0x1ea   :  { %v6196_v2 = vpop.permute.xlu0 %1173  ;;  %v6198_v15 = vpop.permute.xlu1 %1175 }
 0x1eb   :  { %8730 = vst [vmem:[#allocation71_spill] sm:$0xff] %v6196_v2  ;;  %8731 = vst [vmem:[#allocation72_spill] sm:$0xff] %v6198_v15  ;;  %v2558_v15 = vmul.f32 %v6045_v40, %v1256_v29  ;;  %v1544_v2 = vstv %s5015_s14  ;;  %s6397_s14 = sld [smem:[#allocation8 + $0x5]] }
 0x1ec   :  { %1264 = vrot.lane.b32.xlu0 %v1263_v59, %s5338_s27  ;;  %1266 = vrot.lane.b32.xlu1 %v1262_v31, %s5338_s27  ;;  %v1521_v31 = vrot.slane %v1517_v54, 1 }
 0x1ed   :  { %v2562_v13 = vrot.slane %v2558_v15, 1 }
 0x1ee   :  { %v6205_v9 = vpop.permute.xlu0 %2239  ;;  %v6207_v5 = vpop.permute.xlu1 %2241  ;;  %v1523_v26 = vsel %vm298_vm0, %v1521_v31, %v1522_v60  ;;  %v2802_v31 = vrot.slane %v2798_v55, 1 }
 0x1ef   :  { %8732 = vst [vmem:[#allocation73_spill] sm:$0xff] %v6205_v9  ;;  %8733 = vst [vmem:[#allocation74_spill] sm:$0xff] %v6207_v5  ;;  %v2789_v5 = vsel %vm298_vm0, %v2787_v14, %v2788_v33  ;;  %v2557_v9 = vmul.f32 %v6048_v62, %v1256_v29  ;;  %v1024_v14 = vstv %s4979_s4  ;;  %s6326_s4 = sld [smem:[#allocation8 + $0x1]] }
 0x1f0   :  { %2323 = vrot.lane.b32.xlu0 %v2322_v56, %s5338_s27  ;;  %2325 = vrot.lane.b32.xlu1 %v2321_v34, %s5338_s27  ;;  %v2799_v56 = vmul.f32 %v6045_v40, %v1516_v49  ;;  %v1284_v49 = vstv %s4997_s30  ;;  %s6334_s30 = sld [smem:[#allocation8 + $0x2]] }
 0x1f1   :  { %v2561_v54 = vrot.slane %v2557_v9, 1  ;;  %v1026_v9 = vmul.f32 %v1024_v14, %v6024_v39  ;;  %v1285_v55 = vmul.f32 %v1284_v49, %v6027_v57 }
 0x1f2   :  { %v6214_v37 = vpop.permute.xlu0 %929  ;;  %v6216_v59 = vpop.permute.xlu1 %931 }
 0x1f3   :  { %8734 = vst [vmem:[#allocation75_spill] sm:$0xff] %v6214_v37  ;;  %8735 = vst [vmem:[#allocation76_spill] sm:$0xff] %v6216_v59 }
 0x1f4   :  { %2790 = vrot.lane.b32.xlu0 %v2789_v5, %s5337_s2  ;;  %2792 = vrot.lane.b32.xlu1 %v2788_v33, %s5337_s2  ;;  %v1025_v33 = vmul.f32 %v1024_v14, %v6027_v57 }
 0x1f5   :  { %v6378_v0 = vstv %s6326_s4  ;;  %s6823_s4 = sld [smem:[#allocation8 + $0xb]] }
 0x1f6   :  { %v6223_v17 = vpop.permute.xlu0 %1433  ;;  %v6225_v34 = vpop.permute.xlu1 %1435 }
 0x1f7   :  { %8736 = vst [vmem:[#allocation77_spill] sm:$0xff] %v6223_v17  ;;  %8737 = vst [vmem:[#allocation78_spill] sm:$0xff] %v6225_v34  ;;  %v2563_v34 = vsel %vm298_vm0, %v2561_v54, %v2562_v13  ;;  %v2803_v17 = vrot.slane %v2799_v56, 1  ;;  %v1286_v54 = vmul.f32 %v1284_v49, %v6024_v39  ;;  %v2342_v56 = vmul.f32 %v6048_v62, %v1024_v14 }
 0x1f8   :  { %1524 = vrot.lane.b32.xlu0 %v1523_v26, %s5338_s27  ;;  %1526 = vrot.lane.b32.xlu1 %v1522_v60, %s5338_s27  ;;  %v1029_v26 = vrot.slane %v1025_v33, 2 }
 0x1fa   :  { %v6232_v29 = vpop.permute.xlu0 %2480  ;;  %v6234_v5 = vpop.permute.xlu1 %2482 }
 0x1fb   :  { %8738 = vst [vmem:[#allocation79_spill] sm:$0xff] %v6232_v29  ;;  %8739 = vst [vmem:[#allocation80_spill] sm:$0xff] %v6234_v5  ;;  %v2804_v5 = vsel %vm298_vm0, %v2802_v31, %v2803_v17  ;;  %v1030_v29 = vrot.slane %v1026_v9, 2  ;;  %v2343_v31 = vmul.f32 %v6045_v40, %v1024_v14  ;;  %v1040_v9 = vstv %s4980_s29  ;;  %s6339_s29 = sld [smem:[#allocation8 + $0x4]] }
 0x1fc   :  { %2564 = vrot.lane.b32.xlu0 %v2563_v34, %s5338_s27  ;;  %2566 = vrot.lane.b32.xlu1 %v2562_v13, %s5338_s27 }
 0x1fd   :  { %v1031_v33 = vsel %vm355_vm1, %v1029_v26, %v1030_v29  ;;  %v2347_v59 = vrot.slane %v2343_v31, 2  ;;  %v1041_v26 = vmul.f32 %v1040_v9, %v6027_v57 }
 0x1fe   :  { %v6241_v15 = vpop.permute.xlu0 %1189  ;;  %v6243_v60 = vpop.permute.xlu1 %1191 }
 0x1ff   :  { %8740 = vst [vmem:[#allocation81_spill] sm:$0xff] %v6241_v15  ;;  %8741 = vst [vmem:[#allocation82_spill] sm:$0xff] %v6243_v60  ;;  %v1289_v60 = vrot.slane %v1285_v55, 2  ;;  %v1290_v15 = vrot.slane %v1286_v54, 2  ;;  %v1042_v55 = vmul.f32 %v1040_v9, %v6024_v39  ;;  %v1545_v54 = vmul.f32 %v1544_v2, %v6027_v57 }
 0x200   :  { %2805 = vrot.lane.b32.xlu0 %v2804_v5, %s5338_s27  ;;  %2807 = vrot.lane.b32.xlu1 %v2803_v17, %s5338_s27 }
 0x201   :  { %v1046_v31 = vrot.slane %v1042_v55, 2 }
 0x202   :  { %v6250_v34 = vpop.permute.xlu0 %2254  ;;  %v6252_v13 = vpop.permute.xlu1 %2256 }
 0x203   :  { %8742 = vst [vmem:[#allocation83_spill] sm:$0xff] %v6250_v34  ;;  %8743 = vst [vmem:[#allocation84_spill] sm:$0xff] %v6252_v13  ;;  %v2346_v34 = vrot.slane %v2342_v56, 2  ;;  %v1291_v13 = vsel %vm355_vm1, %v1289_v60, %v1290_v15  ;;  %v1546_v56 = vmul.f32 %v1544_v2, %v6024_v39 }
 0x204   :  { %1032 = vrot.lane.b32.xlu0 %v1031_v33, %s5337_s2  ;;  %1034 = vrot.lane.b32.xlu1 %v1030_v29, %s5337_s2  ;;  %v1045_v33 = vrot.slane %v1041_v26, 2 }
 0x205   :  { %v2348_v60 = vsel %vm355_vm1, %v2346_v34, %v2347_v59  ;;  %v2584_v34 = vmul.f32 %v6045_v40, %v1284_v49 }
 0x206   :  { %v6259_v5 = vpop.permute.xlu0 %2721  ;;  %v6261_v17 = vpop.permute.xlu1 %2723 }
 0x207   :  { %8744 = vst [vmem:[#allocation85_spill] sm:$0xff] %v6259_v5  ;;  %8745 = vst [vmem:[#allocation86_spill] sm:$0xff] %v6261_v17  ;;  %v1549_v17 = vrot.slane %v1545_v54, 2  ;;  %v2583_v5 = vmul.f32 %v6048_v62, %v1284_v49 }
 0x208   :  { %1292 = vrot.lane.b32.xlu0 %v1291_v13, %s5337_s2  ;;  %1294 = vrot.lane.b32.xlu1 %v1290_v15, %s5337_s2 }
 0x209   :  { %v2587_v49 = vrot.slane %v2583_v5, 2  ;;  %v2357_v5 = vmul.f32 %v6048_v62, %v1040_v9 }
 0x20a   :  { %v6268_v14 = vpop.permute.xlu0 %1449  ;;  %v6270_v29 = vpop.permute.xlu1 %1451 }
 0x20b   :  { %8746 = vst [vmem:[#allocation87_spill] sm:$0xff] %v6268_v14  ;;  %8747 = vst [vmem:[#allocation88_spill] sm:$0xff] %v6270_v29  ;;  %v1550_v14 = vrot.slane %v1546_v56, 2  ;;  %v1047_v29 = vsel %vm355_vm1, %v1045_v33, %v1046_v31  ;;  %v2588_v56 = vrot.slane %v2584_v34, 2 }
 0x20c   :  { %2349 = vrot.lane.b32.xlu0 %v2348_v60, %s5337_s2  ;;  %2351 = vrot.lane.b32.xlu1 %v2347_v59, %s5337_s2  ;;  %v6290_v59 = vstv %s4998_s0  ;;  %s6513_s0 = sld [smem:[#allocation8 + $0x1b]] }
 0x20d   :  { %v1551_v54 = vsel %vm355_vm1, %v1549_v17, %v1550_v14  ;;  %v1302_v60 = vmul.f32 %v6290_v59, %v6024_v39  ;;  %v2598_v28 = vmul.f32 %v6048_v62, %v6290_v59  ;;  %v2599_v18 = vmul.f32 %v6045_v40, %v6290_v59 }
 0x20e   :  { %v6277_v13 = vpop.permute.xlu0 %2495  ;;  %v6279_v15 = vpop.permute.xlu1 %2497 }
 0x20f   :  { %8748 = vst [vmem:[#allocation89_spill] sm:$0xff] %v6277_v13  ;;  %8749 = vst [vmem:[#allocation90_spill] sm:$0xff] %v6279_v15  ;;  %v820_v15 = vstv %s6281_s21  ;;  %v2602_v11 = vrot.slane %v2598_v28, 2  ;;  %v2603_v6 = vrot.slane %v2599_v18, 2  ;;  %s6527_s21 = sld [smem:[#allocation8 + $0x2d]] }
 0x210   :  { %1048 = vrot.lane.b32.xlu0 %v1047_v29, %s5338_s27  ;;  %1050 = vrot.lane.b32.xlu1 %v1046_v31, %s5338_s27  ;;  %v1301_v29 = vmul.f32 %v6290_v59, %v6027_v57  ;;  %v2589_v31 = vsel %vm355_vm1, %v2587_v49, %v2588_v56  ;;  %v2824_v49 = vmul.f32 %v6048_v62, %v1544_v2 }
 0x211   :  { %v2604_v50 = vsel %vm355_vm1, %v2602_v11, %v2603_v6 }
 0x212   :  { %v6296_v26 = vpop.permute.xlu0 %2736  ;;  %v6298_v55 = vpop.permute.xlu1 %2738  ;;  %v1305_v34 = vrot.slane %v1301_v29, 2  ;;  %v2825_v29 = vmul.f32 %v6045_v40, %v1544_v2  ;;  %v1080_v2 = vstv %s6286_s1  ;;  %s6543_s1 = sld [smem:[#allocation8 + $0x1e]] }
 0x213   :  { %8750 = vst [vmem:[#allocation91_spill] sm:$0xff] %v6296_v26  ;;  %8751 = vst [vmem:[#allocation92_spill] sm:$0xff] %v6298_v55  ;;  %v1306_v55 = vrot.slane %v1302_v60, 2  ;;  %v2361_v60 = vrot.slane %v2357_v5, 2  ;;  %v2828_v5 = vrot.slane %v2824_v49, 2  ;;  %v6361_v49 = vstv %s6311_s26  ;;  %s6785_s26 = sld [smem:[#allocation8 + $0xd]] }
 0x214   :  { %1552 = vrot.lane.b32.xlu0 %v1551_v54, %s5337_s2  ;;  %1554 = vrot.lane.b32.xlu1 %v1550_v14, %s5337_s2  ;;  %v2358_v54 = vmul.f32 %v6045_v40, %v1040_v9  ;;  %v6403_v59 = vmul.f32 %v1080_v2, %v5687_v36 }
 0x215   :  { %v1307_v9 = vsel %vm355_vm1, %v1305_v34, %v1306_v55 }
 0x216   :  { %v6313_v17 = vpop.permute.xlu0 %947  ;;  %v6315_v33 = vpop.permute.xlu1 %949 }
 0x217   :  { %8752 = vst [vmem:[#allocation93_spill] sm:$0xff] %v6313_v17  ;;  %8753 = vst [vmem:[#allocation94_spill] sm:$0xff] %v6315_v33  ;;  %v849_v33 = vstv %s6294_s23  ;;  %v1109_v17 = vstv %s6301_s25  ;;  %s6567_s23 = sld [smem:[#allocation8 + $0x30]] }
 0x218   :  { %2590 = vrot.lane.b32.xlu0 %v2589_v31, %s5337_s2  ;;  %2592 = vrot.lane.b32.xlu1 %v2588_v56, %s5337_s2  ;;  %v2362_v31 = vrot.slane %v2358_v54, 2  ;;  %v1560_v56 = vstv %s5016_s24  ;;  %v2829_v54 = vrot.slane %v2825_v29, 2  ;;  %v6364_v29 = vstv %s6318_s10  ;;  %s6666_s25 = sld [smem:[#allocation8 + $0x7]] }
 0x219   :  { %v850_v38 = vmul.f32 %v849_v33, %v5687_v36  ;;  %v6409_v30 = vmul.f32 %v1109_v17, %v5684_v35  ;;  %v2839_v8 = vmul.f32 %v6048_v62, %v1560_v56  ;;  %v2840_v48 = vmul.f32 %v6045_v40, %v1560_v56  ;;  %s6680_s24 = sld [smem:[#allocation8 + $0x42]] }
 0x21a   :  { %v6328_v14 = vpop.permute.xlu0 %1207  ;;  %v6330_v26 = vpop.permute.xlu1 %1209  ;;  %v6440_v18 = vmul.f32 %v5694_v10, %v849_v33  ;;  %s6792_s10 = sld [smem:[#allocation8 + $0xa]] }
 0x21b   :  { %8754 = vst [vmem:[#allocation95_spill] sm:$0xff] %v6328_v14  ;;  %8755 = vst [vmem:[#allocation96_spill] sm:$0xff] %v6330_v26  ;;  %v6348_v26 = vstv %s6292_s22  ;;  %v1562_v14 = vmul.f32 %v1560_v56, %v6024_v39  ;;  %v854_v21 = vrot.slane %v850_v38, 1  ;;  %v6447_v38 = vmul.f32 %v5697_v44, %v1080_v2  ;;  %s6551_s22 = sld [smem:[#allocation8 + $0x3f]] }
 0x21c   :  { %1308 = vrot.lane.b32.xlu0 %v1307_v9, %s5338_s27  ;;  %1310 = vrot.lane.b32.xlu1 %v1306_v55, %s5338_s27  ;;  %v2363_v55 = vsel %vm355_vm1, %v2361_v60, %v2362_v31  ;;  %v1561_v9 = vmul.f32 %v1560_v56, %v6027_v57  ;;  %v6370_v60 = vmul.f32 %v820_v15, %v5687_v36 }
 0x21d   :  { %v1566_v24 = vrot.slane %v1562_v14, 2  ;;  %v6400_v14 = vmul.f32 %v820_v15, %v5684_v35  ;;  %8760 = vst [vmem:[#allocation101_spill] sm:$0xff] %v6409_v30  ;;  %v6419_v32 = vmul.f32 %v6348_v26, %v5687_v36  ;;  %v6470_v25 = vmul.f32 %v5694_v10, %v6348_v26 }
 0x21e   :  { %v6343_v13 = vpop.permute.xlu0 %2270  ;;  %v6345_v34 = vpop.permute.xlu1 %2272  ;;  %v1565_v61 = vrot.slane %v1561_v9, 2  ;;  %v6406_v9 = vmul.f32 %v1080_v2, %v5684_v35 }
 0x21f   :  { %8756 = vst [vmem:[#allocation97_spill] sm:$0xff] %v6343_v13  ;;  %8757 = vst [vmem:[#allocation98_spill] sm:$0xff] %v6345_v34  ;;  %v6358_v13 = vstv %s6309_s3  ;;  %v6367_v34 = vstv %s6322_s28  ;;  %s6709_s3 = sld [smem:[#allocation8 + $0x8]] }
 0x220   :  { %2364 = vrot.lane.b32.xlu0 %v2363_v55, %s5338_s27  ;;  %2366 = vrot.lane.b32.xlu1 %v2362_v31, %s5338_s27  ;;  %v2830_v55 = vsel %vm355_vm1, %v2828_v5, %v2829_v54  ;;  %v6381_v31 = vstv %s6334_s30  ;;  %v6395_v5 = vstv %s6339_s29  ;;  %v1567_v12 = vsel %vm355_vm1, %v1565_v61, %v1566_v24  ;;  %8767 = vst [vmem:[#allocation108_spill] sm:$0xff] %v6470_v25  ;;  %s6809_s28 = sld [smem:[#allocation8 + $0x21]] }
 0x221   :  { %v6437_v61 = vmul.f32 %v5697_v44, %v849_v33  ;;  %v6444_v28 = vmul.f32 %v6358_v13, %v5687_v36  ;;  %s6838_s30 = sld [smem:[#allocation8 + $0x33]] }
 0x222   :  { %v6372_v37 = vpop.permute.xlu0 %960  ;;  %v6374_v20 = vpop.permute.xlu1 %962  ;;  %s6855_s29 = sld [smem:[#allocation8 + $0xe]] }
 0x223   :  { %8758 = vst [vmem:[#allocation99_spill] sm:$0xff] %v6372_v37  ;;  %8759 = vst [vmem:[#allocation100_spill] sm:$0xff] %v6374_v20  ;;  %v6389_v37 = vmul.f32 %v849_v33, %v5684_v35  ;;  %v1110_v20 = vmul.f32 %v1109_v17, %v5687_v36  ;;  %v2184_v11 = vrot.slane %v6437_v61, 1  ;;  %v894_v61 = vmul.f32 %v6361_v49, %v5687_v36 }
 0x224   :  { %2831 = vrot.lane.b32.xlu0 %v2830_v55, %s5337_s2  ;;  %2833 = vrot.lane.b32.xlu1 %v2829_v54, %s5337_s2  ;;  %v6412_v55 = vmul.f32 %v5697_v44, %v820_v15  ;;  %v6415_v54 = vmul.f32 %v5694_v10, %v820_v15  ;;  %v6430_v15 = vmul.f32 %v6348_v26, %v5684_v35 }
 0x225   :  { %v1114_v41 = vrot.slane %v1110_v20, 1  ;;  %v6457_v20 = vmul.f32 %v5697_v44, %v1109_v17  ;;  %v8768_v51 = vrot.slane %v6389_v37, 1  ;;  %v898_v27 = vrot.slane %v894_v61, 2 }
 0x226   :  { %v6421_v7 = vpop.permute.xlu0 %1467  ;;  %v6423_v19 = vpop.permute.xlu1 %1469 }
 0x227   :  { %8761 = vst [vmem:[#allocation102_spill] sm:$0xff] %v6421_v7  ;;  %8762 = vst [vmem:[#allocation103_spill] sm:$0xff] %v6423_v19  ;;  %v6465_v19 = vmul.f32 %v5697_v44, %v6348_v26  ;;  %v2843_v7 = vrot.slane %v2839_v8, 2  ;;  %v6475_v53 = vsel %vm298_vm0, %v854_v21, %v8768_v51  ;;  %v8769_v8 = vrot.slane %v6409_v30, 1 }
 0x228   :  { %1568 = vrot.lane.b32.xlu0 %v1567_v12, %s5338_s27  ;;  %1570 = vrot.lane.b32.xlu1 %v1566_v24, %s5338_s27  ;;  %v6450_v12 = vmul.f32 %v5694_v10, %v1080_v2  ;;  %v6454_v24 = vmul.f32 %v6358_v13, %v5684_v35  ;;  %v2844_v2 = vrot.slane %v2840_v48, 2  ;;  %v1374_v51 = vrot.slane %v6444_v28, 1 }
 0x229   :  { %8766 = vst [vmem:[#allocation107_spill] sm:$0xff] %v6465_v19  ;;  %v6488_v48 = vsel %vm298_vm0, %v1114_v41, %v8769_v8  ;;  %v6509_v28 = vmul.f32 %v6361_v49, %v5684_v35  ;;  %v6519_v21 = vmul.f32 %v6364_v29, %v5684_v35  ;;  %v2221_v26 = vmul.f32 %v5697_v44, %v6361_v49 }
 0x22a   :  { %8763 = vst [vmem:[#allocation104_spill] sm:$0xff] %v6450_v12  ;;  %v6459_v33 = vpop.permute.xlu0 %2511  ;;  %v6461_v56 = vpop.permute.xlu1 %2513  ;;  %8770 = vst [vmem:[#allocation109_spill] sm:$0xff] %v6488_v48  ;;  %v2845_v8 = vsel %vm355_vm1, %v2843_v7, %v2844_v2  ;;  %v1414_v7 = vmul.f32 %v6367_v34, %v5687_v36  ;;  %v564_v48 = vmul.f32 %v6378_v0, %v5687_v36 }
 0x22b   :  { %8764 = vst [vmem:[#allocation105_spill] sm:$0xff] %v6459_v33  ;;  %8765 = vst [vmem:[#allocation106_spill] sm:$0xff] %v6461_v56  ;;  %v6478_v33 = vmul.f32 %v5694_v10, %v1109_v17  ;;  %v6483_v56 = vstv %s6397_s14  ;;  %v2425_v17 = vrot.slane %v6457_v20, 1  ;;  %v1154_v20 = vmul.f32 %v6364_v29, %v5687_v36  ;;  %s6918_s14 = sld [smem:[#allocation8 + $0x10]] }
 0x22c   :  { %2605 = vrot.lane.b32.xlu0 %v2604_v50, %s5338_s27  ;;  %2607 = vrot.lane.b32.xlu1 %v2603_v6, %s5338_s27  ;;  %v2662_v50 = vmul.f32 %v5697_v44, %v6358_v13  ;;  %v6499_v6 = vmul.f32 %v5694_v10, %v6358_v13  ;;  %8773 = vst [vmem:[#allocation112_spill] sm:$0xff] %v6519_v21  ;;  %v2225_v22 = vrot.slane %v2221_v26, 2 }
 0x22d   :  { %v6535_v13 = vmul.f32 %v6367_v34, %v5684_v35  ;;  %v8784_v61 = vrot.slane %v6478_v33, 1 }
 0x22e   :  { %v6501_v25 = vpop.permute.xlu0 %1220  ;;  %v6503_v41 = vpop.permute.xlu1 %1222  ;;  %v2666_v63 = vrot.slane %v2662_v50, 1 }
 0x22f   :  { %8771 = vst [vmem:[#allocation110_spill] sm:$0xff] %v6501_v25  ;;  %8772 = vst [vmem:[#allocation111_spill] sm:$0xff] %v6503_v41  ;;  %v6525_v41 = vmul.f32 %v5694_v10, %v6361_v49  ;;  %v2462_v25 = vmul.f32 %v5697_v44, %v6364_v29  ;;  %v6541_v49 = vmul.f32 %v5694_v10, %v6364_v29 }
 0x230   :  { %2846 = vrot.lane.b32.xlu0 %v2845_v8, %s5338_s27  ;;  %2848 = vrot.lane.b32.xlu1 %v2844_v2, %s5338_s27  ;;  %8775 = vst [vmem:[#allocation114_spill] sm:$0xff] %v6535_v13  ;;  %v2703_v8 = vmul.f32 %v5697_v44, %v6367_v34  ;;  %v6549_v2 = vmul.f32 %v5694_v10, %v6367_v34  ;;  %v1158_v34 = vrot.slane %v1154_v20, 2 }
 0x231   :  { %8774 = vst [vmem:[#allocation113_spill] sm:$0xff] %v6525_v41  ;;  %8776 = vst [vmem:[#allocation115_spill] sm:$0xff] %v6541_v49  ;;  %v565_v29 = vmul.f32 %v6378_v0, %v5684_v35  ;;  %v2466_v47 = vrot.slane %v2462_v25, 2  ;;  %v6593_v50 = vsel %vm298_vm0, %v2425_v17, %v8784_v61  ;;  %v937_v61 = vstv %s6513_s0  ;;  %s6931_s0 = sld [smem:[#allocation8 + $0x45]] }
 0x232   :  { %8777 = vst [vmem:[#allocation116_spill] sm:$0xff] %v6549_v2  ;;  %v6553_v19 = vpop.permute.xlu0 %2282  ;;  %v6555_v30 = vpop.permute.xlu1 %2284  ;;  %v2707_v23 = vrot.slane %v2703_v8, 2  ;;  %v8783_v8 = vrot.slane %v6454_v24, 1 }
 0x233   :  { %8778 = vst [vmem:[#allocation117_spill] sm:$0xff] %v6553_v19  ;;  %8779 = vst [vmem:[#allocation118_spill] sm:$0xff] %v6555_v30  ;;  %v1418_v30 = vrot.slane %v1414_v7, 2  ;;  %v1916_v7 = vmul.f32 %v5694_v10, %v6378_v0  ;;  %v8785_v19 = vrot.slane %v6499_v6, 1 }
 0x234   :  { %568 = vrot.lane.b32.xlu0 %v564_v48, %s5337_s2  ;;  %570 = vrot.lane.b32.xlu1 %v565_v29, %s5337_s2  ;;  %v1915_v48 = vmul.f32 %v5697_v44, %v6378_v0  ;;  %v8782_v29 = vrot.slane %v6440_v18, 1  ;;  %v6588_v20 = vsel %vm298_vm0, %v1374_v51, %v8783_v8  ;;  %v8788_v8 = vrot.slane %v6525_v41, 2 }
 0x235   :  { %v6598_v0 = vsel %vm298_vm0, %v2666_v63, %v8785_v19  ;;  %v8790_v63 = vrot.slane %v6535_v13, 2  ;;  %v8792_v19 = vrot.slane %v6541_v49, 2 }
 0x236   :  { %v6572_v12 = vpop.permute.xlu0 %2752  ;;  %v6574_v26 = vpop.permute.xlu1 %2754  ;;  %v6583_v25 = vsel %vm298_vm0, %v2184_v11, %v8782_v29  ;;  %v8787_v29 = vrot.slane %v6519_v21, 2  ;;  %v6613_v17 = vsel %vm355_vm1, %v2225_v22, %v8788_v8  ;;  %v8794_v22 = vrot.slane %v6549_v2, 2 }
 0x237   :  { %8780 = vst [vmem:[#allocation119_spill] sm:$0xff] %v6572_v12  ;;  %8781 = vst [vmem:[#allocation120_spill] sm:$0xff] %v6574_v26  ;;  %v8786_v26 = vrot.slane %v6509_v28, 2  ;;  %v1965_v21 = vmul.f32 %v5697_v44, %v6483_v56 }
 0x238   :  { %v6608_v51 = vsel %vm355_vm1, %v1158_v34, %v8787_v29  ;;  %8789 = vst [vmem:[#allocation121_spill] sm:$0xff] %v6613_v17  ;;  %1919 = vrot.lane.b32.xlu0 %v1915_v48, %s5337_s2  ;;  %1921 = vrot.lane.b32.xlu1 %v1916_v7, %s5337_s2  ;;  %v6626_v34 = vsel %vm355_vm1, %v2466_v47, %v8792_v19  ;;  %v968_v29 = vstv %s6543_s1  ;;  %v1457_v48 = vstv %s6551_s22  ;;  %s7293_s1 = sld [smem:[#allocation9 + $0x1]] }
 0x239   :  { %v6603_v11 = vsel %vm355_vm1, %v898_v27, %v8786_v26  ;;  %v6621_v27 = vsel %vm355_vm1, %v1418_v30, %v8790_v63  ;;  %8793 = vst [vmem:[#allocation123_spill] sm:$0xff] %v6626_v34  ;;  %v1197_v26 = vstv %s6527_s21  ;;  %v6633_v8 = vsel %vm355_vm1, %v2707_v23, %v8794_v22  ;;  %s7017_s21 = sld [smem:[#allocation8 + $0x11]] }
 0x23a   :  { %8791 = vst [vmem:[#allocation122_spill] sm:$0xff] %v6621_v27  ;;  %8795 = vst [vmem:[#allocation124_spill] sm:$0xff] %v6633_v8  ;;  %v6636_v7 = vpop.permute.xlu0 %1480  ;;  %v6638_v12 = vpop.permute.xlu1 %1482  ;;  %v577_v30 = vmul.f32 %v6381_v31, %v5687_v36  ;;  %v578_v47 = vmul.f32 %v6381_v31, %v5684_v35  ;;  %v6645_v63 = vmul.f32 %v937_v61, %v6027_v57  ;;  %v6664_v8 = vstv %s6567_s23  ;;  %s7319_s22 = sld [smem:[#allocation9 + $0x2]] }
 0x23b   :  { %8796 = vst [vmem:[#allocation125_spill] sm:$0xff] %v6636_v7  ;;  %8797 = vst [vmem:[#allocation126_spill] sm:$0xff] %v6638_v12  ;;  %v6648_v19 = vmul.f32 %v937_v61, %v6024_v39  ;;  %v602_v23 = vmul.f32 %v6395_v5, %v5687_v36  ;;  %v603_v22 = vmul.f32 %v6395_v5, %v5684_v35  ;;  %s7402_s23 = sld [smem:[#allocation9 + $0x3]] }
 0x23c   :  { %8798 = vst [vmem:[#allocation127_spill] sm:$0xff] %v6645_v63  ;;  %v6655_v12 = vmul.f32 %v1197_v26, %v6027_v57  ;;  %581 = vrot.lane.b32.xlu0 %v577_v30, %s5338_s27  ;;  %583 = vrot.lane.b32.xlu1 %v578_v47, %s5338_s27  ;;  %v969_v7 = vmul.f32 %v968_v29, %v6027_v57 }
 0x23d   :  { %8799 = vst [vmem:[#allocation128_spill] sm:$0xff] %v6648_v19  ;;  %v6661_v2 = vmul.f32 %v968_v29, %v6024_v39  ;;  %v6669_v49 = vmul.f32 %v1197_v26, %v6024_v39  ;;  %v6672_v34 = vmul.f32 %v6048_v62, %v937_v61  ;;  %v6678_v30 = vmul.f32 %v1457_v48, %v6027_v57 }
 0x23e   :  { %8800 = vst [vmem:[#allocation129_spill] sm:$0xff] %v6655_v12  ;;  %v6675_v12 = vmul.f32 %v6045_v40, %v937_v61  ;;  %v6682_v47 = vpop.permute.xlu0 %2523  ;;  %v6684_v13 = vpop.permute.xlu1 %2525  ;;  %v1927_v27 = vmul.f32 %v5697_v44, %v6381_v31  ;;  %v1951_v61 = vmul.f32 %v5694_v10, %v6395_v5  ;;  %v1229_v19 = vmul.f32 %v6664_v8, %v6027_v57 }
 0x23f   :  { %8801 = vst [vmem:[#allocation130_spill] sm:$0xff] %v6669_v49  ;;  %8802 = vst [vmem:[#allocation131_spill] sm:$0xff] %v6672_v34  ;;  %v1928_v49 = vmul.f32 %v5694_v10, %v6381_v31  ;;  %v1950_v34 = vmul.f32 %v5697_v44, %v6395_v5  ;;  %v6704_v31 = vmul.f32 %v6048_v62, %v1197_v26  ;;  %v973_v5 = vrot.slane %v969_v7, 1 }
 0x240   :  { %8803 = vst [vmem:[#allocation132_spill] sm:$0xff] %v6675_v12  ;;  %8804 = vst [vmem:[#allocation133_spill] sm:$0xff] %v6678_v30  ;;  %v606_v12 = vrot.slane %v602_v23, 1  ;;  %v607_v30 = vrot.slane %v603_v22, 1  ;;  %1931 = vrot.lane.b32.xlu0 %v1927_v27, %s5338_s27  ;;  %v6712_v22 = vmul.f32 %v6045_v40, %v1197_v26  ;;  %v6715_v63 = vmul.f32 %v6048_v62, %v1457_v48 }
 0x241   :  { %8805 = vst [vmem:[#allocation134_spill] sm:$0xff] %v6682_v47  ;;  %8806 = vst [vmem:[#allocation135_spill] sm:$0xff] %v6684_v13  ;;  %v6698_v13 = vmul.f32 %v6664_v8, %v6024_v39  ;;  %v6701_v47 = vmul.f32 %v1457_v48, %v6024_v39  ;;  %1933 = vrot.lane.b32.xlu1 %v1928_v49, %s5338_s27  ;;  %v1954_v7 = vrot.slane %v1950_v34, 1  ;;  %v1955_v23 = vrot.slane %v1951_v61, 1 }
 0x242   :  { %8809 = vst [vmem:[#allocation138_spill] sm:$0xff] %v6704_v31  ;;  %8810 = vst [vmem:[#allocation139_spill] sm:$0xff] %v6712_v22  ;;  %v619_v31 = vmul.f32 %v6483_v56, %v5684_v35  ;;  %v6721_v27 = vpop.permute.xlu0 %2764  ;;  %v6723_v49 = vpop.permute.xlu1 %2766  ;;  %v2290_v26 = vmul.f32 %v6048_v62, %v968_v29  ;;  %v6727_v22 = vmul.f32 %v6045_v40, %v968_v29  ;;  %v1233_v17 = vrot.slane %v1229_v19, 1 }
 0x243   :  { %8807 = vst [vmem:[#allocation136_spill] sm:$0xff] %v6698_v13  ;;  %8808 = vst [vmem:[#allocation137_spill] sm:$0xff] %v6701_v47  ;;  %v618_v47 = vmul.f32 %v6483_v56, %v5687_v36  ;;  %v608_v41 = vsel %vm298_vm0, %v606_v12, %v607_v30  ;;  %v835_v34 = vadd.f32 %v5952_v16, %v6400_v14  ;;  %v8816_v29 = vrot.slane %v6661_v2, 1 }
 0x244   :  { %8811 = vst [vmem:[#allocation140_spill] sm:$0xff] %v6715_v63  ;;  %8812 = vst [vmem:[#allocation141_spill] sm:$0xff] %v6721_v27  ;;  %v6730_v63 = vmul.f32 %v6045_v40, %v1457_v48  ;;  %v834_v27 = vadd.f32 %v5950_v43, %v6370_v60  ;;  %609 = vrot.lane.b32.xlu0 %v608_v41, %s5337_s2  ;;  %v645_v61 = vstv %s6666_s25  ;;  %v623_v19 = vrot.slane %v619_v31, 1  ;;  %s183_s25 = sld [smem:[#allocation8]] }
 0x245   :  { %8813 = vst [vmem:[#allocation142_spill] sm:$0xff] %v6723_v49  ;;  %8814 = vst [vmem:[#allocation143_spill] sm:$0xff] %v6727_v22  ;;  %611 = vrot.lane.b32.xlu1 %v607_v30, %s5337_s2  ;;  %v6743_v48 = vsel %vm298_vm0, %v973_v5, %v8816_v29  ;;  %v622_v12 = vrot.slane %v618_v47, 1  ;;  %v6749_v49 = vstv %s6680_s24  ;;  %v1956_v60 = vsel %vm298_vm0, %v1954_v7, %v1955_v23  ;;  %s4951_s24 = sld [smem:[#allocation8 + $0x6]] }
 0x246   :  { %8815 = vst [vmem:[#allocation144_spill] sm:$0xff] %v6730_v63  ;;  %v6751_v43 = vpop.permute.xlu0 %988  ;;  %v6753_v16 = vpop.permute.xlu1 %990  ;;  %v2294_v14 = vrot.slane %v2290_v26, 1  ;;  %v8635_v41 = vrot.slane %v6727_v22, 1  ;;  %v1966_v30 = vmul.f32 %v5694_v10, %v6483_v56  ;;  %v6761_v47 = vadd.f32 %v5963_v42, %v6403_v59 }
 0x247   :  { %8817 = vst [vmem:[#allocation145_spill] sm:$0xff] %v6751_v43  ;;  %8818 = vst [vmem:[#allocation146_spill] sm:$0xff] %v6753_v16  ;;  %v6765_v31 = vadd.f32 %v5965_v45, %v6406_v9  ;;  %v8819_v5 = vrot.slane %v6698_v13, 1  ;;  %v646_v7 = vmul.f32 %v645_v61, %v5687_v36  ;;  %v6776_v56 = vmul.f32 %v645_v61, %v5684_v35 }
 0x248   :  { %1957 = vrot.lane.b32.xlu0 %v1956_v60, %s5337_s2  ;;  %v1489_v42 = vmul.f32 %v6749_v49, %v6027_v57  ;;  %v6782_v45 = vmul.f32 %v6749_v49, %v6024_v39  ;;  %v661_v59 = vstv %s6709_s3  ;;  %v624_v9 = vsel %vm298_vm0, %v622_v12, %v623_v19  ;;  %s4954_s3 = sld [smem:[#allocation8 + $0x9]] }
 0x249   :  { %v6770_v29 = vsel %vm298_vm0, %v1233_v17, %v8819_v5  ;;  %1959 = vrot.lane.b32.xlu1 %v1955_v23, %s5337_s2  ;;  %v1969_v17 = vrot.slane %v1965_v21, 1  ;;  %v1991_v26 = vmul.f32 %v5697_v44, %v645_v61  ;;  %v6790_v23 = vmul.f32 %v5694_v10, %v645_v61 }
 0x24a   :  { %8820 = vst [vmem:[#allocation147_spill] sm:$0xff] %v6770_v29  ;;  %8821 = vst [vmem:[#allocation148_spill] sm:$0xff] %v6782_v45  ;;  %v6794_v60 = vpop.permute.xlu0 %1248  ;;  %v6796_v5 = vpop.permute.xlu1 %1250  ;;  %v6801_v63 = vsel %vm298_vm0, %v2294_v14, %v8635_v41  ;;  %v1970_v13 = vrot.slane %v1966_v30, 1  ;;  %v2531_v21 = vmul.f32 %v6048_v62, %v6664_v8  ;;  %v6807_v12 = vmul.f32 %v6045_v40, %v6664_v8 }
 0x24b   :  { %8822 = vst [vmem:[#allocation149_spill] sm:$0xff] %v6794_v60  ;;  %8823 = vst [vmem:[#allocation150_spill] sm:$0xff] %v6796_v5  ;;  %v662_v61 = vmul.f32 %v661_v59, %v5687_v36  ;;  %v6813_v60 = vmul.f32 %v661_v59, %v5684_v35  ;;  %v2006_v22 = vmul.f32 %v5697_v44, %v661_v59  ;;  %v650_v30 = vrot.slane %v646_v7, 2 }
 0x24c   :  { %8824 = vst [vmem:[#allocation151_spill] sm:$0xff] %v6801_v63  ;;  %8825 = vst [vmem:[#allocation152_spill] sm:$0xff] %v6807_v12  ;;  %v6817_v14 = vmul.f32 %v5694_v10, %v661_v59  ;;  %625 = vrot.lane.b32.xlu0 %v624_v9, %s5338_s27  ;;  %v651_v8 = vrot.slane %v6776_v56, 2  ;;  %v1493_v41 = vrot.slane %v1489_v42, 1  ;;  %v847_v35 = vadd.f32 %v5992_v52, %v834_v27 }
 0x24d   :  { %627 = vrot.lane.b32.xlu1 %v623_v19, %s5338_s27  ;;  %v848_v36 = vadd.f32 %v5994_v58, %v835_v34  ;;  %v1995_v44 = vrot.slane %v1991_v26, 2  ;;  %v1996_v59 = vrot.slane %v6790_v23, 2  ;;  %v6830_v9 = vadd.f32 %v5981_v4, %v6412_v55 }
 0x24e   :  { %v6832_v19 = vpop.permute.xlu0 %2308  ;;  %v6834_v7 = vpop.permute.xlu1 %2310  ;;  %v1971_v56 = vsel %vm298_vm0, %v1969_v17, %v1970_v13  ;;  %v2535_v42 = vrot.slane %v2531_v21, 1  ;;  %v8642_v63 = vrot.slane %v6807_v12, 1  ;;  %v666_v52 = vrot.slane %v662_v61, 2 }
 0x24f   :  { %8826 = vst [vmem:[#allocation153_spill] sm:$0xff] %v6832_v19  ;;  %8827 = vst [vmem:[#allocation154_spill] sm:$0xff] %v6834_v7  ;;  %v8644_v58 = vrot.slane %v6813_v60, 2  ;;  %v2010_v27 = vrot.slane %v2006_v22, 2  ;;  %v8643_v4 = vrot.slane %v6817_v14, 2  ;;  %v6844_v55 = vadd.f32 %v5983_v3, %v6415_v54  ;;  %v8839_v7 = vld [vmem:[#allocation104_spill] sm:$0xff] }
 0x250   :  { %1972 = vrot.lane.b32.xlu0 %v1971_v56, %s5338_s27  ;;  %v652_v34 = vsel %vm355_vm1, %v650_v30, %v651_v8  ;;  %v8828_v17 = vrot.slane %v6782_v45, 1  ;;  %v720_v23 = vstv %s6785_s26  ;;  %v6858_v22 = vadd.f32 %v6475_v53, %v847_v35  ;;  %v8840_v19 = vld [vmem:[#allocation30_spill] sm:$0xff]  ;;  %s4957_s26 = sld [smem:[#allocation8 + $0xc]] }
 0x251   :  { %1974 = vrot.lane.b32.xlu1 %v1970_v13, %s5338_s27  ;;  %v8830_v3 = vrot.slane %v6389_v37, 1  ;;  %v1997_v21 = vsel %vm355_vm1, %v1995_v44, %v1996_v59  ;;  %v682_v13 = vstv %s6792_s10  ;;  %v2772_v35 = vmul.f32 %v6048_v62, %v6749_v49  ;;  %s4960_s10 = sld [smem:[#allocation8 + $0xf]] }
 0x252   :  { %v6852_v26 = vsel %vm298_vm0, %v1493_v41, %v8828_v17  ;;  %v6866_v61 = vpop.permute.xlu0 %1004  ;;  %v6868_v30 = vpop.permute.xlu1 %1006  ;;  %v6873_v41 = vsel %vm298_vm0, %v2535_v42, %v8642_v63  ;;  %v1012_v53 = vstv %s6809_s28  ;;  %v668_v44 = vsel %vm355_vm1, %v666_v52, %v8644_v58  ;;  %s255_s28 = sld [smem:[#allocation9]] }
 0x253   :  { %8829 = vst [vmem:[#allocation155_spill] sm:$0xff] %v6852_v26  ;;  %v6862_v54 = vadd.f32 %v8830_v3, %v848_v36  ;;  %8831 = vst [vmem:[#allocation156_spill] sm:$0xff] %v6866_v61  ;;  %v6879_v36 = vmul.f32 %v6045_v40, %v6749_v49  ;;  %v6888_v37 = vsel %vm355_vm1, %v2010_v27, %v8643_v4  ;;  %v695_v27 = vstv %s6823_s4 }
 0x254   :  { %8832 = vst [vmem:[#allocation157_spill] sm:$0xff] %v6868_v30  ;;  %8833 = vst [vmem:[#allocation158_spill] sm:$0xff] %v6873_v41  ;;  %v721_v56 = vmul.f32 %v720_v23, %v6027_v57  ;;  %v6892_v42 = vmul.f32 %v720_v23, %v6024_v39  ;;  %v6896_v17 = vadd.f32 %v6005_v46, %v6419_v32  ;;  %653 = vrot.lane.b32.xlu0 %v652_v34, %s5337_s2 }
 0x255   :  { %8834 = vst [vmem:[#allocation159_spill] sm:$0xff] %v6879_v36  ;;  %655 = vrot.lane.b32.xlu1 %v651_v8, %s5337_s2  ;;  %v6901_v49 = vmul.f32 %v682_v13, %v6027_v57  ;;  %v6904_v52 = vmul.f32 %v682_v13, %v6024_v39  ;;  %v6909_v3 = vadd.f32 %v6007_v1, %v6430_v15  ;;  %v2776_v4 = vrot.slane %v2772_v35, 1 }
 0x256   :  { %v6912_v63 = vmul.f32 %v6048_v62, %v682_v13  ;;  %v1013_v46 = vmul.f32 %v1012_v53, %v6027_v57  ;;  %v6916_v32 = vmul.f32 %v1012_v53, %v6024_v39  ;;  %v6920_v8 = vpop.permute.xlu0 %1508  ;;  %v6922_v34 = vpop.permute.xlu1 %1510  ;;  %v6926_v1 = vmul.f32 %v6045_v40, %v682_v13 }
 0x257   :  { %8836 = vst [vmem:[#allocation161_spill] sm:$0xff] %v6920_v8  ;;  %8837 = vst [vmem:[#allocation162_spill] sm:$0xff] %v6922_v34  ;;  %v6929_v15 = vstv %s6838_s30  ;;  %v6934_v10 = vmul.f32 %v695_v27, %v6027_v57  ;;  %v6937_v12 = vmul.f32 %v695_v27, %v6024_v39  ;;  %v725_v8 = vrot.slane %v721_v56, 1 }
 0x258   :  { %8835 = vst [vmem:[#allocation160_spill] sm:$0xff] %v6916_v32  ;;  %1998 = vrot.lane.b32.xlu0 %v1997_v21, %s5337_s2  ;;  %v6943_v13 = vmul.f32 %v6048_v62, %v695_v27  ;;  %v6946_v35 = vmul.f32 %v6045_v40, %v695_v27  ;;  %v2060_v58 = vmul.f32 %v6048_v62, %v720_v23  ;;  %v736_v34 = vstv %s6855_s29 }
 0x259   :  { %2000 = vrot.lane.b32.xlu1 %v1996_v59, %s5337_s2  ;;  %v1017_v45 = vrot.slane %v1013_v46, 2  ;;  %v6952_v56 = vmul.f32 %v6045_v40, %v720_v23  ;;  %v1273_v21 = vmul.f32 %v6929_v15, %v6027_v57  ;;  %v8838_v59 = vld [vmem:[#allocation29_spill] sm:$0xff]  ;;  %v6962_v27 = vadd.f32 %v8840_v19, %v8839_v7 }
 0x25a   :  { %v6958_v41 = vadd.f32 %v8838_v59, %v6447_v38  ;;  %v6964_v5 = vpop.permute.xlu0 %2549  ;;  %v6966_v29 = vpop.permute.xlu1 %2551  ;;  %v8843_v46 = vrot.slane %v6879_v36, 1  ;;  %v6975_v26 = vmul.f32 %v6929_v15, %v6024_v39  ;;  %v8846_v38 = vld [vmem:[#allocation33_spill] sm:$0xff]  ;;  %v8847_v19 = vrot.slane %v6892_v42, 1 }
 0x25b   :  { %8841 = vst [vmem:[#allocation29_spill] sm:$0xff] %v6964_v5  ;;  %8842 = vst [vmem:[#allocation104_spill] sm:$0xff] %v6966_v29  ;;  %v1107_v59 = vadd.f32 %v8846_v38, %v6761_v47  ;;  %v737_v29 = vmul.f32 %v736_v34, %v6027_v57  ;;  %v6986_v36 = vmul.f32 %v736_v34, %v6024_v39  ;;  %v2064_v47 = vrot.slane %v2060_v58, 1 }
 0x25c   :  { %v6971_v23 = vsel %vm298_vm0, %v2776_v4, %v8843_v46  ;;  %8845 = vst [vmem:[#allocation163_spill] sm:$0xff] %v6975_v26  ;;  %v6982_v7 = vsel %vm298_vm0, %v725_v8, %v8847_v19  ;;  %v8848_v4 = vld [vmem:[#allocation34_spill] sm:$0xff]  ;;  %669 = vrot.lane.b32.xlu0 %v668_v44, %s5338_s27  ;;  %v2331_v38 = vmul.f32 %v6048_v62, %v1012_v53  ;;  %v8851_v19 = vrot.slane %v6916_v32, 2 }
 0x25d   :  { %8844 = vst [vmem:[#allocation30_spill] sm:$0xff] %v6971_v23  ;;  %v1108_v46 = vadd.f32 %v8848_v4, %v6765_v31  ;;  %v8849_v23 = vrot.slane %v6813_v60, 2  ;;  %v6996_v8 = vmul.f32 %v6045_v40, %v1012_v53  ;;  %v1277_v31 = vrot.slane %v1273_v21, 2  ;;  %v8857_v21 = vld [vmem:[#allocation36_spill] sm:$0xff] }
 0x25e   :  { %v7001_v5 = vsel %vm355_vm1, %v1017_v45, %v8851_v19  ;;  %v764_v4 = vstv %s6918_s14  ;;  %v7005_v44 = vpop.permute.xlu0 %1264  ;;  %v7007_v61 = vpop.permute.xlu1 %1266  ;;  %v2075_v58 = vmul.f32 %v6048_v62, %v736_v34  ;;  %v7012_v53 = vmul.f32 %v6045_v40, %v736_v34  ;;  %v8856_v45 = vld [vmem:[#allocation35_spill] sm:$0xff] }
 0x25f   :  { %671 = vrot.lane.b32.xlu1 %v8849_v23, %s5338_s27  ;;  %8850 = vst [vmem:[#allocation33_spill] sm:$0xff] %v6996_v8  ;;  %8852 = vst [vmem:[#allocation34_spill] sm:$0xff] %v7001_v5  ;;  %v7015_v23 = vstv %s6931_s0  ;;  %v2178_v19 = vadd.f32 %v8856_v45, %v6830_v9  ;;  %v2179_v30 = vadd.f32 %v8857_v21, %v6844_v55  ;;  %v8858_v34 = vrot.slane %v6817_v14, 2  ;;  %v8859_v45 = vld [vmem:[#allocation109_spill] sm:$0xff] }
 0x260   :  { %8853 = vst [vmem:[#allocation164_spill] sm:$0xff] %v7005_v44  ;;  %8854 = vst [vmem:[#allocation165_spill] sm:$0xff] %v7007_v61  ;;  %v741_v44 = vrot.slane %v737_v29, 1  ;;  %2013 = vrot.lane.b32.xlu0 %v6888_v37, %s5338_s27  ;;  %v2335_v60 = vrot.slane %v2331_v38, 2  ;;  %v765_v5 = vmul.f32 %v764_v4, %v6027_v57  ;;  %v7032_v9 = vmul.f32 %v764_v4, %v6024_v39  ;;  %v8860_v29 = vld [vmem:[#allocation101_spill] sm:$0xff] }
 0x261   :  { %8855 = vst [vmem:[#allocation166_spill] sm:$0xff] %v7015_v23  ;;  %v1119_v55 = vadd.f32 %v8859_v45, %v1107_v59  ;;  %v8861_v21 = vrot.slane %v8860_v29, 1  ;;  %v1533_v37 = vmul.f32 %v7015_v23, %v6027_v57  ;;  %v7041_v14 = vmul.f32 %v7015_v23, %v6024_v39  ;;  %v8873_v29 = vld [vmem:[#allocation108_spill] sm:$0xff] }
 0x262   :  { %v7043_v38 = vpop.permute.xlu0 %2323  ;;  %v8864_v32 = vrot.slane %v6952_v56, 1  ;;  %v8865_v59 = vrot.slane %v6975_v26, 2  ;;  %v2079_v45 = vrot.slane %v2075_v58, 1  ;;  %v8866_v23 = vrot.slane %v6440_v18, 1 }
 0x263   :  { %2015 = vrot.lane.b32.xlu1 %v8858_v34, %s5338_s27  ;;  %v1120_v61 = vadd.f32 %v8861_v21, %v1108_v46  ;;  %8862 = vst [vmem:[#allocation35_spill] sm:$0xff] %v7043_v38  ;;  %v7045_v34 = vpop.permute.xlu1 %2325  ;;  %v2189_v21 = vadd.f32 %v6583_v25, %v2178_v19  ;;  %v7063_v43 = vmul.f32 %v6045_v40, %v764_v4  ;;  %v8868_v18 = vrot.slane %v6996_v8, 2  ;;  %v8874_v8 = vld [vmem:[#allocation38_spill] sm:$0xff] }
 0x264   :  { %8863 = vst [vmem:[#allocation36_spill] sm:$0xff] %v7045_v34  ;;  %v7050_v16 = vsel %vm298_vm0, %v2064_v47, %v8864_v32  ;;  %v7055_v46 = vsel %vm355_vm1, %v1277_v31, %v8865_v59  ;;  %v2190_v38 = vadd.f32 %v8866_v23, %v2179_v30  ;;  %v2101_v34 = vmul.f32 %v6048_v62, %v764_v4  ;;  %v8869_v4 = vld [vmem:[#allocation39_spill] sm:$0xff] }
 0x265   :  { %687 = vrot.lane.b32.xlu0 %v6901_v49, %s5337_s2  ;;  %v8867_v32 = vrot.slane %v6986_v36, 1  ;;  %v7077_v25 = vsel %vm355_vm1, %v2335_v60, %v8868_v18  ;;  %v769_v30 = vrot.slane %v765_v5, 2  ;;  %v8655_v31 = vrot.slane %v7032_v9, 2  ;;  %v8870_v49 = vld [vmem:[#allocation40_spill] sm:$0xff]  ;;  %v8871_v59 = vld [vmem:[#allocation107_spill] sm:$0xff] }
 0x266   :  { %v1367_v58 = vadd.f32 %v8869_v4, %v6896_v17  ;;  %v1368_v23 = vadd.f32 %v8870_v49, %v6909_v3  ;;  %v2649_v26 = vadd.f32 %v8874_v8, %v8873_v29  ;;  %v7089_v60 = vpop.permute.xlu0 %2790  ;;  %v8877_v18 = vrot.slane %v7012_v53, 1  ;;  %v8878_v29 = vld [vmem:[#allocation45_spill] sm:$0xff] }
 0x267   :  { %689 = vrot.lane.b32.xlu1 %v6904_v52, %s5337_s2  ;;  %v7072_v47 = vsel %vm298_vm0, %v741_v44, %v8867_v32  ;;  %v1537_v52 = vrot.slane %v1533_v37, 2  ;;  %v8872_v44 = vld [vmem:[#allocation37_spill] sm:$0xff]  ;;  %8875 = vst [vmem:[#allocation109_spill] sm:$0xff] %v7089_v60  ;;  %v7091_v5 = vpop.permute.xlu1 %2792  ;;  %v780_v4 = vstv %s7017_s21  ;;  %v2105_v3 = vrot.slane %v2101_v34, 2  ;;  %v8884_v37 = vld [vmem:[#allocation52_spill] sm:$0xff] }
 0x268   :  { %v2648_v32 = vadd.f32 %v8872_v44, %v8871_v59  ;;  %8876 = vst [vmem:[#allocation101_spill] sm:$0xff] %v7091_v5  ;;  %v7096_v17 = vsel %vm298_vm0, %v2079_v45, %v8877_v18  ;;  %v7102_v49 = vmul.f32 %v6048_v62, %v6929_v15  ;;  %v7106_v8 = vmul.f32 %v6045_v40, %v6929_v15  ;;  %v8879_v44 = vld [vmem:[#allocation46_spill] sm:$0xff]  ;;  %v8880_v15 = vld [vmem:[#allocation41_spill] sm:$0xff] }
 0x269   :  { %v875_v59 = vadd.f32 %v8878_v29, %v6858_v22  ;;  %v876_v19 = vadd.f32 %v8879_v44, %v6862_v54  ;;  %2029 = vrot.lane.b32.xlu0 %v6912_v63, %s5337_s2  ;;  %v7119_v34 = vsel %vm355_vm1, %v769_v30, %v8655_v31  ;;  %v2419_v45 = vadd.f32 %v8880_v15, %v6958_v41  ;;  %v8883_v44 = vld [vmem:[#allocation51_spill] sm:$0xff]  ;;  %v8890_v31 = vld [vmem:[#allocation48_spill] sm:$0xff] }
 0x26a   :  { %v1379_v18 = vadd.f32 %v6588_v20, %v1367_v58  ;;  %v8881_v22 = vrot.slane %v6454_v24, 1  ;;  %v8882_v54 = vrot.slane %v7041_v14, 2  ;;  %v7133_v60 = vpop.permute.xlu0 %1524  ;;  %v7138_v41 = vmul.f32 %v780_v4, %v6027_v57  ;;  %v8885_v24 = vld [vmem:[#allocation42_spill] sm:$0xff] }
 0x26b   :  { %2031 = vrot.lane.b32.xlu1 %v6926_v1, %s5337_s2  ;;  %v891_v1 = vadd.f32 %v8883_v44, %v875_v59  ;;  %v892_v5 = vadd.f32 %v8884_v37, %v876_v19  ;;  %v7135_v30 = vpop.permute.xlu1 %1526  ;;  %v7141_v20 = vmul.f32 %v780_v4, %v6024_v39  ;;  %v2420_v58 = vadd.f32 %v8885_v24, %v6962_v27  ;;  %v8888_v37 = vld [vmem:[#allocation44_spill] sm:$0xff]  ;;  %v8891_v27 = vld [vmem:[#allocation49_spill] sm:$0xff]  ;;  %v8892_v24 = vld [vmem:[#allocation50_spill] sm:$0xff] }
 0x26c   :  { %v1380_v29 = vadd.f32 %v8881_v22, %v1368_v23  ;;  %v7129_v63 = vsel %vm355_vm1, %v1537_v52, %v8882_v54  ;;  %v8886_v23 = vld [vmem:[#allocation43_spill] sm:$0xff]  ;;  %v8887_v15 = vrot.slane %v7063_v43, 2  ;;  %v7152_v19 = vmul.f32 %v6048_v62, %v780_v4 }
 0x26d   :  { %v2660_v52 = vadd.f32 %v8886_v23, %v2648_v32  ;;  %v2661_v22 = vadd.f32 %v8888_v37, %v2649_v26  ;;  %v8889_v54 = vld [vmem:[#allocation47_spill] sm:$0xff]  ;;  %v1136_v39 = vadd.f32 %v8890_v31, %v1120_v61  ;;  %700 = vrot.lane.b32.xlu0 %v6934_v10, %s5338_s27  ;;  %v2204_v32 = vadd.f32 %v8891_v27, %v2189_v21  ;;  %v8893_v26 = vld [vmem:[#allocation57_spill] sm:$0xff] }
 0x26e   :  { %v7149_v59 = vsel %vm355_vm1, %v2105_v3, %v8887_v15  ;;  %v1135_v44 = vadd.f32 %v8889_v54, %v1119_v55  ;;  %v2205_v3 = vadd.f32 %v8892_v24, %v2190_v38  ;;  %v2430_v23 = vadd.f32 %v6593_v50, %v2419_v45  ;;  %v8894_v55 = vld [vmem:[#allocation58_spill] sm:$0xff]  ;;  %v7172_v57 = vpop.permute.xlu0 %2564  ;;  %v8897_v50 = vld [vmem:[#allocation59_spill] sm:$0xff] }
 0x26f   :  { %702 = vrot.lane.b32.xlu1 %v6937_v12, %s5338_s27  ;;  %v7165_v15 = vmul.f32 %v6045_v40, %v780_v4  ;;  %v1152_v54 = vadd.f32 %v8894_v55, %v1136_v39  ;;  %v903_v61 = vadd.f32 %v6603_v11, %v891_v1  ;;  %v8895_v10 = vrot.slane %v6509_v28, 2  ;;  %v7174_v12 = vpop.permute.xlu1 %2566  ;;  %v8898_v4 = vld [vmem:[#allocation60_spill] sm:$0xff]  ;;  %v8900_v11 = vld [vmem:[#allocation69_spill] sm:$0xff]  ;;  %v8901_v28 = vld [vmem:[#allocation70_spill] sm:$0xff] }
 0x270   :  { %v1151_v37 = vadd.f32 %v8893_v26, %v1135_v44  ;;  %v8896_v38 = vrot.slane %v6478_v33, 1  ;;  %v2219_v45 = vadd.f32 %v8897_v50, %v2204_v32  ;;  %v2220_v27 = vadd.f32 %v8898_v4, %v2205_v3  ;;  %v8902_v33 = vld [vmem:[#allocation53_spill] sm:$0xff]  ;;  %v8903_v32 = vld [vmem:[#allocation54_spill] sm:$0xff]  ;;  %v8904_v3 = vld [vmem:[#allocation55_spill] sm:$0xff] }
 0x271   :  { %v904_v31 = vadd.f32 %v8895_v10, %v892_v5  ;;  %v2671_v44 = vadd.f32 %v6598_v0, %v2660_v52  ;;  %v8899_v39 = vrot.slane %v6499_v6, 1  ;;  %v919_v1 = vadd.f32 %v8900_v11, %v903_v61  ;;  %2041 = vrot.lane.b32.xlu0 %v6943_v13, %s5338_s27  ;;  %v8905_v0 = vld [vmem:[#allocation56_spill] sm:$0xff] }
 0x272   :  { %v2431_v21 = vadd.f32 %v8896_v38, %v2420_v58  ;;  %v1395_v58 = vadd.f32 %v8902_v33, %v1379_v18  ;;  %v1396_v26 = vadd.f32 %v8903_v32, %v1380_v29  ;;  %v2445_v55 = vadd.f32 %v8904_v3, %v2430_v23  ;;  %v8909_v50 = vld [vmem:[#allocation76_spill] sm:$0xff]  ;;  %v7198_v4 = vpop.permute.xlu0 %2805  ;;  %v8910_v18 = vld [vmem:[#allocation61_spill] sm:$0xff]  ;;  %v8911_v29 = vld [vmem:[#allocation63_spill] sm:$0xff] }
 0x273   :  { %v2672_v24 = vadd.f32 %v8899_v39, %v2661_v22  ;;  %v920_v5 = vadd.f32 %v8901_v28, %v904_v31  ;;  %2043 = vrot.lane.b32.xlu1 %v6946_v35, %s5338_s27  ;;  %v1163_v6 = vadd.f32 %v6608_v51, %v1151_v37  ;;  %v8906_v22 = vld [vmem:[#allocation112_spill] sm:$0xff]  ;;  %v8908_v31 = vld [vmem:[#allocation75_spill] sm:$0xff]  ;;  %v7200_v35 = vpop.permute.xlu1 %2807  ;;  %v2686_v39 = vadd.f32 %v8910_v18, %v2671_v44  ;;  %v8912_v23 = vld [vmem:[#allocation121_spill] sm:$0xff] }
 0x274   :  { %v2446_v52 = vadd.f32 %v8905_v0, %v2431_v21  ;;  %v8907_v61 = vrot.slane %v8906_v22, 2  ;;  %v935_v38 = vadd.f32 %v8908_v31, %v919_v1  ;;  %v1411_v11 = vadd.f32 %v8911_v29, %v1395_v58  ;;  %v8913_v21 = vld [vmem:[#allocation113_spill] sm:$0xff]  ;;  %v8915_v37 = vld [vmem:[#allocation62_spill] sm:$0xff]  ;;  %v8920_v22 = vld [vmem:[#allocation67_spill] sm:$0xff] }
 0x275   :  { %v936_v13 = vadd.f32 %v8909_v50, %v920_v5  ;;  %v2230_v28 = vadd.f32 %v8912_v23, %v2219_v45  ;;  %v8914_v33 = vrot.slane %v8913_v21, 2  ;;  %v2687_v32 = vadd.f32 %v8915_v37, %v2672_v24  ;;  %v8917_v1 = vld [vmem:[#allocation65_spill] sm:$0xff]  ;;  %728 = vrot.lane.b32.xlu0 %v6982_v7, %s5337_s2  ;;  %v8919_v44 = vld [vmem:[#allocation66_spill] sm:$0xff]  ;;  %v8923_v24 = vld [vmem:[#allocation68_spill] sm:$0xff] }
 0x276   :  { %v1164_v10 = vadd.f32 %v8907_v61, %v1152_v54  ;;  %v8916_v54 = vld [vmem:[#allocation64_spill] sm:$0xff]  ;;  %v2460_v0 = vadd.f32 %v8917_v1, %v2445_v55  ;;  %v8918_v5 = vrot.slane %v6892_v42, 1  ;;  %v2461_v58 = vadd.f32 %v8919_v44, %v2446_v52  ;;  %v8921_v61 = vld [vmem:[#allocation71_spill] sm:$0xff]  ;;  %v8927_v37 = vld [vmem:[#allocation74_spill] sm:$0xff] }
 0x277   :  { %v2231_v51 = vadd.f32 %v8914_v33, %v2220_v27  ;;  %v1412_v3 = vadd.f32 %v8916_v54, %v1396_v26  ;;  %v2701_v45 = vadd.f32 %v8920_v22, %v2686_v39  ;;  %v1179_v31 = vadd.f32 %v8921_v61, %v1163_v6  ;;  %v8922_v27 = vld [vmem:[#allocation72_spill] sm:$0xff]  ;;  %v8924_v26 = vld [vmem:[#allocation73_spill] sm:$0xff]  ;;  %v8925_v55 = vld [vmem:[#allocation127_spill] sm:$0xff]  ;;  %v7223_v33 = vpop.permute.xlu0 %1032  ;;  %v7225_v42 = vpop.permute.xlu1 %1034 }
 0x278   :  { %730 = vrot.lane.b32.xlu1 %v8918_v5, %s5337_s2  ;;  %v1180_v50 = vadd.f32 %v8922_v27, %v1164_v10  ;;  %v2702_v18 = vadd.f32 %v8923_v24, %v2687_v32  ;;  %v2245_v29 = vadd.f32 %v8924_v26, %v2230_v28  ;;  %v940_v23 = vadd.f32 %v8925_v55, %v935_v38  ;;  %v8926_v21 = vld [vmem:[#allocation128_spill] sm:$0xff]  ;;  %v8928_v54 = vld [vmem:[#allocation122_spill] sm:$0xff]  ;;  %v8929_v1 = vld [vmem:[#allocation81_spill] sm:$0xff] }
 0x279   :  { %v941_v7 = vadd.f32 %v8926_v21, %v936_v13  ;;  %v2246_v52 = vadd.f32 %v8927_v37, %v2231_v51  ;;  %v1423_v39 = vadd.f32 %v8928_v54, %v1411_v11  ;;  %v1195_v6 = vadd.f32 %v8929_v1, %v1179_v31  ;;  %v8930_v5 = vld [vmem:[#allocation82_spill] sm:$0xff]  ;;  %v8931_v44 = vld [vmem:[#allocation83_spill] sm:$0xff]  ;;  %v8932_v22 = vld [vmem:[#allocation93_spill] sm:$0xff]  ;;  %2067 = vrot.lane.b32.xlu0 %v7050_v16, %s5337_s2 }
 0x27a   :  { %v1196_v10 = vadd.f32 %v8930_v5, %v1180_v50  ;;  %v2260_v32 = vadd.f32 %v8931_v44, %v2245_v29  ;;  %v953_v28 = vadd.f32 %v8932_v22, %v940_v23  ;;  %v8933_v61 = vld [vmem:[#allocation94_spill] sm:$0xff]  ;;  %v8934_v13 = vrot.slane %v6952_v56, 1  ;;  %v8937_v24 = vld [vmem:[#allocation123_spill] sm:$0xff]  ;;  %v8940_v23 = vld [vmem:[#allocation84_spill] sm:$0xff] }
 0x27b   :  { %v954_v38 = vadd.f32 %v8933_v61, %v941_v7  ;;  %v785_v51 = vrot.slane %v7138_v41, 2  ;;  %v8935_v11 = vld [vmem:[#allocation114_spill] sm:$0xff]  ;;  %v2471_v50 = vadd.f32 %v8937_v24, %v2460_v0  ;;  %v8938_v26 = vld [vmem:[#allocation115_spill] sm:$0xff]  ;;  %v2261_v21 = vadd.f32 %v8940_v23, %v2246_v52  ;;  %v8941_v7 = vld [vmem:[#allocation124_spill] sm:$0xff]  ;;  %v7251_v41 = vpop.permute.xlu0 %1292  ;;  %v7253_v61 = vpop.permute.xlu1 %1294 }
 0x27c   :  { %2069 = vrot.lane.b32.xlu1 %v8934_v13, %s5337_s2  ;;  %v8936_v27 = vrot.slane %v8935_v11, 2  ;;  %v8939_v29 = vrot.slane %v8938_v26, 2  ;;  %v2712_v37 = vadd.f32 %v8941_v7, %v2701_v45  ;;  %v8942_v54 = vld [vmem:[#allocation116_spill] sm:$0xff]  ;;  %v8944_v5 = vld [vmem:[#allocation99_spill] sm:$0xff]  ;;  %v8947_v13 = vld [vmem:[#allocation78_spill] sm:$0xff] }
 0x27d   :  { %v8943_v16 = vrot.slane %v8942_v54, 2  ;;  %v966_v56 = vadd.f32 %v8944_v5, %v953_v28  ;;  %v8945_v44 = vld [vmem:[#allocation100_spill] sm:$0xff]  ;;  %v8949_v52 = vld [vmem:[#allocation130_spill] sm:$0xff]  ;;  %v8950_v45 = vld [vmem:[#allocation79_spill] sm:$0xff]  ;;  %744 = vrot.lane.b32.xlu0 %v7072_v47, %s5338_s27 }
 0x27e   :  { %v1424_v31 = vadd.f32 %v8936_v27, %v1412_v3  ;;  %v2472_v55 = vadd.f32 %v8939_v29, %v2461_v58  ;;  %v967_v22 = vadd.f32 %v8945_v44, %v954_v38  ;;  %v8946_v3 = vld [vmem:[#allocation77_spill] sm:$0xff]  ;;  %v1201_v24 = vadd.f32 %v8949_v52, %v1196_v10  ;;  %v8951_v29 = vld [vmem:[#allocation80_spill] sm:$0xff]  ;;  %v8952_v23 = vld [vmem:[#allocation131_spill] sm:$0xff] }
 0x27f   :  { %v2713_v1 = vadd.f32 %v8943_v16, %v2702_v18  ;;  %v1439_v0 = vadd.f32 %v8946_v3, %v1423_v39  ;;  %v8948_v58 = vld [vmem:[#allocation129_spill] sm:$0xff]  ;;  %v2486_v26 = vadd.f32 %v8950_v45, %v2471_v50  ;;  %v2264_v28 = vadd.f32 %v8952_v23, %v2260_v32  ;;  %v8956_v10 = vld [vmem:[#allocation96_spill] sm:$0xff]  ;;  %v8959_v32 = vld [vmem:[#allocation87_spill] sm:$0xff]  ;;  %v7279_v52 = vpop.permute.xlu1 %2351 }
 0x280   :  { %v1440_v11 = vadd.f32 %v8947_v13, %v1424_v31  ;;  %v1200_v27 = vadd.f32 %v8948_v58, %v1195_v6  ;;  %v2487_v18 = vadd.f32 %v8951_v29, %v2472_v55  ;;  %v8953_v38 = vrot.slane %v6986_v36, 1  ;;  %v8954_v31 = vld [vmem:[#allocation85_spill] sm:$0xff]  ;;  %v8955_v6 = vld [vmem:[#allocation95_spill] sm:$0xff]  ;;  %v8957_v50 = vld [vmem:[#allocation132_spill] sm:$0xff]  ;;  %v7277_v58 = vpop.permute.xlu0 %2349 }
 0x281   :  { %v786_v39 = vrot.slane %v7141_v20, 2  ;;  %v2727_v7 = vadd.f32 %v8954_v31, %v2712_v37  ;;  %v1214_v16 = vadd.f32 %v8956_v10, %v1201_v24  ;;  %v2265_v5 = vadd.f32 %v8957_v50, %v2261_v21  ;;  %v8958_v55 = vld [vmem:[#allocation86_spill] sm:$0xff]  ;;  %v8961_v37 = vld [vmem:[#allocation88_spill] sm:$0xff]  ;;  %v8964_v21 = vld [vmem:[#allocation111_spill] sm:$0xff]  ;;  %2082 = vrot.lane.b32.xlu0 %v7096_v17, %s5338_s27 }
 0x282   :  { %746 = vrot.lane.b32.xlu1 %v8953_v38, %s5338_s27  ;;  %v1213_v54 = vadd.f32 %v8955_v6, %v1200_v27  ;;  %v2728_v44 = vadd.f32 %v8958_v55, %v2713_v1  ;;  %v1455_v3 = vadd.f32 %v8959_v32, %v1439_v0  ;;  %v978_v47 = vadd.f32 %v6743_v48, %v966_v56  ;;  %v8962_v27 = vld [vmem:[#allocation89_spill] sm:$0xff]  ;;  %v8963_v24 = vld [vmem:[#allocation110_spill] sm:$0xff] }
 0x283   :  { %v8960_v13 = vrot.slane %v6661_v2, 1  ;;  %v1456_v45 = vadd.f32 %v8961_v37, %v1440_v11  ;;  %v2501_v29 = vadd.f32 %v8962_v27, %v2486_v26  ;;  %v1227_v38 = vadd.f32 %v8964_v21, %v1214_v16  ;;  %v8965_v1 = vld [vmem:[#allocation90_spill] sm:$0xff]  ;;  %v8966_v0 = vld [vmem:[#allocation145_spill] sm:$0xff]  ;;  %v8969_v11 = vld [vmem:[#allocation91_spill] sm:$0xff]  ;;  %v1051_v27 = vpop.permute.xlu1 %1050 }
 0x284   :  { %v1226_v23 = vadd.f32 %v8963_v24, %v1213_v54  ;;  %v2502_v31 = vadd.f32 %v8965_v1, %v2487_v18  ;;  %v994_v6 = vadd.f32 %v8966_v0, %v978_v47  ;;  %v8967_v48 = vld [vmem:[#allocation146_spill] sm:$0xff]  ;;  %v8968_v2 = vrot.slane %v7012_v53, 1  ;;  %v8970_v54 = vld [vmem:[#allocation92_spill] sm:$0xff]  ;;  %v8971_v18 = vld [vmem:[#allocation97_spill] sm:$0xff]  ;;  %v1049_v53 = vpop.permute.xlu0 %1048 }
 0x285   :  { %v979_v36 = vadd.f32 %v8960_v13, %v967_v22  ;;  %v2120_v22 = vrot.slane %v7152_v19, 2  ;;  %v2742_v26 = vadd.f32 %v8969_v11, %v2727_v7  ;;  %v2743_v10 = vadd.f32 %v8970_v54, %v2728_v44  ;;  %v8972_v50 = vld [vmem:[#allocation98_spill] sm:$0xff]  ;;  %v8973_v32 = vld [vmem:[#allocation133_spill] sm:$0xff]  ;;  %v8974_v13 = vld [vmem:[#allocation156_spill] sm:$0xff]  ;;  %772 = vrot.lane.b32.xlu0 %v7119_v34, %s5337_s2 }
 0x286   :  { %2084 = vrot.lane.b32.xlu1 %v8968_v2, %s5338_s27  ;;  %v2276_v16 = vadd.f32 %v8971_v18, %v2264_v28  ;;  %v2277_v55 = vadd.f32 %v8972_v50, %v2265_v5  ;;  %v1460_v47 = vadd.f32 %v8973_v32, %v1455_v3  ;;  %v1010_v17 = vadd.f32 %v8974_v13, %v994_v6  ;;  %v8976_v24 = vld [vmem:[#allocation117_spill] sm:$0xff]  ;;  %v8977_v21 = vld [vmem:[#allocation118_spill] sm:$0xff]  ;;  %v8978_v1 = vld [vmem:[#allocation147_spill] sm:$0xff] }
 0x287   :  { %v995_v56 = vadd.f32 %v8967_v48, %v979_v36  ;;  %v8975_v36 = vld [vmem:[#allocation157_spill] sm:$0xff]  ;;  %v787_v19 = vsel %vm355_vm1, %v785_v51, %v786_v39  ;;  %v1238_v28 = vadd.f32 %v8978_v1, %v1226_v23  ;;  %v8979_v0 = vld [vmem:[#allocation136_spill] sm:$0xff]  ;;  %v8982_v6 = vld [vmem:[#allocation138_spill] sm:$0xff]  ;;  %v8984_v51 = vrot.slane %v7032_v9, 2 }
 0x288   :  { %v2288_v7 = vadd.f32 %v8976_v24, %v2276_v16  ;;  %v2289_v44 = vadd.f32 %v8977_v21, %v2277_v55  ;;  %v8980_v5 = vrot.slane %v8979_v0, 1  ;;  %v8981_v3 = vld [vmem:[#allocation137_spill] sm:$0xff]  ;;  %v2505_v11 = vadd.f32 %v8982_v6, %v2501_v29  ;;  %v8985_v18 = vld [vmem:[#allocation140_spill] sm:$0xff]  ;;  %v8988_v55 = vld [vmem:[#allocation150_spill] sm:$0xff] }
 0x289   :  { %v1011_v37 = vadd.f32 %v8975_v36, %v995_v56  ;;  %v1461_v2 = vadd.f32 %v8981_v3, %v1456_v45  ;;  %v8983_v56 = vld [vmem:[#allocation139_spill] sm:$0xff]  ;;  %v2121_v23 = vrot.slane %v7165_v15, 2  ;;  %v2746_v16 = vadd.f32 %v8985_v18, %v2742_v26  ;;  %v8987_v45 = vld [vmem:[#allocation149_spill] sm:$0xff]  ;;  %v8989_v32 = vld [vmem:[#allocation102_spill] sm:$0xff]  ;;  %v7333_v15 = vpop.permute.xlu1 %1554  ;;  %2108 = vrot.lane.b32.xlu0 %v7149_v59, %s5337_s2 }
 0x28a   :  { %v1239_v48 = vadd.f32 %v8980_v5, %v1227_v38  ;;  %v2506_v54 = vadd.f32 %v8983_v56, %v2502_v31  ;;  %774 = vrot.lane.b32.xlu1 %v8984_v51, %s5337_s2  ;;  %v8986_v38 = vld [vmem:[#allocation144_spill] sm:$0xff]  ;;  %v1254_v29 = vadd.f32 %v8987_v45, %v1238_v28  ;;  %v1473_v13 = vadd.f32 %v8989_v32, %v1460_v47  ;;  %v8990_v34 = vld [vmem:[#allocation103_spill] sm:$0xff]  ;;  %v8991_v24 = vld [vmem:[#allocation34_spill] sm:$0xff]  ;;  %v7331_v5 = vpop.permute.xlu0 %1552 }
 0x28b   :  { %v2747_v50 = vadd.f32 %v8986_v38, %v2743_v10  ;;  %v1474_v36 = vadd.f32 %v8990_v34, %v1461_v2  ;;  %v1022_v9 = vadd.f32 %v8991_v24, %v1010_v17  ;;  %v8992_v21 = vld [vmem:[#allocation160_spill] sm:$0xff]  ;;  %v8994_v26 = vld [vmem:[#allocation151_spill] sm:$0xff]  ;;  %v8998_v51 = vld [vmem:[#allocation165_spill] sm:$0xff] }
 0x28c   :  { %v1255_v31 = vadd.f32 %v8988_v55, %v1239_v48  ;;  %v8993_v1 = vrot.slane %v8992_v21, 2  ;;  %v2299_v10 = vadd.f32 %v8994_v26, %v2288_v7  ;;  %v8995_v3 = vld [vmem:[#allocation143_spill] sm:$0xff]  ;;  %v8997_v56 = vld [vmem:[#allocation164_spill] sm:$0xff]  ;;  %v8999_v18 = vld [vmem:[#allocation105_spill] sm:$0xff]  ;;  %v9000_v7 = vrot.slane %v7063_v43, 2 }
 0x28d   :  { %v8996_v6 = vrot.slane %v8995_v3, 1  ;;  %v1270_v48 = vadd.f32 %v8997_v56, %v1254_v29  ;;  %v2517_v2 = vadd.f32 %v8999_v18, %v2505_v11  ;;  %v1038_v17 = vadd.f32 %v7223_v33, %v1022_v9  ;;  %v9002_v29 = vld [vmem:[#allocation125_spill] sm:$0xff]  ;;  %v9004_v11 = vld [vmem:[#allocation154_spill] sm:$0xff]  ;;  %v9007_v43 = vld [vmem:[#allocation35_spill] sm:$0xff]  ;;  %788 = vrot.lane.b32.xlu0 %v787_v19, %s5338_s27 }
 0x28e   :  { %v1023_v0 = vadd.f32 %v8993_v1, %v1011_v37  ;;  %v1271_v47 = vadd.f32 %v8998_v51, %v1255_v31  ;;  %v7344_v37 = vstv %s7293_s1  ;;  %2110 = vrot.lane.b32.xlu1 %v9000_v7, %s5337_s2  ;;  %v1486_v55 = vadd.f32 %v9002_v29, %v1473_v13  ;;  %v9003_v31 = vld [vmem:[#allocation153_spill] sm:$0xff]  ;;  %v9005_v34 = vld [vmem:[#allocation126_spill] sm:$0xff]  ;;  %v7357_v59 = vpop.permute.xlu0 %2590 }
 0x28f   :  { %v2300_v28 = vadd.f32 %v8996_v6, %v2289_v44  ;;  %v9001_v44 = vld [vmem:[#allocation106_spill] sm:$0xff]  ;;  %v2314_v32 = vadd.f32 %v9003_v31, %v2299_v10  ;;  %v1054_v21 = vadd.f32 %v1049_v53, %v1038_v17  ;;  %v1282_v13 = vadd.f32 %v7055_v46, %v1270_v48  ;;  %v9009_v10 = vld [vmem:[#allocation163_spill] sm:$0xff] }
 0x290   :  { %v1039_v38 = vadd.f32 %v7225_v42, %v1023_v0  ;;  %v2518_v45 = vadd.f32 %v9001_v44, %v2506_v54  ;;  %v1487_v42 = vadd.f32 %v9005_v34, %v1474_v36  ;;  %v9006_v24 = vld [vmem:[#allocation134_spill] sm:$0xff]  ;;  %v7359_v0 = vpop.permute.xlu1 %2592  ;;  %v9008_v54 = vld [vmem:[#allocation36_spill] sm:$0xff]  ;;  %v9010_v6 = vrot.slane %v9009_v10, 2  ;;  %v9012_v36 = vld [vmem:[#allocation135_spill] sm:$0xff] }
 0x291   :  { %v2315_v33 = vadd.f32 %v9004_v11, %v2300_v28  ;;  %v2529_v9 = vadd.f32 %v9006_v24, %v2517_v2  ;;  %v2329_v26 = vadd.f32 %v9007_v43, %v2314_v32  ;;  %v9011_v28 = vld [vmem:[#allocation119_spill] sm:$0xff]  ;;  %v7373_v53 = vstv %s7319_s22  ;;  %v9013_v2 = vld [vmem:[#allocation120_spill] sm:$0xff]  ;;  %v9017_v19 = vld [vmem:[#allocation158_spill] sm:$0xff] }
 0x292   :  { %v1055_v1 = vadd.f32 %v1051_v27, %v1039_v38  ;;  %v1283_v56 = vadd.f32 %v9010_v6, %v1271_v47  ;;  %v2758_v51 = vadd.f32 %v9011_v28, %v2746_v16  ;;  %v2530_v18 = vadd.f32 %v9012_v36, %v2518_v45  ;;  %790 = vrot.lane.b32.xlu1 %v786_v39, %s5338_s27  ;;  %v9014_v46 = vld [vmem:[#allocation155_spill] sm:$0xff]  ;;  %v9015_v38 = vld [vmem:[#allocation148_spill] sm:$0xff]  ;;  %v9020_v11 = vld [vmem:[#allocation141_spill] sm:$0xff] }
 0x293   :  { %v2330_v3 = vadd.f32 %v9008_v54, %v2315_v33  ;;  %v2122_v27 = vsel %vm355_vm1, %v2120_v22, %v2121_v23  ;;  %v2759_v17 = vadd.f32 %v9013_v2, %v2747_v50  ;;  %v1498_v48 = vadd.f32 %v9014_v46, %v1486_v55  ;;  %v1309_v22 = vpop.permute.xlu0 %1308  ;;  %v9018_v55 = vld [vmem:[#allocation33_spill] sm:$0xff]  ;;  %v9021_v34 = vld [vmem:[#allocation142_spill] sm:$0xff]  ;;  %v9022_v24 = vld [vmem:[#allocation152_spill] sm:$0xff] }
 0x294   :  { %v1298_v47 = vadd.f32 %v7251_v41, %v1282_v13  ;;  %v1299_v16 = vadd.f32 %v7253_v61, %v1283_v56  ;;  %v9016_v7 = vrot.slane %v9015_v38, 1  ;;  %v2540_v45 = vadd.f32 %v9017_v19, %v2529_v9  ;;  %v1311_v29 = vpop.permute.xlu1 %1310  ;;  %2123 = vrot.lane.b32.xlu0 %v2122_v27, %s5338_s27  ;;  %v9025_v54 = vld [vmem:[#allocation162_spill] sm:$0xff] }
 0x295   :  { %v7384_v20 = vadd.f32 %v7344_v37, %v1054_v21  ;;  %v7387_v39 = vadd.f32 %v7344_v37, %v1055_v1  ;;  %v2340_v50 = vadd.f32 %v7077_v25, %v2329_v26  ;;  %v9019_v31 = vrot.slane %v9018_v55, 2  ;;  %v9024_v1 = vld [vmem:[#allocation161_spill] sm:$0xff]  ;;  %v9026_v2 = vld [vmem:[#allocation166_spill] sm:$0xff] }
 0x296   :  { %v1499_v44 = vadd.f32 %v9016_v7, %v1487_v42  ;;  %v1314_v32 = vadd.f32 %v1309_v22, %v1298_v47  ;;  %v1315_v61 = vadd.f32 %v1311_v29, %v1299_v16  ;;  %v2770_v33 = vadd.f32 %v9020_v11, %v2758_v51  ;;  %2125 = vrot.lane.b32.xlu1 %v2121_v23, %s5338_s27  ;;  %v9029_v47 = vld [vmem:[#allocation30_spill] sm:$0xff]  ;;  %v9030_v16 = vld [vmem:[#allocation159_spill] sm:$0xff]  ;;  %v9033_v11 = vld [vmem:[#allocation109_spill] sm:$0xff]  ;;  %s4948_s27 = sld [smem:[#allocation8 + $0x3]] }
 0x297   :  { %v2341_v41 = vadd.f32 %v9019_v31, %v2330_v3  ;;  %v2771_v42 = vadd.f32 %v9021_v34, %v2759_v17  ;;  %v9023_v9 = vrot.slane %v9022_v24, 1  ;;  %v1514_v43 = vadd.f32 %v9024_v1, %v1498_v48  ;;  %v2365_v23 = vpop.permute.xlu0 %2364  ;;  %v9028_v48 = vld [vmem:[#allocation104_spill] sm:$0xff]  ;;  %v9034_v34 = vld [vmem:[#allocation101_spill] sm:$0xff] }
 0x298   :  { %v1515_v25 = vadd.f32 %v9025_v54, %v1499_v44  ;;  %v2355_v26 = vadd.f32 %v7277_v58, %v2340_v50  ;;  %v8671_v13 = vmax.f32 %v7384_v20, 0.0  ;;  %v8670_v10 = vmax.f32 %v7387_v39, 0.0  ;;  %v2367_v28 = vpop.permute.xlu1 %2366 }
 0x299   :  { %v2541_v21 = vadd.f32 %v9023_v9, %v2530_v18  ;;  %v2356_v3 = vadd.f32 %v7279_v52, %v2341_v41  ;;  %v7407_v6 = vadd.f32 %v7373_v53, %v1314_v32  ;;  %v7410_v56 = vadd.f32 %v7373_v53, %v1315_v61 }
 0x29a   :  { %v1530_v51 = vadd.f32 %v7133_v60, %v1514_v43  ;;  %v1531_v58 = vadd.f32 %v7135_v30, %v1515_v25  ;;  %v2370_v36 = vadd.f32 %v2365_v23, %v2355_v26  ;;  %v2576_v18 = vrot.slane %v7102_v49, 2  ;;  %1063 = vrot.lane.b32.xlu0 %v8671_v13, %s5337_s2  ;;  %1065 = vrot.lane.b32.xlu1 %v8670_v10, %s5337_s2  ;;  %v9027_v30 = vld [vmem:[#allocation29_spill] sm:$0xff] }
 0x29b   :  { %v2371_v52 = vadd.f32 %v2367_v28, %v2356_v3  ;;  %v2577_v27 = vrot.slane %v7106_v8, 2  ;;  %v2813_v17 = vmul.f32 %v6048_v62, %v9026_v2  ;;  %v2814_v60 = vmul.f32 %v6045_v40, %v9026_v2  ;;  %v2832_v50 = vpop.permute.xlu0 %2831 }
 0x29c   :  { %v2555_v46 = vadd.f32 %v9027_v30, %v2540_v45  ;;  %v2556_v49 = vadd.f32 %v9028_v48, %v2541_v21  ;;  %v2781_v8 = vadd.f32 %v9029_v47, %v2770_v33  ;;  %v9031_v38 = vrot.slane %v9030_v16, 1  ;;  %v2834_v45 = vpop.permute.xlu1 %2833 }
 0x29d   :  { %v8669_v44 = vmax.f32 %v7407_v6, 0.0  ;;  %v8668_v19 = vmax.f32 %v7410_v56, 0.0  ;;  %v7434_v22 = vadd.f32 %v2370_v36, %v7344_v37  ;;  %v7437_v29 = vadd.f32 %v2371_v52, %v7344_v37 }
 0x29e   :  { %v2782_v7 = vadd.f32 %v9031_v38, %v2771_v42  ;;  %v2570_v55 = vadd.f32 %v7172_v57, %v2555_v46  ;;  %v2571_v31 = vadd.f32 %v7174_v12, %v2556_v49  ;;  %v1542_v41 = vadd.f32 %v7129_v63, %v1530_v51 }
 0x29f   :  { %v9032_v32 = vrot.slane %v7041_v14, 2  ;;  %v2796_v33 = vadd.f32 %v9033_v11, %v2781_v8  ;;  %v2817_v24 = vrot.slane %v2813_v17, 2  ;;  %v2818_v9 = vrot.slane %v2814_v60, 2  ;;  %1323 = vrot.lane.b32.xlu0 %v8669_v44, %s5337_s2  ;;  %1325 = vrot.lane.b32.xlu1 %v8668_v19, %s5337_s2  ;;  %v1569_v54 = vpop.permute.xlu0 %1568 }
 0x2a0   :  { %v2797_v42 = vadd.f32 %v9034_v34, %v2782_v7  ;;  %v1558_v57 = vadd.f32 %v7331_v5, %v1542_v41  ;;  %v2578_v14 = vsel %vm355_vm1, %v2576_v18, %v2577_v27  ;;  %v1576_v12 = vstv %s7402_s23  ;;  %v1571_v25 = vpop.permute.xlu1 %1570 }
 0x2a1   :  { %v1543_v61 = vadd.f32 %v9032_v32, %v1531_v58  ;;  %v2811_v37 = vadd.f32 %v7198_v4, %v2796_v33  ;;  %v8667_v1 = vmax.f32 %v7434_v22, 0.0  ;;  %v8666_v43 = vmax.f32 %v7437_v29, 0.0 }
 0x2a2   :  { %v2812_v21 = vadd.f32 %v7200_v35, %v2797_v42  ;;  %v2581_v26 = vadd.f32 %v2578_v14, %v2570_v55  ;;  %v2582_v3 = vadd.f32 %v2577_v27, %v2571_v31  ;;  %v1574_v23 = vadd.f32 %v1569_v54, %v1558_v57 }
 0x2a3   :  { %v1559_v63 = vadd.f32 %v7333_v15, %v1543_v61  ;;  %v2819_v5 = vsel %vm355_vm1, %v2817_v24, %v2818_v9  ;;  %2378 = vrot.lane.b32.xlu0 %v8667_v1, %s5337_s2  ;;  %2380 = vrot.lane.b32.xlu1 %v8666_v43, %s5337_s2  ;;  %v2606_v52 = vpop.permute.xlu0 %2605  ;;  %v633_v19 = vstv %s4951_s24 }
 0x2a4   :  { %v2596_v4 = vadd.f32 %v7357_v59, %v2581_v26  ;;  %v2597_v35 = vadd.f32 %v7359_v0, %v2582_v3  ;;  %v7469_v15 = vadd.f32 %v1576_v12, %v1574_v23  ;;  %v2822_v58 = vadd.f32 %v2819_v5, %v2811_v37  ;;  %v2608_v18 = vpop.permute.xlu1 %2607 }
 0x2a5   :  { %v1575_v28 = vadd.f32 %v1571_v25, %v1559_v63  ;;  %v2823_v36 = vadd.f32 %v2818_v9, %v2812_v21  ;;  %v560_v5 = vstv %s183_s25 }
 0x2a6   :  { %v8665_v27 = vmax.f32 %v7469_v15, 0.0  ;;  %v2611_v17 = vadd.f32 %v2606_v52, %v2596_v4  ;;  %v2612_v60 = vadd.f32 %v2608_v18, %v2597_v35  ;;  %v2837_v30 = vadd.f32 %v2832_v50, %v2822_v58  ;;  %v9036_v4 = vld [vmem:[#allocation26_spill] sm:$0xff]  ;;  %v9037_v58 = vld [vmem:[#allocation25_spill] sm:$0xff] }
 0x2a7   :  { %v7471_v51 = vadd.f32 %v1576_v12, %v1575_v28  ;;  %v2838_v46 = vadd.f32 %v2834_v45, %v2823_v36  ;;  %v2847_v48 = vpop.permute.xlu0 %2846  ;;  %v589_v28 = vstv %s4948_s27  ;;  %v634_v10 = vmul.f32 %v633_v19, %v9036_v4  ;;  %s5340_s27 = smov 13  }
 0x2a8   :  { %v7476_v59 = vadd.f32 %v2611_v17, %v7373_v53  ;;  %v7479_v0 = vadd.f32 %v2612_v60, %v7373_v53  ;;  %1583 = vrot.lane.b32.xlu0 %v8665_v27, %s5337_s2  ;;  %v2849_v49 = vpop.permute.xlu1 %2848  ;;  %v2852_v16 = vadd.f32 %v2847_v48, %v2837_v30  ;;  %v590_v35 = vmul.f32 %v589_v28, %v9036_v4  ;;  %v9038_v48 = vld [vmem:[#allocation28_spill] sm:$0xff] }
 0x2a9   :  { %v8664_v2 = vmax.f32 %v7471_v51, 0.0  ;;  %v2853_v38 = vadd.f32 %v2849_v49, %v2838_v46  ;;  %v591_v36 = vmul.f32 %v589_v28, %v9037_v58  ;;  %v561_v17 = vmul.f32 %v560_v5, %v9036_v4 }
 0x2aa   :  { %v8663_v47 = vmax.f32 %v7476_v59, 0.0  ;;  %v8662_v8 = vmax.f32 %v7479_v0, 0.0  ;;  %v7489_v7 = vadd.f32 %v2852_v16, %v1576_v12  ;;  %v562_v60 = vmul.f32 %v560_v5, %v9037_v58  ;;  %v9039_v16 = vld [vmem:[#allocation27_spill] sm:$0xff] }
 0x2ab   :  { %1585 = vrot.lane.b32.xlu1 %v8664_v2, %s5337_s2  ;;  %v7491_v53 = vadd.f32 %v2853_v38, %v1576_v12  ;;  %v569_v50 = vpop.permute.xlu0 %568  ;;  %v1939_v49 = vmul.f32 %v9038_v48, %v589_v28  ;;  %v1940_v38 = vmul.f32 %v9039_v16, %v589_v28  ;;  %v1914_v27 = vmul.f32 %v9039_v16, %v560_v5 }
 0x2ac   :  { %2619 = vrot.lane.b32.xlu0 %v8663_v47, %s5337_s2  ;;  %v571_v45 = vpop.permute.xlu1 %570  ;;  %v8661_v55 = vmax.f32 %v7489_v7, 0.0  ;;  %v574_v30 = vadd.f32 %v569_v50, %v561_v17 }
 0x2ad   :  { %9035 = vst [vmem:[#allocation39_spill] sm:$0xff] %v7491_v53  ;;  %v8660_v31 = vmax.f32 %v7491_v53, 0.0  ;;  %v575_v46 = vadd.f32 %v571_v45, %v562_v60  ;;  %v1943_v45 = vrot.slane %v1939_v49, 1  ;;  %v1944_v17 = vrot.slane %v1940_v38, 1 }
 0x2af   :  { %2621 = vrot.lane.b32.xlu1 %v8662_v8, %s5337_s2  ;;  %v1920_v41 = vpop.permute.xlu0 %1919  ;;  %v595_v8 = vrot.slane %v591_v36, 1 }
 0x2b0   :  { %2860 = vrot.lane.b32.xlu0 %v8661_v55, %s5337_s2  ;;  %v1922_v32 = vpop.permute.xlu1 %1921  ;;  %v594_v55 = vrot.slane %v590_v35, 1  ;;  %v635_v35 = vmul.f32 %v633_v19, %v9037_v58 }
 0x2b1   :  { %v1926_v50 = vadd.f32 %v1922_v32, %v1914_v27  ;;  %v638_v32 = vrot.slane %v634_v10, 2 }
 0x2b2   :  { %v596_v28 = vsel %vm298_vm0, %v594_v55, %v595_v8 }
 0x2b3   :  { %2862 = vrot.lane.b32.xlu1 %v8660_v31, %s5337_s2  ;;  %v582_v61 = vpop.permute.xlu0 %581  ;;  %v1913_v31 = vmul.f32 %v9038_v48, %v560_v5 }
 0x2b4   :  { %v584_v11 = vpop.permute.xlu1 %583  ;;  %v587_v43 = vadd.f32 %v582_v61, %v574_v30 }
 0x2b5   :  { %v588_v1 = vadd.f32 %v584_v11, %v575_v46  ;;  %v1925_v44 = vadd.f32 %v1920_v41, %v1913_v31  ;;  %v1980_v11 = vmul.f32 %v9038_v48, %v633_v19  ;;  %v1945_v41 = vsel %vm298_vm0, %v1943_v45, %v1944_v17 }
 0x2b6   :  { %v599_v5 = vadd.f32 %v596_v28, %v587_v43  ;;  %v708_v28 = vstv %s4957_s26 }
 0x2b7   :  { %v1932_v33 = vpop.permute.xlu0 %1931  ;;  %v600_v61 = vadd.f32 %v595_v8, %v588_v1  ;;  %v1984_v8 = vrot.slane %v1980_v11, 2 }
 0x2b8   :  { %v1934_v34 = vpop.permute.xlu1 %1933  ;;  %v1937_v60 = vadd.f32 %v1932_v33, %v1925_v44  ;;  %v1981_v44 = vmul.f32 %v9039_v16, %v633_v19  ;;  %v639_v33 = vrot.slane %v635_v35, 2 }
 0x2b9   :  { %v1938_v53 = vadd.f32 %v1934_v34, %v1926_v50 }
 0x2ba   :  { %v1948_v55 = vadd.f32 %v1945_v41, %v1937_v60  ;;  %v1985_v34 = vrot.slane %v1981_v44, 2  ;;  %v640_v19 = vsel %vm355_vm1, %v638_v32, %v639_v33 }
 0x2bb   :  { %v610_v42 = vpop.permute.xlu0 %609  ;;  %v1949_v30 = vadd.f32 %v1944_v17, %v1938_v53 }
 0x2bc   :  { %v612_v24 = vpop.permute.xlu1 %611  ;;  %v615_v31 = vadd.f32 %v610_v42, %v599_v5 }
 0x2bd   :  { %v616_v27 = vadd.f32 %v612_v24, %v600_v61 }
 0x2bf   :  { %v7507_v9 = vpop.permute.xlu0 %1957 }
 0x2c0   :  { %v7509_v57 = vpop.permute.xlu1 %1959  ;;  %v1963_v1 = vadd.f32 %v7507_v9, %v1948_v55  ;;  %v1986_v9 = vsel %vm355_vm1, %v1984_v8, %v1985_v34 }
 0x2c1   :  { %v1964_v43 = vadd.f32 %v7509_v57, %v1949_v30  ;;  %v677_v57 = vstv %s4954_s3  ;;  %v2050_v30 = vmul.f32 %v6045_v40, %v708_v28  ;;  %s5341_s3 = smov 26  }
 0x2c3   :  { %v626_v63 = vpop.permute.xlu0 %625 }
 0x2c4   :  { %v628_v14 = vpop.permute.xlu1 %627  ;;  %v631_v46 = vadd.f32 %v626_v63, %v615_v31 }
 0x2c5   :  { %v632_v49 = vadd.f32 %v628_v14, %v616_v27 }
 0x2c6   :  { %v643_v16 = vadd.f32 %v640_v19, %v631_v46  ;;  %v752_v19 = vstv %s4960_s10 }
 0x2c7   :  { %v7511_v12 = vpop.permute.xlu0 %1972  ;;  %v644_v38 = vadd.f32 %v639_v33, %v632_v49 }
 0x2c8   :  { %v7513_v37 = vpop.permute.xlu1 %1974  ;;  %v1978_v42 = vadd.f32 %v7511_v12, %v1963_v1 }
 0x2c9   :  { %v1979_v48 = vadd.f32 %v7513_v37, %v1964_v43 }
 0x2ca   :  { %v1989_v14 = vadd.f32 %v1986_v9, %v1978_v42 }
 0x2cb   :  { %v7515_v21 = vpop.permute.xlu0 %653  ;;  %v1990_v17 = vadd.f32 %v1985_v34, %v1979_v48 }
 0x2cc   :  { %v7517_v54 = vpop.permute.xlu1 %655  ;;  %v659_v53 = vadd.f32 %v7515_v21, %v643_v16  ;;  %v9040_v21 = vld [vmem:[#allocation32_spill] sm:$0xff] }
 0x2cd   :  { %v660_v63 = vadd.f32 %v7517_v54, %v644_v38  ;;  %v678_v5 = vmul.f32 %v677_v57, %v9040_v21  ;;  %v9041_v54 = vld [vmem:[#allocation31_spill] sm:$0xff]  ;;  %v709_v31 = vmul.f32 %v708_v28, %v9040_v21  ;;  %v2054_v38 = vrot.slane %v2050_v30, 1 }
 0x2ce   :  { %v679_v61 = vmul.f32 %v677_v57, %v9041_v54  ;;  %v710_v27 = vmul.f32 %v708_v28, %v9041_v54  ;;  %v796_v30 = vstv %s255_s28 }
 0x2cf   :  { %v7519_v25 = vpop.permute.xlu0 %1998  ;;  %v713_v49 = vrot.slane %v709_v31, 1 }
 0x2d0   :  { %v7521_v26 = vpop.permute.xlu1 %2000  ;;  %v2004_v37 = vadd.f32 %v7519_v25, %v1989_v14  ;;  %v2021_v25 = vmul.f32 %v6048_v62, %v677_v57  ;;  %v714_v1 = vrot.slane %v710_v27, 1  ;;  %v753_v14 = vmul.f32 %v752_v19, %v9040_v21 }
 0x2d1   :  { %v2005_v35 = vadd.f32 %v7521_v26, %v1990_v17  ;;  %v2022_v26 = vmul.f32 %v6045_v40, %v677_v57  ;;  %v754_v57 = vmul.f32 %v752_v19, %v9041_v54 }
 0x2d3   :  { %v7523_v3 = vpop.permute.xlu0 %669 }
 0x2d4   :  { %v7525_v23 = vpop.permute.xlu1 %671  ;;  %v675_v12 = vadd.f32 %v7523_v3, %v659_v53  ;;  %v715_v53 = vsel %vm298_vm0, %v713_v49, %v714_v1 }
 0x2d5   :  { %v676_v60 = vadd.f32 %v7525_v23, %v660_v63 }
 0x2d6   :  { %v680_v44 = vadd.f32 %v678_v5, %v675_v12 }
 0x2d7   :  { %v7529_v52 = vpop.permute.xlu0 %2013  ;;  %v681_v55 = vadd.f32 %v679_v61, %v676_v60 }
 0x2d8   :  { %v7531_v18 = vpop.permute.xlu1 %2015  ;;  %v2019_v11 = vadd.f32 %v7529_v52, %v2004_v37  ;;  %v2049_v52 = vmul.f32 %v6048_v62, %v708_v28  ;;  %v2091_v28 = vmul.f32 %v6045_v40, %v752_v19  ;;  %v757_v37 = vrot.slane %v753_v14, 2 }
 0x2d9   :  { %v2020_v23 = vadd.f32 %v7531_v18, %v2005_v35  ;;  %v758_v35 = vrot.slane %v754_v57, 2 }
 0x2da   :  { %v2023_v46 = vadd.f32 %v2021_v25, %v2019_v11 }
 0x2db   :  { %v7538_v47 = vpop.permute.xlu0 %687  ;;  %v2024_v18 = vadd.f32 %v2022_v26, %v2020_v23  ;;  %v2095_v23 = vrot.slane %v2091_v28, 2 }
 0x2dc   :  { %v7540_v2 = vpop.permute.xlu1 %689  ;;  %v693_v32 = vadd.f32 %v7538_v47, %v680_v44  ;;  %v2053_v47 = vrot.slane %v2049_v52, 1 }
 0x2dd   :  { %v694_v33 = vadd.f32 %v7540_v2, %v681_v55 }
 0x2df   :  { %v7546_v36 = vpop.permute.xlu0 %2029 }
 0x2e0   :  { %v7548_v13 = vpop.permute.xlu1 %2031  ;;  %v2035_v48 = vadd.f32 %v7546_v36, %v2023_v46 }
 0x2e1   :  { %v2036_v16 = vadd.f32 %v7548_v13, %v2024_v18  ;;  %v2055_v13 = vsel %vm298_vm0, %v2053_v47, %v2054_v38 }
 0x2e3   :  { %v701_v4 = vpop.permute.xlu0 %700 }
 0x2e4   :  { %v703_v58 = vpop.permute.xlu1 %702  ;;  %v706_v34 = vadd.f32 %v701_v4, %v693_v32 }
 0x2e5   :  { %v707_v42 = vadd.f32 %v703_v58, %v694_v33  ;;  %v2090_v58 = vmul.f32 %v6048_v62, %v752_v19  ;;  %v2927_v19 = vld [vmem:[%s8606_s5 + $0x60] sm:$0xf] }
 0x2e6   :  { %v718_v12 = vadd.f32 %v715_v53, %v706_v34 }
 0x2e7   :  { %v2042_v24 = vpop.permute.xlu0 %2041  ;;  %v719_v4 = vadd.f32 %v714_v1, %v707_v42  ;;  %v2094_v27 = vrot.slane %v2090_v58, 2  ;;  %v2928_v42 = vld [vmem:[%s8606_s5 + $0x68] sm:$0xf] }
 0x2e8   :  { %v2044_v10 = vpop.permute.xlu1 %2043  ;;  %v2047_v2 = vadd.f32 %v2042_v24, %v2035_v48  ;;  %v2926_v48 = vld [vmem:[%s8606_s5 + $0x58] sm:$0xff]  ;;  %5023 = vmatprep.subr.msk.mxu0 %vm2940_vm10, %v2928_v42  ;;  %v9048_v42 = vmax.f32 %v7469_v15, 0.0 }
 0x2e9   :  { %v2048_v17 = vadd.f32 %v2044_v10, %v2036_v16  ;;  %v2096_v33 = vsel %vm355_vm1, %v2094_v27, %v2095_v23  ;;  %5024 = vmatpush1.msk.msra.mxu0 %vm2940_vm10, %v2927_v19  ;;  %v9049_v19 = vmax.f32 %v7471_v51, 0.0 }
 0x2ea   :  { %v2058_v24 = vadd.f32 %v2055_v13, %v2047_v2  ;;  %2967 = vmatprep.subr.mxu0 %v2926_v48  ;;  %v9042_v13 = vmax.f32 %v7384_v20, 0.0  ;;  %v2920_v20 = vld [vmem:[%s8606_s5 + $0x28] sm:$0xff] }
 0x2eb   :  { %v729_v50 = vpop.permute.xlu0 %728  ;;  %v2059_v21 = vadd.f32 %v2054_v38, %v2048_v17  ;;  %v2924_v17 = vld [vmem:[%s8606_s5 + $0x48] sm:$0xff] }
 0x2ec   :  { %v731_v45 = vpop.permute.xlu1 %730  ;;  %v734_v60 = vadd.f32 %v729_v50, %v718_v12  ;;  %v759_v50 = vsel %vm355_vm1, %v757_v37, %v758_v35  ;;  %v2923_v12 = vld [vmem:[%s8606_s5 + $0x40] sm:$0xff]  ;;  %vm3479_vm1 = vcmask 359424  }
 0x2ed   :  { %v735_v36 = vadd.f32 %v731_v45, %v719_v4 }
 0x2ef   :  { %v2068_v41 = vpop.permute.xlu0 %2067 }
 0x2f0   :  { %v2070_v3 = vpop.permute.xlu1 %2069  ;;  %v2073_v10 = vadd.f32 %v2068_v41, %v2058_v24  ;;  %v9043_v24 = vmax.f32 %v7387_v39, 0.0 }
 0x2f1   :  { %v2074_v31 = vadd.f32 %v2070_v3, %v2059_v21 }
 0x2f3   :  { %v745_v43 = vpop.permute.xlu0 %744 }
 0x2f4   :  { %v747_v8 = vpop.permute.xlu1 %746  ;;  %v750_v11 = vadd.f32 %v745_v43, %v734_v60 }
 0x2f5   :  { %v751_v54 = vadd.f32 %v747_v8, %v735_v36 }
 0x2f6   :  { %v762_v40 = vadd.f32 %v759_v50, %v750_v11  ;;  %v2918_v50 = vld [vmem:[%s8606_s5 + $0x18] sm:$0xff] }
 0x2f7   :  { %v2083_v63 = vpop.permute.xlu0 %2082  ;;  %v763_v25 = vadd.f32 %v758_v35, %v751_v54  ;;  %v2922_v35 = vld [vmem:[%s8606_s5 + $0x38] sm:$0xff]  ;;  %v2919_v54 = vld [vmem:[%s8606_s5 + $0x20] sm:$0xff] }
 0x2f8   :  { %v2085_v9 = vpop.permute.xlu1 %2084  ;;  %v2088_v62 = vadd.f32 %v2083_v63, %v2073_v10 }
 0x2f9   :  { %v2089_v55 = vadd.f32 %v2085_v9, %v2074_v31  ;;  %v2925_v9 = vld [vmem:[%s8606_s5 + $0x50] sm:$0xff]  ;;  %v9044_v31 = vmax.f32 %v7407_v6, 0.0  ;;  %v2916_v6 = vld [vmem:[%s8606_s5 + $0x8] sm:$0xff] }
 0x2fa   :  { %v2099_v52 = vadd.f32 %v2096_v33, %v2088_v62  ;;  %2968 = vmatpush1.msra.mxu0 %v2925_v9  ;;  %v9046_v33 = vmax.f32 %v7434_v22, 0.0 }
 0x2fb   :  { %v773_v5 = vpop.permute.xlu0 %772  ;;  %v2100_v41 = vadd.f32 %v2095_v23, %v2089_v55  ;;  %2969 = vmatprep.subr.mxu0 %v2924_v17  ;;  %v9045_v23 = vmax.f32 %v7410_v56, 0.0  ;;  %v9050_v17 = vmax.f32 %v7476_v59, 0.0 }
 0x2fc   :  { %v775_v61 = vpop.permute.xlu1 %774  ;;  %v778_v26 = vadd.f32 %v773_v5, %v762_v40  ;;  %2970 = vmatpush1.msra.mxu0 %v2923_v12  ;;  %v2921_v5 = vld [vmem:[%s8606_s5 + $0x30] sm:$0xff] }
 0x2fd   :  { %v779_v32 = vadd.f32 %v775_v61, %v763_v25  ;;  %2971 = vmatprep.subr.mxu0 %v2922_v35 }
 0x2fe   :  { %2972 = vmatpush1.msra.mxu0 %v2921_v5  ;;  %v9052_v5 = vmax.f32 %v7489_v7, 0.0 }
 0x2ff   :  { %v2109_v45 = vpop.permute.xlu0 %2108  ;;  %2973 = vmatprep.subr.mxu0 %v2920_v20  ;;  %v9053_v20 = vld [vmem:[#allocation39_spill] sm:$0xff] }
 0x300   :  { %v2111_v44 = vpop.permute.xlu1 %2110  ;;  %v2114_v43 = vadd.f32 %v2109_v45, %v2099_v52  ;;  %2974 = vmatpush1.msra.mxu0 %v2919_v54 }
 0x301   :  { %v2115_v8 = vadd.f32 %v2111_v44, %v2100_v41  ;;  %v2917_v44 = vld [vmem:[%s8606_s5 + $0x10] sm:$0xff]  ;;  %2975 = vmatprep.subr.mxu0 %v2918_v50 }
 0x302   :  { %2976 = vmatpush1.msra.mxu0 %v2917_v44 }
 0x303   :  { %v789_v46 = vpop.permute.xlu0 %788  ;;  %2977 = vmatprep.subr.mxu0 %v2916_v6 }
 0x304   :  { %v791_v49 = vpop.permute.xlu1 %790  ;;  %v794_v3 = vadd.f32 %v789_v46, %v778_v26  ;;  %v2915_v26 = vld [vmem:[%s8606_s5] sm:$0xff]  ;;  %s5342_s5 = smov 39  }
 0x305   :  { %v795_v1 = vadd.f32 %v791_v49, %v779_v32  ;;  %2978 = vmatpush1.msra.mxu0 %v2915_v26 }
 0x306   :  { %v7587_v18 = vadd.f32 %v796_v30, %v794_v3 }
 0x307   :  { %v7589_v34 = vadd.f32 %v796_v30, %v795_v1  ;;  %v2124_v16 = vpop.permute.xlu0 %2123 }
 0x308   :  { %v2126_v47 = vpop.permute.xlu1 %2125  ;;  %v799_v38 = vmax.f32 %v7587_v18, 0.0  ;;  %v2129_v53 = vadd.f32 %v2124_v16, %v2114_v43 }
 0x309   :  { %v800_v2 = vmax.f32 %v7589_v34, 0.0  ;;  %v2130_v63 = vadd.f32 %v2126_v47, %v2115_v8 }
 0x30a   :  { %v7607_v14 = vadd.f32 %v2129_v53, %v796_v30  ;;  %803 = vrot.lane.b32.xlu0 %v799_v38, %s5337_s2 }
 0x30b   :  { %v7609_v57 = vadd.f32 %v2130_v63, %v796_v30  ;;  %805 = vrot.lane.b32.xlu1 %v800_v2, %s5337_s2  ;;  %v9047_v30 = vmax.f32 %v7437_v29, 0.0 }
 0x30c   :  { %v1064_v4 = vpop.permute.xlu0 %1063  ;;  %v1066_v58 = vpop.permute.xlu1 %1065  ;;  %v2133_v60 = vmax.f32 %v7607_v14, 0.0 }
 0x30d   :  { %v2134_v36 = vmax.f32 %v7609_v57, 0.0  ;;  %v1069_v28 = vmax.f32 %v9042_v13, %v1064_v4  ;;  %v7629_v37 = vmax.f32 %v9043_v24, %v1066_v58  ;;  %v9051_v4 = vmax.f32 %v7479_v0, 0.0 }
 0x30e   :  { %2137 = vrot.lane.b32.xlu0 %v2133_v60, %s5337_s2 }
 0x30f   :  { %v1073_v61 = vrot.slane %v1069_v28, 1  ;;  %v1074_v21 = vrot.slane %v7629_v37, 1  ;;  %2139 = vrot.lane.b32.xlu1 %v2134_v36, %s5337_s2 }
 0x311   :  { %v1324_v39 = vpop.permute.xlu0 %1323  ;;  %v1326_v11 = vpop.permute.xlu1 %1325  ;;  %v1075_v10 = vsel %vm298_vm0, %v1073_v61, %v1074_v21  ;;  %v1079_v59 = vmax.f32 %v7629_v37, %v1074_v21 }
 0x312   :  { %v1329_v27 = vmax.f32 %v9044_v31, %v1324_v39  ;;  %v1330_v62 = vmax.f32 %v9045_v23, %v1326_v11  ;;  %v1078_v45 = vmax.f32 %v1069_v28, %v1075_v10  ;;  %v9054_v39 = vmax.f32 %v9053_v20, 0.0  ;;  %v3178_v20 = vld [vmem:[%s8609_s8 + $0x160] sm:$0xff] }
 0x314   :  { %v1333_v55 = vrot.slane %v1329_v27, 1  ;;  %v1334_v40 = vrot.slane %v1330_v62, 1  ;;  %1602 = vrot.lane.b32.xlu0 %v1078_v45, %s5340_s27 }
 0x315   :  { %v2379_v56 = vpop.permute.xlu0 %2378  ;;  %v2381_v25 = vpop.permute.xlu1 %2380 }
 0x316   :  { %v1335_v32 = vsel %vm298_vm0, %v1333_v55, %v1334_v40  ;;  %v2384_v52 = vmax.f32 %v9046_v33, %v2379_v56  ;;  %v2385_v46 = vmax.f32 %v9047_v30, %v2381_v25 }
 0x317   :  { %v1338_v49 = vmax.f32 %v1329_v27, %v1335_v32  ;;  %v1339_v27 = vmax.f32 %v1330_v62, %v1334_v40 }
 0x318   :  { %v2388_v41 = vrot.slane %v2384_v52, 1  ;;  %v2389_v3 = vrot.slane %v2385_v46, 1 }
 0x319   :  { %1610 = vrot.lane.b32.xlu1 %v1338_v49, %s5341_s3 }
 0x31a   :  { %v2390_v1 = vsel %vm298_vm0, %v2388_v41, %v2389_v3  ;;  %v1584_v43 = vpop.permute.xlu0 %1583  ;;  %v2394_v7 = vmax.f32 %v2385_v46, %v2389_v3 }
 0x31b   :  { %v1589_v22 = vmax.f32 %v9048_v42, %v1584_v43  ;;  %v2393_v48 = vmax.f32 %v2384_v52, %v2390_v1 }
 0x31d   :  { %v1586_v8 = vpop.permute.xlu1 %1585  ;;  %v1593_v16 = vrot.slane %v1589_v22, 1  ;;  %2879 = vrot.lane.b32.xlu0 %v2393_v48, %s5340_s27 }
 0x31e   :  { %v1590_v29 = vmax.f32 %v9049_v19, %v1586_v8  ;;  %v2620_v53 = vpop.permute.xlu0 %2619 }
 0x31f   :  { %v2625_v12 = vmax.f32 %v9050_v17, %v2620_v53 }
 0x320   :  { %v1594_v47 = vrot.slane %v1590_v29, 1 }
 0x321   :  { %v2622_v63 = vpop.permute.xlu1 %2621  ;;  %v2629_v13 = vrot.slane %v2625_v12, 1 }
 0x322   :  { %v1595_v9 = vsel %vm298_vm0, %v1593_v16, %v1594_v47  ;;  %v2626_v58 = vmax.f32 %v9051_v4, %v2622_v63  ;;  %v2861_v51 = vpop.permute.xlu0 %2860  ;;  %v1599_v50 = vmax.f32 %v1590_v29, %v1594_v47 }
 0x323   :  { %v1598_v15 = vmax.f32 %v1589_v22, %v1595_v9  ;;  %v2866_v61 = vmax.f32 %v9052_v5, %v2861_v51  ;;  %v3181_v5 = vld [vmem:[%s8609_s8 + $0x178] sm:$0xff] }
 0x324   :  { %v2630_v28 = vrot.slane %v2626_v58, 1 }
 0x325   :  { %v2863_v24 = vpop.permute.xlu1 %2862  ;;  %1618 = vrot.lane.b32.xlu1 %v1598_v15, %s5342_s5  ;;  %v2870_v0 = vrot.slane %v2866_v61, 1 }
 0x326   :  { %v2631_v35 = vsel %vm298_vm0, %v2629_v13, %v2630_v28  ;;  %v2867_v11 = vmax.f32 %v9054_v39, %v2863_v24  ;;  %v2635_v37 = vmax.f32 %v2626_v58, %v2630_v28  ;;  %v3223_v39 = vld [vmem:[%s8609_s8 + $0x2c8] sm:$0xff] }
 0x327   :  { %v2634_v54 = vmax.f32 %v2625_v12, %v2631_v35  ;;  %v3229_v35 = vld [vmem:[%s8609_s8 + $0x2f8] sm:$0xff] }
 0x328   :  { %v2871_v10 = vrot.slane %v2867_v11, 1  ;;  %5051 = vmatprep.subr.mxu0 %v3229_v35  ;;  %v3165_v35 = vld [vmem:[%s8609_s8 + $0xf8] sm:$0xff] }
 0x329   :  { %2887 = vrot.lane.b32.xlu0 %v2634_v54, %s5341_s3  ;;  %1604 = vrot.lane.b32.xlu1 %v1079_v59, %s5340_s27  ;;  %v3220_v59 = vld [vmem:[%s8609_s8 + $0x2b0] sm:$0xff] }
 0x32a   :  { %v2872_v31 = vsel %vm298_vm0, %v2870_v0, %v2871_v10  ;;  %v2876_v21 = vmax.f32 %v2867_v11, %v2871_v10  ;;  %v3175_v11 = vld [vmem:[%s8609_s8 + $0x148] sm:$0xff]  ;;  %v3172_v54 = vld [vmem:[%s8609_s8 + $0x130] sm:$0xff]  ;;  %v3217_v0 = vld [vmem:[%s8609_s8 + $0x298] sm:$0xff] }
 0x32b   :  { %v2875_v23 = vmax.f32 %v2866_v61, %v2872_v31  ;;  %v3226_v61 = vld [vmem:[%s8609_s8 + $0x2e0] sm:$0xff]  ;;  %v3169_v10 = vld [vmem:[%s8609_s8 + $0x118] sm:$0xff] }
 0x32c   :  { %v3214_v31 = vld [vmem:[%s8609_s8 + $0x280] sm:$0xff] }
 0x32d   :  { %2895 = vrot.lane.b32.xlu0 %v2875_v23, %s5342_s5  ;;  %1612 = vrot.lane.b32.xlu1 %v1339_v27, %s5341_s3  ;;  %v3166_v27 = vld [vmem:[%s8609_s8 + $0x100] sm:$0xff]  ;;  %v3211_v23 = vld [vmem:[%s8609_s8 + $0x268] sm:$0xff] }
 0x331   :  { %1620 = vrot.lane.b32.xlu0 %v1599_v50, %s5342_s5  ;;  %2881 = vrot.lane.b32.xlu1 %v2394_v7, %s5340_s27  ;;  %v3163_v7 = vld [vmem:[%s8609_s8 + $0xe8] sm:$0xff]  ;;  %v3208_v50 = vld [vmem:[%s8609_s8 + $0x250] sm:$0xff] }
 0x335   :  { %2889 = vrot.lane.b32.xlu0 %v2635_v37, %s5341_s3  ;;  %2897 = vrot.lane.b32.xlu1 %v2876_v21, %s5342_s5  ;;  %v3160_v37 = vld [vmem:[%s8609_s8 + $0xd0] sm:$0xff]  ;;  %v3205_v21 = vld [vmem:[%s8609_s8 + $0x238] sm:$0xff] }
 0x37c   :  { %v804_v45 = vpop.permute.xlu0 %803 }
 0x37d   :  { %v806_v44 = vpop.permute.xlu1 %805  ;;  %v809_v55 = vmax.f32 %v799_v38, %v804_v45  ;;  %v3157_v45 = vld [vmem:[%s8609_s8 + $0xb8] sm:$0xff] }
 0x37e   :  { %v810_v62 = vmax.f32 %v800_v2, %v806_v44  ;;  %v3202_v44 = vld [vmem:[%s8609_s8 + $0x220] sm:$0xff] }
 0x37f   :  { %v813_v40 = vrot.slane %v809_v55, 1 }
 0x380   :  { %v814_v6 = vrot.slane %v810_v62, 1  ;;  %v2138_v56 = vpop.permute.xlu0 %2137 }
 0x381   :  { %v2140_v25 = vpop.permute.xlu1 %2139  ;;  %v2143_v32 = vmax.f32 %v2133_v60, %v2138_v56  ;;  %v9055_v60 = vmov 0.0   ;;  %v3148_v56 = vld [vmem:[%s8609_s8 + $0x70] sm:$0xff] }
 0x382   :  { %v815_v26 = vsel %vm298_vm0, %v813_v40, %v814_v6  ;;  %v2144_v33 = vmax.f32 %v2134_v36, %v2140_v25  ;;  %v819_v19 = vmax.f32 %v810_v62, %v814_v6  ;;  %v3199_v62 = vld [vmem:[%s8609_s8 + $0x208] sm:$0xff]  ;;  %v3196_v6 = vld [vmem:[%s8609_s8 + $0x1f0] sm:$0xff]  ;;  %v3193_v25 = vld [vmem:[%s8609_s8 + $0x1d8] sm:$0xff] }
 0x383   :  { %v818_v18 = vmax.f32 %v809_v55, %v815_v26  ;;  %v2147_v38 = vrot.slane %v2143_v32, 1  ;;  %v3154_v55 = vld [vmem:[%s8609_s8 + $0xa0] sm:$0xff]  ;;  %v3151_v40 = vld [vmem:[%s8609_s8 + $0x88] sm:$0xff]  ;;  %v3145_v26 = vld [vmem:[%s8609_s8 + $0x58] sm:$0xff] }
 0x384   :  { %v2148_v34 = vrot.slane %v2144_v33, 1 }
 0x386   :  { %v1603_v52 = vpop.permute.xlu0 %1602  ;;  %v2149_v57 = vsel %vm298_vm0, %v2147_v38, %v2148_v34  ;;  %v2153_v17 = vmax.f32 %v2144_v33, %v2148_v34  ;;  %v3142_v33 = vld [vmem:[%s8609_s8 + $0x40] sm:$0xff]  ;;  %vm3056_vm0 = vcmask 1041408  }
 0x387   :  { %v1625_v2 = vsel %vm1624_vm11, %v818_v18, %v1603_v52  ;;  %v2152_v1 = vmax.f32 %v2143_v32, %v2149_v57  ;;  %v3190_v32 = vld [vmem:[%s8609_s8 + $0x1c0] sm:$0xff] }
 0x38b   :  { %v1611_v30 = vpop.permute.xlu1 %1610 }
 0x38c   :  { %v1628_v46 = vsel %vm1627_vm12, %v1625_v2, %v1611_v30 }
 0x38f   :  { %v2880_v49 = vpop.permute.xlu0 %2879 }
 0x390   :  { %v2901_v43 = vsel %vm1624_vm11, %v2152_v1, %v2880_v49  ;;  %v3044_v49 = vld [vmem:[%s8607_s6 + $0x38] sm:$0x3] }
 0x391   :  { %v3040_v1 = vld [vmem:[%s8607_s6 + $0x18] sm:$0xff] }
 0x397   :  { %v1619_v41 = vpop.permute.xlu1 %1618 }
 0x398   :  { %v1631_v14 = vsel %vm1630_vm13, %v1628_v46, %v1619_v41  ;;  %v3043_v41 = vld [vmem:[%s8607_s6 + $0x30] sm:$0x3] }
 0x399   :  { %5025 = vmatmul.mubr.msk.f32.vlgmr.msra.gmra.mxu0 %vm2929_vm14, %v1631_v14  ;;  %v3042_v14 = vld [vmem:[%s8607_s6 + $0x28] sm:$0xff] }
 0x39a   :  { %3017 = vmatprep.mubr.f32.mxu0 %v9055_v60  ;;  %5052 = vmatpush3.msra.mxu0 %v3181_v5  ;;  %v3164_v5 = vld [vmem:[%s8609_s8 + $0xf0] sm:$0xff] }
 0x39b   :  { %v2888_v36 = vpop.permute.xlu0 %2887  ;;  %v1605_v3 = vpop.permute.xlu1 %1604  ;;  %5053 = vmatprep.subr.mxu0 %v3226_v61  ;;  %v3162_v61 = vld [vmem:[%s8609_s8 + $0xe0] sm:$0xff] }
 0x39c   :  { %v2903_v8 = vsel %vm1627_vm12, %v2901_v43, %v2888_v36  ;;  %v1626_v48 = vsel %vm1624_vm11, %v819_v19, %v1605_v3  ;;  %5054 = vmatpush3.msra.mxu0 %v3178_v20  ;;  %v3041_v36 = vld [vmem:[%s8607_s6 + $0x20] sm:$0xff]  ;;  %v3161_v20 = vld [vmem:[%s8609_s8 + $0xd8] sm:$0xff] }
 0x39d   :  { %5055 = vmatprep.subr.mxu0 %v3223_v39  ;;  %v3159_v39 = vld [vmem:[%s8609_s8 + $0xc8] sm:$0xff] }
 0x39e   :  { %5056 = vmatpush3.msra.mxu0 %v3175_v11  ;;  %v3158_v11 = vld [vmem:[%s8609_s8 + $0xc0] sm:$0xff] }
 0x39f   :  { %v2896_v42 = vpop.permute.xlu0 %2895  ;;  %v1613_v22 = vpop.permute.xlu1 %1612  ;;  %5057 = vmatprep.subr.mxu0 %v3220_v59  ;;  %v3156_v59 = vld [vmem:[%s8609_s8 + $0xb0] sm:$0xff] }
 0x3a0   :  { %v2905_v29 = vsel %vm1630_vm13, %v2903_v8, %v2896_v42  ;;  %v1629_v47 = vsel %vm1627_vm12, %v1626_v48, %v1613_v22  ;;  %5058 = vmatpush3.msra.mxu0 %v3172_v54  ;;  %v3039_v8 = vld [vmem:[%s8607_s6 + $0x10] sm:$0xff]  ;;  %v3038_v22 = vld [vmem:[%s8607_s6 + $0x8] sm:$0xff] }
 0x3a1   :  { %v2910_v16 = vrot.slane %v2905_v29, 3  ;;  %5059 = vmatprep.subr.mxu0 %v3217_v0  ;;  %v3037_v29 = vld [vmem:[%s8607_s6] sm:$0xff]  ;;  %v3155_v54 = vld [vmem:[%s8609_s8 + $0xa8] sm:$0xff]  ;;  %v3153_v0 = vld [vmem:[%s8609_s8 + $0x98] sm:$0xff] }
 0x3a2   :  { %5060 = vmatpush3.msra.mxu0 %v3169_v10  ;;  %v3152_v10 = vld [vmem:[%s8609_s8 + $0x90] sm:$0xff] }
 0x3a3   :  { %v1621_v53 = vpop.permute.xlu0 %1620  ;;  %v2882_v63 = vpop.permute.xlu1 %2881  ;;  %5061 = vmatprep.subr.mxu0 %v3214_v31  ;;  %v3150_v31 = vld [vmem:[%s8609_s8 + $0x80] sm:$0xff] }
 0x3a4   :  { %v1632_v9 = vsel %vm1630_vm13, %v1629_v47, %v1621_v53  ;;  %v2902_v4 = vsel %vm1624_vm11, %v2153_v17, %v2882_v63  ;;  %5062 = vmatpush3.msra.mxu0 %v3166_v27  ;;  %v3036_v63 = vld [vmem:[%s8608_s7] sm:$0x3]  ;;  %v3179_v17 = vld [vmem:[%s8609_s8 + $0x168] sm:$0xff]  ;;  %v3149_v27 = vld [vmem:[%s8609_s8 + $0x78] sm:$0xff] }
 0x3a5   :  { %v2914_v12 = vsel %vm2909_vm15, %v1632_v9, %v2910_v16  ;;  %5063 = vmatprep.subr.mxu0 %v3211_v23  ;;  %v3180_v9 = vld [vmem:[%s8609_s8 + $0x170] sm:$0xff]  ;;  %v3147_v23 = vld [vmem:[%s8609_s8 + $0x68] sm:$0xff] }
 0x3a6   :  { %5026 = vmatmul.mubr.msk.f32.gmra.mxu0 %vm2929_vm14, %v2914_v12  ;;  %v3177_v12 = vld [vmem:[%s8609_s8 + $0x158] sm:$0xff] }
 0x3a7   :  { %v2890_v58 = vpop.permute.xlu0 %2889  ;;  %v2898_v15 = vpop.permute.xlu1 %2897  ;;  %3023 = vmatprep.mubr.f32.mxu0 %v9055_v60  ;;  %5064 = vmatpush3.msra.mxu0 %v3163_v7  ;;  %v3146_v7 = vld [vmem:[%s8609_s8 + $0x60] sm:$0xff] }
 0x3a8   :  { %v2904_v13 = vsel %vm1627_vm12, %v2902_v4, %v2890_v58  ;;  %5065 = vmatprep.subr.mxu0 %v3208_v50  ;;  %v3176_v4 = vld [vmem:[%s8609_s8 + $0x150] sm:$0xff]  ;;  %v3174_v58 = vld [vmem:[%s8609_s8 + $0x140] sm:$0xff] }
 0x3a9   :  { %v2906_v28 = vsel %vm1630_vm13, %v2904_v13, %v2898_v15  ;;  %5066 = vmatpush3.msra.mxu0 %v3160_v37  ;;  %v3173_v15 = vld [vmem:[%s8609_s8 + $0x138] sm:$0xff]  ;;  %v3171_v13 = vld [vmem:[%s8609_s8 + $0x128] sm:$0xff]  ;;  %v3144_v50 = vld [vmem:[%s8609_s8 + $0x50] sm:$0xff] }
 0x3aa   :  { %v2911_v51 = vrot.slane %v2906_v28, 3  ;;  %5067 = vmatprep.subr.mxu0 %v3205_v21  ;;  %v3170_v28 = vld [vmem:[%s8609_s8 + $0x120] sm:$0xff]  ;;  %v3143_v37 = vld [vmem:[%s8609_s8 + $0x48] sm:$0xff]  ;;  %v3141_v21 = vld [vmem:[%s8609_s8 + $0x38] sm:$0xff] }
 0x3ab   :  { %5068 = vmatpush3.msra.mxu0 %v3157_v45  ;;  %v3140_v45 = vld [vmem:[%s8609_s8 + $0x30] sm:$0xff] }
 0x3ac   :  { %v2912_v24 = vsel %vm2909_vm15, %v2910_v16, %v2911_v51  ;;  %5069 = vmatprep.subr.mxu0 %v3202_v44  ;;  %v3138_v44 = vld [vmem:[%s8609_s8 + $0x20] sm:$0xff] }
 0x3ad   :  { %5027 = vmatmul.mubr.msk.f32.gmra.mxu0 %vm2929_vm14, %v2912_v24  ;;  %v3167_v24 = vld [vmem:[%s8609_s8 + $0x108] sm:$0xff] }
 0x3ae   :  { %3029 = vmatprep.mubr.f32.mxu0 %v9055_v60  ;;  %5070 = vmatpush3.msra.mxu0 %v3154_v55  ;;  %v3137_v55 = vld [vmem:[%s8609_s8 + $0x18] sm:$0xff] }
 0x3af   :  { %5071 = vmatprep.subr.mxu0 %v3199_v62  ;;  %v3135_v62 = vld [vmem:[%s8609_s8 + $0x8] sm:$0xff] }
 0x3b0   :  { %5072 = vmatpush3.msra.mxu0 %v3151_v40  ;;  %v3134_v40 = vld [vmem:[%s8609_s8] sm:$0xff] }
 0x3b1   :  { %5028 = vmatmul.mubr.msk.f32.gmra.mxu0 %vm2929_vm14, %v2911_v51  ;;  %5073 = vmatprep.subr.mxu0 %v3196_v6  ;;  %v3168_v51 = vld [vmem:[%s8609_s8 + $0x110] sm:$0xff] }
 0x3b2   :  { %5074 = vmatpush3.msra.mxu0 %v3148_v56  ;;  %v3228_v6 = vld [vmem:[%s8609_s8 + $0x2f0] sm:$0xff]  ;;  %v3227_v56 = vld [vmem:[%s8609_s8 + $0x2e8] sm:$0xff] }
 0x3b3   :  { %5075 = vmatprep.subr.mxu0 %v3193_v25  ;;  %v3225_v25 = vld [vmem:[%s8609_s8 + $0x2d8] sm:$0xff] }
 0x3b4   :  { %5076 = vmatpush3.msra.mxu0 %v3145_v26  ;;  %v3224_v26 = vld [vmem:[%s8609_s8 + $0x2d0] sm:$0xff] }
 0x3b5   :  { %5077 = vmatprep.subr.mxu0 %v3190_v32  ;;  %v3222_v32 = vld [vmem:[%s8609_s8 + $0x2c0] sm:$0xff] }
 0x3b6   :  { %5078 = vmatpush3.msra.mxu0 %v3142_v33  ;;  %v3221_v33 = vld [vmem:[%s8609_s8 + $0x2b8] sm:$0xff] }
 0x459   :  { %v3013_v52 = vpop.f32.mrf.mxu0 }
 0x45a   :  { %v3045_v53 = vmul.f32 %v3037_v29, %v3013_v52  ;;  %v3219_v52 = vld [vmem:[%s8609_s8 + $0x2a8] sm:$0xff] }
 0x45b   :  { %v3015_v30 = vpop.f32.mrf.mxu0  ;;  %v3191_v29 = vld [vmem:[%s8609_s8 + $0x1c8] sm:$0xff] }
 0x45c   :  { %v3046_v47 = vmul.f32 %v3038_v22, %v3015_v30  ;;  %v3218_v30 = vld [vmem:[%s8609_s8 + $0x2a0] sm:$0xff] }
 0x45d   :  { %v3194_v22 = vld [vmem:[%s8609_s8 + $0x1e0] sm:$0xff] }
 0x466   :  { %v3019_v18 = vpop.f32.mrf.mxu0 }
 0x467   :  { %v3047_v16 = vmul.f32 %v3039_v8, %v3019_v18  ;;  %v3216_v18 = vld [vmem:[%s8609_s8 + $0x290] sm:$0xff]  ;;  %v3197_v8 = vld [vmem:[%s8609_s8 + $0x1f8] sm:$0xff] }
 0x468   :  { %v3021_v38 = vpop.f32.mrf.mxu0 }
 0x469   :  { %v3048_v48 = vmul.f32 %v3040_v1, %v3021_v38  ;;  %v3215_v38 = vld [vmem:[%s8609_s8 + $0x288] sm:$0xff]  ;;  %v3200_v1 = vld [vmem:[%s8609_s8 + $0x210] sm:$0xff] }
 0x46d   :  { %v3025_v34 = vpop.f32.mrf.mxu0 }
 0x46e   :  { %v3049_v19 = vmul.f32 %v3041_v36, %v3025_v34  ;;  %v3213_v34 = vld [vmem:[%s8609_s8 + $0x278] sm:$0xff]  ;;  %v3203_v36 = vld [vmem:[%s8609_s8 + $0x228] sm:$0xff] }
 0x46f   :  { %v3027_v2 = vpop.f32.mrf.mxu0 }
 0x470   :  { %v3050_v42 = vmul.f32 %v3042_v14, %v3027_v2  ;;  %v3212_v2 = vld [vmem:[%s8609_s8 + $0x270] sm:$0xff]  ;;  %v3206_v14 = vld [vmem:[%s8609_s8 + $0x240] sm:$0xff] }
 0x471   :  { %v3031_v46 = vpop.f32.mrf.mxu0 }
 0x472   :  { %v3051_v43 = vmul.f32 %v3043_v41, %v3031_v46  ;;  %v3210_v46 = vld [vmem:[%s8609_s8 + $0x260] sm:$0xff]  ;;  %v3207_v41 = vld [vmem:[%s8609_s8 + $0x248] sm:$0xff] }
 0x473   :  { %v3033_v57 = vpop.f32.mrf.mxu0 }
 0x474   :  { %v3052_v3 = vmul.f32 %v3044_v49, %v3033_v57  ;;  %v3209_v49 = vld [vmem:[%s8609_s8 + $0x258] sm:$0xff]  ;;  %v3204_v57 = vld [vmem:[%s8609_s8 + $0x230] sm:$0xff] }
 0x476   :  { %5029 = vmatprep.subr.msk.mxu1 %vm3056_vm0, %v3052_v3  ;;  %v3201_v3 = vld [vmem:[%s8609_s8 + $0x218] sm:$0xff] }
 0x477   :  { %5030 = vmatpush1.msk.msra.mxu1 %vm3056_vm0, %v3051_v43  ;;  %v3198_v43 = vld [vmem:[%s8609_s8 + $0x200] sm:$0xff] }
 0x478   :  { %3089 = vmatprep.subr.mxu1 %v3050_v42  ;;  %v3195_v42 = vld [vmem:[%s8609_s8 + $0x1e8] sm:$0xff] }
 0x479   :  { %3090 = vmatpush1.msra.mxu1 %v3049_v19  ;;  %v3192_v19 = vld [vmem:[%s8609_s8 + $0x1d0] sm:$0xff] }
 0x47a   :  { %3091 = vmatprep.subr.mxu1 %v3048_v48  ;;  %v3189_v48 = vld [vmem:[%s8609_s8 + $0x1b8] sm:$0xff] }
 0x47b   :  { %3092 = vmatpush1.msra.mxu1 %v3047_v16  ;;  %v3188_v16 = vld [vmem:[%s8609_s8 + $0x1b0] sm:$0xff] }
 0x47c   :  { %3093 = vmatprep.subr.mxu1 %v3046_v47  ;;  %v3186_v47 = vld [vmem:[%s8609_s8 + $0x1a0] sm:$0xff] }
 0x47d   :  { %3094 = vmatpush1.msra.mxu1 %v3045_v53  ;;  %v3187_v53 = vld [vmem:[%s8609_s8 + $0x1a8] sm:$0xff] }
 0x47e   :  { %5031 = vmatmul.mubr.msk.f32.vlgmr.msra.gmra.mxu1 %vm1627_vm12, %v3036_v63  ;;  %3247 = vmatprep.subr.mxu1 %v3180_v9  ;;  %v3185_v63 = vld [vmem:[%s8609_s8 + $0x198] sm:$0xff]  ;;  %v3139_v9 = vld [vmem:[%s8609_s8 + $0x28] sm:$0xff] }
 0x47f   :  { %3248 = vmatpush1.msra.mxu1 %v3179_v17  ;;  %5079 = vmatprep.subr.mxu0 %v3187_v53  ;;  %v3183_v17 = vld [vmem:[%s8609_s8 + $0x188] sm:$0xff]  ;;  %v3435_v53 = vld [vmem:[#allocation11 + $0x160] sm:$0xff] }
 0x480   :  { %3249 = vmatprep.subr.mxu1 %v3177_v12  ;;  %5080 = vmatpush3.msra.mxu0 %v3139_v9  ;;  %v3184_v12 = vld [vmem:[%s8609_s8 + $0x190] sm:$0xff] }
 0x481   :  { %3250 = vmatpush1.msra.mxu1 %v3176_v4  ;;  %v3182_v4 = vld [vmem:[%s8609_s8 + $0x180] sm:$0xff]  ;;  %5081 = vmatprep.subr.mxu0 %v3184_v12  ;;  %v3433_v9 = vld [vmem:[#allocation11 + $0x150] sm:$0xff] }
 0x482   :  { %3251 = vmatprep.subr.mxu1 %v3174_v58  ;;  %v3136_v58 = vld [vmem:[%s8609_s8 + $0x10] sm:$0xff]  ;;  %v3431_v12 = vld [vmem:[#allocation11 + $0x140] sm:$0xff] }
 0x483   :  { %3252 = vmatpush1.msra.mxu1 %v3173_v15  ;;  %5082 = vmatpush3.msra.mxu0 %v3136_v58  ;;  %v3422_v15 = vld [vmem:[#allocation11 + $0xf8] sm:$0xff]  ;;  %v3463_v58 = vld [vmem:[#allocation11 + $0x240] sm:$0xff] }
 0x484   :  { %3253 = vmatprep.subr.mxu1 %v3171_v13  ;;  %3489 = vmatprep.subr.mxu0 %v3422_v15  ;;  %v3466_v13 = vld [vmem:[#allocation11 + $0x258] sm:$0xf]  ;;  %v3429_v15 = vld [vmem:[#allocation11 + $0x130] sm:$0xff] }
 0x485   :  { %3254 = vmatpush1.msra.mxu1 %v3170_v28 }
 0x486   :  { %3255 = vmatprep.subr.mxu1 %v3168_v51 }
 0x487   :  { %3256 = vmatpush1.msra.mxu1 %v3167_v24  ;;  %v3421_v24 = vld [vmem:[#allocation11 + $0xf0] sm:$0xff] }
 0x488   :  { %3257 = vmatprep.subr.mxu1 %v3165_v35  ;;  %v3465_v35 = vld [vmem:[#allocation11 + $0x250] sm:$0xf] }
 0x489   :  { %3258 = vmatpush1.msra.mxu1 %v3164_v5  ;;  %v3420_v5 = vld [vmem:[#allocation11 + $0xe8] sm:$0xff] }
 0x48a   :  { %3259 = vmatprep.subr.mxu1 %v3162_v61  ;;  %v3464_v61 = vld [vmem:[#allocation11 + $0x248] sm:$0xff] }
 0x48b   :  { %3260 = vmatpush1.msra.mxu1 %v3161_v20  ;;  %v3419_v20 = vld [vmem:[#allocation11 + $0xe0] sm:$0xff] }
 0x48c   :  { %3261 = vmatprep.subr.mxu1 %v3159_v39  ;;  %v3418_v39 = vld [vmem:[#allocation11 + $0xd8] sm:$0xff] }
 0x48d   :  { %3262 = vmatpush1.msra.mxu1 %v3158_v11  ;;  %v3417_v11 = vld [vmem:[#allocation11 + $0xd0] sm:$0xff] }
 0x48e   :  { %3263 = vmatprep.subr.mxu1 %v3156_v59  ;;  %v3416_v59 = vld [vmem:[#allocation11 + $0xc8] sm:$0xff] }
 0x48f   :  { %3264 = vmatpush1.msra.mxu1 %v3155_v54  ;;  %v3415_v54 = vld [vmem:[#allocation11 + $0xc0] sm:$0xff] }
 0x490   :  { %3265 = vmatprep.subr.mxu1 %v3153_v0  ;;  %v3414_v0 = vld [vmem:[#allocation11 + $0xb8] sm:$0xff] }
 0x491   :  { %3266 = vmatpush1.msra.mxu1 %v3152_v10  ;;  %v3413_v10 = vld [vmem:[#allocation11 + $0xb0] sm:$0xff] }
 0x492   :  { %3267 = vmatprep.subr.mxu1 %v3150_v31  ;;  %v3412_v31 = vld [vmem:[#allocation11 + $0xa8] sm:$0xff] }
 0x493   :  { %3268 = vmatpush1.msra.mxu1 %v3149_v27  ;;  %v3411_v27 = vld [vmem:[#allocation11 + $0xa0] sm:$0xff] }
 0x494   :  { %3269 = vmatprep.subr.mxu1 %v3147_v23  ;;  %v3410_v23 = vld [vmem:[#allocation11 + $0x98] sm:$0xff] }
 0x495   :  { %3270 = vmatpush1.msra.mxu1 %v3146_v7  ;;  %v3409_v7 = vld [vmem:[#allocation11 + $0x90] sm:$0xff] }
 0x496   :  { %3271 = vmatprep.subr.mxu1 %v3144_v50  ;;  %v3408_v50 = vld [vmem:[#allocation11 + $0x88] sm:$0xff] }
 0x497   :  { %3272 = vmatpush1.msra.mxu1 %v3143_v37  ;;  %v3407_v37 = vld [vmem:[#allocation11 + $0x80] sm:$0xff] }
 0x498   :  { %3273 = vmatprep.subr.mxu1 %v3141_v21  ;;  %v3406_v21 = vld [vmem:[#allocation11 + $0x78] sm:$0xff] }
 0x499   :  { %3274 = vmatpush1.msra.mxu1 %v3140_v45  ;;  %v3405_v45 = vld [vmem:[#allocation11 + $0x70] sm:$0xff] }
 0x49a   :  { %3275 = vmatprep.subr.mxu1 %v3138_v44  ;;  %v3404_v44 = vld [vmem:[#allocation11 + $0x68] sm:$0xff] }
 0x49b   :  { %3276 = vmatpush1.msra.mxu1 %v3137_v55  ;;  %v3403_v55 = vld [vmem:[#allocation11 + $0x60] sm:$0xff] }
 0x49c   :  { %3277 = vmatprep.subr.mxu1 %v3135_v62  ;;  %v3402_v62 = vld [vmem:[#allocation11 + $0x58] sm:$0xff] }
 0x49d   :  { %3278 = vmatpush1.msra.mxu1 %v3134_v40  ;;  %v3401_v40 = vld [vmem:[#allocation11 + $0x50] sm:$0xff] }
 0x49e   :  { %3279 = vmatprep.subr.mxu1 %v3228_v6  ;;  %v3400_v6 = vld [vmem:[#allocation11 + $0x48] sm:$0xff] }
 0x49f   :  { %3280 = vmatpush2.msra.mxu1 %v3227_v56  ;;  %v3399_v56 = vld [vmem:[#allocation11 + $0x40] sm:$0xff] }
 0x4a0   :  { %3281 = vmatprep.subr.mxu1 %v3225_v25  ;;  %v3398_v25 = vld [vmem:[#allocation11 + $0x38] sm:$0xff] }
 0x4a1   :  { %3282 = vmatpush2.msra.mxu1 %v3224_v26  ;;  %v3397_v26 = vld [vmem:[#allocation11 + $0x30] sm:$0xff] }
 0x4a2   :  { %3283 = vmatprep.subr.mxu1 %v3222_v32  ;;  %v3396_v32 = vld [vmem:[#allocation11 + $0x28] sm:$0xff] }
 0x4a3   :  { %3284 = vmatpush2.msra.mxu1 %v3221_v33  ;;  %v3395_v33 = vld [vmem:[#allocation11 + $0x20] sm:$0xff] }
 0x4a4   :  { %3285 = vmatprep.subr.mxu1 %v3219_v52  ;;  %v3394_v52 = vld [vmem:[#allocation11 + $0x18] sm:$0xff] }
 0x4a5   :  { %3286 = vmatpush2.msra.mxu1 %v3218_v30  ;;  %v3393_v30 = vld [vmem:[#allocation11 + $0x10] sm:$0xff] }
 0x4a6   :  { %3287 = vmatprep.subr.mxu1 %v3216_v18  ;;  %v3392_v18 = vld [vmem:[#allocation11 + $0x8] sm:$0xff] }
 0x4a7   :  { %3288 = vmatpush2.msra.mxu1 %v3215_v38  ;;  %v3391_v38 = vld [vmem:[#allocation11] sm:$0xff] }
 0x4a8   :  { %3289 = vmatprep.subr.mxu1 %v3213_v34  ;;  %v3454_v34 = vld [vmem:[#allocation11 + $0x1f8] sm:$0xff] }
 0x4a9   :  { %3290 = vmatpush2.msra.mxu1 %v3212_v2  ;;  %v3453_v2 = vld [vmem:[#allocation11 + $0x1f0] sm:$0xff] }
 0x4aa   :  { %3291 = vmatprep.subr.mxu1 %v3210_v46  ;;  %v3452_v46 = vld [vmem:[#allocation11 + $0x1e8] sm:$0xff] }
 0x4ab   :  { %3292 = vmatpush2.msra.mxu1 %v3209_v49  ;;  %v3451_v49 = vld [vmem:[#allocation11 + $0x1e0] sm:$0xff] }
 0x4ac   :  { %3293 = vmatprep.subr.mxu1 %v3207_v41  ;;  %v3450_v41 = vld [vmem:[#allocation11 + $0x1d8] sm:$0xff] }
 0x4ad   :  { %3294 = vmatpush2.msra.mxu1 %v3206_v14  ;;  %v3449_v14 = vld [vmem:[#allocation11 + $0x1d0] sm:$0xff] }
 0x4ae   :  { %3295 = vmatprep.subr.mxu1 %v3204_v57  ;;  %v3448_v57 = vld [vmem:[#allocation11 + $0x1c8] sm:$0xff] }
 0x4af   :  { %3296 = vmatpush2.msra.mxu1 %v3203_v36  ;;  %v3447_v36 = vld [vmem:[#allocation11 + $0x1c0] sm:$0xff] }
 0x4b0   :  { %3297 = vmatprep.subr.mxu1 %v3201_v3  ;;  %v3446_v3 = vld [vmem:[#allocation11 + $0x1b8] sm:$0xff] }
 0x4b1   :  { %3298 = vmatpush2.msra.mxu1 %v3200_v1  ;;  %v3445_v1 = vld [vmem:[#allocation11 + $0x1b0] sm:$0xff] }
 0x4b2   :  { %3299 = vmatprep.subr.mxu1 %v3198_v43  ;;  %v3444_v43 = vld [vmem:[#allocation11 + $0x1a8] sm:$0xff] }
 0x4b3   :  { %3300 = vmatpush2.msra.mxu1 %v3197_v8  ;;  %v3443_v8 = vld [vmem:[#allocation11 + $0x1a0] sm:$0xff] }
 0x4b4   :  { %3301 = vmatprep.subr.mxu1 %v3195_v42  ;;  %v3442_v42 = vld [vmem:[#allocation11 + $0x198] sm:$0xff] }
 0x4b5   :  { %3302 = vmatpush2.msra.mxu1 %v3194_v22  ;;  %v3441_v22 = vld [vmem:[#allocation11 + $0x190] sm:$0xff] }
 0x4b6   :  { %3303 = vmatprep.subr.mxu1 %v3192_v19  ;;  %v3440_v19 = vld [vmem:[#allocation11 + $0x188] sm:$0xff] }
 0x4b7   :  { %3304 = vmatpush2.msra.mxu1 %v3191_v29  ;;  %v3439_v29 = vld [vmem:[#allocation11 + $0x180] sm:$0xff] }
 0x4b8   :  { %3305 = vmatprep.subr.mxu1 %v3189_v48  ;;  %v3438_v48 = vld [vmem:[#allocation11 + $0x178] sm:$0xff] }
 0x4b9   :  { %3306 = vmatpush2.msra.mxu1 %v3188_v16  ;;  %v3437_v16 = vld [vmem:[#allocation11 + $0x170] sm:$0xff] }
 0x4ba   :  { %3307 = vmatprep.subr.mxu1 %v3186_v47  ;;  %v3436_v47 = vld [vmem:[#allocation11 + $0x168] sm:$0xff] }
 0x4bb   :  { %3308 = vmatpush2.msra.mxu1 %v3185_v63  ;;  %v3434_v63 = vld [vmem:[#allocation11 + $0x158] sm:$0xff] }
 0x4bc   :  { %3309 = vmatprep.subr.mxu1 %v3183_v17  ;;  %v3432_v17 = vld [vmem:[#allocation11 + $0x148] sm:$0xff] }
 0x4bd   :  { %3310 = vmatpush2.msra.mxu1 %v3182_v4  ;;  %v3430_v4 = vld [vmem:[#allocation11 + $0x138] sm:$0xff] }
 0x4be   :  { %5032 = vmatprep.subr.msk.mxu1 %vm2940_vm10, %v3466_v13  ;;  %v3462_v13 = vld [vmem:[#allocation11 + $0x238] sm:$0xff] }
 0x53e   :  { %v3129_v28 = vpop.f32.mrf.mxu1 }
 0x540   :  { %v3131_v51 = vpop.f32.mrf.mxu1 }
 0x541   :  { %3311 = vmatprep.mubr.f32.mxu1 %v3131_v51  ;;  %3382 = vmatprep.mubr.f32.mxu0 %v3131_v51  ;;  %v3461_v51 = vld [vmem:[#allocation11 + $0x230] sm:$0xff] }
 0x542   :  { %3312 = vmatmul.mubr.f32.vlgmr.msra.gmra.mxu1 %v3129_v28  ;;  %3383 = vmatmul.mubr.f32.vlgmr.msra.gmra.mxu0 %v3129_v28  ;;  %v3428_v28 = vld [vmem:[#allocation11 + $0x128] sm:$0xff] }
 0x543   :  { %3490 = vmatpush1.msra.mxu0 %v3421_v24  ;;  %5033 = vmatpush1.msk.msra.mxu1 %vm2940_vm10, %v3465_v35  ;;  %v3427_v24 = vld [vmem:[#allocation11 + $0x120] sm:$0xff]  ;;  %v3460_v35 = vld [vmem:[#allocation11 + $0x228] sm:$0xff] }
 0x544   :  { %3491 = vmatprep.subr.mxu0 %v3420_v5  ;;  %3582 = vmatprep.subr.mxu1 %v3464_v61  ;;  %v3426_v5 = vld [vmem:[#allocation11 + $0x118] sm:$0xff]  ;;  %v3459_v61 = vld [vmem:[#allocation11 + $0x220] sm:$0xff] }
 0x545   :  { %3492 = vmatpush1.msra.mxu0 %v3419_v20  ;;  %3624 = vmatprep.mubr.f32.mxu1 %v9055_v60  ;;  %v3425_v20 = vld [vmem:[#allocation11 + $0x110] sm:$0xff] }
 0x546   :  { %3493 = vmatprep.subr.mxu0 %v3418_v39  ;;  %3583 = vmatpush1.msra.mxu1 %v3463_v58  ;;  %v3458_v39 = vld [vmem:[#allocation11 + $0x218] sm:$0xff]  ;;  %v3839_v58 = vld [vmem:[#allocation12 + $0x68] sm:$0xff] }
 0x547   :  { %3494 = vmatpush1.msra.mxu0 %v3417_v11  ;;  %3584 = vmatprep.subr.mxu1 %v3462_v13  ;;  %v3424_v11 = vld [vmem:[#allocation11 + $0x108] sm:$0xff]  ;;  %v3834_v13 = vld [vmem:[#allocation12 + $0x40] sm:$0xff] }
 0x548   :  { %3495 = vmatprep.subr.mxu0 %v3416_v59  ;;  %3585 = vmatpush1.msra.mxu1 %v3461_v51  ;;  %v3457_v59 = vld [vmem:[#allocation11 + $0x210] sm:$0xff]  ;;  %v3829_v51 = vld [vmem:[#allocation12 + $0x18] sm:$0xff] }
 0x549   :  { %3496 = vmatpush1.msra.mxu0 %v3415_v54  ;;  %3586 = vmatprep.subr.mxu1 %v3460_v35  ;;  %v3423_v54 = vld [vmem:[#allocation11 + $0x100] sm:$0xff]  ;;  %v3984_v35 = vld [vmem:[#allocation12 + $0x4f0] sm:$0xff] }
 0x54a   :  { %3497 = vmatprep.subr.mxu0 %v3414_v0  ;;  %3587 = vmatpush1.msra.mxu1 %v3459_v61  ;;  %v3456_v0 = vld [vmem:[#allocation11 + $0x208] sm:$0xff] }
 0x54b   :  { %3498 = vmatpush1.msra.mxu0 %v3413_v10  ;;  %3588 = vmatprep.subr.mxu1 %v3458_v39  ;;  %v3455_v10 = vld [vmem:[#allocation11 + $0x200] sm:$0xff]  ;;  %v3979_v61 = vld [vmem:[#allocation12 + $0x4c8] sm:$0xff] }
 0x54c   :  { %3499 = vmatprep.subr.mxu0 %v3412_v31  ;;  %3589 = vmatpush1.msra.mxu1 %v3457_v59  ;;  %v9056_v31 = vld [vmem:[#allocation24_spill] sm:$0xff]  ;;  %v3974_v39 = vld [vmem:[#allocation12 + $0x4a0] sm:$0xff] }
 0x54d   :  { %3500 = vmatpush1.msra.mxu0 %v3411_v27  ;;  %3590 = vmatprep.subr.mxu1 %v3456_v0  ;;  %v8048_v27 = vsub.s32 0, %v9056_v31  ;;  %v3969_v59 = vld [vmem:[#allocation12 + $0x478] sm:$0xff]  ;;  %v3964_v0 = vld [vmem:[#allocation12 + $0x450] sm:$0xff] }
 0x54e   :  { %3501 = vmatprep.subr.mxu0 %v3410_v23  ;;  %3591 = vmatpush1.msra.mxu1 %v3455_v10  ;;  %v3230_v23 = vld [vmem:[%s8610_s9] sm:$0x7]  ;;  %v3963_v10 = vld [vmem:[#allocation12 + $0x448] sm:$0xff]  ;;  %s5344_s9 = smov [#allocation15]  }
 0x54f   :  { %3502 = vmatpush1.msra.mxu0 %v3409_v7  ;;  %v8054_v7 = vsub.s32 1, %v9056_v31  ;;  %s4909_s5 = sshll.u32 %s5344_s9, 4  ;;  %s4910_s5 = int_to_ptr.vmem [resolvable:$true] %s4909_s5 }
 0x550   :  { %3503 = vmatprep.subr.mxu0 %v3408_v50  ;;  %v8057_v50 = vsub.s32 2, %v9056_v31  ;;  %p5278_p3 = scmp.lt.s32.totalorder %s4910_s5, %s4910_s5 }
 0x551   :  { %3504 = vmatpush1.msra.mxu0 %v3407_v37  ;;  %v3235_v37 = vrot.slane %v3230_v23, %v8048_v27 }
 0x552   :  { %3505 = vmatprep.subr.mxu0 %v3406_v21  ;;  %v3239_v21 = vrot.slane %v3230_v23, %v8054_v7 }
 0x553   :  { %3506 = vmatpush1.msra.mxu0 %v3405_v45 }
 0x554   :  { %3507 = vmatprep.subr.mxu0 %v3404_v44 }
 0x555   :  { %3508 = vmatpush1.msra.mxu0 %v3403_v55  ;;  %v3243_v55 = vrot.slane %v3230_v23, %v8057_v50  ;;  %v3959_v23 = vld [vmem:[#allocation12 + $0x428] sm:$0xff] }
 0x556   :  { %3509 = vmatprep.subr.mxu0 %v3402_v62 }
 0x557   :  { %3510 = vmatpush1.msra.mxu0 %v3401_v40 }
 0x558   :  { %3511 = vmatprep.subr.mxu0 %v3400_v6 }
 0x559   :  { %3512 = vmatpush1.msra.mxu0 %v3399_v56 }
 0x55a   :  { %3513 = vmatprep.subr.mxu0 %v3398_v25 }
 0x55b   :  { %3514 = vmatpush1.msra.mxu0 %v3397_v26 }
 0x55c   :  { %3515 = vmatprep.subr.mxu0 %v3396_v32 }
 0x55d   :  { %3516 = vmatpush1.msra.mxu0 %v3395_v33 }
 0x55e   :  { %3517 = vmatprep.subr.mxu0 %v3394_v52 }
 0x55f   :  { %3518 = vmatpush1.msra.mxu0 %v3393_v30  ;;  %v3650_v30 = vld [vmem:[%s8613_s12 + $0x8] sm:$0x1f] }
 0x560   :  { %3519 = vmatprep.subr.mxu0 %v3392_v18  ;;  %v3649_v18 = vld [vmem:[%s8613_s12] sm:$0x1f]  ;;  %5036 = vmatprep.subr.msk.mxu1 %vm2909_vm15, %v3650_v30 }
 0x561   :  { %3520 = vmatpush1.msra.mxu0 %v3391_v38  ;;  %v3904_v38 = vld [vmem:[#allocation12 + $0x270] sm:$0xff]  ;;  %v3467_v30 = vld [vmem:[%s8612_s11] sm:$0x3] }
 0x562   :  { %3521 = vmatprep.subr.mxu0 %v3454_v34  ;;  %v3903_v34 = vld [vmem:[#allocation12 + $0x268] sm:$0xff] }
 0x563   :  { %3522 = vmatpush2.msra.mxu0 %v3453_v2  ;;  %v3899_v2 = vld [vmem:[#allocation12 + $0x248] sm:$0xff] }
 0x564   :  { %3523 = vmatprep.subr.mxu0 %v3452_v46  ;;  %v3898_v46 = vld [vmem:[#allocation12 + $0x240] sm:$0xff] }
 0x565   :  { %3524 = vmatpush2.msra.mxu0 %v3451_v49  ;;  %v3894_v49 = vld [vmem:[#allocation12 + $0x220] sm:$0xff] }
 0x566   :  { %3525 = vmatprep.subr.mxu0 %v3450_v41  ;;  %v3893_v41 = vld [vmem:[#allocation12 + $0x218] sm:$0xff] }
 0x567   :  { %3526 = vmatpush2.msra.mxu0 %v3449_v14  ;;  %v3889_v14 = vld [vmem:[#allocation12 + $0x1f8] sm:$0xff] }
 0x568   :  { %3527 = vmatprep.subr.mxu0 %v3448_v57  ;;  %v3888_v57 = vld [vmem:[#allocation12 + $0x1f0] sm:$0xff] }
 0x569   :  { %3528 = vmatpush2.msra.mxu0 %v3447_v36  ;;  %v3884_v36 = vld [vmem:[#allocation12 + $0x1d0] sm:$0xff] }
 0x56a   :  { %3529 = vmatprep.subr.mxu0 %v3446_v3  ;;  %v3883_v3 = vld [vmem:[#allocation12 + $0x1c8] sm:$0xff] }
 0x56b   :  { %3530 = vmatpush2.msra.mxu0 %v3445_v1  ;;  %v3879_v1 = vld [vmem:[#allocation12 + $0x1a8] sm:$0xff] }
 0x56c   :  { %3531 = vmatprep.subr.mxu0 %v3444_v43  ;;  %v3878_v43 = vld [vmem:[#allocation12 + $0x1a0] sm:$0xff] }
 0x56d   :  { %3532 = vmatpush2.msra.mxu0 %v3443_v8  ;;  %v3874_v8 = vld [vmem:[#allocation12 + $0x180] sm:$0xff] }
 0x56e   :  { %3533 = vmatprep.subr.mxu0 %v3442_v42  ;;  %v3873_v42 = vld [vmem:[#allocation12 + $0x178] sm:$0xff] }
 0x56f   :  { %3534 = vmatpush2.msra.mxu0 %v3441_v22  ;;  %v3869_v22 = vld [vmem:[#allocation12 + $0x158] sm:$0xff] }
 0x570   :  { %3535 = vmatprep.subr.mxu0 %v3440_v19  ;;  %v3868_v19 = vld [vmem:[#allocation12 + $0x150] sm:$0xff] }
 0x571   :  { %3536 = vmatpush2.msra.mxu0 %v3439_v29  ;;  %v3864_v29 = vld [vmem:[#allocation12 + $0x130] sm:$0xff] }
 0x572   :  { %3537 = vmatprep.subr.mxu0 %v3438_v48  ;;  %v3863_v48 = vld [vmem:[#allocation12 + $0x128] sm:$0xff] }
 0x573   :  { %3538 = vmatpush2.msra.mxu0 %v3437_v16  ;;  %v3859_v16 = vld [vmem:[#allocation12 + $0x108] sm:$0xff] }
 0x574   :  { %3539 = vmatprep.subr.mxu0 %v3436_v47  ;;  %v3858_v47 = vld [vmem:[#allocation12 + $0x100] sm:$0xff] }
 0x575   :  { %3540 = vmatpush2.msra.mxu0 %v3435_v53  ;;  %v3854_v53 = vld [vmem:[#allocation12 + $0xe0] sm:$0xff] }
 0x576   :  { %3541 = vmatprep.subr.mxu0 %v3434_v63  ;;  %v3853_v63 = vld [vmem:[#allocation12 + $0xd8] sm:$0xff] }
 0x577   :  { %3542 = vmatpush2.msra.mxu0 %v3433_v9  ;;  %v3849_v9 = vld [vmem:[#allocation12 + $0xb8] sm:$0xff] }
 0x578   :  { %3543 = vmatprep.subr.mxu0 %v3432_v17  ;;  %v3848_v17 = vld [vmem:[#allocation12 + $0xb0] sm:$0xff] }
 0x579   :  { %3544 = vmatpush2.msra.mxu0 %v3431_v12  ;;  %v3844_v12 = vld [vmem:[#allocation12 + $0x90] sm:$0xff] }
 0x57a   :  { %3545 = vmatprep.subr.mxu0 %v3430_v4  ;;  %v3843_v4 = vld [vmem:[#allocation12 + $0x88] sm:$0xff] }
 0x57b   :  { %3546 = vmatpush2.msra.mxu0 %v3429_v15  ;;  %v3838_v15 = vld [vmem:[#allocation12 + $0x60] sm:$0xff] }
 0x57c   :  { %3547 = vmatprep.subr.mxu0 %v3428_v28  ;;  %v3833_v28 = vld [vmem:[#allocation12 + $0x38] sm:$0xff] }
 0x57d   :  { %3548 = vmatpush2.msra.mxu0 %v3427_v24  ;;  %v3828_v24 = vld [vmem:[#allocation12 + $0x10] sm:$0xff] }
 0x57e   :  { %3549 = vmatprep.subr.mxu0 %v3426_v5  ;;  %v3983_v5 = vld [vmem:[#allocation12 + $0x4e8] sm:$0xff] }
 0x57f   :  { %3550 = vmatpush2.msra.mxu0 %v3425_v20  ;;  %v3978_v20 = vld [vmem:[#allocation12 + $0x4c0] sm:$0xff] }
 0x580   :  { %3551 = vmatprep.subr.mxu0 %v3424_v11  ;;  %v3973_v11 = vld [vmem:[#allocation12 + $0x498] sm:$0xff] }
 0x581   :  { %3552 = vmatpush2.msra.mxu0 %v3423_v54  ;;  %v3968_v54 = vld [vmem:[#allocation12 + $0x470] sm:$0xff] }
 0x582   :  { %4203 = vmatprep.subr.mxu0 %v3904_v38 }
 0x602   :  { %v3313_v45 = vpop.f32.mrf.mxu1  ;;  %v5083_v44 = vpop.f32.mrf.mxu0 }
 0x603   :  { %v3314_v62 = vadd.f32 %v3313_v45, %v3235_v37  ;;  %v3958_v37 = vld [vmem:[#allocation12 + $0x420] sm:$0xff]  ;;  %v3953_v45 = vld [vmem:[#allocation12 + $0x3f8] sm:$0xff] }
 0x604   :  { %v3315_v40 = vpop.f32.mrf.mxu1  ;;  %v5084_v6 = vpop.f32.mrf.mxu0 }
 0x605   :  { %v3316_v56 = vadd.f32 %v3315_v40, %v3239_v21  ;;  %v5085_v25 = vadd.f32 %v5084_v6, %v5083_v44  ;;  %v3388_v33 = vmax.f32 %v3314_v62, 0.0  ;;  %v3954_v21 = vld [vmem:[#allocation12 + $0x400] sm:$0xff]  ;;  %v3949_v44 = vld [vmem:[#allocation12 + $0x3d8] sm:$0xff]  ;;  %v3944_v62 = vld [vmem:[#allocation12 + $0x3b0] sm:$0xff] }
 0x606   :  { %v3943_v40 = vld [vmem:[#allocation12 + $0x3a8] sm:$0xff] }
 0x607   :  { %v3389_v26 = vmax.f32 %v3316_v56, 0.0  ;;  %v3385_v32 = vadd.f32 %v5085_v25, %v3243_v55  ;;  %v3948_v55 = vld [vmem:[#allocation12 + $0x3d0] sm:$0xff]  ;;  %v3939_v6 = vld [vmem:[#allocation12 + $0x388] sm:$0xff]  ;;  %v3938_v56 = vld [vmem:[#allocation12 + $0x380] sm:$0xff] }
 0x608   :  { %v3934_v25 = vld [vmem:[#allocation12 + $0x360] sm:$0xff] }
 0x609   :  { %v3390_v52 = vmax.f32 %v3385_v32, 0.0  ;;  %3553 = vmatprep.mubr.f32.mxu0 %v3389_v26  ;;  %v3933_v26 = vld [vmem:[#allocation12 + $0x358] sm:$0xff] }
 0x60a   :  { %3554 = vmatmul.mubr.f32.vlgmr.msra.gmra.mxu0 %v3388_v33  ;;  %v3929_v32 = vld [vmem:[#allocation12 + $0x338] sm:$0xff]  ;;  %v3928_v33 = vld [vmem:[#allocation12 + $0x330] sm:$0xff] }
 0x60b   :  { %5034 = vmatmul.mubr.msk.f32.vlgmr.msra.gmra.mxu1 %vm3479_vm1, %v3390_v52  ;;  %4204 = vmatpush1.msra.mxu0 %v3903_v34  ;;  %v3924_v52 = vld [vmem:[#allocation12 + $0x310] sm:$0xff] }
 0x60c   :  { %3746 = vmatprep.mubr.f32.mxu1 %v9055_v60  ;;  %5037 = vmatpush1.msk.msra.mxu1 %vm2909_vm15, %v3649_v18  ;;  %v3476_v18 = vrot.slane %v3467_v30, %v8054_v7 }
 0x60d   :  { %5130 = vmatprep.subr.mxu1 %v9055_v60  ;;  %4205 = vmatprep.subr.mxu0 %v3899_v2 }
 0x60e   :  { %4206 = vmatpush1.msra.mxu0 %v3898_v46 }
 0x60f   :  { %4207 = vmatprep.subr.mxu0 %v3894_v49 }
 0x610   :  { %4208 = vmatpush1.msra.mxu0 %v3893_v41 }
 0x611   :  { %4209 = vmatprep.subr.mxu0 %v3889_v14 }
 0x612   :  { %4210 = vmatpush1.msra.mxu0 %v3888_v57 }
 0x613   :  { %4211 = vmatprep.subr.mxu0 %v3884_v36  ;;  %v3472_v36 = vrot.slane %v3467_v30, %v8048_v27  ;;  %v3962_v30 = vld [vmem:[#allocation12 + $0x440] sm:$0xff] }
 0x614   :  { %4212 = vmatpush1.msra.mxu0 %v3883_v3 }
 0x615   :  { %4213 = vmatprep.subr.mxu0 %v3879_v1  ;;  %v3643_v1 = vld [vmem:[%s8619_s18] sm:$0x3] }
 0x616   :  { %4214 = vmatpush1.msra.mxu0 %v3878_v43 }
 0x617   :  { %4215 = vmatprep.subr.mxu0 %v3874_v8 }
 0x618   :  { %4216 = vmatpush1.msra.mxu0 %v3873_v42 }
 0x619   :  { %4217 = vmatprep.subr.mxu0 %v3869_v22 }
 0x61a   :  { %4218 = vmatpush1.msra.mxu0 %v3868_v19  ;;  %v3651_v19 = vld [vmem:[%s8613_s12 + $0x10] sm:$0x1f] }
 0x61b   :  { %4219 = vmatprep.subr.mxu0 %v3864_v29  ;;  %v3902_v29 = vld [vmem:[#allocation12 + $0x260] sm:$0xff] }
 0x61c   :  { %4220 = vmatpush1.msra.mxu0 %v3863_v48  ;;  %v3901_v48 = vld [vmem:[#allocation12 + $0x258] sm:$0xff] }
 0x61d   :  { %4221 = vmatprep.subr.mxu0 %v3859_v16  ;;  %v3897_v16 = vld [vmem:[#allocation12 + $0x238] sm:$0xff] }
 0x61e   :  { %4222 = vmatpush1.msra.mxu0 %v3858_v47  ;;  %v3896_v47 = vld [vmem:[#allocation12 + $0x230] sm:$0xff] }
 0x61f   :  { %4223 = vmatprep.subr.mxu0 %v3854_v53  ;;  %v3892_v53 = vld [vmem:[#allocation12 + $0x210] sm:$0xff] }
 0x620   :  { %4224 = vmatpush1.msra.mxu0 %v3853_v63  ;;  %v3891_v63 = vld [vmem:[#allocation12 + $0x208] sm:$0xff] }
 0x621   :  { %4225 = vmatprep.subr.mxu0 %v3849_v9  ;;  %v3887_v9 = vld [vmem:[#allocation12 + $0x1e8] sm:$0xff] }
 0x622   :  { %4226 = vmatpush1.msra.mxu0 %v3848_v17  ;;  %v3886_v17 = vld [vmem:[#allocation12 + $0x1e0] sm:$0xff] }
 0x623   :  { %4227 = vmatprep.subr.mxu0 %v3844_v12  ;;  %v3882_v12 = vld [vmem:[#allocation12 + $0x1c0] sm:$0xff] }
 0x624   :  { %4228 = vmatpush1.msra.mxu0 %v3843_v4  ;;  %v3881_v4 = vld [vmem:[#allocation12 + $0x1b8] sm:$0xff] }
 0x625   :  { %4229 = vmatprep.subr.mxu0 %v3839_v58  ;;  %v3877_v58 = vld [vmem:[#allocation12 + $0x198] sm:$0xff] }
 0x626   :  { %4230 = vmatpush1.msra.mxu0 %v3838_v15  ;;  %v3876_v15 = vld [vmem:[#allocation12 + $0x190] sm:$0xff] }
 0x627   :  { %4231 = vmatprep.subr.mxu0 %v3834_v13  ;;  %v3872_v13 = vld [vmem:[#allocation12 + $0x170] sm:$0xff] }
 0x628   :  { %4232 = vmatpush1.msra.mxu0 %v3833_v28  ;;  %v3871_v28 = vld [vmem:[#allocation12 + $0x168] sm:$0xff] }
 0x629   :  { %4233 = vmatprep.subr.mxu0 %v3829_v51 }
 0x62a   :  { %4234 = vmatpush1.msra.mxu0 %v3828_v24  ;;  %v3867_v24 = vld [vmem:[#allocation12 + $0x148] sm:$0xff] }
 0x62b   :  { %4235 = vmatprep.subr.mxu0 %v3984_v35  ;;  %v3866_v35 = vld [vmem:[#allocation12 + $0x140] sm:$0xff] }
 0x62c   :  { %4236 = vmatpush2.msra.mxu0 %v3983_v5  ;;  %v3862_v5 = vld [vmem:[#allocation12 + $0x120] sm:$0xff] }
 0x62d   :  { %4237 = vmatprep.subr.mxu0 %v3979_v61  ;;  %v3861_v61 = vld [vmem:[#allocation12 + $0x118] sm:$0xff] }
 0x62e   :  { %4238 = vmatpush2.msra.mxu0 %v3978_v20  ;;  %v3857_v20 = vld [vmem:[#allocation12 + $0xf8] sm:$0xff] }
 0x62f   :  { %4239 = vmatprep.subr.mxu0 %v3974_v39  ;;  %v3856_v39 = vld [vmem:[#allocation12 + $0xf0] sm:$0xff] }
 0x630   :  { %4240 = vmatpush2.msra.mxu0 %v3973_v11  ;;  %v3852_v11 = vld [vmem:[#allocation12 + $0xd0] sm:$0xff] }
 0x631   :  { %4241 = vmatprep.subr.mxu0 %v3969_v59  ;;  %v3851_v59 = vld [vmem:[#allocation12 + $0xc8] sm:$0xff] }
 0x632   :  { %4242 = vmatpush2.msra.mxu0 %v3968_v54  ;;  %v3847_v54 = vld [vmem:[#allocation12 + $0xa8] sm:$0xff] }
 0x633   :  { %4243 = vmatprep.subr.mxu0 %v3964_v0  ;;  %v3846_v0 = vld [vmem:[#allocation12 + $0xa0] sm:$0xff] }
 0x634   :  { %4244 = vmatpush2.msra.mxu0 %v3963_v10  ;;  %v3842_v10 = vld [vmem:[#allocation12 + $0x80] sm:$0xff] }
 0x635   :  { %4245 = vmatprep.subr.mxu0 %v3959_v23  ;;  %v3841_v23 = vld [vmem:[#allocation12 + $0x78] sm:$0xff] }
 0x636   :  { %4246 = vmatpush2.msra.mxu0 %v3958_v37  ;;  %v3837_v37 = vld [vmem:[#allocation12 + $0x58] sm:$0xff] }
 0x637   :  { %4247 = vmatprep.subr.mxu0 %v3954_v21  ;;  %v3836_v21 = vld [vmem:[#allocation12 + $0x50] sm:$0xff] }
 0x638   :  { %4248 = vmatpush2.msra.mxu0 %v3953_v45  ;;  %v3832_v45 = vld [vmem:[#allocation12 + $0x30] sm:$0xff] }
 0x639   :  { %4249 = vmatprep.subr.mxu0 %v3949_v44  ;;  %v3831_v44 = vld [vmem:[#allocation12 + $0x28] sm:$0xff] }
 0x63a   :  { %4250 = vmatpush2.msra.mxu0 %v3948_v55  ;;  %v3827_v55 = vld [vmem:[#allocation12 + $0x8] sm:$0xff] }
 0x63b   :  { %4251 = vmatprep.subr.mxu0 %v3944_v62  ;;  %v3826_v62 = vld [vmem:[#allocation12] sm:$0xff] }
 0x63c   :  { %4252 = vmatpush2.msra.mxu0 %v3943_v40  ;;  %v3982_v40 = vld [vmem:[#allocation12 + $0x4e0] sm:$0xff] }
 0x63d   :  { %4253 = vmatprep.subr.mxu0 %v3939_v6  ;;  %v3981_v6 = vld [vmem:[#allocation12 + $0x4d8] sm:$0xff] }
 0x63e   :  { %4254 = vmatpush2.msra.mxu0 %v3938_v56  ;;  %v3977_v56 = vld [vmem:[#allocation12 + $0x4b8] sm:$0xff] }
 0x63f   :  { %4255 = vmatprep.subr.mxu0 %v3934_v25  ;;  %v3976_v25 = vld [vmem:[#allocation12 + $0x4b0] sm:$0xff] }
 0x640   :  { %4256 = vmatpush2.msra.mxu0 %v3933_v26  ;;  %v3972_v26 = vld [vmem:[#allocation12 + $0x490] sm:$0xff] }
 0x641   :  { %4257 = vmatprep.subr.mxu0 %v3929_v32  ;;  %v3971_v32 = vld [vmem:[#allocation12 + $0x488] sm:$0xff] }
 0x642   :  { %4258 = vmatpush2.msra.mxu0 %v3928_v33  ;;  %v3967_v33 = vld [vmem:[#allocation12 + $0x468] sm:$0xff] }
 0x643   :  { %4259 = vmatprep.subr.mxu0 %v3924_v52  ;;  %v3966_v52 = vld [vmem:[#allocation12 + $0x460] sm:$0xff] }
 0x6ca   :  { %v3555_v38 = vpop.f32.mrf.mxu0 }
 0x6cb   :  { %v3626_v34 = vpop.f32.mrf.mxu1  ;;  %v3556_v3 = vadd.f32 %v3555_v38, %v3472_v36  ;;  %v3957_v38 = vld [vmem:[#allocation12 + $0x418] sm:$0xff] }
 0x6cc   :  { %v3557_v2 = vpop.f32.mrf.mxu0  ;;  %v3937_v36 = vld [vmem:[#allocation12 + $0x378] sm:$0xff] }
 0x6cd   :  { %v3558_v46 = vadd.f32 %v3557_v2, %v3476_v18  ;;  %v3628_v49 = vpop.f32.mrf.mxu1  ;;  %v3627_v8 = vadd.f32 %v3626_v34, %v3556_v3  ;;  %v3961_v18 = vld [vmem:[#allocation12 + $0x438] sm:$0xff]  ;;  %v3956_v34 = vld [vmem:[#allocation12 + $0x410] sm:$0xff] }
 0x6ce   :  { %v3952_v2 = vld [vmem:[#allocation12 + $0x3f0] sm:$0xff] }
 0x6cf   :  { %v3629_v41 = vadd.f32 %v3628_v49, %v3558_v46  ;;  %v3951_v46 = vld [vmem:[#allocation12 + $0x3e8] sm:$0xff]  ;;  %v3936_v3 = vld [vmem:[#allocation12 + $0x370] sm:$0xff] }
 0x6d0   :  { %v3947_v49 = vld [vmem:[#allocation12 + $0x3c8] sm:$0xff] }
 0x6d1   :  { %v3644_v14 = vmul.f32 0.5, %v3629_v41  ;;  %v3633_v51 = vcombine.low %v3627_v8, %v3629_v41  ;;  %v3946_v41 = vld [vmem:[#allocation12 + $0x3c0] sm:$0xff] }
 0x6d3   :  { %v3645_v57 = vmul.f32 1.442695, %v3644_v14  ;;  %5035 = vst.sshfl [vmem:[#allocation15] sm:$0x33 pattern:$0x76325410] %v3633_v51 }
 0x6d4   :  { %v3942_v14 = vld [vmem:[#allocation12 + $0x3a0] sm:$0xff] }
 0x6d5   :  { %5169 = vpow2.f32 %v3645_v57  ;;  %v3941_v57 = vld [vmem:[#allocation12 + $0x398] sm:$0xff]  ;;  %v3652_v51 = vld [vmem:[%s8614_s13] sm:$0x7] }
 0x6e2   :  { %v5170_v43 = vpop.eup %5169 }
 0x6e3   :  { %v3647_v42 = vmul.f32 %v5170_v43, %v3643_v1  ;;  %v3932_v1 = vld [vmem:[#allocation12 + $0x350] sm:$0xff]  ;;  %v3931_v43 = vld [vmem:[#allocation12 + $0x348] sm:$0xff] }
 0x6e5   :  { %v3648_v22 = vadd.f32 %v3647_v42, %v3627_v8  ;;  %v3927_v8 = vld [vmem:[#allocation12 + $0x328] sm:$0xff]  ;;  %v3926_v42 = vld [vmem:[#allocation12 + $0x320] sm:$0xff] }
 0x6e7   :  { %5038 = vmatmul.mubr.msk.f32.vlgmr.msra.gmra.mxu1 %vm3669_vm2, %v3648_v22 }
 0x6e8   :  { %5131 = vmatpush3.msk.msra.mxu1 %vm2909_vm15, %v3651_v19  ;;  %5132 = vmatprep.mubr.msk.f32.mxu1 %vm5343_vm3, %v9055_v60  ;;  %v3921_v19 = vld [vmem:[#allocation12 + $0x2f8] sm:$0xff] }
 0x6e9   :  { %4061 = vmatprep.subr.mxu1 %v3902_v29  ;;  %v3923_v29 = vld [vmem:[#allocation12 + $0x308] sm:$0xff] }
 0x6ea   :  { %4260 = vmatpush2.msra.mxu0 %v3923_v29  ;;  %v4516_v29 = vld [vmem:[%s8617_s16 + $0xd0] sm:$0xff] }
 0x6eb   :  { %5133 = vmatmul.mubr.msk.f32.vlgmr.msra.gmra.mxu1 %vm3669_vm2, %v3648_v22  ;;  %v3922_v22 = vld [vmem:[#allocation12 + $0x300] sm:$0xff] }
 0x6ec   :  { %4062 = vmatpush1.msra.mxu1 %v3901_v48  ;;  %v3917_v48 = vld [vmem:[#allocation12 + $0x2d8] sm:$0xff] }
 0x6ed   :  { %4063 = vmatprep.subr.mxu1 %v3897_v16  ;;  %v3919_v16 = vld [vmem:[#allocation12 + $0x2e8] sm:$0xff] }
 0x6ee   :  { %4064 = vmatpush1.msra.mxu1 %v3896_v47  ;;  %4261 = vmatprep.subr.mxu0 %v3919_v16  ;;  %v3916_v47 = vld [vmem:[#allocation12 + $0x2d0] sm:$0xff]  ;;  %v4515_v16 = vld [vmem:[%s8617_s16 + $0xc8] sm:$0xff] }
 0x6ef   :  { %4065 = vmatprep.subr.mxu1 %v3892_v53  ;;  %v3918_v53 = vld [vmem:[#allocation12 + $0x2e0] sm:$0xff] }
 0x6f0   :  { %4066 = vmatpush1.msra.mxu1 %v3891_v63  ;;  %v3912_v63 = vld [vmem:[#allocation12 + $0x2b0] sm:$0xff]  ;;  %4262 = vmatpush2.msra.mxu0 %v3918_v53  ;;  %v4514_v53 = vld [vmem:[%s8617_s16 + $0xc0] sm:$0xff] }
 0x6f1   :  { %4067 = vmatprep.subr.mxu1 %v3887_v9  ;;  %v3914_v9 = vld [vmem:[#allocation12 + $0x2c0] sm:$0xff] }
 0x6f2   :  { %4068 = vmatpush1.msra.mxu1 %v3886_v17  ;;  %4263 = vmatprep.subr.mxu0 %v3914_v9  ;;  %v3911_v17 = vld [vmem:[#allocation12 + $0x2a8] sm:$0xff]  ;;  %v4513_v9 = vld [vmem:[%s8617_s16 + $0xb8] sm:$0xff] }
 0x6f3   :  { %4069 = vmatprep.subr.mxu1 %v3882_v12  ;;  %v3913_v12 = vld [vmem:[#allocation12 + $0x2b8] sm:$0xff] }
 0x6f4   :  { %4070 = vmatpush1.msra.mxu1 %v3881_v4  ;;  %v3907_v4 = vld [vmem:[#allocation12 + $0x288] sm:$0xff]  ;;  %4264 = vmatpush2.msra.mxu0 %v3913_v12  ;;  %v3905_v12 = vld [vmem:[#allocation12 + $0x278] sm:$0xff] }
 0x6f5   :  { %4071 = vmatprep.subr.mxu1 %v3877_v58  ;;  %v3909_v58 = vld [vmem:[#allocation12 + $0x298] sm:$0xff] }
 0x6f6   :  { %4072 = vmatpush1.msra.mxu1 %v3876_v15  ;;  %v3906_v15 = vld [vmem:[#allocation12 + $0x280] sm:$0xff]  ;;  %4265 = vmatprep.subr.mxu0 %v3909_v58  ;;  %v4512_v58 = vld [vmem:[%s8617_s16 + $0xb0] sm:$0xff] }
 0x6f7   :  { %4073 = vmatprep.subr.mxu1 %v3872_v13  ;;  %v3908_v13 = vld [vmem:[#allocation12 + $0x290] sm:$0xff] }
 0x6f8   :  { %4074 = vmatpush1.msra.mxu1 %v3871_v28  ;;  %v4012_v28 = vld [vmem:[#allocation12 + $0x5d0] sm:$0xf]  ;;  %4266 = vmatpush2.msra.mxu0 %v3908_v13  ;;  %v4511_v13 = vld [vmem:[%s8617_s16 + $0xa8] sm:$0xff] }
 0x6f9   :  { %4075 = vmatprep.subr.mxu1 %v3867_v24  ;;  %5135 = vmatprep.subr.mxu0 %v9055_v60  ;;  %v3657_v24 = vrot.slane %v3652_v51, %v8048_v27 }
 0x6fa   :  { %4076 = vmatpush1.msra.mxu1 %v3866_v35  ;;  %v3661_v35 = vrot.slane %v3652_v51, %v8054_v7 }
 0x6fb   :  { %4077 = vmatprep.subr.mxu1 %v3862_v5 }
 0x6fc   :  { %4078 = vmatpush1.msra.mxu1 %v3861_v61 }
 0x6fd   :  { %4079 = vmatprep.subr.mxu1 %v3857_v20 }
 0x6fe   :  { %4080 = vmatpush1.msra.mxu1 %v3856_v39 }
 0x6ff   :  { %4081 = vmatprep.subr.mxu1 %v3852_v11 }
 0x700   :  { %4082 = vmatpush1.msra.mxu1 %v3851_v59 }
 0x701   :  { %4083 = vmatprep.subr.mxu1 %v3847_v54 }
 0x702   :  { %4084 = vmatpush1.msra.mxu1 %v3846_v0 }
 0x703   :  { %4085 = vmatprep.subr.mxu1 %v3842_v10  ;;  %v4011_v10 = vld [vmem:[#allocation12 + $0x5c8] sm:$0xf] }
 0x704   :  { %4086 = vmatpush1.msra.mxu1 %v3841_v23  ;;  %v4015_v23 = vld [vmem:[#allocation12 + $0x5e8] sm:$0xf] }
 0x705   :  { %4087 = vmatprep.subr.mxu1 %v3837_v37  ;;  %v4007_v37 = vld [vmem:[#allocation12 + $0x5a8] sm:$0xff] }
 0x706   :  { %4088 = vmatpush1.msra.mxu1 %v3836_v21  ;;  %v4006_v21 = vld [vmem:[#allocation12 + $0x5a0] sm:$0xff] }
 0x707   :  { %4089 = vmatprep.subr.mxu1 %v3832_v45  ;;  %v4010_v45 = vld [vmem:[#allocation12 + $0x5c0] sm:$0xff] }
 0x708   :  { %4090 = vmatpush1.msra.mxu1 %v3831_v44  ;;  %v4002_v44 = vld [vmem:[#allocation12 + $0x580] sm:$0xff] }
 0x709   :  { %4091 = vmatprep.subr.mxu1 %v3827_v55  ;;  %v4001_v55 = vld [vmem:[#allocation12 + $0x578] sm:$0xff] }
 0x70a   :  { %4092 = vmatpush1.msra.mxu1 %v3826_v62  ;;  %v4005_v62 = vld [vmem:[#allocation12 + $0x598] sm:$0xff] }
 0x70b   :  { %4093 = vmatprep.subr.mxu1 %v3982_v40  ;;  %v3665_v40 = vrot.slane %v3652_v51, %v8057_v50  ;;  %v4510_v51 = vld [vmem:[%s8617_s16 + $0xa0] sm:$0xff] }
 0x70c   :  { %4094 = vmatpush2.msra.mxu1 %v3981_v6  ;;  %v3997_v6 = vld [vmem:[#allocation12 + $0x558] sm:$0xff] }
 0x70d   :  { %4095 = vmatprep.subr.mxu1 %v3977_v56  ;;  %v3996_v56 = vld [vmem:[#allocation12 + $0x550] sm:$0xff] }
 0x70e   :  { %4096 = vmatpush2.msra.mxu1 %v3976_v25  ;;  %v4000_v25 = vld [vmem:[#allocation12 + $0x570] sm:$0xff] }
 0x70f   :  { %4097 = vmatprep.subr.mxu1 %v3972_v26  ;;  %v3992_v26 = vld [vmem:[#allocation12 + $0x530] sm:$0xff] }
 0x710   :  { %4098 = vmatpush2.msra.mxu1 %v3971_v32  ;;  %v3991_v32 = vld [vmem:[#allocation12 + $0x528] sm:$0xff] }
 0x711   :  { %4099 = vmatprep.subr.mxu1 %v3967_v33  ;;  %v3995_v33 = vld [vmem:[#allocation12 + $0x548] sm:$0xff] }
 0x712   :  { %4100 = vmatpush2.msra.mxu1 %v3966_v52 }
 0x713   :  { %4101 = vmatprep.subr.mxu1 %v3962_v30  ;;  %v3987_v30 = vld [vmem:[#allocation12 + $0x508] sm:$0xff] }
 0x714   :  { %4102 = vmatpush2.msra.mxu1 %v3961_v18  ;;  %v3986_v18 = vld [vmem:[#allocation12 + $0x500] sm:$0xff] }
 0x715   :  { %4103 = vmatprep.subr.mxu1 %v3957_v38  ;;  %v3990_v38 = vld [vmem:[#allocation12 + $0x520] sm:$0xff] }
 0x716   :  { %4104 = vmatpush2.msra.mxu1 %v3956_v34  ;;  %v4014_v34 = vld [vmem:[#allocation12 + $0x5e0] sm:$0xf] }
 0x717   :  { %4105 = vmatprep.subr.mxu1 %v3952_v2 }
 0x718   :  { %4106 = vmatpush2.msra.mxu1 %v3951_v46  ;;  %v4013_v46 = vld [vmem:[#allocation12 + $0x5d8] sm:$0xf] }
 0x719   :  { %4107 = vmatprep.subr.mxu1 %v3947_v49  ;;  %v4009_v49 = vld [vmem:[#allocation12 + $0x5b8] sm:$0xff] }
 0x71a   :  { %4108 = vmatpush2.msra.mxu1 %v3946_v41  ;;  %v4008_v41 = vld [vmem:[#allocation12 + $0x5b0] sm:$0xff] }
 0x71b   :  { %4109 = vmatprep.subr.mxu1 %v3942_v14  ;;  %v4521_v14 = vld [vmem:[%s8617_s16 + $0xf8] sm:$0xff] }
 0x71c   :  { %4110 = vmatpush2.msra.mxu1 %v3941_v57  ;;  %v4004_v57 = vld [vmem:[#allocation12 + $0x590] sm:$0xff] }
 0x71d   :  { %4111 = vmatprep.subr.mxu1 %v3937_v36  ;;  %v4520_v36 = vld [vmem:[%s8617_s16 + $0xf0] sm:$0xff] }
 0x71e   :  { %4112 = vmatpush2.msra.mxu1 %v3936_v3  ;;  %v4003_v3 = vld [vmem:[#allocation12 + $0x588] sm:$0xff] }
 0x71f   :  { %4113 = vmatprep.subr.mxu1 %v3932_v1  ;;  %v4519_v1 = vld [vmem:[%s8617_s16 + $0xe8] sm:$0xff] }
 0x720   :  { %4114 = vmatpush2.msra.mxu1 %v3931_v43  ;;  %v3999_v43 = vld [vmem:[#allocation12 + $0x568] sm:$0xff] }
 0x721   :  { %4115 = vmatprep.subr.mxu1 %v3927_v8  ;;  %v4518_v8 = vld [vmem:[%s8617_s16 + $0xe0] sm:$0xff] }
 0x722   :  { %4116 = vmatpush2.msra.mxu1 %v3926_v42  ;;  %v3998_v42 = vld [vmem:[#allocation12 + $0x560] sm:$0xff] }
 0x723   :  { %4117 = vmatprep.subr.mxu1 %v3922_v22  ;;  %v4517_v22 = vld [vmem:[%s8617_s16 + $0xd8] sm:$0xff] }
 0x724   :  { %4118 = vmatpush2.msra.mxu1 %v3921_v19  ;;  %v3994_v19 = vld [vmem:[#allocation12 + $0x540] sm:$0xff] }
 0x725   :  { %4119 = vmatprep.subr.mxu1 %v3917_v48  ;;  %v3993_v48 = vld [vmem:[#allocation12 + $0x538] sm:$0xff] }
 0x726   :  { %4120 = vmatpush2.msra.mxu1 %v3916_v47  ;;  %v3989_v47 = vld [vmem:[#allocation12 + $0x518] sm:$0xff] }
 0x727   :  { %4121 = vmatprep.subr.mxu1 %v3912_v63  ;;  %v3988_v63 = vld [vmem:[#allocation12 + $0x510] sm:$0xff] }
 0x728   :  { %4122 = vmatpush2.msra.mxu1 %v3911_v17  ;;  %v3985_v17 = vld [vmem:[#allocation12 + $0x4f8] sm:$0xff] }
 0x729   :  { %4123 = vmatprep.subr.mxu1 %v3907_v4  ;;  %v3980_v4 = vld [vmem:[#allocation12 + $0x4d0] sm:$0xff] }
 0x72a   :  { %4124 = vmatpush2.msra.mxu1 %v3906_v15  ;;  %v3900_v15 = vld [vmem:[#allocation12 + $0x250] sm:$0xff] }
 0x72b   :  { %5041 = vmatprep.subr.msk.mxu1 %vm2940_vm10, %v4012_v28  ;;  %v3975_v28 = vld [vmem:[#allocation12 + $0x4a8] sm:$0xff] }
 0x7a7   :  { %v3748_v5 = vpop.f32.mrf.mxu1 }
 0x7a8   :  { %v3749_v61 = vadd.f32 %v3748_v5, %v3657_v24  ;;  %v3895_v24 = vld [vmem:[#allocation12 + $0x228] sm:$0xff]  ;;  %v3970_v5 = vld [vmem:[#allocation12 + $0x480] sm:$0xff] }
 0x7a9   :  { %v3750_v20 = vpop.f32.mrf.mxu1 }
 0x7aa   :  { %v3751_v39 = vadd.f32 %v3750_v20, %v3661_v35  ;;  %v8096_v54 = vmax.f32 %v3749_v61, 0.0  ;;  %v4509_v35 = vld [vmem:[%s8617_s16 + $0x98] sm:$0xff]  ;;  %v4508_v61 = vld [vmem:[%s8617_s16 + $0x90] sm:$0xff]  ;;  %v3890_v20 = vld [vmem:[#allocation12 + $0x200] sm:$0xff] }
 0x7ab   :  { %v3819_v11 = vpop.f32.mrf.mxu1 }
 0x7ac   :  { %v8094_v59 = vmax.f32 %v3751_v39, 0.0  ;;  %v3820_v52 = vadd.f32 %v3819_v11, %v3665_v40  ;;  %v4507_v39 = vld [vmem:[%s8617_s16 + $0x88] sm:$0xff]  ;;  %v3965_v11 = vld [vmem:[#allocation12 + $0x458] sm:$0xff] }
 0x7ad   :  { %v5134_v0 = vpop.f32.mrf.mxu1  ;;  %v4501_v40 = vld [vmem:[%s8617_s16 + $0x58] sm:$0xff] }
 0x7ae   :  { %4125 = vmatprep.mubr.f32.mxu1 %v8094_v59  ;;  %4267 = vmatprep.mubr.f32.mxu0 %v8094_v59  ;;  %v3825_v2 = vmax.f32 %v3820_v52, 0.0  ;;  %v3885_v0 = vld [vmem:[#allocation12 + $0x1d8] sm:$0xff] }
 0x7af   :  { %4126 = vmatmul.mubr.f32.vlgmr.msra.gmra.mxu1 %v8096_v54  ;;  %4268 = vmatmul.mubr.f32.vlgmr.msra.gmra.mxu0 %v8096_v54  ;;  %v3865_v52 = vld [vmem:[#allocation12 + $0x138] sm:$0xff] }
 0x7b0   :  { %5042 = vmatpush1.msk.msra.mxu1 %vm2940_vm10, %v4011_v10  ;;  %5136 = vmatpush3.msk.msra.mxu0 %vm2940_vm10, %v4015_v23  ;;  %v4505_v10 = vld [vmem:[%s8617_s16 + $0x78] sm:$0xff]  ;;  %v3960_v23 = vld [vmem:[#allocation12 + $0x430] sm:$0xff] }
 0x7b1   :  { %4154 = vmatprep.subr.mxu1 %v4007_v37  ;;  %5137 = vmatprep.subr.mxu0 %v9055_v60  ;;  %v4504_v37 = vld [vmem:[%s8617_s16 + $0x70] sm:$0xff] }
 0x7b2   :  { %4155 = vmatpush1.msra.mxu1 %v4006_v21  ;;  %5138 = vmatpush3.msra.mxu0 %v4010_v45  ;;  %v3880_v21 = vld [vmem:[#allocation12 + $0x1b0] sm:$0xff]  ;;  %v4503_v45 = vld [vmem:[%s8617_s16 + $0x68] sm:$0xff] }
 0x7b3   :  { %4156 = vmatprep.subr.mxu1 %v4002_v44  ;;  %5139 = vmatprep.subr.mxu0 %v9055_v60  ;;  %v3955_v44 = vld [vmem:[#allocation12 + $0x408] sm:$0xff] }
 0x7b4   :  { %4157 = vmatpush1.msra.mxu1 %v4001_v55  ;;  %5140 = vmatpush3.msra.mxu0 %v4005_v62  ;;  %v4502_v55 = vld [vmem:[%s8617_s16 + $0x60] sm:$0xff]  ;;  %v3875_v62 = vld [vmem:[#allocation12 + $0x188] sm:$0xff] }
 0x7b5   :  { %4158 = vmatprep.subr.mxu1 %v3997_v6  ;;  %5141 = vmatprep.subr.mxu0 %v9055_v60  ;;  %v3950_v6 = vld [vmem:[#allocation12 + $0x3e0] sm:$0xff] }
 0x7b6   :  { %4159 = vmatpush1.msra.mxu1 %v3996_v56  ;;  %5142 = vmatpush3.msra.mxu0 %v4000_v25  ;;  %v4500_v56 = vld [vmem:[%s8617_s16 + $0x50] sm:$0xff]  ;;  %v3870_v25 = vld [vmem:[#allocation12 + $0x160] sm:$0xff] }
 0x7b7   :  { %4160 = vmatprep.subr.mxu1 %v3992_v26  ;;  %5143 = vmatprep.subr.mxu0 %v9055_v60  ;;  %v4499_v26 = vld [vmem:[%s8617_s16 + $0x48] sm:$0xff] }
 0x7b8   :  { %4161 = vmatpush1.msra.mxu1 %v3991_v32  ;;  %5144 = vmatpush3.msra.mxu0 %v3995_v33  ;;  %v3945_v32 = vld [vmem:[#allocation12 + $0x3b8] sm:$0xff]  ;;  %v4498_v33 = vld [vmem:[%s8617_s16 + $0x40] sm:$0xff] }
 0x7b9   :  { %4162 = vmatprep.subr.mxu1 %v3987_v30  ;;  %5145 = vmatprep.subr.mxu0 %v9055_v60  ;;  %v4497_v30 = vld [vmem:[%s8617_s16 + $0x38] sm:$0xff] }
 0x7ba   :  { %4163 = vmatpush1.msra.mxu1 %v3986_v18  ;;  %4196 = vmatprep.mubr.f32.mxu1 %v9055_v60  ;;  %v3940_v18 = vld [vmem:[#allocation12 + $0x390] sm:$0xff] }
 0x7bb   :  { %5146 = vmatpush3.msra.mxu0 %v3990_v38  ;;  %5147 = vmatprep.mubr.msk.f32.mxu0 %vm5343_vm3, %v9055_v60  ;;  %v4496_v38 = vld [vmem:[%s8617_s16 + $0x30] sm:$0xff] }
 0x7bc   :  { %5043 = vmatmul.mubr.msk.f32.vlgmr.msra.gmra.mxu1 %vm3479_vm1, %v3825_v2  ;;  %5044 = vmatprep.subr.msk.mxu1 %vm2940_vm10, %v4014_v34  ;;  %v3860_v34 = vld [vmem:[#allocation12 + $0x110] sm:$0xff] }
 0x7bd   :  { %5148 = vmatmul.mubr.msk.f32.vlgmr.msra.gmra.mxu0 %vm3479_vm1, %v3825_v2  ;;  %5045 = vmatpush1.msk.msra.mxu1 %vm2940_vm10, %v4013_v46  ;;  %v3935_v46 = vld [vmem:[#allocation12 + $0x368] sm:$0xff] }
 0x7be   :  { %4296 = vmatprep.subr.mxu1 %v4009_v49  ;;  %4338 = vmatprep.mubr.f32.mxu1 %v9055_v60  ;;  %v4494_v49 = vld [vmem:[%s8617_s16 + $0x20] sm:$0xff] }
 0x7bf   :  { %4297 = vmatpush1.msra.mxu1 %v4008_v41  ;;  %4656 = vmatprep.subr.mxu0 %v4521_v14  ;;  %v3855_v41 = vld [vmem:[#allocation12 + $0xe8] sm:$0xff]  ;;  %v4493_v14 = vld [vmem:[%s8617_s16 + $0x18] sm:$0xff] }
 0x7c0   :  { %4298 = vmatprep.subr.mxu1 %v4004_v57  ;;  %4657 = vmatpush1.msra.mxu0 %v4520_v36  ;;  %v3930_v57 = vld [vmem:[#allocation12 + $0x340] sm:$0xff]  ;;  %v4492_v36 = vld [vmem:[%s8617_s16 + $0x10] sm:$0xff] }
 0x7c1   :  { %4299 = vmatpush1.msra.mxu1 %v4003_v3  ;;  %4658 = vmatprep.subr.mxu0 %v4519_v1  ;;  %v3850_v3 = vld [vmem:[#allocation12 + $0xc0] sm:$0xff]  ;;  %v4491_v1 = vld [vmem:[%s8617_s16 + $0x8] sm:$0xff] }
 0x7c2   :  { %4300 = vmatprep.subr.mxu1 %v3999_v43  ;;  %4659 = vmatpush1.msra.mxu0 %v4518_v8  ;;  %v3925_v43 = vld [vmem:[#allocation12 + $0x318] sm:$0xff]  ;;  %v4490_v8 = vld [vmem:[%s8617_s16] sm:$0xff] }
 0x7c3   :  { %4301 = vmatpush1.msra.mxu1 %v3998_v42  ;;  %4660 = vmatprep.subr.mxu0 %v4517_v22  ;;  %v3845_v42 = vld [vmem:[#allocation12 + $0x98] sm:$0xff] }
 0x7c4   :  { %4302 = vmatprep.subr.mxu1 %v3994_v19  ;;  %4661 = vmatpush1.msra.mxu0 %v4516_v29  ;;  %v4553_v22 = vld [vmem:[%s8617_s16 + $0x1f8] sm:$0xff]  ;;  %v3920_v19 = vld [vmem:[#allocation12 + $0x2f0] sm:$0xff] }
 0x7c5   :  { %4303 = vmatpush1.msra.mxu1 %v3993_v48  ;;  %4662 = vmatprep.subr.mxu0 %v4515_v16  ;;  %v4552_v29 = vld [vmem:[%s8617_s16 + $0x1f0] sm:$0xff]  ;;  %v4551_v16 = vld [vmem:[%s8617_s16 + $0x1e8] sm:$0xff] }
 0x7c6   :  { %4304 = vmatprep.subr.mxu1 %v3989_v47  ;;  %4663 = vmatpush1.msra.mxu0 %v4514_v53  ;;  %v3840_v48 = vld [vmem:[#allocation12 + $0x70] sm:$0xff]  ;;  %v3915_v47 = vld [vmem:[#allocation12 + $0x2c8] sm:$0xff]  ;;  %v4550_v53 = vld [vmem:[%s8617_s16 + $0x1e0] sm:$0xff] }
 0x7c7   :  { %4305 = vmatpush1.msra.mxu1 %v3988_v63  ;;  %4664 = vmatprep.subr.mxu0 %v4513_v9  ;;  %v3835_v63 = vld [vmem:[#allocation12 + $0x48] sm:$0xff]  ;;  %v4549_v9 = vld [vmem:[%s8617_s16 + $0x1d8] sm:$0xff] }
 0x7c8   :  { %5046 = vmatmul.mubr.msk.f32.vlgmr.msra.gmra.mxu1 %vm3479_vm1, %v3825_v2  ;;  %5088 = vmatprep.subr.mxu1 %v3985_v17  ;;  %v4495_v2 = vld [vmem:[%s8617_s16 + $0x28] sm:$0xff]  ;;  %v3910_v17 = vld [vmem:[#allocation12 + $0x2a0] sm:$0xff] }
 0x7c9   :  { %5089 = vmatpush3.msra.mxu1 %v3905_v12  ;;  %4409 = vmatprep.mubr.f32.mxu1 %v8094_v59  ;;  %v4506_v59 = vld [vmem:[%s8617_s16 + $0x80] sm:$0xff]  ;;  %v4548_v12 = vld [vmem:[%s8617_s16 + $0x1d0] sm:$0xff] }
 0x7ca   :  { %5090 = vmatprep.subr.mxu1 %v3980_v4  ;;  %4665 = vmatpush1.msra.mxu0 %v4512_v58  ;;  %v3830_v4 = vld [vmem:[#allocation12 + $0x20] sm:$0xff]  ;;  %v4547_v58 = vld [vmem:[%s8617_s16 + $0x1c8] sm:$0xff] }
 0x7cb   :  { %5091 = vmatpush3.msra.mxu1 %v3900_v15  ;;  %4666 = vmatprep.subr.mxu0 %v4511_v13  ;;  %v4585_v15 = vld [vmem:[%s8617_s16 + $0x2f8] sm:$0xff]  ;;  %v4584_v13 = vld [vmem:[%s8617_s16 + $0x2f0] sm:$0xff] }
 0x7cc   :  { %5092 = vmatprep.subr.mxu1 %v3975_v28  ;;  %4667 = vmatpush1.msra.mxu0 %v4510_v51  ;;  %v4546_v28 = vld [vmem:[%s8617_s16 + $0x1c0] sm:$0xff]  ;;  %v4583_v51 = vld [vmem:[%s8617_s16 + $0x2e8] sm:$0xff] }
 0x7cd   :  { %5093 = vmatpush3.msra.mxu1 %v3895_v24  ;;  %4668 = vmatprep.subr.mxu0 %v4509_v35  ;;  %v4545_v24 = vld [vmem:[%s8617_s16 + $0x1b8] sm:$0xff]  ;;  %v4582_v35 = vld [vmem:[%s8617_s16 + $0x2e0] sm:$0xff] }
 0x7ce   :  { %5094 = vmatprep.subr.mxu1 %v3970_v5  ;;  %4669 = vmatpush1.msra.mxu0 %v4508_v61  ;;  %v4544_v5 = vld [vmem:[%s8617_s16 + $0x1b0] sm:$0xff]  ;;  %v4581_v61 = vld [vmem:[%s8617_s16 + $0x2d8] sm:$0xff] }
 0x7cf   :  { %5095 = vmatpush3.msra.mxu1 %v3890_v20  ;;  %4670 = vmatprep.subr.mxu0 %v4507_v39  ;;  %v4543_v20 = vld [vmem:[%s8617_s16 + $0x1a8] sm:$0xff]  ;;  %v4542_v39 = vld [vmem:[%s8617_s16 + $0x1a0] sm:$0xff] }
 0x7d0   :  { %5096 = vmatprep.subr.mxu1 %v3965_v11  ;;  %4671 = vmatpush1.msra.mxu0 %v4506_v59  ;;  %v4579_v11 = vld [vmem:[%s8617_s16 + $0x2c8] sm:$0xff]  ;;  %v4541_v59 = vld [vmem:[%s8617_s16 + $0x198] sm:$0xff] }
 0x7d1   :  { %5097 = vmatpush3.msra.mxu1 %v3885_v0  ;;  %4672 = vmatprep.subr.mxu0 %v4505_v10  ;;  %v4578_v0 = vld [vmem:[%s8617_s16 + $0x2c0] sm:$0xff]  ;;  %v4577_v10 = vld [vmem:[%s8617_s16 + $0x2b8] sm:$0xff] }
 0x7d2   :  { %5098 = vmatprep.subr.mxu1 %v3960_v23  ;;  %4673 = vmatpush1.msra.mxu0 %v4504_v37  ;;  %v4576_v23 = vld [vmem:[%s8617_s16 + $0x2b0] sm:$0xff]  ;;  %v4575_v37 = vld [vmem:[%s8617_s16 + $0x2a8] sm:$0xff] }
 0x7d3   :  { %5099 = vmatpush3.msra.mxu1 %v3880_v21  ;;  %4674 = vmatprep.subr.mxu0 %v4503_v45  ;;  %v4574_v21 = vld [vmem:[%s8617_s16 + $0x2a0] sm:$0xff]  ;;  %v4540_v45 = vld [vmem:[%s8617_s16 + $0x190] sm:$0xff] }
 0x7d4   :  { %5100 = vmatprep.subr.mxu1 %v3955_v44  ;;  %4675 = vmatpush1.msra.mxu0 %v4502_v55  ;;  %v4539_v44 = vld [vmem:[%s8617_s16 + $0x188] sm:$0xff]  ;;  %v4573_v55 = vld [vmem:[%s8617_s16 + $0x298] sm:$0xff] }
 0x7d5   :  { %5101 = vmatpush3.msra.mxu1 %v3875_v62  ;;  %4676 = vmatprep.subr.mxu0 %v4501_v40  ;;  %v4572_v62 = vld [vmem:[%s8617_s16 + $0x290] sm:$0xff]  ;;  %v4538_v40 = vld [vmem:[%s8617_s16 + $0x180] sm:$0xff] }
 0x7d6   :  { %5102 = vmatprep.subr.mxu1 %v3950_v6  ;;  %4677 = vmatpush1.msra.mxu0 %v4500_v56  ;;  %v4537_v6 = vld [vmem:[%s8617_s16 + $0x178] sm:$0xff]  ;;  %v4571_v56 = vld [vmem:[%s8617_s16 + $0x288] sm:$0xff] }
 0x7d7   :  { %5103 = vmatpush3.msra.mxu1 %v3870_v25  ;;  %4678 = vmatprep.subr.mxu0 %v4499_v26  ;;  %v4536_v25 = vld [vmem:[%s8617_s16 + $0x170] sm:$0xff]  ;;  %v4570_v26 = vld [vmem:[%s8617_s16 + $0x280] sm:$0xff] }
 0x7d8   :  { %5104 = vmatprep.subr.mxu1 %v3945_v32  ;;  %4679 = vmatpush1.msra.mxu0 %v4498_v33  ;;  %v4535_v32 = vld [vmem:[%s8617_s16 + $0x168] sm:$0xff]  ;;  %v4534_v33 = vld [vmem:[%s8617_s16 + $0x160] sm:$0xff] }
 0x7d9   :  { %5105 = vmatpush3.msra.mxu1 %v3865_v52  ;;  %4680 = vmatprep.subr.mxu0 %v4497_v30  ;;  %v4569_v52 = vld [vmem:[%s8617_s16 + $0x278] sm:$0xff] }
 0x7da   :  { %5106 = vmatprep.subr.mxu1 %v3940_v18  ;;  %4681 = vmatpush1.msra.mxu0 %v4496_v38  ;;  %v4533_v30 = vld [vmem:[%s8617_s16 + $0x158] sm:$0xff]  ;;  %v4568_v18 = vld [vmem:[%s8617_s16 + $0x270] sm:$0xff] }
 0x7db   :  { %5107 = vmatpush3.msra.mxu1 %v3860_v34  ;;  %4682 = vmatprep.subr.mxu0 %v4495_v2  ;;  %v4532_v38 = vld [vmem:[%s8617_s16 + $0x150] sm:$0xff]  ;;  %v4567_v34 = vld [vmem:[%s8617_s16 + $0x268] sm:$0xff] }
 0x7dc   :  { %5108 = vmatprep.subr.mxu1 %v3935_v46  ;;  %4683 = vmatpush1.msra.mxu0 %v4494_v49  ;;  %v4531_v2 = vld [vmem:[%s8617_s16 + $0x148] sm:$0xff]  ;;  %v4566_v46 = vld [vmem:[%s8617_s16 + $0x260] sm:$0xff] }
 0x7dd   :  { %5109 = vmatpush3.msra.mxu1 %v3855_v41  ;;  %4684 = vmatprep.subr.mxu0 %v4493_v14  ;;  %v4530_v49 = vld [vmem:[%s8617_s16 + $0x140] sm:$0xff]  ;;  %v4565_v41 = vld [vmem:[%s8617_s16 + $0x258] sm:$0xff]  ;;  %v4564_v14 = vld [vmem:[%s8617_s16 + $0x250] sm:$0xff] }
 0x7de   :  { %5110 = vmatprep.subr.mxu1 %v3930_v57  ;;  %4685 = vmatpush1.msra.mxu0 %v4492_v36  ;;  %v4563_v57 = vld [vmem:[%s8617_s16 + $0x248] sm:$0xff]  ;;  %v4562_v36 = vld [vmem:[%s8617_s16 + $0x240] sm:$0xff] }
 0x7df   :  { %5111 = vmatpush3.msra.mxu1 %v3850_v3  ;;  %4686 = vmatprep.subr.mxu0 %v4491_v1  ;;  %v4561_v3 = vld [vmem:[%s8617_s16 + $0x238] sm:$0xff]  ;;  %v4560_v1 = vld [vmem:[%s8617_s16 + $0x230] sm:$0xff] }
 0x7e0   :  { %5112 = vmatprep.subr.mxu1 %v3925_v43  ;;  %4687 = vmatpush1.msra.mxu0 %v4490_v8  ;;  %v4559_v43 = vld [vmem:[%s8617_s16 + $0x228] sm:$0xff]  ;;  %v4529_v8 = vld [vmem:[%s8617_s16 + $0x138] sm:$0xff] }
 0x7e1   :  { %5113 = vmatpush3.msra.mxu1 %v3845_v42  ;;  %4688 = vmatprep.subr.mxu0 %v4553_v22  ;;  %v4528_v42 = vld [vmem:[%s8617_s16 + $0x130] sm:$0xff]  ;;  %v4558_v22 = vld [vmem:[%s8617_s16 + $0x220] sm:$0xff] }
 0x7e2   :  { %5114 = vmatprep.subr.mxu1 %v3920_v19  ;;  %4689 = vmatpush2.msra.mxu0 %v4552_v29  ;;  %v4557_v19 = vld [vmem:[%s8617_s16 + $0x218] sm:$0xff]  ;;  %v4527_v29 = vld [vmem:[%s8617_s16 + $0x128] sm:$0xff] }
 0x7e3   :  { %5115 = vmatpush3.msra.mxu1 %v3840_v48  ;;  %4690 = vmatprep.subr.mxu0 %v4551_v16  ;;  %v4526_v48 = vld [vmem:[%s8617_s16 + $0x120] sm:$0xff]  ;;  %v4556_v16 = vld [vmem:[%s8617_s16 + $0x210] sm:$0xff] }
 0x7e4   :  { %5116 = vmatprep.subr.mxu1 %v3915_v47  ;;  %4691 = vmatpush2.msra.mxu0 %v4550_v53  ;;  %v4525_v47 = vld [vmem:[%s8617_s16 + $0x118] sm:$0xff]  ;;  %v4555_v53 = vld [vmem:[%s8617_s16 + $0x208] sm:$0xff] }
 0x7e5   :  { %5117 = vmatpush3.msra.mxu1 %v3835_v63  ;;  %4692 = vmatprep.subr.mxu0 %v4549_v9  ;;  %v4524_v63 = vld [vmem:[%s8617_s16 + $0x110] sm:$0xff]  ;;  %v4523_v9 = vld [vmem:[%s8617_s16 + $0x108] sm:$0xff] }
 0x7e6   :  { %5118 = vmatprep.subr.mxu1 %v3910_v17  ;;  %4693 = vmatpush2.msra.mxu0 %v4548_v12  ;;  %v4554_v17 = vld [vmem:[%s8617_s16 + $0x200] sm:$0xff] }
 0x7e7   :  { %5119 = vmatpush3.msra.mxu1 %v3830_v4  ;;  %4694 = vmatprep.subr.mxu0 %v4547_v58  ;;  %v4522_v12 = vld [vmem:[%s8617_s16 + $0x100] sm:$0xff]  ;;  %v4617_v4 = vld [vmem:[%s8617_s16 + $0x3f8] sm:$0xff]  ;;  %v4616_v58 = vld [vmem:[%s8617_s16 + $0x3f0] sm:$0xff] }
 0x7e8   :  { %4410 = vmatmul.mubr.f32.vlgmr.msra.gmra.mxu1 %v8096_v54  ;;  %4727 = vmatprep.subr.mxu1 %v4585_v15  ;;  %v4580_v54 = vld [vmem:[%s8617_s16 + $0x2d0] sm:$0xff]  ;;  %v4615_v15 = vld [vmem:[%s8617_s16 + $0x3e8] sm:$0xff] }
 0x7e9   :  { %4728 = vmatpush1.msra.mxu1 %v4584_v13  ;;  %4695 = vmatpush2.msra.mxu0 %v4546_v28  ;;  %v4614_v13 = vld [vmem:[%s8617_s16 + $0x3e0] sm:$0xff]  ;;  %v4613_v28 = vld [vmem:[%s8617_s16 + $0x3d8] sm:$0xff] }
 0x7ea   :  { %4729 = vmatprep.subr.mxu1 %v4583_v51  ;;  %4696 = vmatprep.subr.mxu0 %v4545_v24  ;;  %v4612_v51 = vld [vmem:[%s8617_s16 + $0x3d0] sm:$0xff]  ;;  %v4611_v24 = vld [vmem:[%s8617_s16 + $0x3c8] sm:$0xff] }
 0x7eb   :  { %4730 = vmatpush1.msra.mxu1 %v4582_v35  ;;  %4697 = vmatpush2.msra.mxu0 %v4544_v5  ;;  %v4610_v35 = vld [vmem:[%s8617_s16 + $0x3c0] sm:$0xff]  ;;  %v4609_v5 = vld [vmem:[%s8617_s16 + $0x3b8] sm:$0xff] }
 0x7ec   :  { %4731 = vmatprep.subr.mxu1 %v4581_v61  ;;  %4698 = vmatprep.subr.mxu0 %v4543_v20  ;;  %v4608_v61 = vld [vmem:[%s8617_s16 + $0x3b0] sm:$0xff]  ;;  %v4607_v20 = vld [vmem:[%s8617_s16 + $0x3a8] sm:$0xff] }
 0x7ed   :  { %4732 = vmatpush1.msra.mxu1 %v4580_v54  ;;  %4699 = vmatpush2.msra.mxu0 %v4542_v39  ;;  %v4606_v54 = vld [vmem:[%s8617_s16 + $0x3a0] sm:$0xff]  ;;  %v4639_v39 = vld [vmem:[%s8617_s16 + $0x4a8] sm:$0xff] }
 0x7ee   :  { %4733 = vmatprep.subr.mxu1 %v4579_v11  ;;  %4700 = vmatprep.subr.mxu0 %v4541_v59  ;;  %v4605_v11 = vld [vmem:[%s8617_s16 + $0x398] sm:$0xff]  ;;  %v4604_v59 = vld [vmem:[%s8617_s16 + $0x390] sm:$0xff] }
 0x7ef   :  { %4734 = vmatpush1.msra.mxu1 %v4578_v0  ;;  %4701 = vmatpush2.msra.mxu0 %v4540_v45  ;;  %v4603_v0 = vld [vmem:[%s8617_s16 + $0x388] sm:$0xff]  ;;  %v4598_v45 = vld [vmem:[%s8617_s16 + $0x360] sm:$0xff] }
 0x7f0   :  { %4735 = vmatprep.subr.mxu1 %v4577_v10  ;;  %4702 = vmatprep.subr.mxu0 %v4539_v44  ;;  %v4602_v10 = vld [vmem:[%s8617_s16 + $0x380] sm:$0xff]  ;;  %v4597_v44 = vld [vmem:[%s8617_s16 + $0x358] sm:$0xff] }
 0x7f1   :  { %4736 = vmatpush1.msra.mxu1 %v4576_v23  ;;  %4703 = vmatpush2.msra.mxu0 %v4538_v40  ;;  %v4601_v23 = vld [vmem:[%s8617_s16 + $0x378] sm:$0xff]  ;;  %v4594_v40 = vld [vmem:[%s8617_s16 + $0x340] sm:$0xff] }
 0x7f2   :  { %4737 = vmatprep.subr.mxu1 %v4575_v37  ;;  %4704 = vmatprep.subr.mxu0 %v4537_v6  ;;  %v4600_v37 = vld [vmem:[%s8617_s16 + $0x370] sm:$0xff]  ;;  %v4593_v6 = vld [vmem:[%s8617_s16 + $0x338] sm:$0xff] }
 0x7f3   :  { %4738 = vmatpush1.msra.mxu1 %v4574_v21  ;;  %4705 = vmatpush2.msra.mxu0 %v4536_v25  ;;  %v4599_v21 = vld [vmem:[%s8617_s16 + $0x368] sm:$0xff] }
 0x7f4   :  { %4739 = vmatprep.subr.mxu1 %v4573_v55  ;;  %4706 = vmatprep.subr.mxu0 %v4535_v32  ;;  %v4596_v55 = vld [vmem:[%s8617_s16 + $0x350] sm:$0xff]  ;;  %v4591_v25 = vld [vmem:[%s8617_s16 + $0x328] sm:$0xff]  ;;  %v4589_v32 = vld [vmem:[%s8617_s16 + $0x318] sm:$0xff] }
 0x7f5   :  { %4740 = vmatpush1.msra.mxu1 %v4572_v62  ;;  %4707 = vmatpush2.msra.mxu0 %v4534_v33  ;;  %v4595_v62 = vld [vmem:[%s8617_s16 + $0x348] sm:$0xff]  ;;  %v4588_v33 = vld [vmem:[%s8617_s16 + $0x310] sm:$0xff] }
 0x7f6   :  { %4741 = vmatprep.subr.mxu1 %v4571_v56  ;;  %4708 = vmatprep.subr.mxu0 %v4533_v30  ;;  %v4592_v56 = vld [vmem:[%s8617_s16 + $0x330] sm:$0xff]  ;;  %v4586_v30 = vld [vmem:[%s8617_s16 + $0x300] sm:$0xff] }
 0x7f7   :  { %4742 = vmatpush1.msra.mxu1 %v4570_v26  ;;  %4709 = vmatpush2.msra.mxu0 %v4532_v38  ;;  %v4590_v26 = vld [vmem:[%s8617_s16 + $0x320] sm:$0xff] }
 0x7f8   :  { %4743 = vmatprep.subr.mxu1 %v4569_v52  ;;  %4710 = vmatprep.subr.mxu0 %v4531_v2  ;;  %v4587_v52 = vld [vmem:[%s8617_s16 + $0x308] sm:$0xff] }
 0x7f9   :  { %4744 = vmatpush1.msra.mxu1 %v4568_v18  ;;  %4711 = vmatpush2.msra.mxu0 %v4530_v49  ;;  %v8511_v18 = vld [vmem:[%s8616_s15] sm:$0x1f] }
 0x7fa   :  { %4745 = vmatprep.subr.mxu1 %v4567_v34  ;;  %4712 = vmatprep.subr.mxu0 %v4529_v8  ;;  %v4021_v2 = vrot.slane %v8511_v18, %v8048_v27 }
 0x7fb   :  { %4746 = vmatpush1.msra.mxu1 %v4566_v46  ;;  %4713 = vmatpush2.msra.mxu0 %v4528_v42  ;;  %v4025_v46 = vrot.slane %v8511_v18, %v8054_v7 }
 0x7fc   :  { %4747 = vmatprep.subr.mxu1 %v4565_v41  ;;  %4714 = vmatprep.subr.mxu0 %v4527_v29 }
 0x7fd   :  { %4748 = vmatpush1.msra.mxu1 %v4564_v14  ;;  %4715 = vmatpush2.msra.mxu0 %v4526_v48  ;;  %v4638_v48 = vld [vmem:[%s8617_s16 + $0x4a0] sm:$0xff] }
 0x7fe   :  { %4749 = vmatprep.subr.mxu1 %v4563_v57  ;;  %4716 = vmatprep.subr.mxu0 %v4525_v47  ;;  %v4029_v47 = vrot.slane %v8511_v18, %v8057_v50  ;;  %v4633_v50 = vld [vmem:[%s8617_s16 + $0x478] sm:$0xff] }
 0x7ff   :  { %4750 = vmatpush1.msra.mxu1 %v4562_v36  ;;  %4717 = vmatpush2.msra.mxu0 %v4524_v63 }
 0x800   :  { %4751 = vmatprep.subr.mxu1 %v4561_v3  ;;  %4718 = vmatprep.subr.mxu0 %v4523_v9  ;;  %v4635_v9 = vld [vmem:[%s8617_s16 + $0x488] sm:$0xff] }
 0x801   :  { %4752 = vmatpush1.msra.mxu1 %v4560_v1  ;;  %4719 = vmatpush2.msra.mxu0 %v4522_v12 }
 0x802   :  { %4753 = vmatprep.subr.mxu1 %v4559_v43  ;;  %4808 = vmatprep.subr.mxu0 %v4639_v39  ;;  %v4626_v39 = vld [vmem:[%s8617_s16 + $0x440] sm:$0xff] }
 0x803   :  { %4754 = vmatpush1.msra.mxu1 %v4558_v22  ;;  %v4032_v22 = vsub.s32 3, %v9056_v31 }
 0x804   :  { %4755 = vmatprep.subr.mxu1 %v4557_v19 }
 0x805   :  { %4756 = vmatpush1.msra.mxu1 %v4556_v16  ;;  %v4637_v16 = vld [vmem:[%s8617_s16 + $0x498] sm:$0xff]  ;;  %v4033_v63 = vrot.slane %v8511_v18, %v4032_v22 }
 0x806   :  { %4757 = vmatprep.subr.mxu1 %v4555_v53  ;;  %v4636_v53 = vld [vmem:[%s8617_s16 + $0x490] sm:$0xff] }
 0x807   :  { %4758 = vmatpush1.msra.mxu1 %v4554_v17  ;;  %v4634_v17 = vld [vmem:[%s8617_s16 + $0x480] sm:$0xff] }
 0x808   :  { %4759 = vmatprep.subr.mxu1 %v4617_v4 }
 0x809   :  { %4760 = vmatpush2.msra.mxu1 %v4616_v58  ;;  %v4632_v58 = vld [vmem:[%s8617_s16 + $0x470] sm:$0xff] }
 0x80a   :  { %4761 = vmatprep.subr.mxu1 %v4615_v15 }
 0x80b   :  { %4762 = vmatpush2.msra.mxu1 %v4614_v13 }
 0x80c   :  { %4763 = vmatprep.subr.mxu1 %v4613_v28 }
 0x80d   :  { %4764 = vmatpush2.msra.mxu1 %v4612_v51  ;;  %v4630_v51 = vld [vmem:[%s8617_s16 + $0x460] sm:$0xff] }
 0x80e   :  { %4765 = vmatprep.subr.mxu1 %v4611_v24 }
 0x80f   :  { %4766 = vmatpush2.msra.mxu1 %v4610_v35  ;;  %v4629_v35 = vld [vmem:[%s8617_s16 + $0x458] sm:$0xff] }
 0x810   :  { %4767 = vmatprep.subr.mxu1 %v4609_v5  ;;  %v4628_v5 = vld [vmem:[%s8617_s16 + $0x450] sm:$0xff] }
 0x811   :  { %4768 = vmatpush2.msra.mxu1 %v4608_v61 }
 0x812   :  { %4769 = vmatprep.subr.mxu1 %v4607_v20  ;;  %v4627_v20 = vld [vmem:[%s8617_s16 + $0x448] sm:$0xff] }
 0x813   :  { %4770 = vmatpush2.msra.mxu1 %v4606_v54 }
 0x814   :  { %4771 = vmatprep.subr.mxu1 %v4605_v11  ;;  %v4625_v11 = vld [vmem:[%s8617_s16 + $0x438] sm:$0xff] }
 0x815   :  { %4772 = vmatpush2.msra.mxu1 %v4604_v59  ;;  %v4624_v59 = vld [vmem:[%s8617_s16 + $0x430] sm:$0xff] }
 0x816   :  { %4773 = vmatprep.subr.mxu1 %v4603_v0  ;;  %v4623_v0 = vld [vmem:[%s8617_s16 + $0x428] sm:$0xff] }
 0x817   :  { %4774 = vmatpush2.msra.mxu1 %v4602_v10  ;;  %v4622_v10 = vld [vmem:[%s8617_s16 + $0x420] sm:$0xff] }
 0x818   :  { %4775 = vmatprep.subr.mxu1 %v4601_v23  ;;  %v4621_v23 = vld [vmem:[%s8617_s16 + $0x418] sm:$0xff] }
 0x819   :  { %4776 = vmatpush2.msra.mxu1 %v4600_v37  ;;  %v4620_v37 = vld [vmem:[%s8617_s16 + $0x410] sm:$0xff] }
 0x81a   :  { %4777 = vmatprep.subr.mxu1 %v4599_v21  ;;  %v4619_v21 = vld [vmem:[%s8617_s16 + $0x408] sm:$0xff] }
 0x81b   :  { %4778 = vmatpush2.msra.mxu1 %v4598_v45  ;;  %v4618_v45 = vld [vmem:[%s8617_s16 + $0x400] sm:$0xff] }
 0x81c   :  { %4779 = vmatprep.subr.mxu1 %v4597_v44  ;;  %v4036_v44 = vsub.s32 4, %v9056_v31 }
 0x81d   :  { %4780 = vmatpush2.msra.mxu1 %v4596_v55 }
 0x81e   :  { %4781 = vmatprep.subr.mxu1 %v4595_v62  ;;  %v4037_v62 = vrot.slane %v8511_v18, %v4036_v44 }
 0x81f   :  { %4782 = vmatpush2.msra.mxu1 %v4594_v40 }
 0x820   :  { %4783 = vmatprep.subr.mxu1 %v4593_v6 }
 0x821   :  { %4784 = vmatpush2.msra.mxu1 %v4592_v56 }
 0x822   :  { %4785 = vmatprep.subr.mxu1 %v4591_v25 }
 0x823   :  { %4786 = vmatpush2.msra.mxu1 %v4590_v26 }
 0x824   :  { %4787 = vmatprep.subr.mxu1 %v4589_v32 }
 0x825   :  { %4788 = vmatpush2.msra.mxu1 %v4588_v33 }
 0x826   :  { %4789 = vmatprep.subr.mxu1 %v4587_v52 }
 0x827   :  { %4790 = vmatpush2.msra.mxu1 %v4586_v30 }
 0x86f   :  { %v4127_v38 = vpop.f32.mrf.mxu1  ;;  %v4269_v34 = vpop.f32.mrf.mxu0 }
 0x870   :  { %v4128_v14 = vadd.f32 %v4127_v38, %v4021_v2  ;;  %v4270_v12 = vadd.f32 %v4269_v34, %v4029_v47 }
 0x871   :  { %v4129_v49 = vpop.f32.mrf.mxu1  ;;  %v4271_v41 = vpop.f32.mrf.mxu0 }
 0x872   :  { %v4130_v36 = vadd.f32 %v4129_v49, %v4025_v46  ;;  %v4272_v15 = vadd.f32 %v4271_v41, %v4033_v63 }
 0x87c   :  { %v4198_v57 = vpop.f32.mrf.mxu1 }
 0x87d   :  { %v8517_v3 = vpop.f32.mrf.mxu0  ;;  %v4199_v1 = vadd.f32 %v4198_v57, %v4128_v14 }
 0x87e   :  { %v4200_v43 = vpop.f32.mrf.mxu1 }
 0x87f   :  { %v4201_v8 = vadd.f32 %v4200_v43, %v4130_v36  ;;  %v5149_v42 = vpop.f32.mrf.mxu0  ;;  %v4485_v29 = vmax.f32 %v4199_v1, 0.0 }
 0x881   :  { %v4486_v19 = vmax.f32 %v4201_v8, 0.0 }
 0x883   :  { %4720 = vmatprep.mubr.f32.mxu0 %v4486_v19 }
 0x884   :  { %4721 = vmatmul.mubr.f32.vlgmr.msra.gmra.mxu0 %v4485_v29 }
 0x885   :  { %4809 = vmatpush1.msra.mxu0 %v4638_v48  ;;  %4862 = vmatprep.mubr.f32.mxu0 %v9055_v60  ;;  %v4631_v60 = vld [vmem:[%s8617_s16 + $0x468] sm:$0xff]  ;;  %s5273_s16 = scalar_lea.vmem %s4910_s5, 64 }
 0x886   :  { %4810 = vmatprep.subr.mxu0 %v4637_v16  ;;  %p5274_p2 = scmp.ne.s32.totalorder %s4910_s5, %s5273_s16  ;;  %p5279_p4 = scmp.lt.s32.totalorder %s5273_s16, %s5273_s16 }
 0x887   :  { %4811 = vmatpush1.msra.mxu0 %v4636_v53 }
 0x888   :  { %v4340_v4 = vpop.f32.mrf.mxu1  ;;  %4812 = vmatprep.subr.mxu0 %v4635_v9  ;;  %p5280_p5 = por %p5279_p4, %p5278_p3 }
 0x889   :  { %4813 = vmatpush1.msra.mxu0 %v4634_v17  ;;  %v4341_v13 = vadd.f32 %v4340_v4, %v4270_v12 }
 0x88a   :  { %v4342_v28 = vpop.f32.mrf.mxu1  ;;  %4814 = vmatprep.subr.mxu0 %v4633_v50  ;;  %p5281_p6 = pnand %p5280_p5, %p5274_p2 }
 0x88b   :  { %v4343_v24 = vadd.f32 %v4342_v28, %v4272_v15  ;;  %4815 = vmatpush1.msra.mxu0 %v4632_v58  ;;  %v4487_v54 = vmax.f32 %v4341_v13, 0.0 }
 0x88c   :  { %4816 = vmatprep.subr.mxu0 %v4631_v60 }
 0x88d   :  { %v4488_v61 = vmax.f32 %v4343_v24, 0.0  ;;  %4817 = vmatpush1.msra.mxu0 %v4630_v51 }
 0x88e   :  { %4818 = vmatprep.subr.mxu0 %v4629_v35 }
 0x88f   :  { %4791 = vmatprep.mubr.f32.mxu1 %v4488_v61  ;;  %4819 = vmatpush1.msra.mxu0 %v4628_v5 }
 0x890   :  { %4792 = vmatmul.mubr.f32.vlgmr.msra.gmra.mxu1 %v4487_v54  ;;  %4820 = vmatprep.subr.mxu0 %v4627_v20 }
 0x891   :  { %4821 = vmatpush1.msra.mxu0 %v4626_v39 }
 0x892   :  { %4822 = vmatprep.subr.mxu0 %v4625_v11 }
 0x893   :  { %4823 = vmatpush1.msra.mxu0 %v4624_v59 }
 0x894   :  { %4824 = vmatprep.subr.mxu0 %v4623_v0 }
 0x895   :  { %4825 = vmatpush1.msra.mxu0 %v4622_v10 }
 0x896   :  { %4826 = vmatprep.subr.mxu0 %v4621_v23 }
 0x897   :  { %4827 = vmatpush1.msra.mxu0 %v4620_v37 }
 0x898   :  { %4828 = vmatprep.subr.mxu0 %v4619_v21 }
 0x899   :  { %4829 = vmatpush1.msra.mxu0 %v4618_v45 }
 0x8a8   :  { %v5120_v55 = vpop.f32.mrf.mxu1 }
 0x8aa   :  { %v5121_v40 = vpop.f32.mrf.mxu1 }
 0x8ab   :  { %v5122_v6 = vadd.f32 %v5121_v40, %v5120_v55 }
 0x8ad   :  { %v4412_v56 = vadd.f32 %v5122_v6, %v4037_v62 }
 0x8af   :  { %v4482_v25 = vadd.f32 %v8517_v3, %v4412_v56 }
 0x8b1   :  { %v4489_v26 = vmax.f32 %v4482_v25, 0.0 }
 0x8b3   :  { %5049 = vmatmul.mubr.msk.f32.vlgmr.msra.gmra.mxu0 %vm4652_vm4, %v4489_v26 }
 0x8b4   :  { %5284 = shalt.err (!%p5281_p6)
}
 0x8b5   :  { %4912 = dma.vmem_to_hbm [thread:$0]  %s4910_s5, 64, %s8621_s20, [#allocation16]   ;;  %v4640_v31 = vld [vmem:[%s8618_s17] sm:$0x3] }
 0x8b6   :  { %v4645_v33 = vrot.slane %v4640_v31, %v8048_v27  ;;  %v4649_v30 = vrot.slane %v4640_v31, %v8054_v7  ;;  %s5345_s17 = smov [#allocation14]  }
 0x8b7   :  { %s4899_s20 = sshll.u32 %s5345_s17, 4  ;;  %s4900_s20 = int_to_ptr.vmem [resolvable:$true] %s4899_s20 }
 0x8b8   :  { %s5293_s30 = scalar_lea.vmem %s4900_s20, 64  ;;  %p5298_p8 = scmp.lt.s32.totalorder %s4900_s20, %s4900_s20 }
 0x8b9   :  { %p5294_p7 = scmp.ne.s32.totalorder %s4900_s20, %s5293_s30  ;;  %p5299_p9 = scmp.lt.s32.totalorder %s5293_s30, %s5293_s30 }
 0x8bb   :  { %p5300_p10 = por %p5299_p9, %p5298_p8 }
 0x8bd   :  { %p5301_p11 = pnand %p5300_p10, %p5294_p7 }
 0x944   :  { %v4722_v32 = vpop.f32.mrf.mxu0 }
 0x945   :  { %v4723_v38 = vadd.f32 %v4722_v32, %v4645_v33 }
 0x946   :  { %v4724_v18 = vpop.f32.mrf.mxu0 }
 0x947   :  { %v4725_v2 = vadd.f32 %v4724_v18, %v4649_v30 }
 0x950   :  { %v4793_v52 = vpop.f32.mrf.mxu1 }
 0x951   :  { %v4794_v46 = vadd.f32 %v4793_v52, %v4723_v38 }
 0x952   :  { %v4795_v34 = vpop.f32.mrf.mxu1 }
 0x953   :  { %v4796_v41 = vadd.f32 %v4795_v34, %v4725_v2 }
 0x973   :  { %v4864_v49 = vpop.f32.mrf.mxu0 }
 0x974   :  { %v4865_v14 = vadd.f32 %v4864_v49, %v4794_v46 }
 0x975   :  { %v4866_v57 = vpop.f32.mrf.mxu0 }
 0x976   :  { %v4869_v36 = vsub.f32 0.0, %v4865_v14  ;;  %v4867_v3 = vadd.f32 %v4866_v57, %v4796_v41 }
 0x978   :  { %v4871_v1 = vmul.f32 1.442695, %v4869_v36  ;;  %v4870_v43 = vsub.f32 0.0, %v4867_v3 }
 0x97a   :  { %5171 = vpow2.f32 %v4871_v1  ;;  %v4873_v8 = vmul.f32 1.442695, %v4870_v43 }
 0x97c   :  { %5173 = vpow2.f32 %v4873_v8 }
 0x987   :  { %v5172_v27 = vpop.eup %5171 }
 0x988   :  { %v4875_v42 = vadd.f32 1.0, %v5172_v27 }
 0x989   :  { %v5174_v22 = vpop.eup %5173 }
 0x98a   :  { %v4876_v7 = vadd.f32 1.0, %v5174_v22  ;;  %5175 = vrcp.f32 %v4875_v42 }
 0x98c   :  { %5177 = vrcp.f32 %v4876_v7 }
 0x997   :  { %v5176_v19 = vpop.eup %5175 }
 0x999   :  { %v5178_v29 = vpop.eup %5177 }
 0x99a   :  { %v4883_v48 = vcombine.low %v5176_v19, %v5178_v29 }
 0x99c   :  { %5050 = vst.sshfl [vmem:[#allocation14] sm:$0x33 pattern:$0x76325410] %v4883_v48 }
 0x99d   :  { %5304 = shalt.err (!%p5301_p11)
}
 0x99e   :  { %4902 = dma.vmem_to_hbm [thread:$0]  %s4900_s20, 64, %s8620_s19, [#allocation4]  }
 0x99f   :  { %5323 = dma.done.wait [#allocation4], 64  }
 0x9a0   :  { %5324 = vsyncadd [#allocation4], 4294967232 }
 0x9a1   :  { %5325 = dma.done.wait [#allocation16], 64  }
 0x9a2   :  { %5326 = vsyncadd [#allocation16], 4294967232 }
 0x9a3   :  { %4919 = vsyncpa [#allocation3], 1 }
 0x9a4   :  { %4920 = vsyncpa [#allocation13], 1 }
 0x9a5   :  { %4921 = vsyncpa [#allocation4], 1 }
 0x9a6   :  { %4922 = vsyncpa [#allocation16], 1 }
 0x9a7   :  { %4923 = vsyncpa [#allocation5], 1 }
 0x9a8   :  { %4924 = vsyncpa [#allocation7], 1 }
 0x9a9   :  { %4925 = vsyncpa [#allocation10], 1 }

</bundles_post_ra>
